<compile_context>
chip_gen: v6e
topology: v6e:2x2x1
jax: 0.10.0
libtpu: 0.0.40
codegen_flags: <defaults>
</compile_context>

<pallas_src>
import functools

import jax
import jax.numpy as jnp
from jax.experimental import pallas as pl
from jax.experimental.pallas import tpu as pltpu

D_MODEL = 768
D_FF = 3072


def _ffn_kernel(x_ref, w1_ref, b1_ref, w2_ref, b2_ref, o_ref):
    # Shapes per grid step (i = token tile, j = D_FF chunk):
    #   x_ref : (tm, 768)   f32   (resident across j; only re-DMA'd when i changes)
    #   w1_ref: (768, tf)   bf16  (column chunk j of W1, double-buffered)
    #   b1_ref: (1, tf)     f32
    #   w2_ref: (tf, 768)   bf16  (row chunk j of W2, double-buffered)
    #   b2_ref: (1, 768)    f32
    #   o_ref : (tm, 768)   f32   (resident accumulator across j)
    j = pl.program_id(1)

    @pl.when(j == 0)
    def _():
        o_ref[...] = jnp.zeros_like(o_ref)

    x = x_ref[...]                                   # f32, reused for residual

    # linear5 chunk: x @ W1[:, j*tf:(j+1)*tf] + b1_chunk  (bf16 MXU, f32 acc)
    h = jnp.dot(x.astype(jnp.bfloat16), w1_ref[...],
                preferred_element_type=jnp.float32) + b1_ref[...]

    # exact (erf) GELU — matches torch._C._nn.gelu default; kept in f32
    # TODO(synk): on v6e/v7x a tanh-approx / bf16 erf would move this off the
    # VALU, at a small precision cost vs. torch's exact erf.
    inv_sqrt2 = jnp.float32(0.7071067811865476)
    g = 0.5 * h * (1.0 + jax.lax.erf(h * inv_sqrt2))

    # linear6 partial sum: accumulate g_chunk @ W2[j*tf:(j+1)*tf, :] into o_ref
    o_ref[...] += jnp.dot(g.astype(jnp.bfloat16), w2_ref[...],
                          preferred_element_type=jnp.float32)

    @pl.when(j == pl.num_programs(1) - 1)
    def _():
        # finalize: add bias2 and the residual (exact f32 x tile)
        o_ref[...] += b2_ref[...] + x


@functools.partial(jax.jit, static_argnames=("tm", "tf"))
def ffn_residual(x, w1, b1, w2, b2, *, tm=128, tf=768):
    # x: (N, 768).  tm=128 divides the module's 384 tokens -> no padding; the
    # pad path below only triggers for genuinely ragged N.
    n_tokens, d = x.shape
    assert d == D_MODEL
    assert D_FF % tf == 0

    n_pad = (-n_tokens) % tm
    if n_pad:
        x = jnp.pad(x, ((0, n_pad), (0, 0)))
    n_total = n_tokens + n_pad

    # Cast weights once in the wrapper so the VMEM-resident copies are bf16.
    w1_bf = w1.astype(jnp.bfloat16)
    w2_bf = w2.astype(jnp.bfloat16)

    grid = (n_total // tm, D_FF // tf)   # (token tiles [parallel], D_FF chunks [arbitrary])

    # Advisory cost hint for the XLA scheduler.
    flops = 4 * n_total * D_MODEL * D_FF                      # two matmuls
    bytes_accessed = (
        2 * D_MODEL * D_FF * 2                                # bf16 W1 + W2
        + (D_FF + D_MODEL) * 4                                # biases (f32)
        + 2 * n_total * D_MODEL * 4)                          # x in + out (f32)
    cost = pl.CostEstimate(flops=flops,
                           transcendentals=n_total * D_FF,
                           bytes_accessed=bytes_accessed)

    out = pl.pallas_call(
        _ffn_kernel,
        out_shape=jax.ShapeDtypeStruct((n_total, D_MODEL), x.dtype),
        grid_spec=pltpu.PrefetchScalarGridSpec(
            num_scalar_prefetch=0,
            grid=grid,
            in_specs=[
                pl.BlockSpec((tm, D_MODEL), lambda i, j: (i, 0)),   # x tile (resident over j)
                pl.BlockSpec((D_MODEL, tf), lambda i, j: (0, j)),   # W1 column chunk (streamed)
                pl.BlockSpec((1, tf), lambda i, j: (0, j)),         # b1 chunk
                pl.BlockSpec((tf, D_MODEL), lambda i, j: (j, 0)),   # W2 row chunk (streamed)
                pl.BlockSpec((1, D_MODEL), lambda i, j: (0, 0)),    # b2 (resident)
            ],
            out_specs=pl.BlockSpec((tm, D_MODEL), lambda i, j: (i, 0)),  # resident accumulator
        ),
        compiler_params=pltpu.CompilerParams(
            dimension_semantics=("parallel", "arbitrary"),
            vmem_limit_bytes=24 * 1024 * 1024,
        ),
        cost_estimate=cost,
    )(x, w1_bf, b1, w2_bf, b2)

    if n_pad:
        out = out[:n_tokens]
    return out


def module_forward(x172, w1, b1, w2, b2):
    """Equivalent of M.forward: linear5 -> gelu -> linear6 -> +residual."""
    B, S, D = x172.shape
    x2d = x172.reshape(B * S, D)
    out = ffn_residual(x2d, w1, b1, w2, b2, tm=128, tf=768)
    return out.reshape(B, S, D)


def _reference(x172, w1, b1, w2, b2):
    h = x172 @ w1 + b1
    g = 0.5 * h * (1.0 + jax.lax.erf(h * 0.7071067811865476))
    y = g @ w2 + b2
    return y + x172


if __name__ == "__main__":
    key = jax.random.PRNGKey(0)
    k_x, k_w1, k_b1, k_w2, k_b2 = jax.random.split(key, 5)

    # Shapes match the module spec: x172 is [1, 384, 768]; hidden dims fixed by the Linears.
    B, S = 1, 384
    x172 = jax.random.normal(k_x, (B, S, D_MODEL), dtype=jnp.float32)

    # Deterministic parameter init (Linear-like uniform scaling), stored as [in, out].
    lim1 = 1.0 / (D_MODEL ** 0.5)
    lim2 = 1.0 / (D_FF ** 0.5)
    w1 = jax.random.uniform(k_w1, (D_MODEL, D_FF), jnp.float32, -lim1, lim1)
    b1 = jax.random.uniform(k_b1, (1, D_FF), jnp.float32, -lim1, lim1)
    w2 = jax.random.uniform(k_w2, (D_FF, D_MODEL), jnp.float32, -lim2, lim2)
    b2 = jax.random.uniform(k_b2, (1, D_MODEL), jnp.float32, -lim2, lim2)

    out = module_forward(x172, w1, b1, w2, b2)
    out = jax.block_until_ready(out)

    ref = _reference(x172, w1, b1, w2, b2)
    assert out.shape == (B, S, D_MODEL)
    # Tolerance loosened because matmul operands are bf16 (f32 accumulation).
    assert jnp.allclose(out, ref, atol=5e-2, rtol=5e-2), float(
        jnp.max(jnp.abs(out - ref)))

    print("KERNEL_OK")
</pallas_src>

<mosaic_0001>
module attributes {stable_mosaic.version = 11 : i64} {
  func.func @_ffn_kernel(%arg0: i32, %arg1: i32, %arg2: memref<128x768xf32, #tpu.memory_space<vmem>>, %arg3: memref<768x768xbf16, #tpu.memory_space<vmem>>, %arg4: memref<1x768xf32, #tpu.memory_space<vmem>>, %arg5: memref<768x768xbf16, #tpu.memory_space<vmem>>, %arg6: memref<1x768xf32, #tpu.memory_space<vmem>>, %arg7: memref<128x768xf32, #tpu.memory_space<vmem>>) attributes {dimension_semantics = [#tpu.dimension_semantics<parallel>, #tpu.dimension_semantics<arbitrary>], iteration_bounds = array<i64: 3, 4>, scalar_prefetch = 0 : i64, scratch_operands = 0 : i64, tpu.core_type = #tpu.core_type<tc>, window_params = [{transform_indices = @transform_0, window_bounds = array<i64: 128, 768>}, {transform_indices = @transform_1, window_bounds = array<i64: 768, 768>}, {transform_indices = @transform_2, window_bounds = array<i64: 1, 768>}, {transform_indices = @transform_3, window_bounds = array<i64: 768, 768>}, {pipeline_mode = #tpu.pipeline_mode<synchronous>, transform_indices = @transform_4, window_bounds = array<i64: 1, 768>}, {transform_indices = @transform_5, window_bounds = array<i64: 128, 768>}]} {
    %c0_i32 = arith.constant 0 : i32
    %0 = arith.cmpi eq, %arg1, %c0_i32 : i32
    %1 = arith.extui %0 : i1 to i32
    %c0_i32_0 = arith.constant 0 : i32
    %2 = arith.cmpi ne, %1, %c0_i32_0 : i32
    scf.if %2 {
      %cst_17 = arith.constant 0.000000e+00 : f32
      %27 = vector.broadcast %cst_17 : f32 to vector<128x768xf32>
      %c0_18 = arith.constant 0 : index
      %c0_19 = arith.constant 0 : index
      %28 = vector.load %arg7[%c0_18, %c0_19] : memref<128x768xf32, #tpu.memory_space<vmem>>, vector<128x768xf32>
      tpu.vector_store %arg7[%c0_18, %c0_19], %27 {strides = array<i32>} : memref<128x768xf32, #tpu.memory_space<vmem>>, vector<128x768xf32>,
    } else {
    }
    %c0 = arith.constant 0 : index
    %c0_1 = arith.constant 0 : index
    %3 = vector.load %arg2[%c0, %c0_1] : memref<128x768xf32, #tpu.memory_space<vmem>>, vector<128x768xf32>
    %4 = arith.truncf %3 : vector<128x768xf32> to vector<128x768xbf16>
    %c0_2 = arith.constant 0 : index
    %c0_3 = arith.constant 0 : index
    %5 = vector.load %arg3[%c0_2, %c0_3] : memref<768x768xbf16, #tpu.memory_space<vmem>>, vector<768x768xbf16>
    %cst = arith.constant dense<0.000000e+00> : vector<128x768xf32>
    %6 = tpu.matmul %4, %5, %cst {dimension_numbers = #tpu.dot_dimension_numbers<[1], [0], [0], [1], [0, 0, 1, 1], [], []>} : vector<128x768xbf16>, vector<768x768xbf16>, vector<128x768xf32> -> vector<128x768xf32>
    %c0_4 = arith.constant 0 : index
    %c0_5 = arith.constant 0 : index
    %7 = vector.load %arg4[%c0_4, %c0_5] : memref<1x768xf32, #tpu.memory_space<vmem>>, vector<1x768xf32>
    %8 = vector.broadcast %7 : vector<1x768xf32> to vector<128x768xf32>
    %9 = arith.addf %6, %8 : vector<128x768xf32>
    %cst_6 = arith.constant 5.000000e-01 : f32
    %10 = vector.broadcast %cst_6 : f32 to vector<128x768xf32>
    %11 = arith.mulf %10, %9 : vector<128x768xf32>
    %cst_7 = arith.constant 0.707106769 : f32
    %12 = vector.broadcast %cst_7 : f32 to vector<128x768xf32>
    %13 = arith.mulf %9, %12 : vector<128x768xf32>
    %14 = math.erf %13 : vector<128x768xf32>
    %cst_8 = arith.constant 1.000000e+00 : f32
    %15 = vector.broadcast %cst_8 : f32 to vector<128x768xf32>
    %16 = arith.addf %15, %14 : vector<128x768xf32>
    %17 = arith.mulf %11, %16 : vector<128x768xf32>
    %c0_9 = arith.constant 0 : index
    %c0_10 = arith.constant 0 : index
    %18 = vector.load %arg7[%c0_9, %c0_10] : memref<128x768xf32, #tpu.memory_space<vmem>>, vector<128x768xf32>
    %19 = arith.truncf %17 : vector<128x768xf32> to vector<128x768xbf16>
    %c0_11 = arith.constant 0 : index
    %c0_12 = arith.constant 0 : index
    %20 = vector.load %arg5[%c0_11, %c0_12] : memref<768x768xbf16, #tpu.memory_space<vmem>>, vector<768x768xbf16>
    %cst_13 = arith.constant dense<0.000000e+00> : vector<128x768xf32>
    %21 = tpu.matmul %19, %20, %cst_13 {dimension_numbers = #tpu.dot_dimension_numbers<[1], [0], [0], [1], [0, 0, 1, 1], [], []>} : vector<128x768xbf16>, vector<768x768xbf16>, vector<128x768xf32> -> vector<128x768xf32>
    %22 = arith.addf %18, %21 : vector<128x768xf32>
    %c0_14 = arith.constant 0 : index
    %c0_15 = arith.constant 0 : index
    %23 = vector.load %arg7[%c0_14, %c0_15] : memref<128x768xf32, #tpu.memory_space<vmem>>, vector<128x768xf32>
    tpu.vector_store %arg7[%c0_14, %c0_15], %22 {strides = array<i32>} : memref<128x768xf32, #tpu.memory_space<vmem>>, vector<128x768xf32>,
    %c3_i32 = arith.constant 3 : i32
    %24 = arith.cmpi eq, %arg1, %c3_i32 : i32
    %25 = arith.extui %24 : i1 to i32
    %c0_i32_16 = arith.constant 0 : i32
    %26 = arith.cmpi ne, %25, %c0_i32_16 : i32
    scf.if %26 {
      %c0_17 = arith.constant 0 : index
      %c0_18 = arith.constant 0 : index
      %27 = vector.load %arg7[%c0_17, %c0_18] : memref<128x768xf32, #tpu.memory_space<vmem>>, vector<128x768xf32>
      %c0_19 = arith.constant 0 : index
      %c0_20 = arith.constant 0 : index
      %28 = vector.load %arg6[%c0_19, %c0_20] : memref<1x768xf32, #tpu.memory_space<vmem>>, vector<1x768xf32>
      %29 = vector.broadcast %28 : vector<1x768xf32> to vector<128x768xf32>
      %30 = arith.addf %29, %3 : vector<128x768xf32>
      %31 = arith.addf %27, %30 : vector<128x768xf32>
      %c0_21 = arith.constant 0 : index
      %c0_22 = arith.constant 0 : index
      %32 = vector.load %arg7[%c0_21, %c0_22] : memref<128x768xf32, #tpu.memory_space<vmem>>, vector<128x768xf32>
      tpu.vector_store %arg7[%c0_21, %c0_22], %31 {strides = array<i32>} : memref<128x768xf32, #tpu.memory_space<vmem>>, vector<128x768xf32>,
    } else {
    }
    return
  }
  func.func @transform_0(%arg0: i32, %arg1: i32) -> (i32, i32) {
    %c0_i32 = arith.constant 0 : i32
    %c0_i32_0 = arith.constant 0 : i32
    return %arg0, %c0_i32 : i32, i32
  }
  func.func @transform_1(%arg0: i32, %arg1: i32) -> (i32, i32) {
    %c0_i32 = arith.constant 0 : i32
    %c0_i32_0 = arith.constant 0 : i32
    return %c0_i32, %arg1 : i32, i32
  }
  func.func @transform_2(%arg0: i32, %arg1: i32) -> (i32, i32) {
    %c0_i32 = arith.constant 0 : i32
    %c0_i32_0 = arith.constant 0 : i32
    return %c0_i32, %arg1 : i32, i32
  }
  func.func @transform_3(%arg0: i32, %arg1: i32) -> (i32, i32) {
    %c0_i32 = arith.constant 0 : i32
    %c0_i32_0 = arith.constant 0 : i32
    return %arg1, %c0_i32 : i32, i32
  }
  func.func @transform_4(%arg0: i32, %arg1: i32) -> (i32, i32) {
    %c0_i32 = arith.constant 0 : i32
    %c0_i32_0 = arith.constant 0 : i32
    %c0_i32_1 = arith.constant 0 : i32
    return %c0_i32, %c0_i32_0 : i32, i32
  }
  func.func @transform_5(%arg0: i32, %arg1: i32) -> (i32, i32) {
    %c0_i32 = arith.constant 0 : i32
    %c0_i32_0 = arith.constant 0 : i32
    return %arg0, %c0_i32 : i32, i32
  }
}

</mosaic_0001>

<bundles_post_ra>
// kernel: ffn_residual.1
= control target key start
LH: loop header
LB: loop body
LE: loop exit
PB: predicated region body
PF: predicated region fallthrough
CT: control target
= control target key end

     0   :  { %s14433_s0 = inlined_call_operand.vmem [shape: f32[384,768], index: 0, kind: input, shape index: {}]   ;;  %s14434_s1 = inlined_call_operand.vmem [shape: bf16[768,3072], index: 1, kind: input, shape index: {}]   ;;  %s14435_s2 = inlined_call_operand.vmem [shape: f32[1,3072], index: 2, kind: input, shape index: {}]   ;;  %s14436_s3 = inlined_call_operand.vmem [shape: bf16[3072,768], index: 3, kind: input, shape index: {}]   ;;  %s14437_s4 = inlined_call_operand.vmem [shape: f32[1,768], index: 4, kind: input, shape index: {}]   ;;  %s14438_s5 = inlined_call_operand.hbm [shape: f32[384,768], index: 5, kind: output, shape index: {}]  }
   0x1   :  { %14611 = sst [smem:[#allocation166_spill]] %s14434_s1 }
   0x2   :  { %10 = vsyncpa [#allocation4], 0 }
   0x3   :  { %12 = vsyncpa [#allocation4 + $0x1], 0  ;;  %s9920_s18 = smov 0   ;;  %s9922_s19 = smov 0  }
   0x4   :  { %s9924_s20 = smov 0   ;;  %s9926_s21 = smov 0  }
   0x5   :  { %s9928_s22 = smov 0   ;;  %s9930_s23 = smov 0  }
   0x6   :  { %s9932_s24 = smov 0   ;;  %s9934_s25 = smov 0  }
   0x7   :  { %s9936_s26 = smov 0   ;;  %s9938_s27 = smov 0  }
   0x8 LB: > { %14612 = sst [smem:[#allocation6_spill]] %s9864_s22  ;;  %s8029_s28 = sadd.s32 4294967295, %s9884_s27   ;;  %s9884_s27 = sphi %s9938_s27, %s18_s27   ;;  %s9880_s26 = sphi %s9936_s26, %s15048_s26   ;;  %s9876_s25 = sphi %s9934_s25, %s15047_s25   ;;  %s9872_s24 = sphi %s9932_s24, %s15046_s24   ;;  %s9868_s23 = sphi %s9930_s23, %s15045_s23   ;;  %s9864_s22 = sphi %s9928_s22, %s15044_s22   ;;  %s9860_s21 = sphi %s9926_s21, %s15043_s21   ;;  %s9856_s20 = sphi %s9924_s20, %s15051_s20   ;;  %s9852_s19 = sphi %s9922_s19, %s15050_s19   ;;  %s9848_s18 = sphi %s9920_s18, %s15049_s18  }
   0x9   : > { %14613 = sst [smem:[#allocation7_spill]] %s9876_s25  ;;  %s8030_s29 = sadd.s32 4294967294, %s9884_s27  }
   0xa   : > { %14614 = sst [smem:[#allocation8_spill]] %s9880_s26  ;;  %s27_s30 = sadd.s32 1, %s9876_s25 }
   0xb   : > { %s30_s6 = sadd.s32 1, %s9880_s26  ;;  %p28_p0 = scmp.ge.s32.totalorder %s27_s30, 4 }
   0xc   : > { %s63_s7 = sadd.s32 1, %s9864_s22  ;;  %p70_p1 = scmp.ne.s32.totalorder %s9864_s22, %s9860_s21 }
   0xd   : > { %p71_p2 = scmp.eq.s32.totalorder %s9884_s27, 0  ;;  %s15053_s30 = smov (%p28_p0, %s27_s30), 0 }
   0xe   : > { %14615 = sst [smem:[#allocation9_spill]] %s15053_s30  ;;  %s15055_s6 = smov (!%p28_p0, %s30_s6), %s9880_s26 }
   0xf   : > { %s60_s8 = ssub.s32 %s9876_s25, %s15053_s30  ;;  %p9983_p3 = por %p71_p2, %p70_p1 }
  0x10   : > { %p32_p4 = scmp.ge.s32.totalorder %s15055_s6, 3  ;;  %p61_p5 = scmp.eq.s32.totalorder %s60_s8, 0 }
  0x11   : > { %s162_s10 = sadd.s32 1, %s9856_s20  ;;  %p172_p6 = scmp.ne.s32.totalorder %s9856_s20, %s9852_s19 }
  0x12   : > { %s15057_s6 = smov (%p32_p4, %s15055_s6), 0  ;;  %p173_p7 = scmp.eq.s32.totalorder %s8029_s28, 11 }
  0x13   : > { %14617 = sst [smem:[#allocation10_spill]] %s15057_s6  ;;  %s159_s12 = ssub.s32 %s9880_s26, %s15057_s6 }
  0x14   : > { %s9993_s11 = scalar_select %p61_p5, %s9864_s22, %s63_s7  }
  0x15   : > { %p160_p8 = scmp.eq.s32.totalorder %s159_s12, 0  ;;  %p178_p9 = scmp.ne.s32.totalorder %s9852_s19, %s9848_s18 }
  0x16   : > { %14618 = sst [smem:[#allocation11_spill]] %s9993_s11  ;;  %p9999_p10 = por %p173_p7, %p172_p6 }
  0x17   : > { %p179_p11 = scmp.eq.s32.totalorder %s8030_s29, 11  ;;  %p8032_p13 = scmp.ge.s32.totalorder %s9884_s27, 12 }
  0x18   : > { %s10004_s14 = scalar_select %p160_p8, %s9856_s20, %s162_s10  }
  0x19   : > { %p10006_p12 = por %p179_p11, %p178_p9  ;;  %198 = sbr.rel (%p8032_p13) target bundleno = 183 (0xb7), region = 20 }
  0x1e   : > { %211 = sbr.rel (!%p9983_p3) target bundleno = 183 (0xb7), region = 28  ;;  %s213_s16 = sand.u32 (%p9983_p3), 1, %s9864_s22  }
  0x1f   : > { %s8621_s17 = smul.u32 (%p9983_p3), 24, %s9876_s25  ;;  %s14621_s1 = sld [smem:[#allocation166_spill]] (%p9983_p3) }
  0x20   : > { %s8622_s28 = smul.u32 (%p9983_p3), 2304, %s213_s16 }
  0x22   : > { %s10023_s9 = scalar_lea.vmem (%p9983_p3), [#allocation2], %s8622_s28 }
  0x25   : > { %s10018_s29 = scalar_lea.vmem %s14621_s1, %s8621_s17 }
  0x26   : > { %v231_v0 = vld [vmem:[%s10018_s29] sm:$0xff]  ;;  %v233_v1 = vld [vmem:[%s10018_s29 + $0x8] sm:$0xff]  ;;  %v235_v2 = vld [vmem:[%s10018_s29 + $0x10] sm:$0xff] }
  0x27   : > { %232 = vst [vmem:[%s10023_s9] sm:$0xff] %v231_v0  ;;  %234 = vst [vmem:[%s10023_s9 + $0x8] sm:$0xff] %v233_v1  ;;  %v237_v3 = vld [vmem:[%s10018_s29 + $0x60] sm:$0xff]  ;;  %v239_v4 = vld [vmem:[%s10018_s29 + $0x68] sm:$0xff] }
  0x28   : > { %236 = vst [vmem:[%s10023_s9 + $0x10] sm:$0xff] %v235_v2  ;;  %v241_v5 = vld [vmem:[%s10018_s29 + $0x70] sm:$0xff]  ;;  %238 = vst [vmem:[%s10023_s9 + $0x18] sm:$0xff] %v237_v3  ;;  %v243_v6 = vld [vmem:[%s10018_s29 + $0xc0] sm:$0xff] }
  0x29   : > { %240 = vst [vmem:[%s10023_s9 + $0x20] sm:$0xff] %v239_v4  ;;  %242 = vst [vmem:[%s10023_s9 + $0x28] sm:$0xff] %v241_v5  ;;  %v245_v7 = vld [vmem:[%s10018_s29 + $0xc8] sm:$0xff]  ;;  %v247_v8 = vld [vmem:[%s10018_s29 + $0xd0] sm:$0xff] }
  0x2a   : > { %244 = vst [vmem:[%s10023_s9 + $0x30] sm:$0xff] %v243_v6  ;;  %246 = vst [vmem:[%s10023_s9 + $0x38] sm:$0xff] %v245_v7  ;;  %v249_v9 = vld [vmem:[%s10018_s29 + $0x120] sm:$0xff]  ;;  %v251_v10 = vld [vmem:[%s10018_s29 + $0x128] sm:$0xff] }
  0x2b   : > { %248 = vst [vmem:[%s10023_s9 + $0x40] sm:$0xff] %v247_v8  ;;  %v253_v11 = vld [vmem:[%s10018_s29 + $0x130] sm:$0xff]  ;;  %250 = vst [vmem:[%s10023_s9 + $0x48] sm:$0xff] %v249_v9  ;;  %v255_v12 = vld [vmem:[%s10018_s29 + $0x180] sm:$0xff] }
  0x2c   : > { %252 = vst [vmem:[%s10023_s9 + $0x50] sm:$0xff] %v251_v10  ;;  %254 = vst [vmem:[%s10023_s9 + $0x58] sm:$0xff] %v253_v11  ;;  %v257_v13 = vld [vmem:[%s10018_s29 + $0x188] sm:$0xff]  ;;  %v259_v14 = vld [vmem:[%s10018_s29 + $0x190] sm:$0xff] }
  0x2d   : > { %256 = vst [vmem:[%s10023_s9 + $0x60] sm:$0xff] %v255_v12  ;;  %258 = vst [vmem:[%s10023_s9 + $0x68] sm:$0xff] %v257_v13  ;;  %v261_v15 = vld [vmem:[%s10018_s29 + $0x1e0] sm:$0xff]  ;;  %v263_v16 = vld [vmem:[%s10018_s29 + $0x1e8] sm:$0xff] }
  0x2e   : > { %260 = vst [vmem:[%s10023_s9 + $0x70] sm:$0xff] %v259_v14  ;;  %v265_v17 = vld [vmem:[%s10018_s29 + $0x1f0] sm:$0xff]  ;;  %262 = vst [vmem:[%s10023_s9 + $0x78] sm:$0xff] %v261_v15  ;;  %v267_v18 = vld [vmem:[%s10018_s29 + $0x240] sm:$0xff] }
  0x2f   : > { %264 = vst [vmem:[%s10023_s9 + $0x80] sm:$0xff] %v263_v16  ;;  %266 = vst [vmem:[%s10023_s9 + $0x88] sm:$0xff] %v265_v17  ;;  %v269_v19 = vld [vmem:[%s10018_s29 + $0x248] sm:$0xff]  ;;  %v271_v20 = vld [vmem:[%s10018_s29 + $0x250] sm:$0xff] }
  0x30   : > { %268 = vst [vmem:[%s10023_s9 + $0x90] sm:$0xff] %v267_v18  ;;  %270 = vst [vmem:[%s10023_s9 + $0x98] sm:$0xff] %v269_v19  ;;  %v273_v21 = vld [vmem:[%s10018_s29 + $0x2a0] sm:$0xff]  ;;  %v275_v22 = vld [vmem:[%s10018_s29 + $0x2a8] sm:$0xff] }
  0x31   : > { %272 = vst [vmem:[%s10023_s9 + $0xa0] sm:$0xff] %v271_v20  ;;  %v277_v23 = vld [vmem:[%s10018_s29 + $0x2b0] sm:$0xff]  ;;  %274 = vst [vmem:[%s10023_s9 + $0xa8] sm:$0xff] %v273_v21  ;;  %v279_v24 = vld [vmem:[%s10018_s29 + $0x300] sm:$0xff] }
  0x32   : > { %276 = vst [vmem:[%s10023_s9 + $0xb0] sm:$0xff] %v275_v22  ;;  %278 = vst [vmem:[%s10023_s9 + $0xb8] sm:$0xff] %v277_v23  ;;  %v281_v25 = vld [vmem:[%s10018_s29 + $0x308] sm:$0xff]  ;;  %v283_v26 = vld [vmem:[%s10018_s29 + $0x310] sm:$0xff] }
  0x33   : > { %280 = vst [vmem:[%s10023_s9 + $0xc0] sm:$0xff] %v279_v24  ;;  %282 = vst [vmem:[%s10023_s9 + $0xc8] sm:$0xff] %v281_v25  ;;  %v285_v27 = vld [vmem:[%s10018_s29 + $0x360] sm:$0xff]  ;;  %v287_v28 = vld [vmem:[%s10018_s29 + $0x368] sm:$0xff] }
  0x34   : > { %284 = vst [vmem:[%s10023_s9 + $0xd0] sm:$0xff] %v283_v26  ;;  %v289_v29 = vld [vmem:[%s10018_s29 + $0x370] sm:$0xff]  ;;  %286 = vst [vmem:[%s10023_s9 + $0xd8] sm:$0xff] %v285_v27  ;;  %v291_v30 = vld [vmem:[%s10018_s29 + $0x3c0] sm:$0xff] }
  0x35   : > { %288 = vst [vmem:[%s10023_s9 + $0xe0] sm:$0xff] %v287_v28  ;;  %290 = vst [vmem:[%s10023_s9 + $0xe8] sm:$0xff] %v289_v29  ;;  %v293_v31 = vld [vmem:[%s10018_s29 + $0x3c8] sm:$0xff]  ;;  %v295_v32 = vld [vmem:[%s10018_s29 + $0x3d0] sm:$0xff] }
  0x36   : > { %292 = vst [vmem:[%s10023_s9 + $0xf0] sm:$0xff] %v291_v30  ;;  %294 = vst [vmem:[%s10023_s9 + $0xf8] sm:$0xff] %v293_v31  ;;  %v297_v33 = vld [vmem:[%s10018_s29 + $0x420] sm:$0xff]  ;;  %v299_v34 = vld [vmem:[%s10018_s29 + $0x428] sm:$0xff] }
  0x37   : > { %296 = vst [vmem:[%s10023_s9 + $0x100] sm:$0xff] %v295_v32  ;;  %v301_v35 = vld [vmem:[%s10018_s29 + $0x430] sm:$0xff]  ;;  %298 = vst [vmem:[%s10023_s9 + $0x108] sm:$0xff] %v297_v33  ;;  %v303_v36 = vld [vmem:[%s10018_s29 + $0x480] sm:$0xff] }
  0x38   : > { %300 = vst [vmem:[%s10023_s9 + $0x110] sm:$0xff] %v299_v34  ;;  %302 = vst [vmem:[%s10023_s9 + $0x118] sm:$0xff] %v301_v35  ;;  %v305_v37 = vld [vmem:[%s10018_s29 + $0x488] sm:$0xff]  ;;  %v307_v38 = vld [vmem:[%s10018_s29 + $0x490] sm:$0xff] }
  0x39   : > { %304 = vst [vmem:[%s10023_s9 + $0x120] sm:$0xff] %v303_v36  ;;  %306 = vst [vmem:[%s10023_s9 + $0x128] sm:$0xff] %v305_v37  ;;  %v309_v39 = vld [vmem:[%s10018_s29 + $0x4e0] sm:$0xff]  ;;  %v311_v40 = vld [vmem:[%s10018_s29 + $0x4e8] sm:$0xff] }
  0x3a   : > { %308 = vst [vmem:[%s10023_s9 + $0x130] sm:$0xff] %v307_v38  ;;  %v313_v41 = vld [vmem:[%s10018_s29 + $0x4f0] sm:$0xff]  ;;  %310 = vst [vmem:[%s10023_s9 + $0x138] sm:$0xff] %v309_v39  ;;  %v315_v42 = vld [vmem:[%s10018_s29 + $0x540] sm:$0xff] }
  0x3b   : > { %312 = vst [vmem:[%s10023_s9 + $0x140] sm:$0xff] %v311_v40  ;;  %314 = vst [vmem:[%s10023_s9 + $0x148] sm:$0xff] %v313_v41  ;;  %v317_v43 = vld [vmem:[%s10018_s29 + $0x548] sm:$0xff]  ;;  %v319_v44 = vld [vmem:[%s10018_s29 + $0x550] sm:$0xff] }
  0x3c   : > { %316 = vst [vmem:[%s10023_s9 + $0x150] sm:$0xff] %v315_v42  ;;  %318 = vst [vmem:[%s10023_s9 + $0x158] sm:$0xff] %v317_v43  ;;  %v321_v45 = vld [vmem:[%s10018_s29 + $0x5a0] sm:$0xff]  ;;  %v323_v46 = vld [vmem:[%s10018_s29 + $0x5a8] sm:$0xff] }
  0x3d   : > { %320 = vst [vmem:[%s10023_s9 + $0x160] sm:$0xff] %v319_v44  ;;  %v325_v47 = vld [vmem:[%s10018_s29 + $0x5b0] sm:$0xff]  ;;  %322 = vst [vmem:[%s10023_s9 + $0x168] sm:$0xff] %v321_v45  ;;  %v327_v48 = vld [vmem:[%s10018_s29 + $0x600] sm:$0xff] }
  0x3e   : > { %324 = vst [vmem:[%s10023_s9 + $0x170] sm:$0xff] %v323_v46  ;;  %326 = vst [vmem:[%s10023_s9 + $0x178] sm:$0xff] %v325_v47  ;;  %v329_v49 = vld [vmem:[%s10018_s29 + $0x608] sm:$0xff]  ;;  %v331_v50 = vld [vmem:[%s10018_s29 + $0x610] sm:$0xff] }
  0x3f   : > { %328 = vst [vmem:[%s10023_s9 + $0x180] sm:$0xff] %v327_v48  ;;  %330 = vst [vmem:[%s10023_s9 + $0x188] sm:$0xff] %v329_v49  ;;  %v333_v51 = vld [vmem:[%s10018_s29 + $0x660] sm:$0xff]  ;;  %v335_v52 = vld [vmem:[%s10018_s29 + $0x668] sm:$0xff] }
  0x40   : > { %332 = vst [vmem:[%s10023_s9 + $0x190] sm:$0xff] %v331_v50  ;;  %v337_v53 = vld [vmem:[%s10018_s29 + $0x670] sm:$0xff]  ;;  %334 = vst [vmem:[%s10023_s9 + $0x198] sm:$0xff] %v333_v51  ;;  %v339_v54 = vld [vmem:[%s10018_s29 + $0x6c0] sm:$0xff] }
  0x41   : > { %336 = vst [vmem:[%s10023_s9 + $0x1a0] sm:$0xff] %v335_v52  ;;  %338 = vst [vmem:[%s10023_s9 + $0x1a8] sm:$0xff] %v337_v53  ;;  %v341_v55 = vld [vmem:[%s10018_s29 + $0x6c8] sm:$0xff]  ;;  %v343_v56 = vld [vmem:[%s10018_s29 + $0x6d0] sm:$0xff] }
  0x42   : > { %340 = vst [vmem:[%s10023_s9 + $0x1b0] sm:$0xff] %v339_v54  ;;  %342 = vst [vmem:[%s10023_s9 + $0x1b8] sm:$0xff] %v341_v55  ;;  %v345_v57 = vld [vmem:[%s10018_s29 + $0x720] sm:$0xff]  ;;  %v347_v58 = vld [vmem:[%s10018_s29 + $0x728] sm:$0xff] }
  0x43   : > { %344 = vst [vmem:[%s10023_s9 + $0x1c0] sm:$0xff] %v343_v56  ;;  %v349_v59 = vld [vmem:[%s10018_s29 + $0x730] sm:$0xff]  ;;  %346 = vst [vmem:[%s10023_s9 + $0x1c8] sm:$0xff] %v345_v57  ;;  %v351_v60 = vld [vmem:[%s10018_s29 + $0x780] sm:$0xff] }
  0x44   : > { %348 = vst [vmem:[%s10023_s9 + $0x1d0] sm:$0xff] %v347_v58  ;;  %350 = vst [vmem:[%s10023_s9 + $0x1d8] sm:$0xff] %v349_v59  ;;  %v353_v61 = vld [vmem:[%s10018_s29 + $0x788] sm:$0xff]  ;;  %v355_v62 = vld [vmem:[%s10018_s29 + $0x790] sm:$0xff] }
  0x45   : > { %352 = vst [vmem:[%s10023_s9 + $0x1e0] sm:$0xff] %v351_v60  ;;  %354 = vst [vmem:[%s10023_s9 + $0x1e8] sm:$0xff] %v353_v61  ;;  %v357_v63 = vld [vmem:[%s10018_s29 + $0x7e0] sm:$0xff]  ;;  %v359_v0 = vld [vmem:[%s10018_s29 + $0x7e8] sm:$0xff] }
  0x46   : > { %356 = vst [vmem:[%s10023_s9 + $0x1f0] sm:$0xff] %v355_v62  ;;  %v361_v1 = vld [vmem:[%s10018_s29 + $0x7f0] sm:$0xff]  ;;  %358 = vst [vmem:[%s10023_s9 + $0x1f8] sm:$0xff] %v357_v63  ;;  %v363_v2 = vld [vmem:[%s10018_s29 + $0x840] sm:$0xff] }
  0x47   : > { %360 = vst [vmem:[%s10023_s9 + $0x200] sm:$0xff] %v359_v0  ;;  %362 = vst [vmem:[%s10023_s9 + $0x208] sm:$0xff] %v361_v1  ;;  %v365_v3 = vld [vmem:[%s10018_s29 + $0x848] sm:$0xff]  ;;  %v367_v4 = vld [vmem:[%s10018_s29 + $0x850] sm:$0xff] }
  0x48   : > { %364 = vst [vmem:[%s10023_s9 + $0x210] sm:$0xff] %v363_v2  ;;  %366 = vst [vmem:[%s10023_s9 + $0x218] sm:$0xff] %v365_v3  ;;  %v369_v5 = vld [vmem:[%s10018_s29 + $0x8a0] sm:$0xff]  ;;  %v371_v6 = vld [vmem:[%s10018_s29 + $0x8a8] sm:$0xff] }
  0x49   : > { %368 = vst [vmem:[%s10023_s9 + $0x220] sm:$0xff] %v367_v4  ;;  %v373_v7 = vld [vmem:[%s10018_s29 + $0x8b0] sm:$0xff]  ;;  %370 = vst [vmem:[%s10023_s9 + $0x228] sm:$0xff] %v369_v5  ;;  %v375_v8 = vld [vmem:[%s10018_s29 + $0x900] sm:$0xff] }
  0x4a   : > { %372 = vst [vmem:[%s10023_s9 + $0x230] sm:$0xff] %v371_v6  ;;  %374 = vst [vmem:[%s10023_s9 + $0x238] sm:$0xff] %v373_v7  ;;  %v377_v9 = vld [vmem:[%s10018_s29 + $0x908] sm:$0xff]  ;;  %v379_v10 = vld [vmem:[%s10018_s29 + $0x910] sm:$0xff] }
  0x4b   : > { %376 = vst [vmem:[%s10023_s9 + $0x240] sm:$0xff] %v375_v8  ;;  %378 = vst [vmem:[%s10023_s9 + $0x248] sm:$0xff] %v377_v9  ;;  %v381_v11 = vld [vmem:[%s10018_s29 + $0x960] sm:$0xff]  ;;  %v383_v12 = vld [vmem:[%s10018_s29 + $0x968] sm:$0xff] }
  0x4c   : > { %380 = vst [vmem:[%s10023_s9 + $0x250] sm:$0xff] %v379_v10  ;;  %v385_v13 = vld [vmem:[%s10018_s29 + $0x970] sm:$0xff]  ;;  %382 = vst [vmem:[%s10023_s9 + $0x258] sm:$0xff] %v381_v11  ;;  %v387_v14 = vld [vmem:[%s10018_s29 + $0x9c0] sm:$0xff] }
  0x4d   : > { %384 = vst [vmem:[%s10023_s9 + $0x260] sm:$0xff] %v383_v12  ;;  %386 = vst [vmem:[%s10023_s9 + $0x268] sm:$0xff] %v385_v13  ;;  %v389_v15 = vld [vmem:[%s10018_s29 + $0x9c8] sm:$0xff]  ;;  %v391_v16 = vld [vmem:[%s10018_s29 + $0x9d0] sm:$0xff] }
  0x4e   : > { %388 = vst [vmem:[%s10023_s9 + $0x270] sm:$0xff] %v387_v14  ;;  %390 = vst [vmem:[%s10023_s9 + $0x278] sm:$0xff] %v389_v15  ;;  %v393_v17 = vld [vmem:[%s10018_s29 + $0xa20] sm:$0xff]  ;;  %v395_v18 = vld [vmem:[%s10018_s29 + $0xa28] sm:$0xff] }
  0x4f   : > { %392 = vst [vmem:[%s10023_s9 + $0x280] sm:$0xff] %v391_v16  ;;  %v397_v19 = vld [vmem:[%s10018_s29 + $0xa30] sm:$0xff]  ;;  %394 = vst [vmem:[%s10023_s9 + $0x288] sm:$0xff] %v393_v17  ;;  %v399_v20 = vld [vmem:[%s10018_s29 + $0xa80] sm:$0xff] }
  0x50   : > { %396 = vst [vmem:[%s10023_s9 + $0x290] sm:$0xff] %v395_v18  ;;  %398 = vst [vmem:[%s10023_s9 + $0x298] sm:$0xff] %v397_v19  ;;  %v401_v21 = vld [vmem:[%s10018_s29 + $0xa88] sm:$0xff]  ;;  %v403_v22 = vld [vmem:[%s10018_s29 + $0xa90] sm:$0xff] }
  0x51   : > { %400 = vst [vmem:[%s10023_s9 + $0x2a0] sm:$0xff] %v399_v20  ;;  %402 = vst [vmem:[%s10023_s9 + $0x2a8] sm:$0xff] %v401_v21  ;;  %v405_v23 = vld [vmem:[%s10018_s29 + $0xae0] sm:$0xff]  ;;  %v407_v24 = vld [vmem:[%s10018_s29 + $0xae8] sm:$0xff] }
  0x52   : > { %404 = vst [vmem:[%s10023_s9 + $0x2b0] sm:$0xff] %v403_v22  ;;  %v409_v25 = vld [vmem:[%s10018_s29 + $0xaf0] sm:$0xff]  ;;  %406 = vst [vmem:[%s10023_s9 + $0x2b8] sm:$0xff] %v405_v23  ;;  %v411_v26 = vld [vmem:[%s10018_s29 + $0xb40] sm:$0xff] }
  0x53   : > { %408 = vst [vmem:[%s10023_s9 + $0x2c0] sm:$0xff] %v407_v24  ;;  %410 = vst [vmem:[%s10023_s9 + $0x2c8] sm:$0xff] %v409_v25  ;;  %v413_v27 = vld [vmem:[%s10018_s29 + $0xb48] sm:$0xff]  ;;  %v415_v28 = vld [vmem:[%s10018_s29 + $0xb50] sm:$0xff] }
  0x54   : > { %412 = vst [vmem:[%s10023_s9 + $0x2d0] sm:$0xff] %v411_v26  ;;  %414 = vst [vmem:[%s10023_s9 + $0x2d8] sm:$0xff] %v413_v27  ;;  %v417_v29 = vld [vmem:[%s10018_s29 + $0xba0] sm:$0xff]  ;;  %v419_v30 = vld [vmem:[%s10018_s29 + $0xba8] sm:$0xff] }
  0x55   : > { %416 = vst [vmem:[%s10023_s9 + $0x2e0] sm:$0xff] %v415_v28  ;;  %v421_v31 = vld [vmem:[%s10018_s29 + $0xbb0] sm:$0xff]  ;;  %418 = vst [vmem:[%s10023_s9 + $0x2e8] sm:$0xff] %v417_v29  ;;  %v423_v32 = vld [vmem:[%s10018_s29 + $0xc00] sm:$0xff] }
  0x56   : > { %420 = vst [vmem:[%s10023_s9 + $0x2f0] sm:$0xff] %v419_v30  ;;  %422 = vst [vmem:[%s10023_s9 + $0x2f8] sm:$0xff] %v421_v31  ;;  %v425_v33 = vld [vmem:[%s10018_s29 + $0xc08] sm:$0xff]  ;;  %v427_v34 = vld [vmem:[%s10018_s29 + $0xc10] sm:$0xff] }
  0x57   : > { %424 = vst [vmem:[%s10023_s9 + $0x300] sm:$0xff] %v423_v32  ;;  %426 = vst [vmem:[%s10023_s9 + $0x308] sm:$0xff] %v425_v33  ;;  %v429_v35 = vld [vmem:[%s10018_s29 + $0xc60] sm:$0xff]  ;;  %v431_v36 = vld [vmem:[%s10018_s29 + $0xc68] sm:$0xff] }
  0x58   : > { %428 = vst [vmem:[%s10023_s9 + $0x310] sm:$0xff] %v427_v34  ;;  %v433_v37 = vld [vmem:[%s10018_s29 + $0xc70] sm:$0xff]  ;;  %430 = vst [vmem:[%s10023_s9 + $0x318] sm:$0xff] %v429_v35  ;;  %v435_v38 = vld [vmem:[%s10018_s29 + $0xcc0] sm:$0xff] }
  0x59   : > { %432 = vst [vmem:[%s10023_s9 + $0x320] sm:$0xff] %v431_v36  ;;  %434 = vst [vmem:[%s10023_s9 + $0x328] sm:$0xff] %v433_v37  ;;  %v437_v39 = vld [vmem:[%s10018_s29 + $0xcc8] sm:$0xff]  ;;  %v439_v40 = vld [vmem:[%s10018_s29 + $0xcd0] sm:$0xff] }
  0x5a   : > { %436 = vst [vmem:[%s10023_s9 + $0x330] sm:$0xff] %v435_v38  ;;  %438 = vst [vmem:[%s10023_s9 + $0x338] sm:$0xff] %v437_v39  ;;  %v441_v41 = vld [vmem:[%s10018_s29 + $0xd20] sm:$0xff]  ;;  %v443_v42 = vld [vmem:[%s10018_s29 + $0xd28] sm:$0xff] }
  0x5b   : > { %440 = vst [vmem:[%s10023_s9 + $0x340] sm:$0xff] %v439_v40  ;;  %v445_v43 = vld [vmem:[%s10018_s29 + $0xd30] sm:$0xff]  ;;  %442 = vst [vmem:[%s10023_s9 + $0x348] sm:$0xff] %v441_v41  ;;  %v447_v44 = vld [vmem:[%s10018_s29 + $0xd80] sm:$0xff] }
  0x5c   : > { %444 = vst [vmem:[%s10023_s9 + $0x350] sm:$0xff] %v443_v42  ;;  %446 = vst [vmem:[%s10023_s9 + $0x358] sm:$0xff] %v445_v43  ;;  %v449_v45 = vld [vmem:[%s10018_s29 + $0xd88] sm:$0xff]  ;;  %v451_v46 = vld [vmem:[%s10018_s29 + $0xd90] sm:$0xff] }
  0x5d   : > { %448 = vst [vmem:[%s10023_s9 + $0x360] sm:$0xff] %v447_v44  ;;  %450 = vst [vmem:[%s10023_s9 + $0x368] sm:$0xff] %v449_v45  ;;  %v453_v47 = vld [vmem:[%s10018_s29 + $0xde0] sm:$0xff]  ;;  %v455_v48 = vld [vmem:[%s10018_s29 + $0xde8] sm:$0xff] }
  0x5e   : > { %452 = vst [vmem:[%s10023_s9 + $0x370] sm:$0xff] %v451_v46  ;;  %v457_v49 = vld [vmem:[%s10018_s29 + $0xdf0] sm:$0xff]  ;;  %454 = vst [vmem:[%s10023_s9 + $0x378] sm:$0xff] %v453_v47  ;;  %v459_v50 = vld [vmem:[%s10018_s29 + $0xe40] sm:$0xff] }
  0x5f   : > { %456 = vst [vmem:[%s10023_s9 + $0x380] sm:$0xff] %v455_v48  ;;  %458 = vst [vmem:[%s10023_s9 + $0x388] sm:$0xff] %v457_v49  ;;  %v461_v51 = vld [vmem:[%s10018_s29 + $0xe48] sm:$0xff]  ;;  %v463_v52 = vld [vmem:[%s10018_s29 + $0xe50] sm:$0xff] }
  0x60   : > { %460 = vst [vmem:[%s10023_s9 + $0x390] sm:$0xff] %v459_v50  ;;  %462 = vst [vmem:[%s10023_s9 + $0x398] sm:$0xff] %v461_v51  ;;  %v465_v53 = vld [vmem:[%s10018_s29 + $0xea0] sm:$0xff]  ;;  %v467_v54 = vld [vmem:[%s10018_s29 + $0xea8] sm:$0xff] }
  0x61   : > { %464 = vst [vmem:[%s10023_s9 + $0x3a0] sm:$0xff] %v463_v52  ;;  %v469_v55 = vld [vmem:[%s10018_s29 + $0xeb0] sm:$0xff]  ;;  %466 = vst [vmem:[%s10023_s9 + $0x3a8] sm:$0xff] %v465_v53  ;;  %v471_v56 = vld [vmem:[%s10018_s29 + $0xf00] sm:$0xff] }
  0x62   : > { %468 = vst [vmem:[%s10023_s9 + $0x3b0] sm:$0xff] %v467_v54  ;;  %470 = vst [vmem:[%s10023_s9 + $0x3b8] sm:$0xff] %v469_v55  ;;  %v473_v57 = vld [vmem:[%s10018_s29 + $0xf08] sm:$0xff]  ;;  %v475_v58 = vld [vmem:[%s10018_s29 + $0xf10] sm:$0xff] }
  0x63   : > { %472 = vst [vmem:[%s10023_s9 + $0x3c0] sm:$0xff] %v471_v56  ;;  %474 = vst [vmem:[%s10023_s9 + $0x3c8] sm:$0xff] %v473_v57  ;;  %v477_v59 = vld [vmem:[%s10018_s29 + $0xf60] sm:$0xff]  ;;  %v479_v60 = vld [vmem:[%s10018_s29 + $0xf68] sm:$0xff] }
  0x64   : > { %476 = vst [vmem:[%s10023_s9 + $0x3d0] sm:$0xff] %v475_v58  ;;  %v481_v61 = vld [vmem:[%s10018_s29 + $0xf70] sm:$0xff]  ;;  %478 = vst [vmem:[%s10023_s9 + $0x3d8] sm:$0xff] %v477_v59  ;;  %v483_v62 = vld [vmem:[%s10018_s29 + $0xfc0] sm:$0xff] }
  0x65   : > { %480 = vst [vmem:[%s10023_s9 + $0x3e0] sm:$0xff] %v479_v60  ;;  %482 = vst [vmem:[%s10023_s9 + $0x3e8] sm:$0xff] %v481_v61  ;;  %v485_v63 = vld [vmem:[%s10018_s29 + $0xfc8] sm:$0xff]  ;;  %v487_v0 = vld [vmem:[%s10018_s29 + $0xfd0] sm:$0xff] }
  0x66   : > { %484 = vst [vmem:[%s10023_s9 + $0x3f0] sm:$0xff] %v483_v62  ;;  %486 = vst [vmem:[%s10023_s9 + $0x3f8] sm:$0xff] %v485_v63  ;;  %v489_v1 = vld [vmem:[%s10018_s29 + $0x1020] sm:$0xff]  ;;  %v491_v2 = vld [vmem:[%s10018_s29 + $0x1028] sm:$0xff] }
  0x67   : > { %488 = vst [vmem:[%s10023_s9 + $0x400] sm:$0xff] %v487_v0  ;;  %v493_v3 = vld [vmem:[%s10018_s29 + $0x1030] sm:$0xff]  ;;  %490 = vst [vmem:[%s10023_s9 + $0x408] sm:$0xff] %v489_v1  ;;  %v495_v4 = vld [vmem:[%s10018_s29 + $0x1080] sm:$0xff] }
  0x68   : > { %492 = vst [vmem:[%s10023_s9 + $0x410] sm:$0xff] %v491_v2  ;;  %494 = vst [vmem:[%s10023_s9 + $0x418] sm:$0xff] %v493_v3  ;;  %v497_v5 = vld [vmem:[%s10018_s29 + $0x1088] sm:$0xff]  ;;  %v499_v6 = vld [vmem:[%s10018_s29 + $0x1090] sm:$0xff] }
  0x69   : > { %496 = vst [vmem:[%s10023_s9 + $0x420] sm:$0xff] %v495_v4  ;;  %498 = vst [vmem:[%s10023_s9 + $0x428] sm:$0xff] %v497_v5  ;;  %v501_v7 = vld [vmem:[%s10018_s29 + $0x10e0] sm:$0xff]  ;;  %v503_v8 = vld [vmem:[%s10018_s29 + $0x10e8] sm:$0xff] }
  0x6a   : > { %500 = vst [vmem:[%s10023_s9 + $0x430] sm:$0xff] %v499_v6  ;;  %v505_v9 = vld [vmem:[%s10018_s29 + $0x10f0] sm:$0xff]  ;;  %502 = vst [vmem:[%s10023_s9 + $0x438] sm:$0xff] %v501_v7  ;;  %v507_v10 = vld [vmem:[%s10018_s29 + $0x1140] sm:$0xff] }
  0x6b   : > { %504 = vst [vmem:[%s10023_s9 + $0x440] sm:$0xff] %v503_v8  ;;  %506 = vst [vmem:[%s10023_s9 + $0x448] sm:$0xff] %v505_v9  ;;  %v509_v11 = vld [vmem:[%s10018_s29 + $0x1148] sm:$0xff]  ;;  %v511_v12 = vld [vmem:[%s10018_s29 + $0x1150] sm:$0xff] }
  0x6c   : > { %508 = vst [vmem:[%s10023_s9 + $0x450] sm:$0xff] %v507_v10  ;;  %510 = vst [vmem:[%s10023_s9 + $0x458] sm:$0xff] %v509_v11  ;;  %v513_v13 = vld [vmem:[%s10018_s29 + $0x11a0] sm:$0xff]  ;;  %v515_v14 = vld [vmem:[%s10018_s29 + $0x11a8] sm:$0xff] }
  0x6d   : > { %512 = vst [vmem:[%s10023_s9 + $0x460] sm:$0xff] %v511_v12  ;;  %v517_v15 = vld [vmem:[%s10018_s29 + $0x11b0] sm:$0xff]  ;;  %514 = vst [vmem:[%s10023_s9 + $0x468] sm:$0xff] %v513_v13  ;;  %v519_v16 = vld [vmem:[%s10018_s29 + $0x1200] sm:$0xff] }
  0x6e   : > { %516 = vst [vmem:[%s10023_s9 + $0x470] sm:$0xff] %v515_v14  ;;  %518 = vst [vmem:[%s10023_s9 + $0x478] sm:$0xff] %v517_v15  ;;  %v521_v17 = vld [vmem:[%s10018_s29 + $0x1208] sm:$0xff]  ;;  %v523_v18 = vld [vmem:[%s10018_s29 + $0x1210] sm:$0xff] }
  0x6f   : > { %520 = vst [vmem:[%s10023_s9 + $0x480] sm:$0xff] %v519_v16  ;;  %522 = vst [vmem:[%s10023_s9 + $0x488] sm:$0xff] %v521_v17  ;;  %v525_v19 = vld [vmem:[%s10018_s29 + $0x1260] sm:$0xff]  ;;  %v527_v20 = vld [vmem:[%s10018_s29 + $0x1268] sm:$0xff] }
  0x70   : > { %524 = vst [vmem:[%s10023_s9 + $0x490] sm:$0xff] %v523_v18  ;;  %v529_v21 = vld [vmem:[%s10018_s29 + $0x1270] sm:$0xff]  ;;  %526 = vst [vmem:[%s10023_s9 + $0x498] sm:$0xff] %v525_v19  ;;  %v531_v22 = vld [vmem:[%s10018_s29 + $0x12c0] sm:$0xff] }
  0x71   : > { %528 = vst [vmem:[%s10023_s9 + $0x4a0] sm:$0xff] %v527_v20  ;;  %530 = vst [vmem:[%s10023_s9 + $0x4a8] sm:$0xff] %v529_v21  ;;  %v533_v23 = vld [vmem:[%s10018_s29 + $0x12c8] sm:$0xff]  ;;  %v535_v24 = vld [vmem:[%s10018_s29 + $0x12d0] sm:$0xff] }
  0x72   : > { %532 = vst [vmem:[%s10023_s9 + $0x4b0] sm:$0xff] %v531_v22  ;;  %534 = vst [vmem:[%s10023_s9 + $0x4b8] sm:$0xff] %v533_v23  ;;  %v537_v25 = vld [vmem:[%s10018_s29 + $0x1320] sm:$0xff]  ;;  %v539_v26 = vld [vmem:[%s10018_s29 + $0x1328] sm:$0xff] }
  0x73   : > { %536 = vst [vmem:[%s10023_s9 + $0x4c0] sm:$0xff] %v535_v24  ;;  %v541_v27 = vld [vmem:[%s10018_s29 + $0x1330] sm:$0xff]  ;;  %538 = vst [vmem:[%s10023_s9 + $0x4c8] sm:$0xff] %v537_v25  ;;  %v543_v28 = vld [vmem:[%s10018_s29 + $0x1380] sm:$0xff] }
  0x74   : > { %540 = vst [vmem:[%s10023_s9 + $0x4d0] sm:$0xff] %v539_v26  ;;  %542 = vst [vmem:[%s10023_s9 + $0x4d8] sm:$0xff] %v541_v27  ;;  %v545_v29 = vld [vmem:[%s10018_s29 + $0x1388] sm:$0xff]  ;;  %v547_v30 = vld [vmem:[%s10018_s29 + $0x1390] sm:$0xff] }
  0x75   : > { %544 = vst [vmem:[%s10023_s9 + $0x4e0] sm:$0xff] %v543_v28  ;;  %546 = vst [vmem:[%s10023_s9 + $0x4e8] sm:$0xff] %v545_v29  ;;  %v549_v31 = vld [vmem:[%s10018_s29 + $0x13e0] sm:$0xff]  ;;  %v551_v32 = vld [vmem:[%s10018_s29 + $0x13e8] sm:$0xff] }
  0x76   : > { %548 = vst [vmem:[%s10023_s9 + $0x4f0] sm:$0xff] %v547_v30  ;;  %v553_v33 = vld [vmem:[%s10018_s29 + $0x13f0] sm:$0xff]  ;;  %550 = vst [vmem:[%s10023_s9 + $0x4f8] sm:$0xff] %v549_v31  ;;  %v555_v34 = vld [vmem:[%s10018_s29 + $0x1440] sm:$0xff] }
  0x77   : > { %552 = vst [vmem:[%s10023_s9 + $0x500] sm:$0xff] %v551_v32  ;;  %554 = vst [vmem:[%s10023_s9 + $0x508] sm:$0xff] %v553_v33  ;;  %v557_v35 = vld [vmem:[%s10018_s29 + $0x1448] sm:$0xff]  ;;  %v559_v36 = vld [vmem:[%s10018_s29 + $0x1450] sm:$0xff] }
  0x78   : > { %556 = vst [vmem:[%s10023_s9 + $0x510] sm:$0xff] %v555_v34  ;;  %558 = vst [vmem:[%s10023_s9 + $0x518] sm:$0xff] %v557_v35  ;;  %v561_v37 = vld [vmem:[%s10018_s29 + $0x14a0] sm:$0xff]  ;;  %v563_v38 = vld [vmem:[%s10018_s29 + $0x14a8] sm:$0xff] }
  0x79   : > { %560 = vst [vmem:[%s10023_s9 + $0x520] sm:$0xff] %v559_v36  ;;  %v565_v39 = vld [vmem:[%s10018_s29 + $0x14b0] sm:$0xff]  ;;  %562 = vst [vmem:[%s10023_s9 + $0x528] sm:$0xff] %v561_v37  ;;  %v567_v40 = vld [vmem:[%s10018_s29 + $0x1500] sm:$0xff] }
  0x7a   : > { %564 = vst [vmem:[%s10023_s9 + $0x530] sm:$0xff] %v563_v38  ;;  %566 = vst [vmem:[%s10023_s9 + $0x538] sm:$0xff] %v565_v39  ;;  %v569_v41 = vld [vmem:[%s10018_s29 + $0x1508] sm:$0xff]  ;;  %v571_v42 = vld [vmem:[%s10018_s29 + $0x1510] sm:$0xff] }
  0x7b   : > { %568 = vst [vmem:[%s10023_s9 + $0x540] sm:$0xff] %v567_v40  ;;  %570 = vst [vmem:[%s10023_s9 + $0x548] sm:$0xff] %v569_v41  ;;  %v573_v43 = vld [vmem:[%s10018_s29 + $0x1560] sm:$0xff]  ;;  %v575_v44 = vld [vmem:[%s10018_s29 + $0x1568] sm:$0xff] }
  0x7c   : > { %572 = vst [vmem:[%s10023_s9 + $0x550] sm:$0xff] %v571_v42  ;;  %v577_v45 = vld [vmem:[%s10018_s29 + $0x1570] sm:$0xff]  ;;  %574 = vst [vmem:[%s10023_s9 + $0x558] sm:$0xff] %v573_v43  ;;  %v579_v46 = vld [vmem:[%s10018_s29 + $0x15c0] sm:$0xff] }
  0x7d   : > { %576 = vst [vmem:[%s10023_s9 + $0x560] sm:$0xff] %v575_v44  ;;  %578 = vst [vmem:[%s10023_s9 + $0x568] sm:$0xff] %v577_v45  ;;  %v581_v47 = vld [vmem:[%s10018_s29 + $0x15c8] sm:$0xff]  ;;  %v583_v48 = vld [vmem:[%s10018_s29 + $0x15d0] sm:$0xff] }
  0x7e   : > { %580 = vst [vmem:[%s10023_s9 + $0x570] sm:$0xff] %v579_v46  ;;  %582 = vst [vmem:[%s10023_s9 + $0x578] sm:$0xff] %v581_v47  ;;  %v585_v49 = vld [vmem:[%s10018_s29 + $0x1620] sm:$0xff]  ;;  %v587_v50 = vld [vmem:[%s10018_s29 + $0x1628] sm:$0xff] }
  0x7f   : > { %584 = vst [vmem:[%s10023_s9 + $0x580] sm:$0xff] %v583_v48  ;;  %v589_v51 = vld [vmem:[%s10018_s29 + $0x1630] sm:$0xff]  ;;  %586 = vst [vmem:[%s10023_s9 + $0x588] sm:$0xff] %v585_v49  ;;  %v591_v52 = vld [vmem:[%s10018_s29 + $0x1680] sm:$0xff] }
  0x80   : > { %588 = vst [vmem:[%s10023_s9 + $0x590] sm:$0xff] %v587_v50  ;;  %590 = vst [vmem:[%s10023_s9 + $0x598] sm:$0xff] %v589_v51  ;;  %v593_v53 = vld [vmem:[%s10018_s29 + $0x1688] sm:$0xff]  ;;  %v595_v54 = vld [vmem:[%s10018_s29 + $0x1690] sm:$0xff] }
  0x81   : > { %592 = vst [vmem:[%s10023_s9 + $0x5a0] sm:$0xff] %v591_v52  ;;  %594 = vst [vmem:[%s10023_s9 + $0x5a8] sm:$0xff] %v593_v53  ;;  %v597_v55 = vld [vmem:[%s10018_s29 + $0x16e0] sm:$0xff]  ;;  %v599_v56 = vld [vmem:[%s10018_s29 + $0x16e8] sm:$0xff] }
  0x82   : > { %596 = vst [vmem:[%s10023_s9 + $0x5b0] sm:$0xff] %v595_v54  ;;  %v601_v57 = vld [vmem:[%s10018_s29 + $0x16f0] sm:$0xff]  ;;  %598 = vst [vmem:[%s10023_s9 + $0x5b8] sm:$0xff] %v597_v55  ;;  %v603_v58 = vld [vmem:[%s10018_s29 + $0x1740] sm:$0xff] }
  0x83   : > { %600 = vst [vmem:[%s10023_s9 + $0x5c0] sm:$0xff] %v599_v56  ;;  %602 = vst [vmem:[%s10023_s9 + $0x5c8] sm:$0xff] %v601_v57  ;;  %v605_v59 = vld [vmem:[%s10018_s29 + $0x1748] sm:$0xff]  ;;  %v607_v60 = vld [vmem:[%s10018_s29 + $0x1750] sm:$0xff] }
  0x84   : > { %604 = vst [vmem:[%s10023_s9 + $0x5d0] sm:$0xff] %v603_v58  ;;  %606 = vst [vmem:[%s10023_s9 + $0x5d8] sm:$0xff] %v605_v59  ;;  %v609_v61 = vld [vmem:[%s10018_s29 + $0x17a0] sm:$0xff]  ;;  %v611_v62 = vld [vmem:[%s10018_s29 + $0x17a8] sm:$0xff] }
  0x85   : > { %608 = vst [vmem:[%s10023_s9 + $0x5e0] sm:$0xff] %v607_v60  ;;  %v613_v63 = vld [vmem:[%s10018_s29 + $0x17b0] sm:$0xff]  ;;  %610 = vst [vmem:[%s10023_s9 + $0x5e8] sm:$0xff] %v609_v61  ;;  %v615_v0 = vld [vmem:[%s10018_s29 + $0x1800] sm:$0xff] }
  0x86   : > { %612 = vst [vmem:[%s10023_s9 + $0x5f0] sm:$0xff] %v611_v62  ;;  %614 = vst [vmem:[%s10023_s9 + $0x5f8] sm:$0xff] %v613_v63  ;;  %v617_v1 = vld [vmem:[%s10018_s29 + $0x1808] sm:$0xff]  ;;  %v619_v2 = vld [vmem:[%s10018_s29 + $0x1810] sm:$0xff] }
  0x87   : > { %616 = vst [vmem:[%s10023_s9 + $0x600] sm:$0xff] %v615_v0  ;;  %618 = vst [vmem:[%s10023_s9 + $0x608] sm:$0xff] %v617_v1  ;;  %v621_v3 = vld [vmem:[%s10018_s29 + $0x1860] sm:$0xff]  ;;  %v623_v4 = vld [vmem:[%s10018_s29 + $0x1868] sm:$0xff] }
  0x88   : > { %620 = vst [vmem:[%s10023_s9 + $0x610] sm:$0xff] %v619_v2  ;;  %v625_v5 = vld [vmem:[%s10018_s29 + $0x1870] sm:$0xff]  ;;  %622 = vst [vmem:[%s10023_s9 + $0x618] sm:$0xff] %v621_v3  ;;  %v627_v6 = vld [vmem:[%s10018_s29 + $0x18c0] sm:$0xff] }
  0x89   : > { %624 = vst [vmem:[%s10023_s9 + $0x620] sm:$0xff] %v623_v4  ;;  %626 = vst [vmem:[%s10023_s9 + $0x628] sm:$0xff] %v625_v5  ;;  %v629_v7 = vld [vmem:[%s10018_s29 + $0x18c8] sm:$0xff]  ;;  %v631_v8 = vld [vmem:[%s10018_s29 + $0x18d0] sm:$0xff] }
  0x8a   : > { %628 = vst [vmem:[%s10023_s9 + $0x630] sm:$0xff] %v627_v6  ;;  %630 = vst [vmem:[%s10023_s9 + $0x638] sm:$0xff] %v629_v7  ;;  %v633_v9 = vld [vmem:[%s10018_s29 + $0x1920] sm:$0xff]  ;;  %v635_v10 = vld [vmem:[%s10018_s29 + $0x1928] sm:$0xff] }
  0x8b   : > { %632 = vst [vmem:[%s10023_s9 + $0x640] sm:$0xff] %v631_v8  ;;  %v637_v11 = vld [vmem:[%s10018_s29 + $0x1930] sm:$0xff]  ;;  %634 = vst [vmem:[%s10023_s9 + $0x648] sm:$0xff] %v633_v9  ;;  %v639_v12 = vld [vmem:[%s10018_s29 + $0x1980] sm:$0xff] }
  0x8c   : > { %636 = vst [vmem:[%s10023_s9 + $0x650] sm:$0xff] %v635_v10  ;;  %638 = vst [vmem:[%s10023_s9 + $0x658] sm:$0xff] %v637_v11  ;;  %v641_v13 = vld [vmem:[%s10018_s29 + $0x1988] sm:$0xff]  ;;  %v643_v14 = vld [vmem:[%s10018_s29 + $0x1990] sm:$0xff] }
  0x8d   : > { %640 = vst [vmem:[%s10023_s9 + $0x660] sm:$0xff] %v639_v12  ;;  %642 = vst [vmem:[%s10023_s9 + $0x668] sm:$0xff] %v641_v13  ;;  %v645_v15 = vld [vmem:[%s10018_s29 + $0x19e0] sm:$0xff]  ;;  %v647_v16 = vld [vmem:[%s10018_s29 + $0x19e8] sm:$0xff] }
  0x8e   : > { %644 = vst [vmem:[%s10023_s9 + $0x670] sm:$0xff] %v643_v14  ;;  %v649_v17 = vld [vmem:[%s10018_s29 + $0x19f0] sm:$0xff]  ;;  %646 = vst [vmem:[%s10023_s9 + $0x678] sm:$0xff] %v645_v15  ;;  %v651_v18 = vld [vmem:[%s10018_s29 + $0x1a40] sm:$0xff] }
  0x8f   : > { %648 = vst [vmem:[%s10023_s9 + $0x680] sm:$0xff] %v647_v16  ;;  %650 = vst [vmem:[%s10023_s9 + $0x688] sm:$0xff] %v649_v17  ;;  %v653_v19 = vld [vmem:[%s10018_s29 + $0x1a48] sm:$0xff]  ;;  %v655_v20 = vld [vmem:[%s10018_s29 + $0x1a50] sm:$0xff] }
  0x90   : > { %652 = vst [vmem:[%s10023_s9 + $0x690] sm:$0xff] %v651_v18  ;;  %654 = vst [vmem:[%s10023_s9 + $0x698] sm:$0xff] %v653_v19  ;;  %v657_v21 = vld [vmem:[%s10018_s29 + $0x1aa0] sm:$0xff]  ;;  %v659_v22 = vld [vmem:[%s10018_s29 + $0x1aa8] sm:$0xff] }
  0x91   : > { %656 = vst [vmem:[%s10023_s9 + $0x6a0] sm:$0xff] %v655_v20  ;;  %v661_v23 = vld [vmem:[%s10018_s29 + $0x1ab0] sm:$0xff]  ;;  %658 = vst [vmem:[%s10023_s9 + $0x6a8] sm:$0xff] %v657_v21  ;;  %v663_v24 = vld [vmem:[%s10018_s29 + $0x1b00] sm:$0xff] }
  0x92   : > { %660 = vst [vmem:[%s10023_s9 + $0x6b0] sm:$0xff] %v659_v22  ;;  %662 = vst [vmem:[%s10023_s9 + $0x6b8] sm:$0xff] %v661_v23  ;;  %v665_v25 = vld [vmem:[%s10018_s29 + $0x1b08] sm:$0xff]  ;;  %v667_v26 = vld [vmem:[%s10018_s29 + $0x1b10] sm:$0xff] }
  0x93   : > { %664 = vst [vmem:[%s10023_s9 + $0x6c0] sm:$0xff] %v663_v24  ;;  %666 = vst [vmem:[%s10023_s9 + $0x6c8] sm:$0xff] %v665_v25  ;;  %v669_v27 = vld [vmem:[%s10018_s29 + $0x1b60] sm:$0xff]  ;;  %v671_v28 = vld [vmem:[%s10018_s29 + $0x1b68] sm:$0xff] }
  0x94   : > { %668 = vst [vmem:[%s10023_s9 + $0x6d0] sm:$0xff] %v667_v26  ;;  %v673_v29 = vld [vmem:[%s10018_s29 + $0x1b70] sm:$0xff]  ;;  %670 = vst [vmem:[%s10023_s9 + $0x6d8] sm:$0xff] %v669_v27  ;;  %v675_v30 = vld [vmem:[%s10018_s29 + $0x1bc0] sm:$0xff] }
  0x95   : > { %672 = vst [vmem:[%s10023_s9 + $0x6e0] sm:$0xff] %v671_v28  ;;  %674 = vst [vmem:[%s10023_s9 + $0x6e8] sm:$0xff] %v673_v29  ;;  %v677_v31 = vld [vmem:[%s10018_s29 + $0x1bc8] sm:$0xff]  ;;  %v679_v32 = vld [vmem:[%s10018_s29 + $0x1bd0] sm:$0xff] }
  0x96   : > { %676 = vst [vmem:[%s10023_s9 + $0x6f0] sm:$0xff] %v675_v30  ;;  %678 = vst [vmem:[%s10023_s9 + $0x6f8] sm:$0xff] %v677_v31  ;;  %v681_v33 = vld [vmem:[%s10018_s29 + $0x1c20] sm:$0xff]  ;;  %v683_v34 = vld [vmem:[%s10018_s29 + $0x1c28] sm:$0xff] }
  0x97   : > { %680 = vst [vmem:[%s10023_s9 + $0x700] sm:$0xff] %v679_v32  ;;  %v685_v35 = vld [vmem:[%s10018_s29 + $0x1c30] sm:$0xff]  ;;  %682 = vst [vmem:[%s10023_s9 + $0x708] sm:$0xff] %v681_v33  ;;  %v687_v36 = vld [vmem:[%s10018_s29 + $0x1c80] sm:$0xff] }
  0x98   : > { %684 = vst [vmem:[%s10023_s9 + $0x710] sm:$0xff] %v683_v34  ;;  %686 = vst [vmem:[%s10023_s9 + $0x718] sm:$0xff] %v685_v35  ;;  %v689_v37 = vld [vmem:[%s10018_s29 + $0x1c88] sm:$0xff]  ;;  %v691_v38 = vld [vmem:[%s10018_s29 + $0x1c90] sm:$0xff] }
  0x99   : > { %688 = vst [vmem:[%s10023_s9 + $0x720] sm:$0xff] %v687_v36  ;;  %690 = vst [vmem:[%s10023_s9 + $0x728] sm:$0xff] %v689_v37  ;;  %v693_v39 = vld [vmem:[%s10018_s29 + $0x1ce0] sm:$0xff]  ;;  %v695_v40 = vld [vmem:[%s10018_s29 + $0x1ce8] sm:$0xff] }
  0x9a   : > { %692 = vst [vmem:[%s10023_s9 + $0x730] sm:$0xff] %v691_v38  ;;  %v697_v41 = vld [vmem:[%s10018_s29 + $0x1cf0] sm:$0xff]  ;;  %694 = vst [vmem:[%s10023_s9 + $0x738] sm:$0xff] %v693_v39  ;;  %v699_v42 = vld [vmem:[%s10018_s29 + $0x1d40] sm:$0xff] }
  0x9b   : > { %696 = vst [vmem:[%s10023_s9 + $0x740] sm:$0xff] %v695_v40  ;;  %698 = vst [vmem:[%s10023_s9 + $0x748] sm:$0xff] %v697_v41  ;;  %v701_v43 = vld [vmem:[%s10018_s29 + $0x1d48] sm:$0xff]  ;;  %v703_v44 = vld [vmem:[%s10018_s29 + $0x1d50] sm:$0xff] }
  0x9c   : > { %700 = vst [vmem:[%s10023_s9 + $0x750] sm:$0xff] %v699_v42  ;;  %702 = vst [vmem:[%s10023_s9 + $0x758] sm:$0xff] %v701_v43  ;;  %v705_v45 = vld [vmem:[%s10018_s29 + $0x1da0] sm:$0xff]  ;;  %v707_v46 = vld [vmem:[%s10018_s29 + $0x1da8] sm:$0xff] }
  0x9d   : > { %704 = vst [vmem:[%s10023_s9 + $0x760] sm:$0xff] %v703_v44  ;;  %v709_v47 = vld [vmem:[%s10018_s29 + $0x1db0] sm:$0xff]  ;;  %706 = vst [vmem:[%s10023_s9 + $0x768] sm:$0xff] %v705_v45  ;;  %v711_v48 = vld [vmem:[%s10018_s29 + $0x1e00] sm:$0xff] }
  0x9e   : > { %708 = vst [vmem:[%s10023_s9 + $0x770] sm:$0xff] %v707_v46  ;;  %710 = vst [vmem:[%s10023_s9 + $0x778] sm:$0xff] %v709_v47  ;;  %v713_v49 = vld [vmem:[%s10018_s29 + $0x1e08] sm:$0xff]  ;;  %v715_v50 = vld [vmem:[%s10018_s29 + $0x1e10] sm:$0xff] }
  0x9f   : > { %712 = vst [vmem:[%s10023_s9 + $0x780] sm:$0xff] %v711_v48  ;;  %714 = vst [vmem:[%s10023_s9 + $0x788] sm:$0xff] %v713_v49  ;;  %v717_v51 = vld [vmem:[%s10018_s29 + $0x1e60] sm:$0xff]  ;;  %v719_v52 = vld [vmem:[%s10018_s29 + $0x1e68] sm:$0xff] }
  0xa0   : > { %716 = vst [vmem:[%s10023_s9 + $0x790] sm:$0xff] %v715_v50  ;;  %v721_v53 = vld [vmem:[%s10018_s29 + $0x1e70] sm:$0xff]  ;;  %718 = vst [vmem:[%s10023_s9 + $0x798] sm:$0xff] %v717_v51  ;;  %v723_v54 = vld [vmem:[%s10018_s29 + $0x1ec0] sm:$0xff] }
  0xa1   : > { %720 = vst [vmem:[%s10023_s9 + $0x7a0] sm:$0xff] %v719_v52  ;;  %722 = vst [vmem:[%s10023_s9 + $0x7a8] sm:$0xff] %v721_v53  ;;  %v725_v55 = vld [vmem:[%s10018_s29 + $0x1ec8] sm:$0xff]  ;;  %v727_v56 = vld [vmem:[%s10018_s29 + $0x1ed0] sm:$0xff] }
  0xa2   : > { %724 = vst [vmem:[%s10023_s9 + $0x7b0] sm:$0xff] %v723_v54  ;;  %726 = vst [vmem:[%s10023_s9 + $0x7b8] sm:$0xff] %v725_v55  ;;  %v729_v57 = vld [vmem:[%s10018_s29 + $0x1f20] sm:$0xff]  ;;  %v731_v58 = vld [vmem:[%s10018_s29 + $0x1f28] sm:$0xff] }
  0xa3   : > { %728 = vst [vmem:[%s10023_s9 + $0x7c0] sm:$0xff] %v727_v56  ;;  %v733_v59 = vld [vmem:[%s10018_s29 + $0x1f30] sm:$0xff]  ;;  %730 = vst [vmem:[%s10023_s9 + $0x7c8] sm:$0xff] %v729_v57  ;;  %v735_v60 = vld [vmem:[%s10018_s29 + $0x1f80] sm:$0xff] }
  0xa4   : > { %732 = vst [vmem:[%s10023_s9 + $0x7d0] sm:$0xff] %v731_v58  ;;  %734 = vst [vmem:[%s10023_s9 + $0x7d8] sm:$0xff] %v733_v59  ;;  %v737_v61 = vld [vmem:[%s10018_s29 + $0x1f88] sm:$0xff]  ;;  %v739_v62 = vld [vmem:[%s10018_s29 + $0x1f90] sm:$0xff] }
  0xa5   : > { %736 = vst [vmem:[%s10023_s9 + $0x7e0] sm:$0xff] %v735_v60  ;;  %738 = vst [vmem:[%s10023_s9 + $0x7e8] sm:$0xff] %v737_v61  ;;  %v741_v63 = vld [vmem:[%s10018_s29 + $0x1fe0] sm:$0xff]  ;;  %v743_v0 = vld [vmem:[%s10018_s29 + $0x1fe8] sm:$0xff] }
  0xa6   : > { %740 = vst [vmem:[%s10023_s9 + $0x7f0] sm:$0xff] %v739_v62  ;;  %v745_v1 = vld [vmem:[%s10018_s29 + $0x1ff0] sm:$0xff]  ;;  %742 = vst [vmem:[%s10023_s9 + $0x7f8] sm:$0xff] %v741_v63  ;;  %v747_v2 = vld [vmem:[%s10018_s29 + $0x2040] sm:$0xff] }
  0xa7   : > { %744 = vst [vmem:[%s10023_s9 + $0x800] sm:$0xff] %v743_v0  ;;  %746 = vst [vmem:[%s10023_s9 + $0x808] sm:$0xff] %v745_v1  ;;  %v749_v3 = vld [vmem:[%s10018_s29 + $0x2048] sm:$0xff]  ;;  %v751_v4 = vld [vmem:[%s10018_s29 + $0x2050] sm:$0xff] }
  0xa8   : > { %748 = vst [vmem:[%s10023_s9 + $0x810] sm:$0xff] %v747_v2  ;;  %750 = vst [vmem:[%s10023_s9 + $0x818] sm:$0xff] %v749_v3  ;;  %v753_v5 = vld [vmem:[%s10018_s29 + $0x20a0] sm:$0xff]  ;;  %v755_v6 = vld [vmem:[%s10018_s29 + $0x20a8] sm:$0xff] }
  0xa9   : > { %752 = vst [vmem:[%s10023_s9 + $0x820] sm:$0xff] %v751_v4  ;;  %v757_v7 = vld [vmem:[%s10018_s29 + $0x20b0] sm:$0xff]  ;;  %754 = vst [vmem:[%s10023_s9 + $0x828] sm:$0xff] %v753_v5  ;;  %v759_v8 = vld [vmem:[%s10018_s29 + $0x2100] sm:$0xff] }
  0xaa   : > { %756 = vst [vmem:[%s10023_s9 + $0x830] sm:$0xff] %v755_v6  ;;  %758 = vst [vmem:[%s10023_s9 + $0x838] sm:$0xff] %v757_v7  ;;  %v761_v9 = vld [vmem:[%s10018_s29 + $0x2108] sm:$0xff]  ;;  %v763_v10 = vld [vmem:[%s10018_s29 + $0x2110] sm:$0xff] }
  0xab   : > { %760 = vst [vmem:[%s10023_s9 + $0x840] sm:$0xff] %v759_v8  ;;  %762 = vst [vmem:[%s10023_s9 + $0x848] sm:$0xff] %v761_v9  ;;  %v765_v11 = vld [vmem:[%s10018_s29 + $0x2160] sm:$0xff]  ;;  %v767_v12 = vld [vmem:[%s10018_s29 + $0x2168] sm:$0xff] }
  0xac   : > { %764 = vst [vmem:[%s10023_s9 + $0x850] sm:$0xff] %v763_v10  ;;  %v769_v13 = vld [vmem:[%s10018_s29 + $0x2170] sm:$0xff]  ;;  %766 = vst [vmem:[%s10023_s9 + $0x858] sm:$0xff] %v765_v11  ;;  %v771_v14 = vld [vmem:[%s10018_s29 + $0x21c0] sm:$0xff] }
  0xad   : > { %768 = vst [vmem:[%s10023_s9 + $0x860] sm:$0xff] %v767_v12  ;;  %770 = vst [vmem:[%s10023_s9 + $0x868] sm:$0xff] %v769_v13  ;;  %v773_v15 = vld [vmem:[%s10018_s29 + $0x21c8] sm:$0xff]  ;;  %v775_v16 = vld [vmem:[%s10018_s29 + $0x21d0] sm:$0xff] }
  0xae   : > { %772 = vst [vmem:[%s10023_s9 + $0x870] sm:$0xff] %v771_v14  ;;  %774 = vst [vmem:[%s10023_s9 + $0x878] sm:$0xff] %v773_v15  ;;  %v777_v17 = vld [vmem:[%s10018_s29 + $0x2220] sm:$0xff]  ;;  %v779_v18 = vld [vmem:[%s10018_s29 + $0x2228] sm:$0xff] }
  0xaf   : > { %776 = vst [vmem:[%s10023_s9 + $0x880] sm:$0xff] %v775_v16  ;;  %v781_v19 = vld [vmem:[%s10018_s29 + $0x2230] sm:$0xff]  ;;  %778 = vst [vmem:[%s10023_s9 + $0x888] sm:$0xff] %v777_v17  ;;  %v783_v20 = vld [vmem:[%s10018_s29 + $0x2280] sm:$0xff] }
  0xb0   : > { %780 = vst [vmem:[%s10023_s9 + $0x890] sm:$0xff] %v779_v18  ;;  %782 = vst [vmem:[%s10023_s9 + $0x898] sm:$0xff] %v781_v19  ;;  %v785_v21 = vld [vmem:[%s10018_s29 + $0x2288] sm:$0xff]  ;;  %v787_v22 = vld [vmem:[%s10018_s29 + $0x2290] sm:$0xff] }
  0xb1   : > { %784 = vst [vmem:[%s10023_s9 + $0x8a0] sm:$0xff] %v783_v20  ;;  %786 = vst [vmem:[%s10023_s9 + $0x8a8] sm:$0xff] %v785_v21  ;;  %v789_v23 = vld [vmem:[%s10018_s29 + $0x22e0] sm:$0xff]  ;;  %v791_v24 = vld [vmem:[%s10018_s29 + $0x22e8] sm:$0xff] }
  0xb2   : > { %788 = vst [vmem:[%s10023_s9 + $0x8b0] sm:$0xff] %v787_v22  ;;  %v793_v25 = vld [vmem:[%s10018_s29 + $0x22f0] sm:$0xff]  ;;  %790 = vst [vmem:[%s10023_s9 + $0x8b8] sm:$0xff] %v789_v23  ;;  %v795_v26 = vld [vmem:[%s10018_s29 + $0x2340] sm:$0xff] }
  0xb3   : > { %792 = vst [vmem:[%s10023_s9 + $0x8c0] sm:$0xff] %v791_v24  ;;  %794 = vst [vmem:[%s10023_s9 + $0x8c8] sm:$0xff] %v793_v25  ;;  %v797_v27 = vld [vmem:[%s10018_s29 + $0x2348] sm:$0xff]  ;;  %v799_v28 = vld [vmem:[%s10018_s29 + $0x2350] sm:$0xff] }
  0xb4   : > { %796 = vst [vmem:[%s10023_s9 + $0x8d0] sm:$0xff] %v795_v26  ;;  %798 = vst [vmem:[%s10023_s9 + $0x8d8] sm:$0xff] %v797_v27  ;;  %v801_v29 = vld [vmem:[%s10018_s29 + $0x23a0] sm:$0xff]  ;;  %v803_v30 = vld [vmem:[%s10018_s29 + $0x23a8] sm:$0xff] }
  0xb5   : > { %800 = vst [vmem:[%s10023_s9 + $0x8e0] sm:$0xff] %v799_v28  ;;  %v805_v31 = vld [vmem:[%s10018_s29 + $0x23b0] sm:$0xff]  ;;  %802 = vst [vmem:[%s10023_s9 + $0x8e8] sm:$0xff] %v801_v29 }
  0xb6   : > { %804 = vst [vmem:[%s10023_s9 + $0x8f0] sm:$0xff] %v803_v30  ;;  %806 = vst [vmem:[%s10023_s9 + $0x8f8] sm:$0xff] %v805_v31 }
  0xb7 PF: > { %p8034_p0 = scmp.ge.s32.totalorder %s9884_s27, 1  ;;  %p829_p1 = scmp.lt.s32.totalorder %s9884_s27, 13 }
  0xb9   : > { %p830_p2 = pnand %p8034_p0, %p829_p1 }
  0xbb   : > { %833 = sbr.rel (%p830_p2) target bundleno = 1360 (0x550), region = 59 }
  0xc0   : > { %s836_s10 = sand.u32 1, %s9860_s21   ;;  %s14441_s12 = sand.u32 1, %s9852_s19  }
  0xc1   : > { %s8623_s16 = smul.u32 2304, %s836_s10  ;;  %s8035_s17 = sshll.u32 %s9872_s24, 4 }
  0xc2   : > { %s8624_s28 = smul.u32 768, %s14441_s12  ;;  %p880_p3 = scmp.lt.s32.totalorder %s8035_s17, 47 }
  0xc3   : > { %s887_s7 = smul.u32 6, %s9868_s23  ;;  %p8038_p6 = scmp.ne.s32.totalorder %s9868_s23, 0 }
  0xc4   : > { %s892_s8 = smul.u32 96, %s9868_s23  ;;  %s15059_s17 = smov (!%p880_p3, %s8035_s17), 47 }
  0xc5   : > { %p888_p4 = scmp.lt.s32.totalorder %s887_s7, 23  ;;  %s8625_s29 = smul.u32 48, %s15059_s17 }
  0xc6   : > { %p893_p5 = scmp.lt.s32.totalorder %s892_s8, 383  ;;  %s10622_s17 = scalar_lea.vmem [#allocation2], %s8623_s16 }
  0xc7   : > { %s15061_s7 = smov (!%p888_p4, %s887_s7), 23  ;;  %s10610_s6 = scalar_lea.vmem %s14433_s0, %s8625_s29 }
  0xc8   : > { %s10615_s10 = scalar_lea.vmem %s14435_s2, %s15061_s7  ;;  %s15063_s8 = smov (!%p893_p5, %s892_s8), 383 }
  0xc9   : > { %s8626_s12 = smul.u32 24, %s15063_s8  ;;  %s10624_s22 = scalar_lea.vmem [#allocation3], %s8624_s28 }
  0xca   : > { %903 = sbr.rel (%p8038_p6) target bundleno = 256 (0x100), region = 67 }
  0xcb   : > { %s10620_s11 = scalar_lea.vmem %s14436_s3, %s8626_s12 }
  0xcf   : > { %v9886_v32 = vmov 0.0  }
  0xd0   : > { %904 = vst [vmem:[%s10624_s22] sm:$0xff] %v9886_v32  ;;  %905 = vst [vmem:[%s10624_s22 + $0x8] sm:$0xff] %v9886_v32 }
  0xd1   : > { %906 = vst [vmem:[%s10624_s22 + $0x10] sm:$0xff] %v9886_v32  ;;  %907 = vst [vmem:[%s10624_s22 + $0x18] sm:$0xff] %v9886_v32 }
  0xd2   : > { %908 = vst [vmem:[%s10624_s22 + $0x20] sm:$0xff] %v9886_v32  ;;  %909 = vst [vmem:[%s10624_s22 + $0x28] sm:$0xff] %v9886_v32 }
  0xd3   : > { %910 = vst [vmem:[%s10624_s22 + $0x30] sm:$0xff] %v9886_v32  ;;  %911 = vst [vmem:[%s10624_s22 + $0x38] sm:$0xff] %v9886_v32 }
  0xd4   : > { %912 = vst [vmem:[%s10624_s22 + $0x40] sm:$0xff] %v9886_v32  ;;  %913 = vst [vmem:[%s10624_s22 + $0x48] sm:$0xff] %v9886_v32 }
  0xd5   : > { %914 = vst [vmem:[%s10624_s22 + $0x50] sm:$0xff] %v9886_v32  ;;  %915 = vst [vmem:[%s10624_s22 + $0x58] sm:$0xff] %v9886_v32 }
  0xd6   : > { %916 = vst [vmem:[%s10624_s22 + $0x60] sm:$0xff] %v9886_v32  ;;  %917 = vst [vmem:[%s10624_s22 + $0x68] sm:$0xff] %v9886_v32 }
  0xd7   : > { %918 = vst [vmem:[%s10624_s22 + $0x70] sm:$0xff] %v9886_v32  ;;  %919 = vst [vmem:[%s10624_s22 + $0x78] sm:$0xff] %v9886_v32 }
  0xd8   : > { %920 = vst [vmem:[%s10624_s22 + $0x80] sm:$0xff] %v9886_v32  ;;  %921 = vst [vmem:[%s10624_s22 + $0x88] sm:$0xff] %v9886_v32 }
  0xd9   : > { %922 = vst [vmem:[%s10624_s22 + $0x90] sm:$0xff] %v9886_v32  ;;  %923 = vst [vmem:[%s10624_s22 + $0x98] sm:$0xff] %v9886_v32 }
  0xda   : > { %924 = vst [vmem:[%s10624_s22 + $0xa0] sm:$0xff] %v9886_v32  ;;  %925 = vst [vmem:[%s10624_s22 + $0xa8] sm:$0xff] %v9886_v32 }
  0xdb   : > { %926 = vst [vmem:[%s10624_s22 + $0xb0] sm:$0xff] %v9886_v32  ;;  %927 = vst [vmem:[%s10624_s22 + $0xb8] sm:$0xff] %v9886_v32 }
  0xdc   : > { %928 = vst [vmem:[%s10624_s22 + $0xc0] sm:$0xff] %v9886_v32  ;;  %929 = vst [vmem:[%s10624_s22 + $0xc8] sm:$0xff] %v9886_v32 }
  0xdd   : > { %930 = vst [vmem:[%s10624_s22 + $0xd0] sm:$0xff] %v9886_v32  ;;  %931 = vst [vmem:[%s10624_s22 + $0xd8] sm:$0xff] %v9886_v32 }
  0xde   : > { %932 = vst [vmem:[%s10624_s22 + $0xe0] sm:$0xff] %v9886_v32  ;;  %933 = vst [vmem:[%s10624_s22 + $0xe8] sm:$0xff] %v9886_v32 }
  0xdf   : > { %934 = vst [vmem:[%s10624_s22 + $0xf0] sm:$0xff] %v9886_v32  ;;  %935 = vst [vmem:[%s10624_s22 + $0xf8] sm:$0xff] %v9886_v32 }
  0xe0   : > { %936 = vst [vmem:[%s10624_s22 + $0x100] sm:$0xff] %v9886_v32  ;;  %937 = vst [vmem:[%s10624_s22 + $0x108] sm:$0xff] %v9886_v32 }
  0xe1   : > { %938 = vst [vmem:[%s10624_s22 + $0x110] sm:$0xff] %v9886_v32  ;;  %939 = vst [vmem:[%s10624_s22 + $0x118] sm:$0xff] %v9886_v32 }
  0xe2   : > { %940 = vst [vmem:[%s10624_s22 + $0x120] sm:$0xff] %v9886_v32  ;;  %941 = vst [vmem:[%s10624_s22 + $0x128] sm:$0xff] %v9886_v32 }
  0xe3   : > { %942 = vst [vmem:[%s10624_s22 + $0x130] sm:$0xff] %v9886_v32  ;;  %943 = vst [vmem:[%s10624_s22 + $0x138] sm:$0xff] %v9886_v32 }
  0xe4   : > { %944 = vst [vmem:[%s10624_s22 + $0x140] sm:$0xff] %v9886_v32  ;;  %945 = vst [vmem:[%s10624_s22 + $0x148] sm:$0xff] %v9886_v32 }
  0xe5   : > { %946 = vst [vmem:[%s10624_s22 + $0x150] sm:$0xff] %v9886_v32  ;;  %947 = vst [vmem:[%s10624_s22 + $0x158] sm:$0xff] %v9886_v32 }
  0xe6   : > { %948 = vst [vmem:[%s10624_s22 + $0x160] sm:$0xff] %v9886_v32  ;;  %949 = vst [vmem:[%s10624_s22 + $0x168] sm:$0xff] %v9886_v32 }
  0xe7   : > { %950 = vst [vmem:[%s10624_s22 + $0x170] sm:$0xff] %v9886_v32  ;;  %951 = vst [vmem:[%s10624_s22 + $0x178] sm:$0xff] %v9886_v32 }
  0xe8   : > { %952 = vst [vmem:[%s10624_s22 + $0x180] sm:$0xff] %v9886_v32  ;;  %953 = vst [vmem:[%s10624_s22 + $0x188] sm:$0xff] %v9886_v32 }
  0xe9   : > { %954 = vst [vmem:[%s10624_s22 + $0x190] sm:$0xff] %v9886_v32  ;;  %955 = vst [vmem:[%s10624_s22 + $0x198] sm:$0xff] %v9886_v32 }
  0xea   : > { %956 = vst [vmem:[%s10624_s22 + $0x1a0] sm:$0xff] %v9886_v32  ;;  %957 = vst [vmem:[%s10624_s22 + $0x1a8] sm:$0xff] %v9886_v32 }
  0xeb   : > { %958 = vst [vmem:[%s10624_s22 + $0x1b0] sm:$0xff] %v9886_v32  ;;  %959 = vst [vmem:[%s10624_s22 + $0x1b8] sm:$0xff] %v9886_v32 }
  0xec   : > { %960 = vst [vmem:[%s10624_s22 + $0x1c0] sm:$0xff] %v9886_v32  ;;  %961 = vst [vmem:[%s10624_s22 + $0x1c8] sm:$0xff] %v9886_v32 }
  0xed   : > { %962 = vst [vmem:[%s10624_s22 + $0x1d0] sm:$0xff] %v9886_v32  ;;  %963 = vst [vmem:[%s10624_s22 + $0x1d8] sm:$0xff] %v9886_v32 }
  0xee   : > { %964 = vst [vmem:[%s10624_s22 + $0x1e0] sm:$0xff] %v9886_v32  ;;  %965 = vst [vmem:[%s10624_s22 + $0x1e8] sm:$0xff] %v9886_v32 }
  0xef   : > { %966 = vst [vmem:[%s10624_s22 + $0x1f0] sm:$0xff] %v9886_v32  ;;  %967 = vst [vmem:[%s10624_s22 + $0x1f8] sm:$0xff] %v9886_v32 }
  0xf0   : > { %968 = vst [vmem:[%s10624_s22 + $0x200] sm:$0xff] %v9886_v32  ;;  %969 = vst [vmem:[%s10624_s22 + $0x208] sm:$0xff] %v9886_v32 }
  0xf1   : > { %970 = vst [vmem:[%s10624_s22 + $0x210] sm:$0xff] %v9886_v32  ;;  %971 = vst [vmem:[%s10624_s22 + $0x218] sm:$0xff] %v9886_v32 }
  0xf2   : > { %972 = vst [vmem:[%s10624_s22 + $0x220] sm:$0xff] %v9886_v32  ;;  %973 = vst [vmem:[%s10624_s22 + $0x228] sm:$0xff] %v9886_v32 }
  0xf3   : > { %974 = vst [vmem:[%s10624_s22 + $0x230] sm:$0xff] %v9886_v32  ;;  %975 = vst [vmem:[%s10624_s22 + $0x238] sm:$0xff] %v9886_v32 }
  0xf4   : > { %976 = vst [vmem:[%s10624_s22 + $0x240] sm:$0xff] %v9886_v32  ;;  %977 = vst [vmem:[%s10624_s22 + $0x248] sm:$0xff] %v9886_v32 }
  0xf5   : > { %978 = vst [vmem:[%s10624_s22 + $0x250] sm:$0xff] %v9886_v32  ;;  %979 = vst [vmem:[%s10624_s22 + $0x258] sm:$0xff] %v9886_v32 }
  0xf6   : > { %980 = vst [vmem:[%s10624_s22 + $0x260] sm:$0xff] %v9886_v32  ;;  %981 = vst [vmem:[%s10624_s22 + $0x268] sm:$0xff] %v9886_v32 }
  0xf7   : > { %982 = vst [vmem:[%s10624_s22 + $0x270] sm:$0xff] %v9886_v32  ;;  %983 = vst [vmem:[%s10624_s22 + $0x278] sm:$0xff] %v9886_v32 }
  0xf8   : > { %984 = vst [vmem:[%s10624_s22 + $0x280] sm:$0xff] %v9886_v32  ;;  %985 = vst [vmem:[%s10624_s22 + $0x288] sm:$0xff] %v9886_v32 }
  0xf9   : > { %986 = vst [vmem:[%s10624_s22 + $0x290] sm:$0xff] %v9886_v32  ;;  %987 = vst [vmem:[%s10624_s22 + $0x298] sm:$0xff] %v9886_v32 }
  0xfa   : > { %988 = vst [vmem:[%s10624_s22 + $0x2a0] sm:$0xff] %v9886_v32  ;;  %989 = vst [vmem:[%s10624_s22 + $0x2a8] sm:$0xff] %v9886_v32 }
  0xfb   : > { %990 = vst [vmem:[%s10624_s22 + $0x2b0] sm:$0xff] %v9886_v32  ;;  %991 = vst [vmem:[%s10624_s22 + $0x2b8] sm:$0xff] %v9886_v32 }
  0xfc   : > { %992 = vst [vmem:[%s10624_s22 + $0x2c0] sm:$0xff] %v9886_v32  ;;  %993 = vst [vmem:[%s10624_s22 + $0x2c8] sm:$0xff] %v9886_v32 }
  0xfd   : > { %994 = vst [vmem:[%s10624_s22 + $0x2d0] sm:$0xff] %v9886_v32  ;;  %995 = vst [vmem:[%s10624_s22 + $0x2d8] sm:$0xff] %v9886_v32 }
  0xfe   : > { %996 = vst [vmem:[%s10624_s22 + $0x2e0] sm:$0xff] %v9886_v32  ;;  %997 = vst [vmem:[%s10624_s22 + $0x2e8] sm:$0xff] %v9886_v32 }
  0xff   : > { %998 = vst [vmem:[%s10624_s22 + $0x2f0] sm:$0xff] %v9886_v32  ;;  %999 = vst [vmem:[%s10624_s22 + $0x2f8] sm:$0xff] %v9886_v32 }
 0x100 PF: > { %v8718_v33 = vld [vmem:[%s10622_s17 + $0x154] ss:$24 sps:$4 sm:$0xff]   ;;  %v8720_v34 = vld [vmem:[%s10622_s17 + $0x150] ss:$24 sps:$4 sm:$0xff]   ;;  %v8724_v37 = vld [vmem:[%s10622_s17 + $0x124] ss:$24 sps:$4 sm:$0xff]  }
 0x101   : > { %2904 = vmatprep.subr.bf16.mxu0 %v8718_v33  ;;  %v8721_v35 = vld [vmem:[%s10622_s17 + $0x454] ss:$24 sps:$4 sm:$0xff]   ;;  %v8723_v36 = vld [vmem:[%s10622_s17 + $0x450] ss:$24 sps:$4 sm:$0xff]   ;;  %v8726_v38 = vld [vmem:[%s10622_s17 + $0x120] ss:$24 sps:$4 sm:$0xff]  }
 0x102   : > { %2905 = vmatpush1.bf16.msra.mxu0 %v8720_v34  ;;  %3017 = vmatprep.subr.bf16.mxu1 %v8721_v35  ;;  %v8727_v39 = vld [vmem:[%s10622_s17 + $0x424] ss:$24 sps:$4 sm:$0xff]   ;;  %v8729_v40 = vld [vmem:[%s10622_s17 + $0x420] ss:$24 sps:$4 sm:$0xff]   ;;  %v8730_v41 = vld [vmem:[%s10622_s17 + $0xf4] ss:$24 sps:$4 sm:$0xff]  }
 0x103   : > { %3018 = vmatpush1.bf16.msra.mxu1 %v8723_v36  ;;  %2906 = vmatprep.subr.bf16.mxu0 %v8724_v37  ;;  %v8732_v42 = vld [vmem:[%s10622_s17 + $0xf0] ss:$24 sps:$4 sm:$0xff]   ;;  %v8733_v43 = vld [vmem:[%s10622_s17 + $0x3f4] ss:$24 sps:$4 sm:$0xff]   ;;  %v8736_v44 = vld [vmem:[%s10622_s17 + $0xc4] ss:$24 sps:$4 sm:$0xff]  }
 0x104   : > { %3019 = vmatprep.subr.bf16.mxu1 %v8727_v39  ;;  %v8735_v45 = vld [vmem:[%s10622_s17 + $0x3f0] ss:$24 sps:$4 sm:$0xff]   ;;  %v8739_v46 = vld [vmem:[%s10622_s17 + $0x3c4] ss:$24 sps:$4 sm:$0xff]   ;;  %v8738_v47 = vld [vmem:[%s10622_s17 + $0xc0] ss:$24 sps:$4 sm:$0xff]  }
 0x105   : > { %v8742_v48 = vld [vmem:[%s10622_s17 + $0x94] ss:$24 sps:$4 sm:$0xff]   ;;  %v8741_v49 = vld [vmem:[%s10622_s17 + $0x3c0] ss:$24 sps:$4 sm:$0xff]   ;;  %v8744_v51 = vld [vmem:[%s10622_s17 + $0x90] ss:$24 sps:$4 sm:$0xff]  }
 0x106   : > { %2907 = vmatpush1.bf16.msra.mxu0 %v8726_v38  ;;  %v8745_v50 = vld [vmem:[%s10622_s17 + $0x394] ss:$24 sps:$4 sm:$0xff]   ;;  %v8748_v52 = vld [vmem:[%s10622_s17 + $0x64] ss:$24 sps:$4 sm:$0xff]   ;;  %v8747_v53 = vld [vmem:[%s10622_s17 + $0x390] ss:$24 sps:$4 sm:$0xff]  }
 0x107   : > { %2908 = vmatprep.subr.bf16.mxu0 %v8730_v41  ;;  %3020 = vmatpush1.bf16.msra.mxu1 %v8729_v40  ;;  %v8751_v54 = vld [vmem:[%s10622_s17 + $0x364] ss:$24 sps:$4 sm:$0xff]   ;;  %v8750_v55 = vld [vmem:[%s10622_s17 + $0x60] ss:$24 sps:$4 sm:$0xff]   ;;  %v8754_v56 = vld [vmem:[%s10622_s17 + $0x34] ss:$24 sps:$4 sm:$0xff]  }
 0x108   : > { %3021 = vmatprep.subr.bf16.mxu1 %v8733_v43  ;;  %v8753_v57 = vld [vmem:[%s10622_s17 + $0x360] ss:$24 sps:$4 sm:$0xff]   ;;  %v8757_v58 = vld [vmem:[%s10622_s17 + $0x334] ss:$24 sps:$4 sm:$0xff]   ;;  %v8756_v59 = vld [vmem:[%s10622_s17 + $0x30] ss:$24 sps:$4 sm:$0xff]  }
 0x109   : > { %v8760_v60 = vld [vmem:[%s10622_s17 + $0x4] ss:$24 sps:$4 sm:$0xff]   ;;  %v8759_v61 = vld [vmem:[%s10622_s17 + $0x330] ss:$24 sps:$4 sm:$0xff]   ;;  %v8762_v63 = vld [vmem:[%s10622_s17] ss:$24 sps:$4 sm:$0xff]  }
 0x10a   : > { %2909 = vmatpush1.bf16.msra.mxu0 %v8732_v42  ;;  %v8763_v62 = vld [vmem:[%s10622_s17 + $0x304] ss:$24 sps:$4 sm:$0xff]   ;;  %v8766_v0 = vld [vmem:[%s10622_s17 + $0x2d4] ss:$24 sps:$4 sm:$0xff]   ;;  %v8765_v1 = vld [vmem:[%s10622_s17 + $0x300] ss:$24 sps:$4 sm:$0xff]  }
 0x10b   : > { %2910 = vmatprep.subr.bf16.mxu0 %v8736_v44  ;;  %3022 = vmatpush1.bf16.msra.mxu1 %v8735_v45  ;;  %v8769_v2 = vld [vmem:[%s10622_s17 + $0x5d4] ss:$24 sps:$4 sm:$0xff]   ;;  %v8768_v3 = vld [vmem:[%s10622_s17 + $0x2d0] ss:$24 sps:$4 sm:$0xff]   ;;  %v8772_v4 = vld [vmem:[%s10622_s17 + $0x2a4] ss:$24 sps:$4 sm:$0xff]  }
 0x10c   : > { %3023 = vmatprep.subr.bf16.mxu1 %v8739_v46  ;;  %v8771_v5 = vld [vmem:[%s10622_s17 + $0x5d0] ss:$24 sps:$4 sm:$0xff]   ;;  %v8775_v6 = vld [vmem:[%s10622_s17 + $0x5a4] ss:$24 sps:$4 sm:$0xff]   ;;  %v8774_v7 = vld [vmem:[%s10622_s17 + $0x2a0] ss:$24 sps:$4 sm:$0xff]  }
 0x10d   : > { %v8778_v8 = vld [vmem:[%s10622_s17 + $0x274] ss:$24 sps:$4 sm:$0xff]   ;;  %v8777_v9 = vld [vmem:[%s10622_s17 + $0x5a0] ss:$24 sps:$4 sm:$0xff]   ;;  %v8780_v11 = vld [vmem:[%s10622_s17 + $0x270] ss:$24 sps:$4 sm:$0xff]  }
 0x10e   : > { %2911 = vmatpush1.bf16.msra.mxu0 %v8738_v47  ;;  %v8781_v10 = vld [vmem:[%s10622_s17 + $0x574] ss:$24 sps:$4 sm:$0xff]   ;;  %v8784_v12 = vld [vmem:[%s10622_s17 + $0x244] ss:$24 sps:$4 sm:$0xff]   ;;  %v8783_v13 = vld [vmem:[%s10622_s17 + $0x570] ss:$24 sps:$4 sm:$0xff]  }
 0x10f   : > { %2912 = vmatprep.subr.bf16.mxu0 %v8742_v48  ;;  %3024 = vmatpush1.bf16.msra.mxu1 %v8741_v49  ;;  %v8787_v14 = vld [vmem:[%s10622_s17 + $0x544] ss:$24 sps:$4 sm:$0xff]   ;;  %v10866_v15 = vld [vmem:[%s10610_s6 + $0x8] sm:$0xff]  ;;  %v8786_v17 = vld [vmem:[%s10622_s17 + $0x240] ss:$24 sps:$4 sm:$0xff]   ;;  %p8615_p7 = scmp.ne.s32.totalorder %s9868_s23, 3 }
 0x110   : > { %3025 = vmatprep.subr.bf16.mxu1 %v8745_v50  ;;  %14622 = vst [vmem:[#allocation12_spill] sm:$0xff] %v10866_v15  ;;  %v10869_v16 = vld [vmem:[%s10610_s6 + $0x38] sm:$0xff]  ;;  %v8790_v19 = vld [vmem:[%s10622_s17 + $0x214] ss:$24 sps:$4 sm:$0xff]   ;;  %v8792_v25 = vld [vmem:[%s10622_s17 + $0x210] ss:$24 sps:$4 sm:$0xff]  }
 0x111   : > { %14623 = vst [vmem:[#allocation13_spill] sm:$0xff] %v10869_v16  ;;  %v10874_v18 = vpack.c.bf16 %v10869_v16, %v10866_v15  ;;  %v8789_v20 = vld [vmem:[%s10622_s17 + $0x540] ss:$24 sps:$4 sm:$0xff]   ;;  %v10883_v22 = vld [vmem:[%s10610_s6 + $0x48] sm:$0xff]  ;;  %v8796_v26 = vld [vmem:[%s10622_s17 + $0x1e4] ss:$24 sps:$4 sm:$0xff]  }
 0x112   : > { %2913 = vmatpush1.bf16.msra.mxu0 %v8744_v51  ;;  %v10880_v21 = vld [vmem:[%s10610_s6 + $0x18] sm:$0xff]  ;;  %14625 = vst [vmem:[#allocation15_spill] sm:$0xff] %v10883_v22  ;;  %v8793_v23 = vld [vmem:[%s10622_s17 + $0x514] ss:$24 sps:$4 sm:$0xff]   ;;  %v8795_v27 = vld [vmem:[%s10622_s17 + $0x510] ss:$24 sps:$4 sm:$0xff]  }
 0x113   : > { %2914 = vmatprep.subr.bf16.mxu0 %v8748_v52  ;;  %3026 = vmatpush1.bf16.msra.mxu1 %v8747_v53  ;;  %14624 = vst [vmem:[#allocation14_spill] sm:$0xff] %v10880_v21  ;;  %v10888_v24 = vpack.c.bf16 %v10883_v22, %v10880_v21  ;;  %v8799_v28 = vld [vmem:[%s10622_s17 + $0x4e4] ss:$24 sps:$4 sm:$0xff]   ;;  %v8798_v29 = vld [vmem:[%s10622_s17 + $0x1e0] ss:$24 sps:$4 sm:$0xff]   ;;  %v10909_v40 = vld [vmem:[%s10610_s6 + $0x30] sm:$0xff] }
 0x114   : > { %3027 = vmatprep.subr.bf16.mxu1 %v8751_v54  ;;  %2936 = vmatprep.mubr.bf16.mxu0 %v10874_v18  ;;  %v8802_v30 = vld [vmem:[%s10622_s17 + $0x1b4] ss:$24 sps:$4 sm:$0xff]   ;;  %v8801_v31 = vld [vmem:[%s10622_s17 + $0x4e0] ss:$24 sps:$4 sm:$0xff]   ;;  %v8804_v33 = vld [vmem:[%s10622_s17 + $0x1b0] ss:$24 sps:$4 sm:$0xff]  }
 0x115   : > { %3049 = vmatprep.mubr.bf16.mxu1 %v10888_v24  ;;  %v8805_v32 = vld [vmem:[%s10622_s17 + $0x4b4] ss:$24 sps:$4 sm:$0xff]   ;;  %v8808_v34 = vld [vmem:[%s10622_s17 + $0x184] ss:$24 sps:$4 sm:$0xff]   ;;  %v8807_v35 = vld [vmem:[%s10622_s17 + $0x4b0] ss:$24 sps:$4 sm:$0xff]  }
 0x116   : > { %2915 = vmatpush1.bf16.msra.mxu0 %v8750_v55  ;;  %v8810_v36 = vld [vmem:[%s10622_s17 + $0x180] ss:$24 sps:$4 sm:$0xff]   ;;  %v8811_v37 = vld [vmem:[%s10622_s17 + $0x484] ss:$24 sps:$4 sm:$0xff]   ;;  %14627 = vst [vmem:[#allocation17_spill] sm:$0xff] %v10909_v40  ;;  %v10913_v42 = vld [vmem:[%s10610_s6 + $0x68] sm:$0xff] }
 0x117   : > { %2916 = vmatprep.subr.bf16.mxu0 %v8754_v56  ;;  %3028 = vmatpush1.bf16.msra.mxu1 %v8753_v57  ;;  %v10905_v38 = vld [vmem:[%s10610_s6] sm:$0xff]  ;;  %v8816_v41 = vld [vmem:[%s10622_s17 + $0x754] ss:$24 sps:$4 sm:$0xff]   ;;  %14628 = vst [vmem:[#allocation18_spill] sm:$0xff] %v10913_v42  ;;  %v10916_v43 = vld [vmem:[%s10610_s6 + $0x98] sm:$0xff] }
 0x118   : > { %3029 = vmatprep.subr.bf16.mxu1 %v8757_v58  ;;  %14626 = vst [vmem:[#allocation16_spill] sm:$0xff] %v10905_v38  ;;  %v8813_v39 = vld [vmem:[%s10622_s17 + $0x480] ss:$24 sps:$4 sm:$0xff]   ;;  %14629 = vst [vmem:[#allocation19_spill] sm:$0xff] %v10916_v43  ;;  %v10919_v44 = vld [vmem:[%s10610_s6 + $0x10] sm:$0xff]  ;;  %v10927_v47 = vpack.c.bf16 %v10909_v40, %v10905_v38  ;;  %v10938_v51 = vpack.c.bf16 %v10916_v43, %v10913_v42 }
 0x119   : > { %14630 = vst [vmem:[#allocation20_spill] sm:$0xff] %v10919_v44  ;;  %v10922_v45 = vld [vmem:[%s10610_s6 + $0x40] sm:$0xff]  ;;  %v8819_v46 = vld [vmem:[%s10622_s17 + $0x15c] ss:$24 sps:$4 sm:$0xff]   ;;  %v10933_v49 = vld [vmem:[%s10610_s6 + $0xa8] sm:$0xff] }
 0x11a   : > { %2917 = vmatpush1.bf16.msra.mxu0 %v8756_v59  ;;  %14631 = vst [vmem:[#allocation21_spill] sm:$0xff] %v10922_v45  ;;  %v10930_v48 = vld [vmem:[%s10610_s6 + $0x78] sm:$0xff]  ;;  %14633 = vst [vmem:[#allocation23_spill] sm:$0xff] %v10933_v49  ;;  %v8814_v50 = vld [vmem:[%s10622_s17 + $0x750] ss:$24 sps:$4 sm:$0xff]   ;;  %v10942_v52 = vpack.c.bf16 %v10922_v45, %v10919_v44 }
 0x11b   : > { %2918 = vmatprep.subr.bf16.mxu0 %v8760_v60  ;;  %3030 = vmatpush1.bf16.msra.mxu1 %v8759_v61  ;;  %14632 = vst [vmem:[#allocation22_spill] sm:$0xff] %v10930_v48  ;;  %v8822_v53 = vld [vmem:[%s10622_s17 + $0x724] ss:$24 sps:$4 sm:$0xff]   ;;  %v8817_v54 = vld [vmem:[%s10622_s17 + $0x158] ss:$24 sps:$4 sm:$0xff]   ;;  %v10948_v55 = vpack.c.bf16 %v10933_v49, %v10930_v48 }
 0x11c   : > { %3031 = vmatprep.subr.bf16.mxu1 %v8763_v62  ;;  %v8820_v56 = vld [vmem:[%s10622_s17 + $0x720] ss:$24 sps:$4 sm:$0xff]   ;;  %v8825_v57 = vld [vmem:[%s10622_s17 + $0x12c] ss:$24 sps:$4 sm:$0xff]   ;;  %v10959_v60 = vld [vmem:[%s10610_s6 + $0x90] sm:$0xff] }
 0x11d   : > { %v10954_v58 = vld [vmem:[%s10610_s6 + $0x60] sm:$0xff]  ;;  %14635 = vst [vmem:[#allocation25_spill] sm:$0xff] %v10959_v60  ;;  %v8828_v61 = vld [vmem:[%s10622_s17 + $0x6f4] ss:$24 sps:$4 sm:$0xff]   ;;  %v8934_v48 = vld [vmem:[%s10622_s17 + $0x398] ss:$24 sps:$4 sm:$0xff]  }
 0x11e   : > { %2919 = vmatpush1.bf16.msra.mxu0 %v8762_v63  ;;  %14634 = vst [vmem:[#allocation24_spill] sm:$0xff] %v10954_v58  ;;  %v8823_v59 = vld [vmem:[%s10622_s17 + $0x128] ss:$24 sps:$4 sm:$0xff]   ;;  %v10967_v63 = vld [vmem:[%s10610_s6 + $0xf8] sm:$0xff]  ;;  %v8969_v45 = vld [vmem:[%s10622_s17 + $0x8ac] ss:$24 sps:$4 sm:$0xff]  }
 0x11f   : > { %2920 = vmatprep.subr.bf16.mxu0 %v8766_v0  ;;  %3032 = vmatpush1.bf16.msra.mxu1 %v8765_v1  ;;  %v10963_v62 = vld [vmem:[%s10610_s6 + $0xc8] sm:$0xff]  ;;  %14637 = vst [vmem:[#allocation27_spill] sm:$0xff] %v10967_v63  ;;  %v10971_v0 = vld [vmem:[%s10610_s6 + $0x70] sm:$0xff]  ;;  %v10974_v1 = vld [vmem:[%s10610_s6 + $0xa0] sm:$0xff] }
 0x120   : > { %3033 = vmatprep.subr.bf16.mxu1 %v8769_v2  ;;  %14636 = vst [vmem:[#allocation26_spill] sm:$0xff] %v10963_v62  ;;  %14638 = vst [vmem:[#allocation28_spill] sm:$0xff] %v10971_v0  ;;  %v8831_v2 = vld [vmem:[%s10622_s17 + $0xfc] ss:$24 sps:$4 sm:$0xff]   ;;  %v11340_v43 = vld [vmem:[%s10610_s6 + $0x80] sm:$0xff] }
 0x121   : > { %14639 = vst [vmem:[#allocation29_spill] sm:$0xff] %v10974_v1  ;;  %14692 = vst [vmem:[#allocation82_spill] sm:$0xff] %v11340_v43  ;;  %v11404_v42 = vld [vmem:[%s10610_s6 + $0x140] sm:$0xff] }
 0x122   : > { %2921 = vmatpush2.bf16.msra.mxu0 %v8768_v3  ;;  %v10979_v3 = vpack.c.bf16 %v10959_v60, %v10954_v58  ;;  %v8927_v60 = vld [vmem:[%s10622_s17 + $0x6fc] ss:$24 sps:$4 sm:$0xff]   ;;  %14700 = vst [vmem:[#allocation90_spill] sm:$0xff] %v11404_v42  ;;  %v8946_v58 = vld [vmem:[%s10622_s17 + $0x338] ss:$24 sps:$4 sm:$0xff]  }
 0x123   : > { %2922 = vmatprep.subr.bf16.mxu0 %v8772_v4  ;;  %3034 = vmatpush2.bf16.msra.mxu1 %v8771_v5  ;;  %v10982_v4 = vld [vmem:[%s10610_s6 + $0xd8] sm:$0xff]  ;;  %v10985_v5 = vld [vmem:[%s10610_s6 + $0x108] sm:$0xff] }
 0x124   : > { %3035 = vmatprep.subr.bf16.mxu1 %v8775_v6  ;;  %14640 = vst [vmem:[#allocation30_spill] sm:$0xff] %v10982_v4  ;;  %14641 = vst [vmem:[#allocation31_spill] sm:$0xff] %v10985_v5  ;;  %v8826_v6 = vld [vmem:[%s10622_s17 + $0x6f0] ss:$24 sps:$4 sm:$0xff]   ;;  %v8981_v40 = vld [vmem:[%s10622_s17 + $0x84c] ss:$24 sps:$4 sm:$0xff]  }
 0x125   : > { %v9137_v44 = vld [vmem:[%s10620_s11 + $0x124] ss:$24 sps:$4 sm:$0xff]  }
 0x126   : > { %2923 = vmatpush2.bf16.msra.mxu0 %v8774_v7  ;;  %v10990_v7 = vpack.c.bf16 %v10967_v63, %v10963_v62  ;;  %v11311_v62 = vld [vmem:[%s10610_s6 + $0x50] sm:$0xff]  ;;  %v9110_v15 = vld [vmem:[%s10622_s17 + $0x704] ss:$24 sps:$4 sm:$0xff]  }
 0x127   : > { %2924 = vmatprep.subr.bf16.mxu0 %v8778_v8  ;;  %3036 = vmatpush2.bf16.msra.mxu1 %v8777_v9  ;;  %v10994_v8 = vpack.c.bf16 %v10974_v1, %v10971_v0  ;;  %v8834_v9 = vld [vmem:[%s10622_s17 + $0x6c4] ss:$24 sps:$4 sm:$0xff]   ;;  %14689 = vst [vmem:[#allocation79_spill] sm:$0xff] %v11311_v62 }
 0x128   : > { %3037 = vmatprep.subr.bf16.mxu1 %v8781_v10  ;;  %v8829_v10 = vld [vmem:[%s10622_s17 + $0xf8] ss:$24 sps:$4 sm:$0xff]   ;;  %v8921_v1 = vld [vmem:[%s10622_s17 + $0x72c] ss:$24 sps:$4 sm:$0xff]  }
 0x12a   : > { %2925 = vmatpush2.bf16.msra.mxu0 %v8780_v11  ;;  %v11000_v11 = vpack.c.bf16 %v10985_v5, %v10982_v4  ;;  %v11242_v5 = vld [vmem:[%s10610_s6 + $0x2b8] sm:$0xff] }
 0x12b   : > { %2926 = vmatprep.subr.bf16.mxu0 %v8784_v12  ;;  %3038 = vmatpush2.bf16.msra.mxu1 %v8783_v13  ;;  %v8832_v12 = vld [vmem:[%s10622_s17 + $0x6c0] ss:$24 sps:$4 sm:$0xff]   ;;  %v8837_v13 = vld [vmem:[%s10622_s17 + $0xcc] ss:$24 sps:$4 sm:$0xff]   ;;  %14680 = vst [vmem:[#allocation70_spill] sm:$0xff] %v11242_v5 }
 0x12c   : > { %3039 = vmatprep.subr.bf16.mxu1 %v8787_v14  ;;  %v11006_v14 = vld [vmem:[%s10610_s6 + $0xc0] sm:$0xff] }
 0x12d   : > { %14642 = vst [vmem:[#allocation32_spill] sm:$0xff] %v11006_v14 }
 0x12e   : > { %2927 = vmatpush2.bf16.msra.mxu0 %v8786_v17  ;;  %v8835_v17 = vld [vmem:[%s10622_s17 + $0xc8] ss:$24 sps:$4 sm:$0xff]  }
 0x12f   : > { %2928 = vmatprep.subr.bf16.mxu0 %v8790_v19  ;;  %3040 = vmatpush2.bf16.msra.mxu1 %v8789_v20  ;;  %v11011_v19 = vld [vmem:[%s10610_s6 + $0xf0] sm:$0xff] }
 0x130   : > { %3041 = vmatprep.subr.bf16.mxu1 %v8793_v23  ;;  %14643 = vst [vmem:[#allocation33_spill] sm:$0xff] %v11011_v19  ;;  %v8840_v20 = vld [vmem:[%s10622_s17 + $0x694] ss:$24 sps:$4 sm:$0xff]  }
 0x131   : > { %v11015_v23 = vld [vmem:[%s10610_s6 + $0x128] sm:$0xff] }
 0x132   : > { %2929 = vmatpush2.bf16.msra.mxu0 %v8792_v25  ;;  %14644 = vst [vmem:[#allocation34_spill] sm:$0xff] %v11015_v23  ;;  %v11019_v25 = vld [vmem:[%s10610_s6 + $0x158] sm:$0xff] }
 0x133   : > { %2930 = vmatprep.subr.bf16.mxu0 %v8796_v26  ;;  %3042 = vmatpush2.bf16.msra.mxu1 %v8795_v27  ;;  %14645 = vst [vmem:[#allocation35_spill] sm:$0xff] %v11019_v25  ;;  %v11023_v26 = vld [vmem:[%s10610_s6 + $0xd0] sm:$0xff]  ;;  %v11026_v27 = vld [vmem:[%s10610_s6 + $0x100] sm:$0xff] }
 0x134   : > { %3043 = vmatprep.subr.bf16.mxu1 %v8799_v28  ;;  %14646 = vst [vmem:[#allocation36_spill] sm:$0xff] %v11023_v26  ;;  %14647 = vst [vmem:[#allocation37_spill] sm:$0xff] %v11026_v27  ;;  %v8843_v28 = vld [vmem:[%s10622_s17 + $0x9c] ss:$24 sps:$4 sm:$0xff]  }
 0x136   : > { %2931 = vmatpush2.bf16.msra.mxu0 %v8798_v29  ;;  %v11031_v29 = vpack.c.bf16 %v11011_v19, %v11006_v14  ;;  %v8897_v19 = vld [vmem:[%s10622_s17 + $0x1ec] ss:$24 sps:$4 sm:$0xff]   ;;  %v8910_v14 = vld [vmem:[%s10622_s17 + $0x458] ss:$24 sps:$4 sm:$0xff]  }
 0x137   : > { %2932 = vmatprep.subr.bf16.mxu0 %v8802_v30  ;;  %3044 = vmatpush2.bf16.msra.mxu1 %v8801_v31  ;;  %v11034_v30 = vld [vmem:[%s10610_s6 + $0x138] sm:$0xff]  ;;  %v11037_v31 = vld [vmem:[%s10610_s6 + $0x168] sm:$0xff] }
 0x138   : > { %3045 = vmatprep.subr.bf16.mxu1 %v8805_v32  ;;  %14648 = vst [vmem:[#allocation38_spill] sm:$0xff] %v11034_v30  ;;  %14649 = vst [vmem:[#allocation39_spill] sm:$0xff] %v11037_v31  ;;  %v8838_v32 = vld [vmem:[%s10622_s17 + $0x690] ss:$24 sps:$4 sm:$0xff]  }
 0x13a   : > { %2933 = vmatpush2.bf16.msra.mxu0 %v8804_v33  ;;  %v11042_v33 = vpack.c.bf16 %v11019_v25, %v11015_v23  ;;  %v8879_v25 = vld [vmem:[%s10622_s17 + $0x27c] ss:$24 sps:$4 sm:$0xff]  }
 0x13b   : > { %2934 = vmatprep.subr.bf16.mxu0 %v8808_v34  ;;  %3046 = vmatpush2.bf16.msra.mxu1 %v8807_v35  ;;  %v11046_v34 = vpack.c.bf16 %v11026_v27, %v11023_v26  ;;  %v8846_v35 = vld [vmem:[%s10622_s17 + $0x664] ss:$24 sps:$4 sm:$0xff]   ;;  %v11245_v27 = vld [vmem:[%s10610_s6 + $0x2e8] sm:$0xff] }
 0x13c   : > { %3047 = vmatprep.subr.bf16.mxu1 %v8811_v37  ;;  %v11052_v37 = vpack.c.bf16 %v11037_v31, %v11034_v30  ;;  %v11141_v31 = vld [vmem:[%s10610_s6 + $0x228] sm:$0xff]  ;;  %14681 = vst [vmem:[#allocation71_spill] sm:$0xff] %v11245_v27  ;;  %v11265_v4 = vpack.c.bf16 %v11245_v27, %v11242_v5  ;;  %v8903_v5 = vld [vmem:[%s10622_s17 + $0x1bc] ss:$24 sps:$4 sm:$0xff]  }
 0x13d   : > { %14665 = vst [vmem:[#allocation55_spill] sm:$0xff] %v11141_v31  ;;  %v11193_v30 = vld [vmem:[%s10610_s6 + $0x288] sm:$0xff]  ;;  %v8906_v26 = vld [vmem:[%s10622_s17 + $0x784] ss:$24 sps:$4 sm:$0xff]  }
 0x13e   : > { %2935 = vmatpush2.bf16.msra.mxu0 %v8810_v36  ;;  %v8841_v36 = vld [vmem:[%s10622_s17 + $0x98] ss:$24 sps:$4 sm:$0xff]   ;;  %14673 = vst [vmem:[#allocation63_spill] sm:$0xff] %v11193_v30 }
 0x13f   : > { %3130 = vmatprep.subr.bf16.mxu0 %v8816_v41  ;;  %3048 = vmatpush2.bf16.msra.mxu1 %v8813_v39  ;;  %v8844_v39 = vld [vmem:[%s10622_s17 + $0x660] ss:$24 sps:$4 sm:$0xff]   ;;  %v8849_v41 = vld [vmem:[%s10622_s17 + $0x6c] ss:$24 sps:$4 sm:$0xff]  }
 0x140   : > { %3243 = vmatprep.subr.bf16.mxu1 %v8819_v46  ;;  %v11058_v46 = vld [vmem:[%s10610_s6 + $0x120] sm:$0xff] }
 0x141   : > { %2937 = vmatmul.mubr.bf16.vlgmr.msra.gmra.mxu0 %v10927_v47  ;;  %14650 = vst [vmem:[#allocation40_spill] sm:$0xff] %v11058_v46 }
 0x142   : > { %3131 = vmatpush1.bf16.msra.mxu0 %v8814_v50  ;;  %2946 = vmatprep.mubr.bf16.mxu0 %v10938_v51  ;;  %v8847_v50 = vld [vmem:[%s10622_s17 + $0x68] ss:$24 sps:$4 sm:$0xff]  }
 0x143   : > { %3050 = vmatmul.mubr.bf16.vlgmr.msra.gmra.mxu1 %v10942_v52  ;;  %3132 = vmatprep.subr.bf16.mxu0 %v8822_v53  ;;  %v11063_v53 = vld [vmem:[%s10610_s6 + $0x150] sm:$0xff] }
 0x144   : > { %3244 = vmatpush1.bf16.msra.mxu1 %v8817_v54  ;;  %3059 = vmatprep.mubr.bf16.mxu1 %v10948_v55  ;;  %14651 = vst [vmem:[#allocation41_spill] sm:$0xff] %v11063_v53  ;;  %v8852_v54 = vld [vmem:[%s10622_s17 + $0x634] ss:$24 sps:$4 sm:$0xff]  }
 0x145   : > { %3245 = vmatprep.subr.bf16.mxu1 %v8825_v57  ;;  %v11071_v57 = vld [vmem:[%s10610_s6 + $0x1b8] sm:$0xff] }
 0x146   : > { %3133 = vmatpush1.bf16.msra.mxu0 %v8820_v56  ;;  %v11067_v56 = vld [vmem:[%s10610_s6 + $0x188] sm:$0xff]  ;;  %14653 = vst [vmem:[#allocation43_spill] sm:$0xff] %v11071_v57 }
 0x147   : > { %3134 = vmatprep.subr.bf16.mxu0 %v8828_v61  ;;  %14652 = vst [vmem:[#allocation42_spill] sm:$0xff] %v11067_v56  ;;  %v11078_v61 = vld [vmem:[%s10610_s6 + $0x160] sm:$0xff] }
 0x148   : > { %3246 = vmatpush1.bf16.msra.mxu1 %v8823_v59  ;;  %v11075_v59 = vld [vmem:[%s10610_s6 + $0x130] sm:$0xff]  ;;  %14655 = vst [vmem:[#allocation45_spill] sm:$0xff] %v11078_v61 }
 0x149   : > { %2947 = vmatmul.mubr.bf16.gmra.mxu0 %v10979_v3  ;;  %3247 = vmatprep.subr.bf16.mxu1 %v8831_v2  ;;  %14654 = vst [vmem:[#allocation44_spill] sm:$0xff] %v11075_v59  ;;  %v8855_v2 = vld [vmem:[%s10622_s17 + $0x3c] ss:$24 sps:$4 sm:$0xff]  }
 0x14a   : > { %3135 = vmatpush1.bf16.msra.mxu0 %v8826_v6  ;;  %2956 = vmatprep.mubr.bf16.mxu0 %v10990_v7  ;;  %v11083_v6 = vpack.c.bf16 %v11063_v53, %v11058_v46 }
 0x14b   : > { %3060 = vmatmul.mubr.bf16.gmra.mxu1 %v10994_v8  ;;  %3136 = vmatprep.subr.bf16.mxu0 %v8834_v9  ;;  %v11086_v9 = vld [vmem:[%s10610_s6 + $0x198] sm:$0xff] }
 0x14c   : > { %3248 = vmatpush1.bf16.msra.mxu1 %v8829_v10  ;;  %3069 = vmatprep.mubr.bf16.mxu1 %v11000_v11  ;;  %14656 = vst [vmem:[#allocation46_spill] sm:$0xff] %v11086_v9  ;;  %v11089_v10 = vld [vmem:[%s10610_s6 + $0x1c8] sm:$0xff] }
 0x14d   : > { %3249 = vmatprep.subr.bf16.mxu1 %v8837_v13  ;;  %14657 = vst [vmem:[#allocation47_spill] sm:$0xff] %v11089_v10  ;;  %v11094_v13 = vpack.c.bf16 %v11071_v57, %v11067_v56  ;;  %v11130_v57 = vld [vmem:[%s10610_s6 + $0x1c0] sm:$0xff] }
 0x14e   : > { %3137 = vmatpush1.bf16.msra.mxu0 %v8832_v12  ;;  %v8850_v12 = vld [vmem:[%s10622_s17 + $0x630] ss:$24 sps:$4 sm:$0xff]   ;;  %14663 = vst [vmem:[#allocation53_spill] sm:$0xff] %v11130_v57 }
 0x14f   : > { %3138 = vmatprep.subr.bf16.mxu0 %v8840_v20  ;;  %v8858_v20 = vld [vmem:[%s10622_s17 + $0x604] ss:$24 sps:$4 sm:$0xff]  }
 0x150   : > { %3250 = vmatpush1.bf16.msra.mxu1 %v8835_v17  ;;  %v11098_v17 = vpack.c.bf16 %v11078_v61, %v11075_v59  ;;  %v8877_v59 = vld [vmem:[%s10622_s17 + $0x278] ss:$24 sps:$4 sm:$0xff]  }
 0x151   : > { %2957 = vmatmul.mubr.bf16.gmra.mxu0 %v11031_v29  ;;  %3251 = vmatprep.subr.bf16.mxu1 %v8843_v28  ;;  %v8853_v28 = vld [vmem:[%s10622_s17 + $0x38] ss:$24 sps:$4 sm:$0xff]  }
 0x152   : > { %3139 = vmatpush1.bf16.msra.mxu0 %v8838_v32  ;;  %2966 = vmatprep.mubr.bf16.mxu0 %v11042_v33  ;;  %v11104_v32 = vpack.c.bf16 %v11089_v10, %v11086_v9  ;;  %v11119_v10 = vld [vmem:[%s10610_s6 + $0x1e8] sm:$0xff]  ;;  %v8867_v9 = vld [vmem:[%s10622_s17 + $0x2dc] ss:$24 sps:$4 sm:$0xff]  }
 0x153   : > { %3070 = vmatmul.mubr.bf16.gmra.mxu1 %v11046_v34  ;;  %3140 = vmatprep.subr.bf16.mxu0 %v8846_v35  ;;  %v8856_v35 = vld [vmem:[%s10622_s17 + $0x600] ss:$24 sps:$4 sm:$0xff]   ;;  %14660 = vst [vmem:[#allocation50_spill] sm:$0xff] %v11119_v10 }
 0x154   : > { %3252 = vmatpush1.bf16.msra.mxu1 %v8841_v36  ;;  %3079 = vmatprep.mubr.bf16.mxu1 %v11052_v37  ;;  %v8861_v36 = vld [vmem:[%s10622_s17 + $0xc] ss:$24 sps:$4 sm:$0xff]  }
 0x155   : > { %3253 = vmatprep.subr.bf16.mxu1 %v8849_v41  ;;  %v8859_v41 = vld [vmem:[%s10622_s17 + $0x8] ss:$24 sps:$4 sm:$0xff]  }
 0x156   : > { %3141 = vmatpush1.bf16.msra.mxu0 %v8844_v39  ;;  %v11110_v39 = vld [vmem:[%s10610_s6 + $0x180] sm:$0xff] }
 0x157   : > { %3142 = vmatprep.subr.bf16.mxu0 %v8852_v54  ;;  %14658 = vst [vmem:[#allocation48_spill] sm:$0xff] %v11110_v39  ;;  %v8864_v54 = vld [vmem:[%s10622_s17 + $0x8d4] ss:$24 sps:$4 sm:$0xff]  }
 0x158   : > { %3254 = vmatpush1.bf16.msra.mxu1 %v8847_v50  ;;  %v11115_v50 = vld [vmem:[%s10610_s6 + $0x1b0] sm:$0xff] }
 0x159   : > { %2967 = vmatmul.mubr.bf16.gmra.mxu0 %v11083_v6  ;;  %3255 = vmatprep.subr.bf16.mxu1 %v8855_v2  ;;  %14659 = vst [vmem:[#allocation49_spill] sm:$0xff] %v11115_v50  ;;  %v11123_v2 = vld [vmem:[%s10610_s6 + $0x218] sm:$0xff]  ;;  %v11135_v56 = vpack.c.bf16 %v11115_v50, %v11110_v39 }
 0x15a   : > { %3143 = vmatpush1.bf16.msra.mxu0 %v8850_v12  ;;  %2976 = vmatprep.mubr.bf16.mxu0 %v11094_v13  ;;  %14661 = vst [vmem:[#allocation51_spill] sm:$0xff] %v11123_v2  ;;  %v11127_v12 = vld [vmem:[%s10610_s6 + $0x190] sm:$0xff]  ;;  %v11146_v61 = vpack.c.bf16 %v11123_v2, %v11119_v10  ;;  %v8870_v50 = vld [vmem:[%s10622_s17 + $0x8a4] ss:$24 sps:$4 sm:$0xff]   ;;  %v8868_v2 = vld [vmem:[%s10622_s17 + $0x8a0] ss:$24 sps:$4 sm:$0xff]  }
 0x15b   : > { %3080 = vmatmul.mubr.bf16.gmra.mxu1 %v11098_v17  ;;  %3144 = vmatprep.subr.bf16.mxu0 %v8858_v20  ;;  %14662 = vst [vmem:[#allocation52_spill] sm:$0xff] %v11127_v12  ;;  %v11138_v20 = vld [vmem:[%s10610_s6 + $0x1f8] sm:$0xff]  ;;  %v11162_v10 = vld [vmem:[%s10610_s6 + $0x1e0] sm:$0xff] }
 0x15c   : > { %3256 = vmatpush1.bf16.msra.mxu1 %v8853_v28  ;;  %3089 = vmatprep.mubr.bf16.mxu1 %v11104_v32  ;;  %14664 = vst [vmem:[#allocation54_spill] sm:$0xff] %v11138_v20  ;;  %v8862_v28 = vld [vmem:[%s10622_s17 + $0x8d0] ss:$24 sps:$4 sm:$0xff]   ;;  %14666 = vst [vmem:[#allocation56_spill] sm:$0xff] %v11162_v10 }
 0x15d   : > { %3257 = vmatprep.subr.bf16.mxu1 %v8861_v36  ;;  %v11150_v36 = vpack.c.bf16 %v11130_v57, %v11127_v12  ;;  %v8865_v39 = vld [vmem:[%s10622_s17 + $0x2d8] ss:$24 sps:$4 sm:$0xff]   ;;  %v8871_v57 = vld [vmem:[%s10622_s17 + $0x2a8] ss:$24 sps:$4 sm:$0xff]  }
 0x15e   : > { %3145 = vmatpush1.bf16.msra.mxu0 %v8856_v35  ;;  %v11156_v35 = vpack.c.bf16 %v11141_v31, %v11138_v20  ;;  %v8876_v31 = vld [vmem:[%s10622_s17 + $0x874] ss:$24 sps:$4 sm:$0xff]   ;;  %v11182_v12 = vld [vmem:[%s10610_s6 + $0x220] sm:$0xff] }
 0x15f   : > { %3146 = vmatprep.subr.bf16.mxu0 %v8864_v54  ;;  %v8873_v54 = vld [vmem:[%s10622_s17 + $0x2ac] ss:$24 sps:$4 sm:$0xff]   ;;  %14671 = vst [vmem:[#allocation61_spill] sm:$0xff] %v11182_v12 }
 0x160   : > { %3258 = vmatpush1.bf16.msra.mxu1 %v8859_v41  ;;  %v11167_v41 = vld [vmem:[%s10610_s6 + $0x210] sm:$0xff]  ;;  %v11171_v20 = vld [vmem:[%s10610_s6 + $0x248] sm:$0xff] }
 0x161   : > { %2977 = vmatmul.mubr.bf16.gmra.mxu0 %v11135_v56  ;;  %3259 = vmatprep.subr.bf16.mxu1 %v8867_v9  ;;  %14667 = vst [vmem:[#allocation57_spill] sm:$0xff] %v11167_v41  ;;  %14668 = vst [vmem:[#allocation58_spill] sm:$0xff] %v11171_v20  ;;  %v11175_v9 = vld [vmem:[%s10610_s6 + $0x278] sm:$0xff]  ;;  %v11187_v53 = vpack.c.bf16 %v11167_v41, %v11162_v10 }
 0x162   : > { %3147 = vmatpush2.bf16.msra.mxu0 %v8862_v28  ;;  %2986 = vmatprep.mubr.bf16.mxu0 %v11146_v61  ;;  %14669 = vst [vmem:[#allocation59_spill] sm:$0xff] %v11175_v9  ;;  %v11179_v28 = vld [vmem:[%s10610_s6 + $0x1f0] sm:$0xff]  ;;  %v11199_v23 = vpack.c.bf16 %v11175_v9, %v11171_v20  ;;  %v8882_v41 = vld [vmem:[%s10622_s17 + $0x844] ss:$24 sps:$4 sm:$0xff]   ;;  %v8880_v10 = vld [vmem:[%s10622_s17 + $0x840] ss:$24 sps:$4 sm:$0xff]  }
 0x163   : > { %3090 = vmatmul.mubr.bf16.gmra.mxu1 %v11150_v36  ;;  %3148 = vmatprep.subr.bf16.mxu0 %v8870_v50  ;;  %14670 = vst [vmem:[#allocation60_spill] sm:$0xff] %v11179_v28  ;;  %v11190_v50 = vld [vmem:[%s10610_s6 + $0x258] sm:$0xff]  ;;  %v11217_v9 = vld [vmem:[%s10610_s6 + $0x270] sm:$0xff] }
 0x164   : > { %3260 = vmatpush2.bf16.msra.mxu1 %v8865_v39  ;;  %3099 = vmatprep.mubr.bf16.mxu1 %v11156_v35  ;;  %14672 = vst [vmem:[#allocation62_spill] sm:$0xff] %v11190_v50  ;;  %v8874_v39 = vld [vmem:[%s10622_s17 + $0x870] ss:$24 sps:$4 sm:$0xff]   ;;  %v11210_v46 = vpack.c.bf16 %v11193_v30, %v11190_v50  ;;  %14675 = vst [vmem:[#allocation65_spill] sm:$0xff] %v11217_v9  ;;  %v8888_v20 = vld [vmem:[%s10622_s17 + $0x814] ss:$24 sps:$4 sm:$0xff]  }
 0x165   : > { %3261 = vmatprep.subr.bf16.mxu1 %v8873_v54  ;;  %v11203_v54 = vpack.c.bf16 %v11182_v12, %v11179_v28  ;;  %v11223_v12 = vld [vmem:[%s10610_s6 + $0x250] sm:$0xff]  ;;  %v11226_v30 = vld [vmem:[%s10610_s6 + $0x280] sm:$0xff]  ;;  %v11229_v50 = vld [vmem:[%s10610_s6 + $0x2a8] sm:$0xff] }
 0x166   : > { %3149 = vmatpush2.bf16.msra.mxu0 %v8868_v2  ;;  %v8885_v2 = vld [vmem:[%s10622_s17 + $0x24c] ss:$24 sps:$4 sm:$0xff]   ;;  %14676 = vst [vmem:[#allocation66_spill] sm:$0xff] %v11223_v12  ;;  %14677 = vst [vmem:[#allocation67_spill] sm:$0xff] %v11226_v30 }
 0x167   : > { %3150 = vmatprep.subr.bf16.mxu0 %v8876_v31  ;;  %v11214_v31 = vld [vmem:[%s10610_s6 + $0x240] sm:$0xff]  ;;  %14678 = vst [vmem:[#allocation68_spill] sm:$0xff] %v11229_v50 }
 0x168   : > { %3262 = vmatpush2.bf16.msra.mxu1 %v8871_v57  ;;  %14674 = vst [vmem:[#allocation64_spill] sm:$0xff] %v11214_v31  ;;  %v8883_v57 = vld [vmem:[%s10622_s17 + $0x248] ss:$24 sps:$4 sm:$0xff]   ;;  %v11239_v28 = vpack.c.bf16 %v11217_v9, %v11214_v31  ;;  %v8894_v9 = vld [vmem:[%s10622_s17 + $0x7e4] ss:$24 sps:$4 sm:$0xff]  }
 0x169   : > { %2987 = vmatmul.mubr.bf16.gmra.mxu0 %v11187_v53  ;;  %3263 = vmatprep.subr.bf16.mxu1 %v8879_v25  ;;  %v11233_v25 = vld [vmem:[%s10610_s6 + $0x2d8] sm:$0xff] }
 0x16a   : > { %3151 = vmatpush2.bf16.msra.mxu0 %v8874_v39  ;;  %2996 = vmatprep.mubr.bf16.mxu0 %v11199_v23  ;;  %14679 = vst [vmem:[#allocation69_spill] sm:$0xff] %v11233_v25  ;;  %v8891_v39 = vld [vmem:[%s10622_s17 + $0x21c] ss:$24 sps:$4 sm:$0xff]   ;;  %v11251_v63 = vpack.c.bf16 %v11233_v25, %v11229_v50  ;;  %v8892_v31 = vld [vmem:[%s10622_s17 + $0x7e0] ss:$24 sps:$4 sm:$0xff]  }
 0x16b   : > { %3100 = vmatmul.mubr.bf16.gmra.mxu1 %v11203_v54  ;;  %3152 = vmatprep.subr.bf16.mxu0 %v8882_v41  ;;  %v8886_v41 = vld [vmem:[%s10622_s17 + $0x810] ss:$24 sps:$4 sm:$0xff]   ;;  %v8900_v25 = vld [vmem:[%s10622_s17 + $0x7b4] ss:$24 sps:$4 sm:$0xff]  }
 0x16c   : > { %3264 = vmatpush2.bf16.msra.mxu1 %v8877_v59  ;;  %3109 = vmatprep.mubr.bf16.mxu1 %v11210_v46  ;;  %v8889_v59 = vld [vmem:[%s10622_s17 + $0x218] ss:$24 sps:$4 sm:$0xff]  }
 0x16d   : > { %3265 = vmatprep.subr.bf16.mxu1 %v8885_v2  ;;  %v11255_v2 = vpack.c.bf16 %v11226_v30, %v11223_v12  ;;  %v11275_v50 = vld [vmem:[%s10610_s6 + $0x2b0] sm:$0xff]  ;;  %v11278_v30 = vld [vmem:[%s10610_s6 + $0x28] sm:$0xff] }
 0x16e   : > { %3153 = vmatpush2.bf16.msra.mxu0 %v8880_v10  ;;  %v11261_v10 = vld [vmem:[%s10610_s6 + $0x2a0] sm:$0xff]  ;;  %14684 = vst [vmem:[#allocation74_spill] sm:$0xff] %v11275_v50  ;;  %14685 = vst [vmem:[#allocation75_spill] sm:$0xff] %v11278_v30 }
 0x16f   : > { %3154 = vmatprep.subr.bf16.mxu0 %v8888_v20  ;;  %14682 = vst [vmem:[#allocation72_spill] sm:$0xff] %v11261_v10  ;;  %v11269_v20 = vld [vmem:[%s10610_s6 + $0x2d0] sm:$0xff] }
 0x170   : > { %3266 = vmatpush2.bf16.msra.mxu1 %v8883_v57  ;;  %14683 = vst [vmem:[#allocation73_spill] sm:$0xff] %v11269_v20  ;;  %v8895_v57 = vld [vmem:[%s10622_s17 + $0x1e8] ss:$24 sps:$4 sm:$0xff]   ;;  %v11290_v27 = vpack.c.bf16 %v11269_v20, %v11261_v10  ;;  %v8909_v10 = vld [vmem:[%s10622_s17 + $0x18c] ss:$24 sps:$4 sm:$0xff]  }
 0x171   : > { %2997 = vmatmul.mubr.bf16.gmra.mxu0 %v11239_v28  ;;  %3267 = vmatprep.subr.bf16.mxu1 %v8891_v39  ;;  %v11282_v39 = vld [vmem:[%s10610_s6 + $0x58] sm:$0xff] }
 0x172   : > { %3155 = vmatpush2.bf16.msra.mxu0 %v8886_v41  ;;  %3006 = vmatprep.mubr.bf16.mxu0 %v11251_v63  ;;  %14686 = vst [vmem:[#allocation76_spill] sm:$0xff] %v11282_v39  ;;  %v11286_v41 = vld [vmem:[%s10610_s6 + $0x2e0] sm:$0xff]  ;;  %v11296_v12 = vpack.c.bf16 %v11282_v39, %v11278_v30  ;;  %v8949_v39 = vld [vmem:[%s10622_s17 + $0x638] ss:$24 sps:$4 sm:$0xff]  }
 0x173   : > { %3110 = vmatmul.mubr.bf16.gmra.mxu1 %v11255_v2  ;;  %3156 = vmatprep.subr.bf16.mxu0 %v8894_v9  ;;  %14687 = vst [vmem:[#allocation77_spill] sm:$0xff] %v11286_v41  ;;  %v8898_v9 = vld [vmem:[%s10622_s17 + $0x7b0] ss:$24 sps:$4 sm:$0xff]   ;;  %v8904_v20 = vld [vmem:[%s10622_s17 + $0x780] ss:$24 sps:$4 sm:$0xff]  }
 0x174   : > { %3268 = vmatpush2.bf16.msra.mxu1 %v8889_v59  ;;  %3119 = vmatprep.mubr.bf16.mxu1 %v11265_v4  ;;  %v11300_v59 = vpack.c.bf16 %v11286_v41, %v11275_v50  ;;  %v11316_v41 = vld [vmem:[%s10610_s6 + $0x88] sm:$0xff]  ;;  %v8915_v50 = vld [vmem:[%s10622_s17 + $0x75c] ss:$24 sps:$4 sm:$0xff]   ;;  %v8985_v30 = vld [vmem:[%s10622_s17 + $0x818] ss:$24 sps:$4 sm:$0xff]  }
 0x175   : > { %3269 = vmatprep.subr.bf16.mxu1 %v8897_v19  ;;  %v8901_v19 = vld [vmem:[%s10622_s17 + $0x1b8] ss:$24 sps:$4 sm:$0xff]   ;;  %14690 = vst [vmem:[#allocation80_spill] sm:$0xff] %v11316_v41 }
 0x176   : > { %3157 = vmatpush2.bf16.msra.mxu0 %v8892_v31  ;;  %v11308_v31 = vld [vmem:[%s10610_s6 + $0x20] sm:$0xff] }
 0x177   : > { %3158 = vmatprep.subr.bf16.mxu0 %v8900_v25  ;;  %14688 = vst [vmem:[#allocation78_spill] sm:$0xff] %v11308_v31  ;;  %v8912_v25 = vld [vmem:[%s10622_s17 + $0x45c] ss:$24 sps:$4 sm:$0xff]  }
 0x178   : > { %3270 = vmatpush2.bf16.msra.mxu1 %v8895_v57  ;;  %v11320_v57 = vld [vmem:[%s10610_s6 + $0xb8] sm:$0xff] }
 0x179   : > { %3007 = vmatmul.mubr.bf16.gmra.mxu0 %v11290_v27  ;;  %3271 = vmatprep.subr.bf16.mxu1 %v8903_v5  ;;  %14691 = vst [vmem:[#allocation81_spill] sm:$0xff] %v11320_v57  ;;  %v8907_v5 = vld [vmem:[%s10622_s17 + $0x188] ss:$24 sps:$4 sm:$0xff]   ;;  %v11333_v49 = vpack.c.bf16 %v11320_v57, %v11316_v41  ;;  %v8924_v57 = vld [vmem:[%s10622_s17 + $0x3fc] ss:$24 sps:$4 sm:$0xff]  }
 0x17a   : > { %3159 = vmatpush2.bf16.msra.mxu0 %v8898_v9  ;;  %3162 = vmatprep.mubr.bf16.mxu0 %v11296_v12  ;;  %v11326_v9 = vpack.c.bf16 %v11311_v62, %v11308_v31  ;;  %v8922_v41 = vld [vmem:[%s10622_s17 + $0x3f8] ss:$24 sps:$4 sm:$0xff]   ;;  %v8957_v62 = vld [vmem:[%s10622_s17 + $0x60c] ss:$24 sps:$4 sm:$0xff]  }
 0x17b   : > { %3120 = vmatmul.mubr.bf16.gmra.mxu1 %v11300_v59  ;;  %3160 = vmatprep.subr.bf16.mxu0 %v8906_v26  ;;  %v8913_v26 = vld [vmem:[%s10622_s17 + $0x758] ss:$24 sps:$4 sm:$0xff]   ;;  %v9101_v31 = vld [vmem:[%s10622_s17 + $0x494] ss:$24 sps:$4 sm:$0xff]  }
 0x17c   : > { %3272 = vmatpush2.bf16.msra.mxu1 %v8901_v19  ;;  %3275 = vmatprep.mubr.bf16.mxu1 %v10874_v18  ;;  %v8918_v19 = vld [vmem:[%s10622_s17 + $0x42c] ss:$24 sps:$4 sm:$0xff]  }
 0x17d   : > { %3273 = vmatprep.subr.bf16.mxu1 %v8909_v10  ;;  %v8916_v10 = vld [vmem:[%s10622_s17 + $0x428] ss:$24 sps:$4 sm:$0xff]  }
 0x17e   : > { %3161 = vmatpush2.bf16.msra.mxu0 %v8904_v20  ;;  %v11343_v20 = vld [vmem:[%s10610_s6 + $0xb0] sm:$0xff] }
 0x17f   : > { %3356 = vmatprep.subr.bf16.mxu0 %v8912_v25  ;;  %14693 = vst [vmem:[#allocation83_spill] sm:$0xff] %v11343_v20  ;;  %v11348_v25 = vld [vmem:[%s10610_s6 + $0xe8] sm:$0xff] }
 0x180   : > { %3274 = vmatpush2.bf16.msra.mxu1 %v8907_v5  ;;  %14694 = vst [vmem:[#allocation84_spill] sm:$0xff] %v11348_v25  ;;  %v11352_v5 = vld [vmem:[%s10610_s6 + $0x118] sm:$0xff] }
 0x181   : > { %3163 = vmatmul.mubr.bf16.vlgmr.msra.gmra.mxu0 %v11326_v9  ;;  %3469 = vmatprep.subr.bf16.mxu1 %v8915_v50  ;;  %14695 = vst [vmem:[#allocation85_spill] sm:$0xff] %v11352_v5  ;;  %v8919_v50 = vld [vmem:[%s10622_s17 + $0x728] ss:$24 sps:$4 sm:$0xff]  }
 0x182   : > { %3357 = vmatpush1.bf16.msra.mxu0 %v8910_v14  ;;  %3172 = vmatprep.mubr.bf16.mxu0 %v11333_v49  ;;  %v11358_v14 = vpack.c.bf16 %v11343_v20, %v11340_v43  ;;  %v8928_v20 = vld [vmem:[%s10622_s17 + $0x3c8] ss:$24 sps:$4 sm:$0xff]   ;;  %v8933_v43 = vld [vmem:[%s10622_s17 + $0x6cc] ss:$24 sps:$4 sm:$0xff]  }
 0x183   : > { %3276 = vmatmul.mubr.bf16.vlgmr.msra.gmra.mxu1 %v10927_v47  ;;  %3358 = vmatprep.subr.bf16.mxu0 %v8918_v19  ;;  %v11364_v19 = vpack.c.bf16 %v11352_v5, %v11348_v25  ;;  %v11376_v5 = vld [vmem:[%s10610_s6 + $0x110] sm:$0xff] }
 0x184   : > { %3470 = vmatpush1.bf16.msra.mxu1 %v8913_v26  ;;  %3285 = vmatprep.mubr.bf16.mxu1 %v10938_v51  ;;  %v8930_v26 = vld [vmem:[%s10622_s17 + $0x3cc] ss:$24 sps:$4 sm:$0xff]   ;;  %14697 = vst [vmem:[#allocation87_spill] sm:$0xff] %v11376_v5 }
 0x185   : > { %3471 = vmatprep.subr.bf16.mxu1 %v8921_v1  ;;  %v8925_v1 = vld [vmem:[%s10622_s17 + $0x6f8] ss:$24 sps:$4 sm:$0xff]  }
 0x186   : > { %3359 = vmatpush1.bf16.msra.mxu0 %v8916_v10  ;;  %v11373_v10 = vld [vmem:[%s10610_s6 + $0xe0] sm:$0xff] }
 0x187   : > { %3360 = vmatprep.subr.bf16.mxu0 %v8924_v57  ;;  %14696 = vst [vmem:[#allocation86_spill] sm:$0xff] %v11373_v10  ;;  %v8936_v57 = vld [vmem:[%s10622_s17 + $0x39c] ss:$24 sps:$4 sm:$0xff]   ;;  %v11390_v25 = vpack.c.bf16 %v11376_v5, %v11373_v10  ;;  %v8940_v5 = vld [vmem:[%s10622_s17 + $0x368] ss:$24 sps:$4 sm:$0xff]  }
 0x188   : > { %3472 = vmatpush1.bf16.msra.mxu1 %v8919_v50  ;;  %v11381_v50 = vld [vmem:[%s10610_s6 + $0x148] sm:$0xff] }
 0x189   : > { %3173 = vmatmul.mubr.bf16.gmra.mxu0 %v11358_v14  ;;  %3473 = vmatprep.subr.bf16.mxu1 %v8927_v60  ;;  %14698 = vst [vmem:[#allocation88_spill] sm:$0xff] %v11381_v50  ;;  %v11384_v60 = vld [vmem:[%s10610_s6 + $0x178] sm:$0xff]  ;;  %v8945_v10 = vld [vmem:[%s10622_s17 + $0x66c] ss:$24 sps:$4 sm:$0xff]  }
 0x18a   : > { %3361 = vmatpush1.bf16.msra.mxu0 %v8922_v41  ;;  %3182 = vmatprep.mubr.bf16.mxu0 %v11364_v19  ;;  %14699 = vst [vmem:[#allocation89_spill] sm:$0xff] %v11384_v60  ;;  %v8931_v41 = vld [vmem:[%s10622_s17 + $0x6c8] ss:$24 sps:$4 sm:$0xff]   ;;  %v11396_v0 = vpack.c.bf16 %v11384_v60, %v11381_v50  ;;  %v8951_v50 = vld [vmem:[%s10622_s17 + $0x63c] ss:$24 sps:$4 sm:$0xff]  }
 0x18b   : > { %3286 = vmatmul.mubr.bf16.gmra.mxu1 %v10979_v3  ;;  %3362 = vmatprep.subr.bf16.mxu0 %v8930_v26  ;;  %v8939_v26 = vld [vmem:[%s10622_s17 + $0x69c] ss:$24 sps:$4 sm:$0xff]   ;;  %v11412_v60 = vld [vmem:[%s10610_s6 + $0x1a8] sm:$0xff] }
 0x18c   : > { %3474 = vmatpush1.bf16.msra.mxu1 %v8925_v1  ;;  %3295 = vmatprep.mubr.bf16.mxu1 %v10990_v7  ;;  %v8942_v1 = vld [vmem:[%s10622_s17 + $0x36c] ss:$24 sps:$4 sm:$0xff]   ;;  %14702 = vst [vmem:[#allocation92_spill] sm:$0xff] %v11412_v60 }
 0x18d   : > { %3475 = vmatprep.subr.bf16.mxu1 %v8933_v43  ;;  %v8937_v43 = vld [vmem:[%s10622_s17 + $0x698] ss:$24 sps:$4 sm:$0xff]  }
 0x18e   : > { %3363 = vmatpush1.bf16.msra.mxu0 %v8928_v20  ;;  %v11408_v20 = vld [vmem:[%s10610_s6 + $0x170] sm:$0xff] }
 0x18f   : > { %3364 = vmatprep.subr.bf16.mxu0 %v8936_v57  ;;  %14701 = vst [vmem:[#allocation91_spill] sm:$0xff] %v11408_v20  ;;  %v8948_v57 = vld [vmem:[%s10622_s17 + $0x33c] ss:$24 sps:$4 sm:$0xff]  }
 0x190   : > { %3476 = vmatpush1.bf16.msra.mxu1 %v8931_v41  ;;  %v11416_v41 = vld [vmem:[%s10610_s6 + $0x1d8] sm:$0xff] }
 0x191   : > { %3183 = vmatmul.mubr.bf16.gmra.mxu0 %v11390_v25  ;;  %3477 = vmatprep.subr.bf16.mxu1 %v8939_v26  ;;  %14703 = vst [vmem:[#allocation93_spill] sm:$0xff] %v11416_v41  ;;  %v8943_v26 = vld [vmem:[%s10622_s17 + $0x668] ss:$24 sps:$4 sm:$0xff]  }
 0x192   : > { %3365 = vmatpush1.bf16.msra.mxu0 %v8934_v48  ;;  %3192 = vmatprep.mubr.bf16.mxu0 %v11396_v0  ;;  %v11422_v48 = vpack.c.bf16 %v11408_v20, %v11404_v42  ;;  %v11436_v20 = vld [vmem:[%s10610_s6 + $0x1a0] sm:$0xff]  ;;  %v8958_v42 = vld [vmem:[%s10622_s17 + $0x5d8] ss:$24 sps:$4 sm:$0xff]  }
 0x193   : > { %3296 = vmatmul.mubr.bf16.gmra.mxu1 %v11031_v29  ;;  %3366 = vmatprep.subr.bf16.mxu0 %v8942_v1  ;;  %v11428_v1 = vpack.c.bf16 %v11416_v41, %v11412_v60  ;;  %14704 = vst [vmem:[#allocation94_spill] sm:$0xff] %v11436_v20  ;;  %v11448_v41 = vld [vmem:[%s10610_s6 + $0x238] sm:$0xff] }
 0x194   : > { %3478 = vmatpush1.bf16.msra.mxu1 %v8937_v43  ;;  %3305 = vmatprep.mubr.bf16.mxu1 %v11042_v33  ;;  %v8954_v43 = vld [vmem:[%s10622_s17 + $0x30c] ss:$24 sps:$4 sm:$0xff]   ;;  %14707 = vst [vmem:[#allocation97_spill] sm:$0xff] %v11448_v41  ;;  %v8963_v60 = vld [vmem:[%s10622_s17 + $0x8dc] ss:$24 sps:$4 sm:$0xff]  }
 0x195   : > { %3479 = vmatprep.subr.bf16.mxu1 %v8945_v10  ;;  %v8952_v10 = vld [vmem:[%s10622_s17 + $0x308] ss:$24 sps:$4 sm:$0xff]  }
 0x196   : > { %3367 = vmatpush1.bf16.msra.mxu0 %v8940_v5  ;;  %v11439_v5 = vld [vmem:[%s10610_s6 + $0x1d0] sm:$0xff] }
 0x197   : > { %3368 = vmatprep.subr.bf16.mxu0 %v8948_v57  ;;  %14705 = vst [vmem:[#allocation95_spill] sm:$0xff] %v11439_v5  ;;  %v8960_v57 = vld [vmem:[%s10622_s17 + $0x5dc] ss:$24 sps:$4 sm:$0xff]  }
 0x198   : > { %3480 = vmatpush1.bf16.msra.mxu1 %v8943_v26  ;;  %v11444_v26 = vld [vmem:[%s10610_s6 + $0x208] sm:$0xff] }
 0x199   : > { %3193 = vmatmul.mubr.bf16.gmra.mxu0 %v11422_v48  ;;  %3481 = vmatprep.subr.bf16.mxu1 %v8951_v50  ;;  %14706 = vst [vmem:[#allocation96_spill] sm:$0xff] %v11444_v26  ;;  %v8955_v50 = vld [vmem:[%s10622_s17 + $0x608] ss:$24 sps:$4 sm:$0xff]   ;;  %v11461_v22 = vpack.c.bf16 %v11448_v41, %v11444_v26  ;;  %v8972_v41 = vld [vmem:[%s10622_s17 + $0x57c] ss:$24 sps:$4 sm:$0xff]  }
 0x19a   : > { %3369 = vmatpush1.bf16.msra.mxu0 %v8946_v58  ;;  %3202 = vmatprep.mubr.bf16.mxu0 %v11428_v1  ;;  %v11454_v58 = vpack.c.bf16 %v11439_v5, %v11436_v20  ;;  %v11468_v5 = vld [vmem:[%s10610_s6 + $0x200] sm:$0xff]  ;;  %v8975_v26 = vld [vmem:[%s10622_s17 + $0x87c] ss:$24 sps:$4 sm:$0xff]   ;;  %v8970_v20 = vld [vmem:[%s10622_s17 + $0x578] ss:$24 sps:$4 sm:$0xff]  }
 0x19b   : > { %3306 = vmatmul.mubr.bf16.gmra.mxu1 %v11083_v6  ;;  %3370 = vmatprep.subr.bf16.mxu0 %v8954_v43  ;;  %v8961_v43 = vld [vmem:[%s10622_s17 + $0x8d8] ss:$24 sps:$4 sm:$0xff]   ;;  %14708 = vst [vmem:[#allocation98_spill] sm:$0xff] %v11468_v5 }
 0x19c   : > { %3482 = vmatpush1.bf16.msra.mxu1 %v8949_v39  ;;  %3315 = vmatprep.mubr.bf16.mxu1 %v11094_v13  ;;  %v8966_v39 = vld [vmem:[%s10622_s17 + $0x5ac] ss:$24 sps:$4 sm:$0xff]  }
 0x19d   : > { %3483 = vmatprep.subr.bf16.mxu1 %v8957_v62  ;;  %v8964_v62 = vld [vmem:[%s10622_s17 + $0x5a8] ss:$24 sps:$4 sm:$0xff]  }
 0x19e   : > { %3371 = vmatpush1.bf16.msra.mxu0 %v8952_v10  ;;  %v11471_v10 = vld [vmem:[%s10610_s6 + $0x230] sm:$0xff] }
 0x19f   : > { %3372 = vmatprep.subr.bf16.mxu0 %v8960_v57  ;;  %14709 = vst [vmem:[#allocation99_spill] sm:$0xff] %v11471_v10  ;;  %v11476_v57 = vld [vmem:[%s10610_s6 + $0x268] sm:$0xff] }
 0x1a0   : > { %3484 = vmatpush1.bf16.msra.mxu1 %v8955_v50  ;;  %14710 = vst [vmem:[#allocation100_spill] sm:$0xff] %v11476_v57  ;;  %v11480_v50 = vld [vmem:[%s10610_s6 + $0x298] sm:$0xff] }
 0x1a1   : > { %3203 = vmatmul.mubr.bf16.gmra.mxu0 %v11454_v58  ;;  %3485 = vmatprep.subr.bf16.mxu1 %v8963_v60  ;;  %14711 = vst [vmem:[#allocation101_spill] sm:$0xff] %v11480_v50  ;;  %v8967_v60 = vld [vmem:[%s10622_s17 + $0x8a8] ss:$24 sps:$4 sm:$0xff]   ;;  %v11493_v16 = vpack.c.bf16 %v11480_v50, %v11476_v57  ;;  %v8984_v50 = vld [vmem:[%s10622_s17 + $0x51c] ss:$24 sps:$4 sm:$0xff]  }
 0x1a2   : > { %3373 = vmatpush2.bf16.msra.mxu0 %v8958_v42  ;;  %3212 = vmatprep.mubr.bf16.mxu0 %v11461_v22  ;;  %v11486_v42 = vpack.c.bf16 %v11471_v10, %v11468_v5  ;;  %v11500_v10 = vld [vmem:[%s10610_s6 + $0x260] sm:$0xff]  ;;  %v8987_v57 = vld [vmem:[%s10622_s17 + $0x81c] ss:$24 sps:$4 sm:$0xff]   ;;  %v8982_v5 = vld [vmem:[%s10622_s17 + $0x518] ss:$24 sps:$4 sm:$0xff]  }
 0x1a3   : > { %3316 = vmatmul.mubr.bf16.gmra.mxu1 %v11135_v56  ;;  %3374 = vmatprep.subr.bf16.mxu0 %v8966_v39  ;;  %v8973_v39 = vld [vmem:[%s10622_s17 + $0x878] ss:$24 sps:$4 sm:$0xff]   ;;  %14713 = vst [vmem:[#allocation103_spill] sm:$0xff] %v11493_v16  ;;  %14714 = vst [vmem:[#allocation104_spill] sm:$0xff] %v11500_v10 }
 0x1a4   : > { %3486 = vmatpush2.bf16.msra.mxu1 %v8961_v43  ;;  %3325 = vmatprep.mubr.bf16.mxu1 %v11146_v61  ;;  %14712 = vst [vmem:[#allocation102_spill] sm:$0xff] %v11486_v42  ;;  %v8978_v43 = vld [vmem:[%s10622_s17 + $0x54c] ss:$24 sps:$4 sm:$0xff]  }
 0x1a5   : > { %3487 = vmatprep.subr.bf16.mxu1 %v8969_v45  ;;  %v8976_v45 = vld [vmem:[%s10622_s17 + $0x548] ss:$24 sps:$4 sm:$0xff]  }
 0x1a6   : > { %3375 = vmatpush2.bf16.msra.mxu0 %v8964_v62  ;;  %v11503_v62 = vld [vmem:[%s10610_s6 + $0x290] sm:$0xff] }
 0x1a7   : > { %3376 = vmatprep.subr.bf16.mxu0 %v8972_v41  ;;  %14715 = vst [vmem:[#allocation105_spill] sm:$0xff] %v11503_v62  ;;  %v11508_v41 = vld [vmem:[%s10610_s6 + $0x2c8] sm:$0xff] }
 0x1a8   : > { %3488 = vmatpush2.bf16.msra.mxu1 %v8967_v60  ;;  %14716 = vst [vmem:[#allocation106_spill] sm:$0xff] %v11508_v41  ;;  %v11512_v60 = vld [vmem:[%s10610_s6 + $0x2f8] sm:$0xff] }
 0x1a9   : > { %3213 = vmatmul.mubr.bf16.gmra.mxu0 %v11486_v42  ;;  %3489 = vmatprep.subr.bf16.mxu1 %v8975_v26  ;;  %14717 = vst [vmem:[#allocation107_spill] sm:$0xff] %v11512_v60  ;;  %v8979_v26 = vld [vmem:[%s10622_s17 + $0x848] ss:$24 sps:$4 sm:$0xff]  }
 0x1aa   : > { %3377 = vmatpush2.bf16.msra.mxu0 %v8970_v20  ;;  %3222 = vmatprep.mubr.bf16.mxu0 %v11493_v16  ;;  %v11518_v20 = vpack.c.bf16 %v11503_v62, %v11500_v10  ;;  %v8993_v62 = vld [vmem:[%s10622_s17 + $0x7ec] ss:$24 sps:$4 sm:$0xff]  }
 0x1ab   : > { %3326 = vmatmul.mubr.bf16.gmra.mxu1 %v11187_v53  ;;  %3378 = vmatprep.subr.bf16.mxu0 %v8978_v43  ;;  %v11524_v43 = vpack.c.bf16 %v11512_v60, %v11508_v41  ;;  %v11536_v60 = vld [vmem:[%s10610_s6 + $0x2f0] sm:$0xff]  ;;  %v9002_v10 = vld [vmem:[%s10622_s17 + $0x48c] ss:$24 sps:$4 sm:$0xff]  }
 0x1ac   : > { %3490 = vmatpush2.bf16.msra.mxu1 %v8973_v39  ;;  %3335 = vmatprep.mubr.bf16.mxu1 %v11199_v23  ;;  %14718 = vst [vmem:[#allocation108_spill] sm:$0xff] %v11518_v20  ;;  %v8990_v39 = vld [vmem:[%s10622_s17 + $0x4ec] ss:$24 sps:$4 sm:$0xff]   ;;  %14721 = vst [vmem:[#allocation111_spill] sm:$0xff] %v11536_v60  ;;  %v8994_v41 = vld [vmem:[%s10622_s17 + $0x4b8] ss:$24 sps:$4 sm:$0xff]  }
 0x1ad   : > { %3491 = vmatprep.subr.bf16.mxu1 %v8981_v40  ;;  %14719 = vst [vmem:[#allocation109_spill] sm:$0xff] %v11524_v43  ;;  %v8988_v40 = vld [vmem:[%s10622_s17 + $0x4e8] ss:$24 sps:$4 sm:$0xff]  }
 0x1ae   : > { %3379 = vmatpush2.bf16.msra.mxu0 %v8976_v45  ;;  %v11533_v45 = vld [vmem:[%s10610_s6 + $0x2c0] sm:$0xff] }
 0x1af   : > { %3380 = vmatprep.subr.bf16.mxu0 %v8984_v50  ;;  %14720 = vst [vmem:[#allocation110_spill] sm:$0xff] %v11533_v45  ;;  %v8996_v50 = vld [vmem:[%s10622_s17 + $0x4bc] ss:$24 sps:$4 sm:$0xff]  }
 0x1b0   : > { %3492 = vmatpush2.bf16.msra.mxu1 %v8979_v26  ;;  %v8999_v26 = vld [vmem:[%s10622_s17 + $0x7bc] ss:$24 sps:$4 sm:$0xff]  }
 0x1b1   : > { %3223 = vmatmul.mubr.bf16.gmra.mxu0 %v11518_v20  ;;  %3493 = vmatprep.subr.bf16.mxu1 %v8987_v57  ;;  %v8991_v57 = vld [vmem:[%s10622_s17 + $0x7e8] ss:$24 sps:$4 sm:$0xff]  }
 0x1b2   : > { %3381 = vmatpush2.bf16.msra.mxu0 %v8982_v5  ;;  %3232 = vmatprep.mubr.bf16.mxu0 %v11524_v43  ;;  %v11544_v5 = vpack.c.bf16 %v11536_v60, %v11533_v45  ;;  %v9009_v60 = vld [vmem:[%s10622_s17 + $0x460] ss:$24 sps:$4 sm:$0xff]   ;;  %v9098_v45 = vld [vmem:[%s10622_s17 + $0x194] ss:$24 sps:$4 sm:$0xff]  }
 0x1b3   : > { %3336 = vmatmul.mubr.bf16.gmra.mxu1 %v11239_v28  ;;  %3382 = vmatprep.subr.bf16.mxu0 %v8990_v39  ;;  %v8997_v39 = vld [vmem:[%s10622_s17 + $0x7b8] ss:$24 sps:$4 sm:$0xff]  }
 0x1b4   : > { %3494 = vmatpush2.bf16.msra.mxu1 %v8985_v30  ;;  %3345 = vmatprep.mubr.bf16.mxu1 %v11251_v63  ;;  %14722 = vst [vmem:[#allocation112_spill] sm:$0xff] %v11544_v5  ;;  %v9005_v30 = vld [vmem:[%s10622_s17 + $0x78c] ss:$24 sps:$4 sm:$0xff]  }
 0x1b5   : > { %3495 = vmatprep.subr.bf16.mxu1 %v8993_v62  ;;  %v9000_v62 = vld [vmem:[%s10622_s17 + $0x488] ss:$24 sps:$4 sm:$0xff]  }
 0x1b6   : > { %3383 = vmatpush2.bf16.msra.mxu0 %v8988_v40  ;;  %v9008_v40 = vld [vmem:[%s10622_s17 + $0x164] ss:$24 sps:$4 sm:$0xff]  }
 0x1b7   : > { %3384 = vmatprep.subr.bf16.mxu0 %v8996_v50  ;;  %v9003_v50 = vld [vmem:[%s10622_s17 + $0x788] ss:$24 sps:$4 sm:$0xff]  }
 0x1b8   : > { %3496 = vmatpush2.bf16.msra.mxu1 %v8991_v57  ;;  %v9011_v57 = vld [vmem:[%s10622_s17 + $0x464] ss:$24 sps:$4 sm:$0xff]  }
 0x1b9   : > { %3233 = vmatmul.mubr.bf16.gmra.mxu0 %v11544_v5  ;;  %3497 = vmatprep.subr.bf16.mxu1 %v8999_v26  ;;  %v9014_v26 = vld [vmem:[%s10622_s17 + $0x134] ss:$24 sps:$4 sm:$0xff]  }
 0x1ba   : > { %3385 = vmatpush2.bf16.msra.mxu0 %v8994_v41  ;;  %3388 = vmatprep.mubr.bf16.mxu0 %v10888_v24  ;;  %v9006_v41 = vld [vmem:[%s10622_s17 + $0x160] ss:$24 sps:$4 sm:$0xff]  }
 0x1bb   : > { %3346 = vmatmul.mubr.bf16.gmra.mxu1 %v11290_v27  ;;  %3386 = vmatprep.subr.bf16.mxu0 %v9002_v10  ;;  %v9017_v10 = vld [vmem:[%s10622_s17 + $0x434] ss:$24 sps:$4 sm:$0xff]  }
 0x1bc   : > { %3498 = vmatpush2.bf16.msra.mxu1 %v8997_v39  ;;  %3501 = vmatprep.mubr.bf16.mxu1 %v11296_v12  ;;  %v9012_v39 = vld [vmem:[%s10622_s17 + $0x130] ss:$24 sps:$4 sm:$0xff]  }
 0x1bd   : > { %3499 = vmatprep.subr.bf16.mxu1 %v9005_v30  ;;  %v9020_v30 = vld [vmem:[%s10622_s17 + $0x104] ss:$24 sps:$4 sm:$0xff]  }
 0x1be   : > { %3387 = vmatpush2.bf16.msra.mxu0 %v9000_v62  ;;  %v9015_v62 = vld [vmem:[%s10622_s17 + $0x430] ss:$24 sps:$4 sm:$0xff]  }
 0x1bf   : > { %3582 = vmatprep.subr.bf16.mxu0 %v9008_v40  ;;  %v9023_v40 = vld [vmem:[%s10622_s17 + $0x404] ss:$24 sps:$4 sm:$0xff]  }
 0x1c0   : > { %3500 = vmatpush2.bf16.msra.mxu1 %v9003_v50  ;;  %v9018_v50 = vld [vmem:[%s10622_s17 + $0x100] ss:$24 sps:$4 sm:$0xff]  }
 0x1c1   : > { %3389 = vmatmul.mubr.bf16.vlgmr.msra.gmra.mxu0 %v10942_v52  ;;  %3695 = vmatprep.subr.bf16.mxu1 %v9011_v57  ;;  %v9026_v57 = vld [vmem:[%s10622_s17 + $0xd4] ss:$24 sps:$4 sm:$0xff]  }
 0x1c2   : > { %3583 = vmatpush1.bf16.msra.mxu0 %v9006_v41  ;;  %3398 = vmatprep.mubr.bf16.mxu0 %v10948_v55  ;;  %v9021_v41 = vld [vmem:[%s10622_s17 + $0x400] ss:$24 sps:$4 sm:$0xff]  }
 0x1c3   : > { %3502 = vmatmul.mubr.bf16.vlgmr.msra.gmra.mxu1 %v11326_v9  ;;  %3584 = vmatprep.subr.bf16.mxu0 %v9014_v26  ;;  %v9024_v26 = vld [vmem:[%s10622_s17 + $0xd0] ss:$24 sps:$4 sm:$0xff]  }
 0x1c4   : > { %3696 = vmatpush1.bf16.msra.mxu1 %v9009_v60  ;;  %3511 = vmatprep.mubr.bf16.mxu1 %v11333_v49  ;;  %v9029_v60 = vld [vmem:[%s10622_s17 + $0x3d4] ss:$24 sps:$4 sm:$0xff]  }
 0x1c5   : > { %3697 = vmatprep.subr.bf16.mxu1 %v9017_v10  ;;  %v9032_v10 = vld [vmem:[%s10622_s17 + $0xa4] ss:$24 sps:$4 sm:$0xff]  }
 0x1c6   : > { %3585 = vmatpush1.bf16.msra.mxu0 %v9012_v39  ;;  %v9027_v39 = vld [vmem:[%s10622_s17 + $0x3d0] ss:$24 sps:$4 sm:$0xff]  }
 0x1c7   : > { %3586 = vmatprep.subr.bf16.mxu0 %v9020_v30  ;;  %v9035_v30 = vld [vmem:[%s10622_s17 + $0x3a4] ss:$24 sps:$4 sm:$0xff]  }
 0x1c8   : > { %3698 = vmatpush1.bf16.msra.mxu1 %v9015_v62  ;;  %v9030_v62 = vld [vmem:[%s10622_s17 + $0xa0] ss:$24 sps:$4 sm:$0xff]  }
 0x1c9   : > { %3399 = vmatmul.mubr.bf16.gmra.mxu0 %v10994_v8  ;;  %3699 = vmatprep.subr.bf16.mxu1 %v9023_v40  ;;  %v9038_v40 = vld [vmem:[%s10622_s17 + $0x74] ss:$24 sps:$4 sm:$0xff]  }
 0x1ca   : > { %3587 = vmatpush1.bf16.msra.mxu0 %v9018_v50  ;;  %3408 = vmatprep.mubr.bf16.mxu0 %v11000_v11  ;;  %v9033_v50 = vld [vmem:[%s10622_s17 + $0x3a0] ss:$24 sps:$4 sm:$0xff]  }
 0x1cb   : > { %3512 = vmatmul.mubr.bf16.gmra.mxu1 %v11358_v14  ;;  %3588 = vmatprep.subr.bf16.mxu0 %v9026_v57  ;;  %v9041_v57 = vld [vmem:[%s10622_s17 + $0x374] ss:$24 sps:$4 sm:$0xff]  }
 0x1cc   : > { %3700 = vmatpush1.bf16.msra.mxu1 %v9021_v41  ;;  %3521 = vmatprep.mubr.bf16.mxu1 %v11364_v19  ;;  %v9036_v41 = vld [vmem:[%s10622_s17 + $0x70] ss:$24 sps:$4 sm:$0xff]  }
 0x1cd   : > { %3701 = vmatprep.subr.bf16.mxu1 %v9029_v60  ;;  %v9044_v60 = vld [vmem:[%s10622_s17 + $0x44] ss:$24 sps:$4 sm:$0xff]  }
 0x1ce   : > { %3589 = vmatpush1.bf16.msra.mxu0 %v9024_v26  ;;  %v9039_v26 = vld [vmem:[%s10622_s17 + $0x370] ss:$24 sps:$4 sm:$0xff]  }
 0x1cf   : > { %3590 = vmatprep.subr.bf16.mxu0 %v9032_v10  ;;  %v9047_v10 = vld [vmem:[%s10622_s17 + $0x344] ss:$24 sps:$4 sm:$0xff]  }
 0x1d0   : > { %3702 = vmatpush1.bf16.msra.mxu1 %v9027_v39  ;;  %v9042_v39 = vld [vmem:[%s10622_s17 + $0x40] ss:$24 sps:$4 sm:$0xff]  }
 0x1d1   : > { %3409 = vmatmul.mubr.bf16.gmra.mxu0 %v11046_v34  ;;  %3703 = vmatprep.subr.bf16.mxu1 %v9035_v30  ;;  %v9050_v30 = vld [vmem:[%s10622_s17 + $0x14] ss:$24 sps:$4 sm:$0xff]  }
 0x1d2   : > { %3591 = vmatpush1.bf16.msra.mxu0 %v9030_v62  ;;  %3418 = vmatprep.mubr.bf16.mxu0 %v11052_v37  ;;  %v9045_v62 = vld [vmem:[%s10622_s17 + $0x340] ss:$24 sps:$4 sm:$0xff]  }
 0x1d3   : > { %3522 = vmatmul.mubr.bf16.gmra.mxu1 %v11390_v25  ;;  %3592 = vmatprep.subr.bf16.mxu0 %v9038_v40  ;;  %v9053_v40 = vld [vmem:[%s10622_s17 + $0x314] ss:$24 sps:$4 sm:$0xff]  }
 0x1d4   : > { %3704 = vmatpush1.bf16.msra.mxu1 %v9033_v50  ;;  %3531 = vmatprep.mubr.bf16.mxu1 %v11396_v0  ;;  %v9048_v50 = vld [vmem:[%s10622_s17 + $0x10] ss:$24 sps:$4 sm:$0xff]  }
 0x1d5   : > { %3705 = vmatprep.subr.bf16.mxu1 %v9041_v57  ;;  %v9056_v57 = vld [vmem:[%s10622_s17 + $0x2e4] ss:$24 sps:$4 sm:$0xff]  }
 0x1d6   : > { %3593 = vmatpush1.bf16.msra.mxu0 %v9036_v41  ;;  %v9051_v41 = vld [vmem:[%s10622_s17 + $0x310] ss:$24 sps:$4 sm:$0xff]  }
 0x1d7   : > { %3594 = vmatprep.subr.bf16.mxu0 %v9044_v60  ;;  %v9059_v60 = vld [vmem:[%s10622_s17 + $0x5e4] ss:$24 sps:$4 sm:$0xff]  }
 0x1d8   : > { %3706 = vmatpush1.bf16.msra.mxu1 %v9039_v26  ;;  %v9054_v26 = vld [vmem:[%s10622_s17 + $0x2e0] ss:$24 sps:$4 sm:$0xff]  }
 0x1d9   : > { %3419 = vmatmul.mubr.bf16.gmra.mxu0 %v11098_v17  ;;  %3707 = vmatprep.subr.bf16.mxu1 %v9047_v10  ;;  %v9062_v10 = vld [vmem:[%s10622_s17 + $0x2b4] ss:$24 sps:$4 sm:$0xff]  }
 0x1da   : > { %3595 = vmatpush1.bf16.msra.mxu0 %v9042_v39  ;;  %3428 = vmatprep.mubr.bf16.mxu0 %v11104_v32  ;;  %v9057_v39 = vld [vmem:[%s10622_s17 + $0x5e0] ss:$24 sps:$4 sm:$0xff]  }
 0x1db   : > { %3532 = vmatmul.mubr.bf16.gmra.mxu1 %v11422_v48  ;;  %3596 = vmatprep.subr.bf16.mxu0 %v9050_v30  ;;  %v9065_v30 = vld [vmem:[%s10622_s17 + $0x5b4] ss:$24 sps:$4 sm:$0xff]  }
 0x1dc   : > { %3708 = vmatpush1.bf16.msra.mxu1 %v9045_v62  ;;  %3541 = vmatprep.mubr.bf16.mxu1 %v11428_v1  ;;  %v9060_v62 = vld [vmem:[%s10622_s17 + $0x2b0] ss:$24 sps:$4 sm:$0xff]  }
 0x1dd   : > { %3709 = vmatprep.subr.bf16.mxu1 %v9053_v40  ;;  %v9068_v40 = vld [vmem:[%s10622_s17 + $0x284] ss:$24 sps:$4 sm:$0xff]  }
 0x1de   : > { %3597 = vmatpush1.bf16.msra.mxu0 %v9048_v50  ;;  %v9063_v50 = vld [vmem:[%s10622_s17 + $0x5b0] ss:$24 sps:$4 sm:$0xff]  }
 0x1df   : > { %3598 = vmatprep.subr.bf16.mxu0 %v9056_v57  ;;  %v9071_v57 = vld [vmem:[%s10622_s17 + $0x584] ss:$24 sps:$4 sm:$0xff]  }
 0x1e0   : > { %3710 = vmatpush1.bf16.msra.mxu1 %v9051_v41  ;;  %v9066_v41 = vld [vmem:[%s10622_s17 + $0x280] ss:$24 sps:$4 sm:$0xff]  }
 0x1e1   : > { %3429 = vmatmul.mubr.bf16.gmra.mxu0 %v11150_v36  ;;  %3711 = vmatprep.subr.bf16.mxu1 %v9059_v60  ;;  %v9074_v60 = vld [vmem:[%s10622_s17 + $0x254] ss:$24 sps:$4 sm:$0xff]  }
 0x1e2   : > { %3599 = vmatpush2.bf16.msra.mxu0 %v9054_v26  ;;  %3438 = vmatprep.mubr.bf16.mxu0 %v11156_v35  ;;  %v9069_v26 = vld [vmem:[%s10622_s17 + $0x580] ss:$24 sps:$4 sm:$0xff]  }
 0x1e3   : > { %3542 = vmatmul.mubr.bf16.gmra.mxu1 %v11454_v58  ;;  %3600 = vmatprep.subr.bf16.mxu0 %v9062_v10  ;;  %v9077_v10 = vld [vmem:[%s10622_s17 + $0x554] ss:$24 sps:$4 sm:$0xff]  }
 0x1e4   : > { %3712 = vmatpush2.bf16.msra.mxu1 %v9057_v39  ;;  %3551 = vmatprep.mubr.bf16.mxu1 %v11461_v22  ;;  %v9072_v39 = vld [vmem:[%s10622_s17 + $0x250] ss:$24 sps:$4 sm:$0xff]  }
 0x1e5   : > { %3713 = vmatprep.subr.bf16.mxu1 %v9065_v30  ;;  %v9080_v30 = vld [vmem:[%s10622_s17 + $0x224] ss:$24 sps:$4 sm:$0xff]  }
 0x1e6   : > { %3601 = vmatpush2.bf16.msra.mxu0 %v9060_v62  ;;  %v9075_v62 = vld [vmem:[%s10622_s17 + $0x550] ss:$24 sps:$4 sm:$0xff]  }
 0x1e7   : > { %3602 = vmatprep.subr.bf16.mxu0 %v9068_v40  ;;  %v9083_v40 = vld [vmem:[%s10622_s17 + $0x524] ss:$24 sps:$4 sm:$0xff]  }
 0x1e8   : > { %3714 = vmatpush2.bf16.msra.mxu1 %v9063_v50  ;;  %v9078_v50 = vld [vmem:[%s10622_s17 + $0x220] ss:$24 sps:$4 sm:$0xff]  }
 0x1e9   : > { %3439 = vmatmul.mubr.bf16.gmra.mxu0 %v11203_v54  ;;  %3715 = vmatprep.subr.bf16.mxu1 %v9071_v57  ;;  %v9086_v57 = vld [vmem:[%s10622_s17 + $0x1f4] ss:$24 sps:$4 sm:$0xff]  }
 0x1ea   : > { %3603 = vmatpush2.bf16.msra.mxu0 %v9066_v41  ;;  %3448 = vmatprep.mubr.bf16.mxu0 %v11210_v46  ;;  %v9081_v41 = vld [vmem:[%s10622_s17 + $0x520] ss:$24 sps:$4 sm:$0xff]  }
 0x1eb   : > { %3552 = vmatmul.mubr.bf16.gmra.mxu1 %v11486_v42  ;;  %3604 = vmatprep.subr.bf16.mxu0 %v9074_v60  ;;  %v9089_v60 = vld [vmem:[%s10622_s17 + $0x4f4] ss:$24 sps:$4 sm:$0xff]  }
 0x1ec   : > { %3716 = vmatpush2.bf16.msra.mxu1 %v9069_v26  ;;  %3561 = vmatprep.mubr.bf16.mxu1 %v11493_v16  ;;  %v9084_v26 = vld [vmem:[%s10622_s17 + $0x1f0] ss:$24 sps:$4 sm:$0xff]  }
 0x1ed   : > { %3717 = vmatprep.subr.bf16.mxu1 %v9077_v10  ;;  %v1434_v10 = vlaneseq }
 0x1ee   : > { %3605 = vmatpush2.bf16.msra.mxu0 %v9072_v39  ;;  %v9092_v39 = vld [vmem:[%s10622_s17 + $0x1c4] ss:$24 sps:$4 sm:$0xff]  }
 0x1ef   : > { %3606 = vmatprep.subr.bf16.mxu0 %v9080_v30  ;;  %v9087_v30 = vld [vmem:[%s10622_s17 + $0x4f0] ss:$24 sps:$4 sm:$0xff]  }
 0x1f0   : > { %3718 = vmatpush2.bf16.msra.mxu1 %v9075_v62  ;;  %v9095_v62 = vld [vmem:[%s10622_s17 + $0x4c4] ss:$24 sps:$4 sm:$0xff]  }
 0x1f1   : > { %3449 = vmatmul.mubr.bf16.gmra.mxu0 %v11255_v2  ;;  %3719 = vmatprep.subr.bf16.mxu1 %v9083_v40  ;;  %v9090_v40 = vld [vmem:[%s10622_s17 + $0x1c0] ss:$24 sps:$4 sm:$0xff]  }
 0x1f2   : > { %3607 = vmatpush2.bf16.msra.mxu0 %v9078_v50  ;;  %3458 = vmatprep.mubr.bf16.mxu0 %v11265_v4  ;;  %v11644_v50 = vshrl.u32 %v1434_v10, 7  ;;  %v9104_v10 = vld [vmem:[%s10622_s17 + $0x764] ss:$24 sps:$4 sm:$0xff]  }
 0x1f3   : > { %3562 = vmatmul.mubr.bf16.gmra.mxu1 %v11518_v20  ;;  %3608 = vmatprep.subr.bf16.mxu0 %v9086_v57  ;;  %v9093_v57 = vld [vmem:[%s10622_s17 + $0x4c0] ss:$24 sps:$4 sm:$0xff]  }
 0x1f4   : > { %3720 = vmatpush2.bf16.msra.mxu1 %v9081_v41  ;;  %3571 = vmatprep.mubr.bf16.mxu1 %v11524_v43  ;;  %14723 = vst [vmem:[#allocation113_spill] sm:$0xff] %v11644_v50  ;;  %v9096_v41 = vld [vmem:[%s10622_s17 + $0x190] ss:$24 sps:$4 sm:$0xff]  }
 0x1f5   : > { %3721 = vmatprep.subr.bf16.mxu1 %v9089_v60  ;;  %v1432_v60 = vld [vmem:[%s10615_s10] sm:$0x3f] }
 0x1f6   : > { %3609 = vmatpush2.bf16.msra.mxu0 %v9084_v26  ;;  %v14540_v26 = vsub.s32 0, %v11644_v50 }
 0x1f7   : > { %3610 = vmatprep.subr.bf16.mxu0 %v9092_v39  ;;  %v9099_v39 = vld [vmem:[%s10622_s17 + $0x490] ss:$24 sps:$4 sm:$0xff]  }
 0x1f8   : > { %3722 = vmatpush2.bf16.msra.mxu1 %v9087_v30  ;;  %v9102_v30 = vld [vmem:[%s10622_s17 + $0x760] ss:$24 sps:$4 sm:$0xff]   ;;  %v11664_v21 = vrot.slane %v1432_v60, %v14540_v26 }
 0x1f9   : > { %3459 = vmatmul.mubr.bf16.gmra.mxu0 %v11300_v59  ;;  %3723 = vmatprep.subr.bf16.mxu1 %v9095_v62  ;;  %v14541_v62 = vsub.s32 1, %v11644_v50 }
 0x1fa   : > { %3611 = vmatpush2.bf16.msra.mxu0 %v9090_v40  ;;  %3614 = vmatprep.mubr.bf16.mxu0 %v10874_v18  ;;  %v9107_v18 = vld [vmem:[%s10622_s17 + $0x734] ss:$24 sps:$4 sm:$0xff]  }
 0x1fb   : > { %3572 = vmatmul.mubr.bf16.gmra.mxu1 %v11544_v5  ;;  %3612 = vmatprep.subr.bf16.mxu0 %v9098_v45  ;;  %v9131_v40 = vld [vmem:[%s10620_s11 + $0x154] ss:$24 sps:$4 sm:$0xff]   ;;  %v9129_v45 = vld [vmem:[%s10620_s11 + $0x150] ss:$24 sps:$4 sm:$0xff]  }
 0x1fc   : > { %3724 = vmatpush2.bf16.msra.mxu1 %v9093_v57  ;;  %3727 = vmatprep.mubr.bf16.mxu1 %v10888_v24  ;;  %v11670_v57 = vrot.slane %v1432_v60, %v14541_v62  ;;  %v9105_v24 = vld [vmem:[%s10622_s17 + $0x730] ss:$24 sps:$4 sm:$0xff]   ;;  %v9143_v60 = vld [vmem:[%s10620_s11 + $0xf4] ss:$24 sps:$4 sm:$0xff]  }
 0x1fd   : > { %3725 = vmatprep.subr.bf16.mxu1 %v9101_v31 }
 0x1fe   : > { %3613 = vmatpush2.bf16.msra.mxu0 %v9096_v41 }
 0x1ff   : > { %3808 = vmatprep.subr.bf16.mxu0 %v9104_v10  ;;  %v9135_v10 = vld [vmem:[%s10620_s11 + $0x120] ss:$24 sps:$4 sm:$0xff]  }
 0x200   : > { %3726 = vmatpush2.bf16.msra.mxu1 %v9099_v39 }
 0x201   : > { %v2938_v31 = vpop.f32.mrf.mxu0  ;;  %3615 = vmatmul.mubr.bf16.vlgmr.msra.gmra.mxu0 %v10927_v47  ;;  %6273 = vmatprep.subr.bf16.mxu1 %v9131_v40  ;;  %v9108_v40 = vld [vmem:[%s10622_s17 + $0x700] ss:$24 sps:$4 sm:$0xff]  }
 0x202   : > { %v2939_v41 = vadd.f32 %v2938_v31, %v11664_v21  ;;  %3809 = vmatpush1.bf16.msra.mxu0 %v9102_v30  ;;  %3624 = vmatprep.mubr.bf16.mxu0 %v10938_v51  ;;  %v9113_v31 = vld [vmem:[%s10622_s17 + $0x6d4] ss:$24 sps:$4 sm:$0xff]  }
 0x203   : > { %v2940_v26 = vpop.f32.mrf.mxu0  ;;  %v3051_v39 = vpop.f32.mrf.mxu1  ;;  %3728 = vmatmul.mubr.bf16.vlgmr.msra.gmra.mxu1 %v10942_v52  ;;  %3810 = vmatprep.subr.bf16.mxu0 %v9107_v18  ;;  %v9141_v18 = vld [vmem:[%s10620_s11 + $0xf0] ss:$24 sps:$4 sm:$0xff]  }
 0x204   : > { %v2941_v62 = vadd.f32 %v2940_v26, %v11670_v57  ;;  %v11681_v47 = vadd.f32 %v3051_v39, %v2939_v41  ;;  %3737 = vmatprep.mubr.bf16.mxu1 %v10948_v55  ;;  %6274 = vmatpush1.bf16.msra.mxu1 %v9129_v45  ;;  %v9149_v39 = vld [vmem:[%s10620_s11 + $0xc4] ss:$24 sps:$4 sm:$0xff]   ;;  %v9111_v55 = vld [vmem:[%s10622_s17 + $0x6d0] ss:$24 sps:$4 sm:$0xff]  }
 0x205   : > { %v2942_v30 = vpop.f32.mrf.mxu0  ;;  %v3053_v51 = vpop.f32.mrf.mxu1  ;;  %6275 = vmatprep.subr.bf16.mxu1 %v9137_v44 }
 0x206   : > { %v2943_v38 = vadd.f32 %v2942_v30, %v11664_v21  ;;  %v11687_v52 = vadd.f32 %v3053_v51, %v2941_v62  ;;  %3811 = vmatpush1.bf16.msra.mxu0 %v9105_v24  ;;  %v9116_v62 = vld [vmem:[%s10622_s17 + $0x6a4] ss:$24 sps:$4 sm:$0xff]  }
 0x207   : > { %v11690_v26 = vpop.f32.mrf.mxu0  ;;  %v3055_v41 = vpop.f32.mrf.mxu1  ;;  %3812 = vmatprep.subr.bf16.mxu0 %v9110_v15  ;;  %v9147_v15 = vld [vmem:[%s10620_s11 + $0xc0] ss:$24 sps:$4 sm:$0xff]  }
 0x208   : > { %v11693_v5 = vadd.f32 %v3055_v41, %v2943_v38  ;;  %6276 = vmatpush1.bf16.msra.mxu1 %v9135_v10  ;;  %v9155_v10 = vld [vmem:[%s10620_s11 + $0x94] ss:$24 sps:$4 sm:$0xff]  }
 0x209   : > { %v2948_v45 = vpop.f32.mrf.mxu0  ;;  %v11696_v44 = vpop.f32.mrf.mxu1  ;;  %3625 = vmatmul.mubr.bf16.gmra.mxu0 %v10979_v3  ;;  %6277 = vmatprep.subr.bf16.mxu1 %v9143_v60  ;;  %v9114_v60 = vld [vmem:[%s10622_s17 + $0x6a0] ss:$24 sps:$4 sm:$0xff]   ;;  %v9119_v41 = vld [vmem:[%s10622_s17 + $0x674] ss:$24 sps:$4 sm:$0xff]  }
 0x20a   : > { %v2949_v24 = vadd.f32 %v2948_v45, %v11664_v21  ;;  %3813 = vmatpush1.bf16.msra.mxu0 %v9108_v40  ;;  %3634 = vmatprep.mubr.bf16.mxu0 %v10990_v7 }
 0x20b   : > { %v2950_v38 = vpop.f32.mrf.mxu0  ;;  %v3061_v30 = vpop.f32.mrf.mxu1  ;;  %3738 = vmatmul.mubr.bf16.gmra.mxu1 %v10994_v8  ;;  %3814 = vmatprep.subr.bf16.mxu0 %v9113_v31  ;;  %v9153_v31 = vld [vmem:[%s10620_s11 + $0x90] ss:$24 sps:$4 sm:$0xff]  }
 0x20c   : > { %v2951_v51 = vadd.f32 %v2950_v38, %v11670_v57  ;;  %v11706_v3 = vadd.f32 %v3061_v30, %v2949_v24  ;;  %3747 = vmatprep.mubr.bf16.mxu1 %v11000_v11  ;;  %6278 = vmatpush1.bf16.msra.mxu1 %v9141_v18  ;;  %v9161_v30 = vld [vmem:[%s10620_s11 + $0x64] ss:$24 sps:$4 sm:$0xff]   ;;  %v9117_v11 = vld [vmem:[%s10622_s17 + $0x670] ss:$24 sps:$4 sm:$0xff]  }
 0x20d   : > { %v2952_v40 = vpop.f32.mrf.mxu0  ;;  %v3063_v7 = vpop.f32.mrf.mxu1  ;;  %6279 = vmatprep.subr.bf16.mxu1 %v9149_v39  ;;  %v9122_v39 = vld [vmem:[%s10622_s17 + $0x644] ss:$24 sps:$4 sm:$0xff]  }
 0x20e   : > { %v2953_v45 = vadd.f32 %v2952_v40, %v11664_v21  ;;  %v11712_v8 = vadd.f32 %v3063_v7, %v2951_v51  ;;  %3815 = vmatpush1.bf16.msra.mxu0 %v9111_v55 }
 0x20f   : > { %v11715_v38 = vpop.f32.mrf.mxu0  ;;  %v3065_v24 = vpop.f32.mrf.mxu1  ;;  %3816 = vmatprep.subr.bf16.mxu0 %v9116_v62 }
 0x210   : > { %v11718_v43 = vadd.f32 %v3065_v24, %v2953_v45  ;;  %6280 = vmatpush1.bf16.msra.mxu1 %v9147_v15  ;;  %v9159_v15 = vld [vmem:[%s10620_s11 + $0x60] ss:$24 sps:$4 sm:$0xff]   ;;  %v9125_v45 = vld [vmem:[%s10622_s17 + $0x614] ss:$24 sps:$4 sm:$0xff]  }
 0x211   : > { %v2958_v18 = vpop.f32.mrf.mxu0  ;;  %v11721_v20 = vpop.f32.mrf.mxu1  ;;  %3635 = vmatmul.mubr.bf16.gmra.mxu0 %v11031_v29  ;;  %6281 = vmatprep.subr.bf16.mxu1 %v9155_v10  ;;  %v9120_v29 = vld [vmem:[%s10622_s17 + $0x640] ss:$24 sps:$4 sm:$0xff]   ;;  %v9167_v10 = vld [vmem:[%s10620_s11 + $0x34] ss:$24 sps:$4 sm:$0xff]  }
 0x212   : > { %v2959_v55 = vadd.f32 %v2958_v18, %v11664_v21  ;;  %3817 = vmatpush1.bf16.msra.mxu0 %v9114_v60  ;;  %3644 = vmatprep.mubr.bf16.mxu0 %v11042_v33 }
 0x213   : > { %v2960_v62 = vpop.f32.mrf.mxu0  ;;  %v3071_v51 = vpop.f32.mrf.mxu1  ;;  %3748 = vmatmul.mubr.bf16.gmra.mxu1 %v11046_v34  ;;  %3818 = vmatprep.subr.bf16.mxu0 %v9119_v41 }
 0x214   : > { %v2961_v40 = vadd.f32 %v2960_v62, %v11670_v57  ;;  %v11730_v7 = vadd.f32 %v3071_v51, %v2959_v55  ;;  %3757 = vmatprep.mubr.bf16.mxu1 %v11052_v37  ;;  %6282 = vmatpush1.bf16.msra.mxu1 %v9153_v31  ;;  %v9165_v55 = vld [vmem:[%s10620_s11 + $0x30] ss:$24 sps:$4 sm:$0xff]   ;;  %v9173_v31 = vld [vmem:[%s10620_s11 + $0x4] ss:$24 sps:$4 sm:$0xff]  }
 0x215   : > { %v2962_v60 = vpop.f32.mrf.mxu0  ;;  %v3073_v33 = vpop.f32.mrf.mxu1  ;;  %6283 = vmatprep.subr.bf16.mxu1 %v9161_v30  ;;  %v9123_v37 = vld [vmem:[%s10622_s17 + $0x610] ss:$24 sps:$4 sm:$0xff]   ;;  %v9128_v30 = vld [vmem:[%s10622_s17 + $0x8e4] ss:$24 sps:$4 sm:$0xff]  }
 0x216   : > { %v2963_v34 = vadd.f32 %v2962_v60, %v11664_v21  ;;  %v11737_v41 = vadd.f32 %v3073_v33, %v2961_v40  ;;  %3819 = vmatpush1.bf16.msra.mxu0 %v9117_v11 }
 0x217   : > { %v11739_v24 = vpop.f32.mrf.mxu0  ;;  %v3075_v18 = vpop.f32.mrf.mxu1  ;;  %3820 = vmatprep.subr.bf16.mxu0 %v9122_v39 }
 0x218   : > { %v11742_v62 = vadd.f32 %v3075_v18, %v2963_v34  ;;  %6284 = vmatpush1.bf16.msra.mxu1 %v9159_v15  ;;  %v9171_v15 = vld [vmem:[%s10620_s11] ss:$24 sps:$4 sm:$0xff]   ;;  %v9134_v34 = vld [vmem:[%s10622_s17 + $0x8b4] ss:$24 sps:$4 sm:$0xff]  }
 0x219   : > { %v2968_v51 = vpop.f32.mrf.mxu0  ;;  %v11746_v16 = vpop.f32.mrf.mxu1  ;;  %3645 = vmatmul.mubr.bf16.gmra.mxu0 %v11083_v6  ;;  %6285 = vmatprep.subr.bf16.mxu1 %v9167_v10  ;;  %v9126_v6 = vld [vmem:[%s10622_s17 + $0x8e0] ss:$24 sps:$4 sm:$0xff]  }
 0x21a   : > { %v2969_v11 = vadd.f32 %v2968_v51, %v11664_v21  ;;  %3821 = vmatpush1.bf16.msra.mxu0 %v9120_v29  ;;  %3654 = vmatprep.mubr.bf16.mxu0 %v11094_v13  ;;  %v9176_v29 = vld [vmem:[%s10620_s11 + $0x2d4] ss:$24 sps:$4 sm:$0xff]  }
 0x21b   : > { %v2970_v39 = vpop.f32.mrf.mxu0  ;;  %v3081_v40 = vpop.f32.mrf.mxu1  ;;  %3758 = vmatmul.mubr.bf16.gmra.mxu1 %v11098_v17  ;;  %3822 = vmatprep.subr.bf16.mxu0 %v9125_v45 }
 0x21c   : > { %v2971_v60 = vadd.f32 %v2970_v39, %v11670_v57  ;;  %v11755_v33 = vadd.f32 %v3081_v40, %v2969_v11  ;;  %3767 = vmatprep.mubr.bf16.mxu1 %v11104_v32  ;;  %6286 = vmatpush1.bf16.msra.mxu1 %v9165_v55  ;;  %v9174_v11 = vld [vmem:[%s10620_s11 + $0x2d0] ss:$24 sps:$4 sm:$0xff]   ;;  %v9179_v55 = vld [vmem:[%s10620_s11 + $0x2a4] ss:$24 sps:$4 sm:$0xff]  }
 0x21d   : > { %v2972_v10 = vpop.f32.mrf.mxu0  ;;  %v3083_v13 = vpop.f32.mrf.mxu1  ;;  %6287 = vmatprep.subr.bf16.mxu1 %v9173_v31  ;;  %v9132_v32 = vld [vmem:[%s10622_s17 + $0x8b0] ss:$24 sps:$4 sm:$0xff]   ;;  %v9140_v31 = vld [vmem:[%s10622_s17 + $0x884] ss:$24 sps:$4 sm:$0xff]  }
 0x21e   : > { %v2973_v17 = vadd.f32 %v2972_v10, %v11664_v21  ;;  %v11762_v45 = vadd.f32 %v3083_v13, %v2971_v60  ;;  %3823 = vmatpush1.bf16.msra.mxu0 %v9123_v37 }
 0x21f   : > { %v11764_v18 = vpop.f32.mrf.mxu0  ;;  %v3085_v51 = vpop.f32.mrf.mxu1  ;;  %3824 = vmatprep.subr.bf16.mxu0 %v9128_v30 }
 0x220   : > { %v11767_v39 = vadd.f32 %v3085_v51, %v2973_v17  ;;  %6288 = vmatpush1.bf16.msra.mxu1 %v9171_v15  ;;  %v9177_v15 = vld [vmem:[%s10620_s11 + $0x2a0] ss:$24 sps:$4 sm:$0xff]   ;;  %v9146_v17 = vld [vmem:[%s10622_s17 + $0x854] ss:$24 sps:$4 sm:$0xff]  }
 0x221   : > { %v2978_v40 = vpop.f32.mrf.mxu0  ;;  %v11771_v42 = vpop.f32.mrf.mxu1  ;;  %3655 = vmatmul.mubr.bf16.gmra.mxu0 %v11135_v56  ;;  %6289 = vmatprep.subr.bf16.mxu1 %v9176_v29  ;;  %v9138_v56 = vld [vmem:[%s10622_s17 + $0x880] ss:$24 sps:$4 sm:$0xff]  }
 0x222   : > { %v2979_v37 = vadd.f32 %v2978_v40, %v11664_v21  ;;  %3825 = vmatpush2.bf16.msra.mxu0 %v9126_v6  ;;  %3664 = vmatprep.mubr.bf16.mxu0 %v11146_v61  ;;  %v9182_v6 = vld [vmem:[%s10620_s11 + $0x274] ss:$24 sps:$4 sm:$0xff]  }
 0x223   : > { %v2980_v30 = vpop.f32.mrf.mxu0  ;;  %v3091_v60 = vpop.f32.mrf.mxu1  ;;  %3768 = vmatmul.mubr.bf16.gmra.mxu1 %v11150_v36  ;;  %3826 = vmatprep.subr.bf16.mxu0 %v9134_v34 }
 0x224   : > { %v2981_v10 = vadd.f32 %v2980_v30, %v11670_v57  ;;  %v11780_v13 = vadd.f32 %v3091_v60, %v2979_v37  ;;  %3777 = vmatprep.mubr.bf16.mxu1 %v11156_v35  ;;  %6290 = vmatpush2.bf16.msra.mxu1 %v9174_v11  ;;  %v9180_v37 = vld [vmem:[%s10620_s11 + $0x270] ss:$24 sps:$4 sm:$0xff]   ;;  %v9185_v30 = vld [vmem:[%s10620_s11 + $0x244] ss:$24 sps:$4 sm:$0xff]  }
 0x225   : > { %v2982_v29 = vpop.f32.mrf.mxu0  ;;  %v3093_v61 = vpop.f32.mrf.mxu1  ;;  %6291 = vmatprep.subr.bf16.mxu1 %v9179_v55  ;;  %v9144_v11 = vld [vmem:[%s10622_s17 + $0x850] ss:$24 sps:$4 sm:$0xff]  }
 0x226   : > { %v2983_v36 = vadd.f32 %v2982_v29, %v11664_v21  ;;  %v11787_v34 = vadd.f32 %v3093_v61, %v2981_v10  ;;  %3827 = vmatpush2.bf16.msra.mxu0 %v9132_v32  ;;  %v9152_v10 = vld [vmem:[%s10622_s17 + $0x824] ss:$24 sps:$4 sm:$0xff]  }
 0x227   : > { %v11789_v51 = vpop.f32.mrf.mxu0  ;;  %v3095_v40 = vpop.f32.mrf.mxu1  ;;  %3828 = vmatprep.subr.bf16.mxu0 %v9140_v31  ;;  %v9183_v31 = vld [vmem:[%s10620_s11 + $0x240] ss:$24 sps:$4 sm:$0xff]  }
 0x228   : > { %v11792_v35 = vadd.f32 %v3095_v40, %v2983_v36  ;;  %6292 = vmatpush2.bf16.msra.mxu1 %v9177_v15  ;;  %v9188_v15 = vld [vmem:[%s10620_s11 + $0x214] ss:$24 sps:$4 sm:$0xff]  }
 0x229   : > { %v2988_v60 = vpop.f32.mrf.mxu0  ;;  %v11796_v55 = vpop.f32.mrf.mxu1  ;;  %3665 = vmatmul.mubr.bf16.gmra.mxu0 %v11187_v53  ;;  %6293 = vmatprep.subr.bf16.mxu1 %v9182_v6  ;;  %v9150_v6 = vld [vmem:[%s10622_s17 + $0x820] ss:$24 sps:$4 sm:$0xff]   ;;  %v9158_v40 = vld [vmem:[%s10622_s17 + $0x7f4] ss:$24 sps:$4 sm:$0xff]  }
 0x22a   : > { %v2989_v32 = vadd.f32 %v2988_v60, %v11664_v21  ;;  %3829 = vmatpush2.bf16.msra.mxu0 %v9138_v56  ;;  %3674 = vmatprep.mubr.bf16.mxu0 %v11199_v23 }
 0x22b   : > { %v2990_v29 = vpop.f32.mrf.mxu0  ;;  %v3101_v61 = vpop.f32.mrf.mxu1  ;;  %3778 = vmatmul.mubr.bf16.gmra.mxu1 %v11203_v54  ;;  %3830 = vmatprep.subr.bf16.mxu0 %v9146_v17  ;;  %v9186_v17 = vld [vmem:[%s10620_s11 + $0x210] ss:$24 sps:$4 sm:$0xff]  }
 0x22c   : > { %v2991_v36 = vadd.f32 %v2990_v29, %v11670_v57  ;;  %v11806_v53 = vadd.f32 %v3101_v61, %v2989_v32  ;;  %3787 = vmatprep.mubr.bf16.mxu1 %v11210_v46  ;;  %6294 = vmatpush2.bf16.msra.mxu1 %v9180_v37  ;;  %v9191_v61 = vld [vmem:[%s10620_s11 + $0x1e4] ss:$24 sps:$4 sm:$0xff]   ;;  %v9156_v46 = vld [vmem:[%s10622_s17 + $0x7f0] ss:$24 sps:$4 sm:$0xff]  }
 0x22d   : > { %v2992_v56 = vpop.f32.mrf.mxu0  ;;  %v3103_v23 = vpop.f32.mrf.mxu1  ;;  %6295 = vmatprep.subr.bf16.mxu1 %v9185_v30 }
 0x22e   : > { %14724 = vst [vmem:[#allocation114_spill] sm:$0xff] %v11806_v53  ;;  %v2993_v60 = vadd.f32 %v2992_v56, %v11664_v21  ;;  %v11812_v54 = vadd.f32 %v3103_v23, %v2991_v36  ;;  %3831 = vmatpush2.bf16.msra.mxu0 %v9144_v11  ;;  %v9164_v36 = vld [vmem:[%s10622_s17 + $0x7c4] ss:$24 sps:$4 sm:$0xff]  }
 0x22f   : > { %v11815_v29 = vpop.f32.mrf.mxu0  ;;  %v3105_v32 = vpop.f32.mrf.mxu1  ;;  %3832 = vmatprep.subr.bf16.mxu0 %v9152_v10  ;;  %v9189_v10 = vld [vmem:[%s10620_s11 + $0x1e0] ss:$24 sps:$4 sm:$0xff]  }
 0x230   : > { %v11818_v53 = vadd.f32 %v3105_v32, %v2993_v60  ;;  %6296 = vmatpush2.bf16.msra.mxu1 %v9183_v31  ;;  %v9194_v31 = vld [vmem:[%s10620_s11 + $0x1b4] ss:$24 sps:$4 sm:$0xff]  }
 0x231   : > { %v2998_v37 = vpop.f32.mrf.mxu0  ;;  %v11821_v30 = vpop.f32.mrf.mxu1  ;;  %3675 = vmatmul.mubr.bf16.gmra.mxu0 %v11239_v28  ;;  %6297 = vmatprep.subr.bf16.mxu1 %v9188_v15  ;;  %v9162_v15 = vld [vmem:[%s10622_s17 + $0x7c0] ss:$24 sps:$4 sm:$0xff]   ;;  %v9170_v32 = vld [vmem:[%s10622_s17 + $0x794] ss:$24 sps:$4 sm:$0xff]  }
 0x232   : > { %14725 = vst [vmem:[#allocation115_spill] sm:$0xff] %v11821_v30  ;;  %v2999_v11 = vadd.f32 %v2998_v37, %v11664_v21  ;;  %3833 = vmatpush2.bf16.msra.mxu0 %v9150_v6  ;;  %3684 = vmatprep.mubr.bf16.mxu0 %v11251_v63 }
 0x233   : > { %v3000_v56 = vpop.f32.mrf.mxu0  ;;  %v3111_v23 = vpop.f32.mrf.mxu1  ;;  %3788 = vmatmul.mubr.bf16.gmra.mxu1 %v11255_v2  ;;  %3834 = vmatprep.subr.bf16.mxu0 %v9158_v40  ;;  %v9192_v2 = vld [vmem:[%s10620_s11 + $0x1b0] ss:$24 sps:$4 sm:$0xff]  }
 0x234   : > { %v3001_v60 = vadd.f32 %v3000_v56, %v11670_v57  ;;  %v11831_v28 = vadd.f32 %v3111_v23, %v2999_v11  ;;  %3797 = vmatprep.mubr.bf16.mxu1 %v11265_v4  ;;  %6298 = vmatpush2.bf16.msra.mxu1 %v9186_v17  ;;  %v9197_v56 = vld [vmem:[%s10620_s11 + $0x184] ss:$24 sps:$4 sm:$0xff]   ;;  %v9168_v4 = vld [vmem:[%s10622_s17 + $0x790] ss:$24 sps:$4 sm:$0xff]  }
 0x235   : > { %v3002_v6 = vpop.f32.mrf.mxu0  ;;  %v3113_v63 = vpop.f32.mrf.mxu1  ;;  %6299 = vmatprep.subr.bf16.mxu1 %v9191_v61 }
 0x236   : > { %14726 = vst [vmem:[#allocation116_spill] sm:$0xff] %v11831_v28  ;;  %v3003_v37 = vadd.f32 %v3002_v6, %v11664_v21  ;;  %v11837_v30 = vadd.f32 %v3113_v63, %v3001_v60  ;;  %3835 = vmatpush2.bf16.msra.mxu0 %v9156_v46  ;;  %v9195_v46 = vld [vmem:[%s10620_s11 + $0x180] ss:$24 sps:$4 sm:$0xff]  }
 0x237   : > { %v11840_v40 = vpop.f32.mrf.mxu0  ;;  %v3115_v11 = vpop.f32.mrf.mxu1  ;;  %3836 = vmatprep.subr.bf16.mxu0 %v9164_v36 }
 0x238   : > { %v11843_v23 = vadd.f32 %v3115_v11, %v3003_v37  ;;  %6300 = vmatpush2.bf16.msra.mxu1 %v9189_v10  ;;  %v9200_v10 = vld [vmem:[%s10620_s11 + $0x454] ss:$24 sps:$4 sm:$0xff]   ;;  %v9198_v37 = vld [vmem:[%s10620_s11 + $0x450] ss:$24 sps:$4 sm:$0xff]  }
 0x239   : > { %v3008_v17 = vpop.f32.mrf.mxu0  ;;  %v11846_v28 = vpop.f32.mrf.mxu1  ;;  %3685 = vmatmul.mubr.bf16.gmra.mxu0 %v11290_v27  ;;  %6301 = vmatprep.subr.bf16.mxu1 %v9194_v31 }
 0x23a   : > { %v3009_v61 = vadd.f32 %v3008_v17, %v11664_v21  ;;  %3837 = vmatpush2.bf16.msra.mxu0 %v9162_v15  ;;  %3840 = vmatprep.mubr.bf16.mxu0 %v11296_v12 }
 0x23b   : > { %v3010_v36 = vpop.f32.mrf.mxu0  ;;  %v3121_v60 = vpop.f32.mrf.mxu1  ;;  %3798 = vmatmul.mubr.bf16.gmra.mxu1 %v11300_v59  ;;  %3838 = vmatprep.subr.bf16.mxu0 %v9170_v32  ;;  %v9203_v32 = vld [vmem:[%s10620_s11 + $0x424] ss:$24 sps:$4 sm:$0xff]  }
 0x23c   : > { %v3011_v6 = vadd.f32 %v3010_v36, %v11670_v57  ;;  %v11855_v63 = vadd.f32 %v3121_v60, %v3009_v61  ;;  %6302 = vmatpush2.bf16.msra.mxu1 %v9192_v2 }
 0x23d   : > { %v3012_v27 = vpop.f32.mrf.mxu0  ;;  %v3123_v31 = vpop.f32.mrf.mxu1  ;;  %6303 = vmatprep.subr.bf16.mxu1 %v9197_v56 }
 0x23e   : > { %v3013_v15 = vadd.f32 %v3012_v27, %v11664_v21  ;;  %v11858_v12 = vadd.f32 %v3123_v31, %v3011_v6  ;;  %3839 = vmatpush2.bf16.msra.mxu0 %v9168_v4  ;;  %v2945_v21 = vadd.f32 %v11690_v26, %v11670_v57  ;;  %v9201_v4 = vld [vmem:[%s10620_s11 + $0x420] ss:$24 sps:$4 sm:$0xff]   ;;  %v9204_v31 = vld [vmem:[%s10620_s11 + $0x3f0] ss:$24 sps:$4 sm:$0xff]  }
 0x23f   : > { %v11861_v11 = vpop.f32.mrf.mxu0  ;;  %v3125_v59 = vpop.f32.mrf.mxu1  ;;  %6386 = vmatprep.subr.bf16.mxu0 %v9200_v10 }
 0x240   : > { %14727 = vst [vmem:[#allocation117_spill] sm:$0xff] %v11858_v12  ;;  %v11864_v17 = vadd.f32 %v3125_v59, %v3013_v15  ;;  %6304 = vmatpush2.bf16.msra.mxu1 %v9195_v46  ;;  %v9206_v46 = vld [vmem:[%s10620_s11 + $0x3f4] ss:$24 sps:$4 sm:$0xff]  }
 0x241   : > { %v11866_v2 = vpop.f32.mrf.mxu1  ;;  %v3164_v61 = vpop.f32.mrf.mxu0  ;;  %3841 = vmatmul.mubr.bf16.vlgmr.msra.gmra.mxu0 %v11326_v9 }
 0x242   : > { %14728 = vst [vmem:[#allocation118_spill] sm:$0xff] %v11864_v17  ;;  %v11872_v56 = vadd.f32 %v3164_v61, %v11681_v47  ;;  %3850 = vmatprep.mubr.bf16.mxu0 %v11333_v49  ;;  %6387 = vmatpush1.bf16.msra.mxu0 %v9198_v37  ;;  %v3058_v47 = vadd.f32 %v11696_v44, %v2945_v21 }
 0x243   : > { %v3166_v36 = vpop.f32.mrf.mxu0  ;;  %v11876_v60 = vpop.f32.mrf.mxu1  ;;  %6388 = vmatprep.subr.bf16.mxu0 %v9203_v32 }
 0x244   : > { %v4017_v10 = vmul.f32 0.70710677, %v11872_v56  ;;  %v11881_v9 = vadd.f32 %v3166_v36, %v11687_v52  ;;  %v9209_v52 = vld [vmem:[%s10620_s11 + $0x3c4] ss:$24 sps:$4 sm:$0xff]   ;;  %v9207_v36 = vld [vmem:[%s10620_s11 + $0x3c0] ss:$24 sps:$4 sm:$0xff]  }
 0x245   : > { %v3168_v26 = vpop.f32.mrf.mxu0  ;;  %v11883_v6 = vpop.f32.mrf.mxu1 }
 0x246   : > { %9582 = verf.f32 %v4017_v10  ;;  %v4018_v49 = vmul.f32 0.70710677, %v11881_v9  ;;  %v11888_v27 = vadd.f32 %v3168_v26, %v11693_v5  ;;  %6389 = vmatpush1.bf16.msra.mxu0 %v9201_v4  ;;  %v2955_v5 = vadd.f32 %v11715_v38, %v11670_v57 }
 0x247   : > { %v3170_v15 = vpop.f32.mrf.mxu0  ;;  %v11891_v37 = vpop.f32.mrf.mxu1  ;;  %6390 = vmatprep.subr.bf16.mxu0 %v9206_v46 }
 0x248   : > { %9584 = verf.f32 %v4018_v49  ;;  %v4023_v59 = vmul.f32 0.70710677, %v11888_v27  ;;  %v11895_v32 = vadd.f32 %v3170_v15, %v3058_v47  ;;  %v9210_v15 = vld [vmem:[%s10620_s11 + $0x390] ss:$24 sps:$4 sm:$0xff]  }
 0x249   : > { %v3174_v44 = vpop.f32.mrf.mxu0  ;;  %v11897_v61 = vpop.f32.mrf.mxu1  ;;  %3851 = vmatmul.mubr.bf16.gmra.mxu0 %v11358_v14  ;;  %v9212_v14 = vld [vmem:[%s10620_s11 + $0x394] ss:$24 sps:$4 sm:$0xff]  }
 0x24a   : > { %9586 = verf.f32 %v4023_v59  ;;  %v4024_v21 = vmul.f32 0.70710677, %v11895_v32  ;;  %v11904_v4 = vadd.f32 %v3174_v44, %v11706_v3  ;;  %3860 = vmatprep.mubr.bf16.mxu0 %v11364_v19  ;;  %6391 = vmatpush1.bf16.msra.mxu0 %v9204_v31  ;;  %v3068_v19 = vadd.f32 %v11721_v20, %v2955_v5 }
 0x24b   : > { %v3176_v46 = vpop.f32.mrf.mxu0  ;;  %v11908_v10 = vpop.f32.mrf.mxu1  ;;  %6392 = vmatprep.subr.bf16.mxu0 %v9209_v52 }
 0x24c   : > { %9588 = verf.f32 %v4024_v21  ;;  %v4029_v38 = vmul.f32 0.70710677, %v11904_v4  ;;  %v11913_v26 = vadd.f32 %v3176_v46, %v11712_v8  ;;  %v9215_v8 = vld [vmem:[%s10620_s11 + $0x364] ss:$24 sps:$4 sm:$0xff]  }
 0x24d   : > { %v3178_v47 = vpop.f32.mrf.mxu0  ;;  %v11915_v3 = vpop.f32.mrf.mxu1 }
 0x24e   : > { %9590 = verf.f32 %v4029_v38  ;;  %v4030_v49 = vmul.f32 0.70710677, %v11913_v26  ;;  %v11920_v31 = vadd.f32 %v3178_v47, %v11718_v43  ;;  %6393 = vmatpush1.bf16.msra.mxu0 %v9207_v36  ;;  %v2965_v43 = vadd.f32 %v11739_v24, %v11670_v57 }
 0x24f   : > { %v3180_v52 = vpop.f32.mrf.mxu0  ;;  %v11923_v59 = vpop.f32.mrf.mxu1  ;;  %6394 = vmatprep.subr.bf16.mxu0 %v9212_v14  ;;  %v9213_v14 = vld [vmem:[%s10620_s11 + $0x360] ss:$24 sps:$4 sm:$0xff]  }
 0x250   : > { %14729 = vst [vmem:[#allocation119_spill] sm:$0xff] %v11923_v59  ;;  %9592 = verf.f32 %v4030_v49  ;;  %v4035_v44 = vmul.f32 0.70710677, %v11920_v31  ;;  %v11927_v21 = vadd.f32 %v3180_v52, %v3068_v19  ;;  %v9216_v49 = vld [vmem:[%s10620_s11 + $0x330] ss:$24 sps:$4 sm:$0xff]  }
 0x251   : > { %v3184_v20 = vpop.f32.mrf.mxu0  ;;  %v11929_v5 = vpop.f32.mrf.mxu1  ;;  %3861 = vmatmul.mubr.bf16.gmra.mxu0 %v11390_v25  ;;  %v9218_v25 = vld [vmem:[%s10620_s11 + $0x334] ss:$24 sps:$4 sm:$0xff]  }
 0x252   : > { %14730 = vst [vmem:[#allocation120_spill] sm:$0xff] %v11929_v5  ;;  %9594 = verf.f32 %v4035_v44  ;;  %v4036_v36 = vmul.f32 0.70710677, %v11927_v21  ;;  %v11936_v46 = vadd.f32 %v3184_v20, %v11730_v7  ;;  %3870 = vmatprep.mubr.bf16.mxu0 %v11396_v0  ;;  %6395 = vmatpush1.bf16.msra.mxu0 %v9210_v15  ;;  %v3078_v15 = vadd.f32 %v11746_v16, %v2965_v43 }
 0x253   : > { %v9583_v38 = vpop.eup %9582  ;;  %v3186_v47 = vpop.f32.mrf.mxu0  ;;  %6396 = vmatprep.subr.bf16.mxu0 %v9215_v8  ;;  %v9221_v8 = vld [vmem:[%s10620_s11 + $0x304] ss:$24 sps:$4 sm:$0xff]   ;;  %v2975_v5 = vadd.f32 %v11764_v18, %v11670_v57 }
 0x254   : > { %v11940_v19 = vpop.f32.mrf.mxu1  ;;  %9596 = verf.f32 %v4036_v36  ;;  %v4041_v24 = vmul.f32 0.70710677, %v11936_v46  ;;  %v4209_v44 = vadd.f32 1.0, %v9583_v38  ;;  %v11946_v7 = vadd.f32 %v3186_v47, %v11737_v41 }
 0x255   : > { %14731 = vst [vmem:[#allocation121_spill] sm:$0xff] %v11940_v19  ;;  %v9585_v52 = vpop.eup %9584  ;;  %v3188_v20 = vpop.f32.mrf.mxu0  ;;  %v3921_v38 = vmul.f32 0.5, %v11872_v56  ;;  %v3922_v41 = vmul.f32 0.5, %v11881_v9  ;;  %v3928_v56 = vmul.f32 0.5, %v11895_v32 }
 0x256   : > { %v11948_v0 = vpop.f32.mrf.mxu1  ;;  %9598 = verf.f32 %v4041_v24  ;;  %v11952_v19 = vadd.f32 %v3188_v20, %v11742_v62  ;;  %6397 = vmatpush1.bf16.msra.mxu0 %v9213_v14  ;;  %v4042_v47 = vmul.f32 0.70710677, %v11946_v7  ;;  %v4210_v43 = vadd.f32 1.0, %v9585_v52  ;;  %v9219_v20 = vld [vmem:[%s10620_s11 + $0x300] ss:$24 sps:$4 sm:$0xff]  }
 0x257   : > { %14732 = vst [vmem:[#allocation122_spill] sm:$0xff] %v11948_v0  ;;  %v9587_v36 = vpop.eup %9586  ;;  %v3190_v0 = vpop.f32.mrf.mxu0  ;;  %6398 = vmatprep.subr.bf16.mxu0 %v9218_v25  ;;  %v3927_v62 = vmul.f32 0.5, %v11888_v27  ;;  %v4305_v18 = vmul.f32 %v4209_v44, %v3921_v38  ;;  %v9224_v25 = vld [vmem:[%s10620_s11 + $0x5d4] ss:$24 sps:$4 sm:$0xff]  }
 0x258   : > { %v11960_v16 = vpop.f32.mrf.mxu1  ;;  %v4215_v14 = vadd.f32 1.0, %v9587_v36  ;;  %v4047_v24 = vmul.f32 0.70710677, %v11952_v19  ;;  %9600 = verf.f32 %v4042_v47  ;;  %v11966_v9 = vadd.f32 %v3190_v0, %v3078_v15 }
 0x259   : > { %14733 = vst [vmem:[#allocation123_spill] sm:$0xff] %v11960_v16  ;;  %v9589_v17 = vpop.eup %9588  ;;  %v3194_v59 = vpop.f32.mrf.mxu0  ;;  %3871 = vmatmul.mubr.bf16.gmra.mxu0 %v11422_v48  ;;  %v4306_v36 = vmul.f32 %v4210_v43, %v3922_v41  ;;  %v3934_v41 = vmul.f32 0.5, %v11913_v26  ;;  %v9222_v43 = vld [vmem:[%s10620_s11 + $0x5d0] ss:$24 sps:$4 sm:$0xff]  }
 0x25a   : > { %v11968_v12 = vpop.f32.mrf.mxu1  ;;  %v4311_v52 = vmul.f32 %v4215_v14, %v3927_v62  ;;  %v4216_v16 = vadd.f32 1.0, %v9589_v17  ;;  %9602 = verf.f32 %v4047_v24  ;;  %v11973_v27 = vadd.f32 %v3194_v59, %v11755_v33  ;;  %3880 = vmatprep.mubr.bf16.mxu0 %v11428_v1  ;;  %6399 = vmatpush1.bf16.msra.mxu0 %v9216_v49 }
 0x25b   : > { %v9591_v44 = vpop.eup %9590  ;;  %v4048_v32 = vmul.f32 0.70710677, %v11966_v9  ;;  %v3196_v0 = vpop.f32.mrf.mxu0  ;;  %6400 = vmatprep.subr.bf16.mxu0 %v9221_v8  ;;  %v3088_v62 = vadd.f32 %v11771_v42, %v2975_v5  ;;  %v3933_v8 = vmul.f32 0.5, %v11904_v4  ;;  %v3939_v24 = vmul.f32 0.5, %v11920_v31  ;;  %v9227_v42 = vld [vmem:[%s10620_s11 + $0x5a4] ss:$24 sps:$4 sm:$0xff]  }
 0x25c   : > { %v11977_v15 = vpop.f32.mrf.mxu1  ;;  %v11979_v48 = vpack.c.bf16 %v4311_v52, %v4305_v18  ;;  %v4312_v38 = vmul.f32 %v4216_v16, %v3928_v56  ;;  %v4221_v47 = vadd.f32 1.0, %v9591_v44  ;;  %v4053_v33 = vmul.f32 0.70710677, %v11973_v27 }
 0x25d   : > { %v9593_v17 = vpop.eup %9592  ;;  %9604 = verf.f32 %v4048_v32  ;;  %v11983_v1 = vadd.f32 %v3196_v0, %v11762_v45  ;;  %v3198_v59 = vpop.f32.mrf.mxu0  ;;  %v2985_v4 = vadd.f32 %v11789_v51, %v11670_v57  ;;  %v3940_v44 = vmul.f32 0.5, %v11927_v21  ;;  %v9294_v21 = vld [vmem:[%s10620_s11 + $0x750] ss:$24 sps:$4 sm:$0xff]  }
 0x25e   : > { %14734 = vst [vmem:[#allocation124_spill] sm:$0xff] %v11979_v48  ;;  %v11985_v49 = vpop.f32.mrf.mxu1  ;;  %v11991_v16 = vadd.f32 %v3198_v59, %v11767_v39  ;;  %6401 = vmatpush1.bf16.msra.mxu0 %v9219_v20  ;;  %9606 = verf.f32 %v4053_v33  ;;  %v11998_v52 = vpack.c.bf16 %v4312_v38, %v4306_v36  ;;  %v4222_v39 = vadd.f32 1.0, %v9593_v17  ;;  %v9296_v17 = vld [vmem:[%s10620_s11 + $0x754] ss:$24 sps:$4 sm:$0xff]  }
 0x25f   : > { %v9595_v14 = vpop.eup %9594  ;;  %v4054_v45 = vmul.f32 0.70710677, %v11983_v1  ;;  %v3200_v18 = vpop.f32.mrf.mxu0  ;;  %6402 = vmatprep.subr.bf16.mxu0 %v9224_v25  ;;  %v4317_v31 = vmul.f32 %v4221_v47, %v3933_v8  ;;  %6499 = vmatprep.subr.bf16.mxu1 %v9296_v17 }
 0x260   : > { %v11996_v56 = vpop.f32.mrf.mxu1  ;;  %14735 = vst [vmem:[#allocation125_spill] sm:$0xff] %v11998_v52  ;;  %v4227_v26 = vadd.f32 1.0, %v9595_v14  ;;  %v4059_v5 = vmul.f32 0.70710677, %v11991_v16  ;;  %v12005_v32 = vadd.f32 %v3200_v18, %v3088_v62  ;;  %6305 = vmatprep.mubr.bf16.mxu1 %v11998_v52  ;;  %v4318_v8 = vmul.f32 %v4222_v39, %v3934_v41 }
 0x261   : > { %v9597_v20 = vpop.eup %9596  ;;  %9608 = verf.f32 %v4054_v45  ;;  %v3204_v25 = vpop.f32.mrf.mxu0  ;;  %3881 = vmatmul.mubr.bf16.gmra.mxu0 %v11454_v58  ;;  %6306 = vmatmul.mubr.bf16.vlgmr.msra.gmra.mxu1 %v11979_v48  ;;  %v9225_v58 = vld [vmem:[%s10620_s11 + $0x5a0] ss:$24 sps:$4 sm:$0xff]   ;;  %v3098_v41 = vadd.f32 %v11796_v55, %v2985_v4  ;;  %v9233_v55 = vld [vmem:[%s10620_s11 + $0x544] ss:$24 sps:$4 sm:$0xff]  }
 0x262   : > { %v12008_v0 = vpop.f32.mrf.mxu1  ;;  %v4323_v51 = vmul.f32 %v4227_v26, %v3939_v24  ;;  %v4228_v36 = vadd.f32 1.0, %v9597_v20  ;;  %9610 = verf.f32 %v4059_v5  ;;  %v12012_v38 = vadd.f32 %v3204_v25, %v11780_v13  ;;  %3890 = vmatprep.mubr.bf16.mxu0 %v11461_v22  ;;  %6403 = vmatpush2.bf16.msra.mxu0 %v9222_v43  ;;  %v9230_v24 = vld [vmem:[%s10620_s11 + $0x574] ss:$24 sps:$4 sm:$0xff]   ;;  %v9228_v20 = vld [vmem:[%s10620_s11 + $0x570] ss:$24 sps:$4 sm:$0xff]  }
 0x263   : > { %v9599_v47 = vpop.eup %9598  ;;  %v4060_v33 = vmul.f32 0.70710677, %v12005_v32  ;;  %v3206_v59 = vpop.f32.mrf.mxu0  ;;  %6404 = vmatprep.subr.bf16.mxu0 %v9227_v42  ;;  %6500 = vmatpush1.bf16.msra.mxu1 %v9294_v21 }
 0x264   : > { %v12019_v62 = vpop.f32.mrf.mxu1  ;;  %v12022_v14 = vpack.c.bf16 %v4323_v51, %v4317_v31  ;;  %v4324_v13 = vmul.f32 %v4228_v36, %v3940_v44  ;;  %v4065_v22 = vmul.f32 0.70710677, %v12012_v38  ;;  %v12027_v45 = vadd.f32 %v3206_v59, %v11787_v34 }
 0x265   : > { %9612 = verf.f32 %v4060_v33  ;;  %v3208_v18 = vpop.f32.mrf.mxu0  ;;  %v9601_v43 = vpop.eup %9600  ;;  %v4233_v39 = vadd.f32 1.0, %v9599_v47  ;;  %v14548_v34 = vsub.s32 2, %v11644_v50  ;;  %v3945_v44 = vmul.f32 0.5, %v11936_v46  ;;  %v9302_v46 = vld [vmem:[%s10620_s11 + $0x724] ss:$24 sps:$4 sm:$0xff]  }
 0x266   : > { %14736 = vst [vmem:[#allocation126_spill] sm:$0xff] %v12022_v14  ;;  %v12029_v26 = vpop.f32.mrf.mxu1  ;;  %v12033_v5 = vadd.f32 %v3208_v18, %v11792_v35  ;;  %v12035_v42 = vpack.c.bf16 %v4324_v13, %v4318_v8  ;;  %9614 = verf.f32 %v4065_v22  ;;  %v4066_v25 = vmul.f32 0.70710677, %v12027_v45  ;;  %6405 = vmatpush2.bf16.msra.mxu0 %v9225_v58  ;;  %v9300_v13 = vld [vmem:[%s10620_s11 + $0x720] ss:$24 sps:$4 sm:$0xff]   ;;  %6501 = vmatprep.subr.bf16.mxu1 %v9302_v46 }
 0x267   : > { %v9603_v31 = vpop.eup %9602  ;;  %v3210_v51 = vpop.f32.mrf.mxu0  ;;  %v3951_v35 = vmul.f32 0.5, %v11952_v19  ;;  %6406 = vmatprep.subr.bf16.mxu0 %v9230_v24  ;;  %v2995_v47 = vadd.f32 %v11815_v29, %v11670_v57  ;;  %v4234_v59 = vadd.f32 1.0, %v9601_v43  ;;  %v14738_v19 = vld [vmem:[#allocation102_spill] sm:$0xff]  ;;  %v4329_v18 = vmul.f32 %v4233_v39, %v3945_v44  ;;  %v14739_v29 = vld [vmem:[#allocation103_spill] sm:$0xff]  ;;  %6502 = vmatpush1.bf16.msra.mxu1 %v9300_v13 }
 0x268   : > { %14737 = vst [vmem:[#allocation127_spill] sm:$0xff] %v12035_v42  ;;  %v12041_v36 = vpop.f32.mrf.mxu1  ;;  %v4239_v4 = vadd.f32 1.0, %v9603_v31  ;;  %v4071_v21 = vmul.f32 0.70710677, %v12033_v5  ;;  %v12046_v17 = vadd.f32 %v3210_v51, %v3098_v41  ;;  %6315 = vmatprep.mubr.bf16.mxu1 %v12035_v42  ;;  %9616 = verf.f32 %v4066_v25  ;;  %v14740_v51 = vld [vmem:[#allocation114_spill] sm:$0xff] }
 0x269   : > { %v3214_v58 = vpop.f32.mrf.mxu0  ;;  %3891 = vmatmul.mubr.bf16.gmra.mxu0 %v14738_v19  ;;  %6316 = vmatmul.mubr.bf16.gmra.mxu1 %v12022_v14  ;;  %v3946_v43 = vmul.f32 0.5, %v11946_v7  ;;  %v3952_v31 = vmul.f32 0.5, %v11966_v9  ;;  %v9236_v9 = vld [vmem:[%s10620_s11 + $0x514] ss:$24 sps:$4 sm:$0xff]  }
 0x26a   : > { %v12053_v8 = vpop.f32.mrf.mxu1  ;;  %v9605_v22 = vpop.eup %9604  ;;  %v4335_v41 = vmul.f32 %v4239_v4, %v3951_v35  ;;  %9618 = verf.f32 %v4071_v21  ;;  %v4072_v24 = vmul.f32 0.70710677, %v12046_v17  ;;  %3900 = vmatprep.mubr.bf16.mxu0 %v14739_v29  ;;  %v12063_v19 = vadd.f32 %v3214_v58, %v14740_v51  ;;  %6407 = vmatpush2.bf16.msra.mxu0 %v9228_v20  ;;  %v9231_v35 = vld [vmem:[%s10620_s11 + $0x540] ss:$24 sps:$4 sm:$0xff]  }
 0x26b   : > { %v4240_v25 = vadd.f32 1.0, %v9605_v22  ;;  %v3216_v39 = vpop.f32.mrf.mxu0  ;;  %v9607_v4 = vpop.eup %9606  ;;  %6408 = vmatprep.subr.bf16.mxu0 %v9233_v55  ;;  %v9308_v22 = vld [vmem:[%s10620_s11 + $0x6f4] ss:$24 sps:$4 sm:$0xff]   ;;  %v9774_v58 = vld [vmem:[%s10615_s10] sm:$0x3f]  ;;  %v4330_v20 = vmul.f32 %v4234_v59, %v3946_v43  ;;  %v14742_v55 = vsub.s32 3, %v11644_v50 }
 0x26c   : > { %v12065_v44 = vpop.f32.mrf.mxu1  ;;  %v12068_v21 = vpack.c.bf16 %v4335_v41, %v4329_v18  ;;  %9620 = verf.f32 %v4072_v24  ;;  %v12071_v7 = vadd.f32 %v3216_v39, %v11812_v54  ;;  %v12078_v29 = vrot.slane %v9774_v58, %v14548_v34  ;;  %v9306_v41 = vld [vmem:[%s10620_s11 + $0x6f0] ss:$24 sps:$4 sm:$0xff]   ;;  %6503 = vmatprep.subr.bf16.mxu1 %v9308_v22  ;;  %v14743_v43 = vld [vmem:[#allocation115_spill] sm:$0xff] }
 0x26d   : > { %v4336_v51 = vmul.f32 %v4240_v25, %v3952_v31  ;;  %v4077_v46 = vmul.f32 0.70710677, %v12063_v19  ;;  %v3218_v33 = vpop.f32.mrf.mxu0  ;;  %v12086_v13 = vrot.slane %v9774_v58, %v14742_v55  ;;  %v4245_v24 = vadd.f32 1.0, %v9607_v4  ;;  %v9234_v4 = vld [vmem:[%s10620_s11 + $0x510] ss:$24 sps:$4 sm:$0xff]   ;;  %6504 = vmatpush1.bf16.msra.mxu1 %v9306_v41 }
 0x26e   : > { %14741 = vst [vmem:[#allocation102_spill] sm:$0xff] %v12068_v21  ;;  %v12081_v18 = vpop.f32.mrf.mxu1  ;;  %v9609_v54 = vpop.eup %9608  ;;  %v4078_v39 = vmul.f32 0.70710677, %v12071_v7  ;;  %v12090_v34 = vadd.f32 %v3218_v33, %v11818_v53  ;;  %v3108_v31 = vadd.f32 %v14743_v43, %v2995_v47  ;;  %v3957_v25 = vmul.f32 0.5, %v11973_v27  ;;  %6409 = vmatpush2.bf16.msra.mxu0 %v9231_v35  ;;  %v9239_v58 = vld [vmem:[%s10620_s11 + $0x4e4] ss:$24 sps:$4 sm:$0xff]  }
 0x26f   : > { %v9611_v59 = vpop.eup %9610  ;;  %9622 = verf.f32 %v4077_v46  ;;  %v3220_v14 = vpop.f32.mrf.mxu0  ;;  %v12096_v50 = vpack.c.bf16 %v4336_v51, %v4330_v20  ;;  %v3005_v53 = vadd.f32 %v11840_v40, %v11670_v57  ;;  %v3963_v33 = vmul.f32 0.5, %v11991_v16  ;;  %6410 = vmatprep.subr.bf16.mxu0 %v9236_v9  ;;  %v9314_v27 = vld [vmem:[%s10620_s11 + $0x6c4] ss:$24 sps:$4 sm:$0xff]   ;;  %v9312_v55 = vld [vmem:[%s10620_s11 + $0x6c0] ss:$24 sps:$4 sm:$0xff]  }
 0x270   : > { %v12094_v42 = vpop.f32.mrf.mxu1  ;;  %v4251_v22 = vadd.f32 1.0, %v9611_v59  ;;  %v4083_v47 = vmul.f32 0.70710677, %v12090_v34  ;;  %v3015_v46 = vadd.f32 %v11861_v11, %v11670_v57  ;;  %v4246_v20 = vadd.f32 1.0, %v9609_v54  ;;  %v14745_v16 = vld [vmem:[#allocation108_spill] sm:$0xff]  ;;  %v14747_v57 = vld [vmem:[#allocation109_spill] sm:$0xff]  ;;  %6505 = vmatprep.subr.bf16.mxu1 %v9314_v27 }
 0x271   : > { %14744 = vst [vmem:[#allocation103_spill] sm:$0xff] %v12096_v50  ;;  %9624 = verf.f32 %v4078_v39  ;;  %v12107_v35 = vadd.f32 %v3220_v14, %v3108_v31  ;;  %6325 = vmatprep.mubr.bf16.mxu1 %v12096_v50  ;;  %v3224_v51 = vpop.f32.mrf.mxu0  ;;  %3901 = vmatmul.mubr.bf16.gmra.mxu0 %v14745_v16  ;;  %v4341_v9 = vmul.f32 %v4245_v24, %v3957_v25  ;;  %v14746_v43 = vld [vmem:[#allocation116_spill] sm:$0xff]  ;;  %v3958_v14 = vmul.f32 0.5, %v11983_v1  ;;  %v9320_v16 = vld [vmem:[%s10620_s11 + $0x694] ss:$24 sps:$4 sm:$0xff]  }
 0x272   : > { %v12110_v40 = vpop.f32.mrf.mxu1  ;;  %v9613_v59 = vpop.eup %9612  ;;  %v4347_v41 = vmul.f32 %v4251_v22, %v3963_v33  ;;  %9626 = verf.f32 %v4083_v47  ;;  %v12115_v48 = vadd.f32 %v3224_v51, %v14746_v43  ;;  %6326 = vmatmul.mubr.bf16.gmra.mxu1 %v12068_v21  ;;  %3910 = vmatprep.mubr.bf16.mxu0 %v14747_v57  ;;  %v9237_v11 = vld [vmem:[%s10620_s11 + $0x4e0] ss:$24 sps:$4 sm:$0xff]   ;;  %v3964_v54 = vmul.f32 0.5, %v12005_v32  ;;  %v9242_v32 = vld [vmem:[%s10620_s11 + $0x4b4] ss:$24 sps:$4 sm:$0xff]  }
 0x273   : > { %v4252_v39 = vadd.f32 1.0, %v9613_v59  ;;  %v4084_v31 = vmul.f32 0.70710677, %v12107_v35  ;;  %v3226_v24 = vpop.f32.mrf.mxu0  ;;  %6411 = vmatpush2.bf16.msra.mxu0 %v9234_v4  ;;  %v9615_v33 = vpop.eup %9614  ;;  %v3118_v22 = vadd.f32 %v11846_v28, %v3005_v53  ;;  %6506 = vmatpush1.bf16.msra.mxu1 %v9312_v55  ;;  %v4342_v59 = vmul.f32 %v4246_v20, %v3958_v14  ;;  %v9318_v28 = vld [vmem:[%s10620_s11 + $0x690] ss:$24 sps:$4 sm:$0xff]  }
 0x274   : > { %v12123_v25 = vpop.f32.mrf.mxu1  ;;  %v12126_v47 = vpack.c.bf16 %v4347_v41, %v4341_v9  ;;  %v4089_v51 = vmul.f32 0.70710677, %v12115_v48  ;;  %v12130_v1 = vadd.f32 %v3226_v24, %v11837_v30  ;;  %6412 = vmatprep.subr.bf16.mxu0 %v9239_v58  ;;  %v4257_v57 = vadd.f32 1.0, %v9615_v33  ;;  %6507 = vmatprep.subr.bf16.mxu1 %v9320_v16 }
 0x275   : > { %v4348_v43 = vmul.f32 %v4252_v39, %v3964_v54  ;;  %9628 = verf.f32 %v4084_v31  ;;  %v3228_v4 = vpop.f32.mrf.mxu0  ;;  %v9617_v53 = vpop.eup %9616  ;;  %v12138_v9 = vadd.f32 %v11866_v2, %v3015_v46  ;;  %v12146_v55 = vadd.f32 %v11876_v60, %v12078_v29  ;;  %v9240_v39 = vld [vmem:[%s10620_s11 + $0x4b0] ss:$24 sps:$4 sm:$0xff]  }
 0x276   : > { %14748 = vst [vmem:[#allocation114_spill] sm:$0xff] %v12126_v47  ;;  %v12134_v27 = vpop.f32.mrf.mxu1  ;;  %9630 = verf.f32 %v4089_v51  ;;  %v4090_v30 = vmul.f32 0.70710677, %v12130_v1  ;;  %v12142_v58 = vadd.f32 %v3228_v4, %v11843_v23  ;;  %v3969_v41 = vmul.f32 0.5, %v12012_v38  ;;  %v9245_v23 = vld [vmem:[%s10620_s11 + $0x484] ss:$24 sps:$4 sm:$0xff]  }
 0x277   : > { %v9619_v20 = vpop.eup %9618  ;;  %v3975_v14 = vmul.f32 0.5, %v12033_v5  ;;  %v3230_v54 = vpop.f32.mrf.mxu0  ;;  %v12152_v46 = vpack.c.bf16 %v4348_v43, %v4342_v59  ;;  %6413 = vmatpush2.bf16.msra.mxu0 %v9237_v11  ;;  %v12158_v31 = vadd.f32 %v11883_v6, %v12086_v13  ;;  %v3976_v60 = vmul.f32 0.5, %v12046_v17  ;;  %6508 = vmatpush1.bf16.msra.mxu1 %v9318_v28  ;;  %v9326_v5 = vld [vmem:[%s10620_s11 + $0x664] ss:$24 sps:$4 sm:$0xff]   ;;  %v9324_v17 = vld [vmem:[%s10620_s11 + $0x660] ss:$24 sps:$4 sm:$0xff]  }
 0x278   : > { %v12150_v2 = vpop.f32.mrf.mxu1  ;;  %v4263_v24 = vadd.f32 1.0, %v9619_v20  ;;  %v4095_v38 = vmul.f32 0.70710677, %v12142_v58  ;;  %6414 = vmatprep.subr.bf16.mxu0 %v9242_v32  ;;  %v4353_v51 = vmul.f32 %v4257_v57, %v3969_v41  ;;  %v4258_v16 = vadd.f32 1.0, %v9617_v53  ;;  %v14750_v43 = vld [vmem:[#allocation112_spill] sm:$0xff]  ;;  %6509 = vmatprep.subr.bf16.mxu1 %v9326_v5 }
 0x279   : > { %14749 = vst [vmem:[#allocation115_spill] sm:$0xff] %v12152_v46  ;;  %v9621_v33 = vpop.eup %9620  ;;  %9632 = verf.f32 %v4090_v30  ;;  %v12163_v11 = vadd.f32 %v3230_v54, %v3118_v22  ;;  %6335 = vmatprep.mubr.bf16.mxu1 %v12152_v46  ;;  %v3234_v59 = vpop.f32.mrf.mxu0  ;;  %3911 = vmatmul.mubr.bf16.gmra.mxu0 %v14750_v43  ;;  %v12176_v22 = vadd.f32 %v11891_v37, %v12078_v29  ;;  %v3970_v28 = vmul.f32 0.5, %v12027_v45  ;;  %v9243_v41 = vld [vmem:[%s10620_s11 + $0x480] ss:$24 sps:$4 sm:$0xff]   ;;  %v9248_v45 = vld [vmem:[%s10620_s11 + $0x15c] ss:$24 sps:$4 sm:$0xff]  }
 0x27a   : > { %v12166_v6 = vpop.f32.mrf.mxu1  ;;  %v4359_v4 = vmul.f32 %v4263_v24, %v3975_v14  ;;  %v4264_v20 = vadd.f32 1.0, %v9621_v33  ;;  %9634 = verf.f32 %v4095_v38  ;;  %v12171_v32 = vadd.f32 %v3234_v59, %v11855_v63  ;;  %6336 = vmatmul.mubr.bf16.gmra.mxu1 %v12126_v47  ;;  %v9332_v38 = vld [vmem:[%s10620_s11 + $0x634] ss:$24 sps:$4 sm:$0xff]  }
 0x27b   : > { %v12180_v57 = vadd.f32 %v11897_v61, %v12086_v13  ;;  %v4096_v53 = vmul.f32 0.70710677, %v12163_v11  ;;  %v3236_v30 = vpop.f32.mrf.mxu0  ;;  %6415 = vmatpush2.bf16.msra.mxu0 %v9240_v39  ;;  %v12189_v37 = vadd.f32 %v11908_v10, %v12078_v29  ;;  %6510 = vmatpush1.bf16.msra.mxu1 %v9324_v17  ;;  %v12198_v5 = vadd.f32 %v11915_v3, %v12086_v13  ;;  %v14752_v33 = vld [vmem:[#allocation117_spill] sm:$0xff] }
 0x27c   : > { %v12184_v63 = vpop.f32.mrf.mxu1  ;;  %v9623_v14 = vpop.eup %9622  ;;  %v12191_v54 = vpack.c.bf16 %v4359_v4, %v4353_v51  ;;  %v4360_v24 = vmul.f32 %v4264_v20, %v3976_v60  ;;  %v4101_v61 = vmul.f32 0.70710677, %v12171_v32  ;;  %6416 = vmatprep.subr.bf16.mxu0 %v9245_v23  ;;  %v4354_v39 = vmul.f32 %v4258_v16, %v3970_v28  ;;  %v9330_v51 = vld [vmem:[%s10620_s11 + $0x630] ss:$24 sps:$4 sm:$0xff]   ;;  %v14753_v4 = vld [vmem:[#allocation119_spill] sm:$0xff]  ;;  %6511 = vmatprep.subr.bf16.mxu1 %v9332_v38  ;;  %v14755_v16 = vld [vmem:[#allocation120_spill] sm:$0xff] }
 0x27d   : > { %9636 = verf.f32 %v4096_v53  ;;  %v12201_v59 = vadd.f32 %v3236_v30, %v14752_v33  ;;  %v3238_v10 = vpop.f32.mrf.mxu0  ;;  %v12208_v23 = vadd.f32 %v14753_v4, %v12078_v29  ;;  %v4269_v17 = vadd.f32 1.0, %v9623_v14  ;;  %v14754_v20 = vld [vmem:[#allocation118_spill] sm:$0xff]  ;;  %v14757_v14 = vld [vmem:[#allocation121_spill] sm:$0xff] }
 0x27e   : > { %14751 = vst [vmem:[#allocation108_spill] sm:$0xff] %v12191_v54  ;;  %v12203_v43 = vpop.f32.mrf.mxu1  ;;  %v9625_v60 = vpop.eup %9624  ;;  %9638 = verf.f32 %v4101_v61  ;;  %v12211_v47 = vadd.f32 %v3238_v10, %v14754_v20  ;;  %v12215_v28 = vadd.f32 %v14755_v16, %v12086_v13  ;;  %v3981_v53 = vmul.f32 0.5, %v12063_v19  ;;  %v9338_v19 = vld [vmem:[%s10620_s11 + $0x604] ss:$24 sps:$4 sm:$0xff]   ;;  %v14758_v16 = vld [vmem:[#allocation122_spill] sm:$0xff] }
 0x27f   : > { %v9627_v3 = vpop.eup %9626  ;;  %v4102_v30 = vmul.f32 0.70710677, %v12201_v59  ;;  %v3240_v33 = vpop.f32.mrf.mxu0  ;;  %v12221_v4 = vpack.c.bf16 %v4360_v24, %v4354_v39  ;;  %6417 = vmatpush2.bf16.msra.mxu0 %v9243_v41  ;;  %v12225_v61 = vadd.f32 %v14757_v14, %v12078_v29  ;;  %v3987_v38 = vmul.f32 0.5, %v12090_v34  ;;  %6512 = vmatpush1.bf16.msra.mxu1 %v9330_v51 }
 0x280   : > { %v12219_v46 = vpop.f32.mrf.mxu1  ;;  %v4275_v10 = vadd.f32 1.0, %v9627_v3  ;;  %v4107_v20 = vmul.f32 0.70710677, %v12211_v47  ;;  %6612 = vmatprep.subr.bf16.mxu0 %v9248_v45  ;;  %v12232_v21 = vadd.f32 %v14758_v16, %v12086_v13  ;;  %v4270_v24 = vadd.f32 1.0, %v9625_v60  ;;  %v9336_v3 = vld [vmem:[%s10620_s11 + $0x600] ss:$24 sps:$4 sm:$0xff]   ;;  %6513 = vmatprep.subr.bf16.mxu1 %v9338_v19 }
 0x281   : > { %14756 = vst [vmem:[#allocation116_spill] sm:$0xff] %v12221_v4  ;;  %9640 = verf.f32 %v4102_v30  ;;  %v12235_v41 = vadd.f32 %v3240_v33, %v12138_v9  ;;  %6345 = vmatprep.mubr.bf16.mxu1 %v12221_v4  ;;  %v3390_v34 = vpop.f32.mrf.mxu0  ;;  %v4365_v50 = vmul.f32 %v4269_v17, %v3981_v53  ;;  %v3982_v9 = vmul.f32 0.5, %v12071_v7  ;;  %v14760_v17 = vld [vmem:[#allocation123_spill] sm:$0xff]  ;;  %v9344_v7 = vld [vmem:[%s10620_s11 + $0x8d4] ss:$24 sps:$4 sm:$0xff]  }
 0x282   : > { %v12238_v39 = vpop.f32.mrf.mxu1  ;;  %v9629_v14 = vpop.eup %9628  ;;  %v4371_v45 = vmul.f32 %v4275_v10, %v3987_v38  ;;  %9642 = verf.f32 %v4107_v20  ;;  %v3391_v51 = vadd.f32 %v3390_v34, %v12146_v55  ;;  %6346 = vmatmul.mubr.bf16.gmra.mxu1 %v12191_v54  ;;  %v3988_v30 = vmul.f32 0.5, %v12107_v35  ;;  %v9342_v54 = vld [vmem:[%s10620_s11 + $0x8d0] ss:$24 sps:$4 sm:$0xff]  }
 0x283   : > { %14759 = vst [vmem:[#allocation109_spill] sm:$0xff] %v12238_v39  ;;  %v9631_v60 = vpop.eup %9630  ;;  %v4276_v33 = vadd.f32 1.0, %v9629_v14  ;;  %v4108_v16 = vmul.f32 0.70710677, %v12235_v41  ;;  %v3392_v4 = vpop.f32.mrf.mxu0  ;;  %v12248_v53 = vadd.f32 %v14760_v17, %v12078_v29  ;;  %6514 = vmatpush1.bf16.msra.mxu1 %v9336_v3  ;;  %v4366_v20 = vmul.f32 %v4270_v24, %v3982_v9 }
 0x284   : > { %v3503_v52 = vpop.f32.mrf.mxu1  ;;  %v12250_v38 = vpack.c.bf16 %v4371_v45, %v4365_v50  ;;  %v3393_v55 = vadd.f32 %v3392_v4, %v12158_v31  ;;  %v4281_v19 = vadd.f32 1.0, %v9631_v60  ;;  %v12259_v17 = vadd.f32 %v11968_v12, %v12086_v13  ;;  %6515 = vmatprep.subr.bf16.mxu1 %v9344_v7 }
 0x285   : > { %v12253_v10 = vadd.f32 %v3503_v52, %v3391_v51  ;;  %v4372_v35 = vmul.f32 %v4276_v33, %v3988_v30  ;;  %9644 = verf.f32 %v4108_v16  ;;  %v3394_v34 = vpop.f32.mrf.mxu0  ;;  %v12263_v50 = vadd.f32 %v11977_v15, %v12078_v29 }
 0x286   : > { %v3505_v14 = vpop.f32.mrf.mxu1  ;;  %v9633_v39 = vpop.eup %9632  ;;  %v12267_v52 = vadd.f32 %v11985_v49, %v12086_v13  ;;  %v3993_v24 = vmul.f32 0.5, %v12115_v48  ;;  %v3395_v3 = vadd.f32 %v3394_v34, %v12176_v22  ;;  %v12278_v60 = vadd.f32 %v11996_v56, %v12078_v29  ;;  %v9350_v48 = vld [vmem:[%s10620_s11 + $0x8a4] ss:$24 sps:$4 sm:$0xff]  }
 0x287   : > { %v4019_v31 = vmul.f32 0.70710677, %v12253_v10  ;;  %v9635_v4 = vpop.eup %9634  ;;  %v12272_v45 = vadd.f32 %v3505_v14, %v3393_v55  ;;  %v3396_v12 = vpop.f32.mrf.mxu0  ;;  %v12274_v15 = vpack.c.bf16 %v4372_v35, %v4366_v20  ;;  %v3999_v49 = vmul.f32 0.5, %v12142_v58  ;;  %6516 = vmatpush2.bf16.msra.mxu1 %v9342_v54  ;;  %v9348_v35 = vld [vmem:[%s10620_s11 + $0x8a0] ss:$24 sps:$4 sm:$0xff]  }
 0x288   : > { %v3507_v51 = vpop.f32.mrf.mxu1  ;;  %v4287_v9 = vadd.f32 1.0, %v9635_v4  ;;  %v3397_v30 = vadd.f32 %v3396_v12, %v12180_v57  ;;  %v4377_v33 = vmul.f32 %v4281_v19, %v3993_v24  ;;  %v4282_v22 = vadd.f32 1.0, %v9633_v39  ;;  %6517 = vmatprep.subr.bf16.mxu1 %v9350_v48 }
 0x289   : > { %v4020_v16 = vmul.f32 0.70710677, %v12272_v45  ;;  %v12284_v55 = vadd.f32 %v3507_v51, %v3395_v3  ;;  %6355 = vmatprep.mubr.bf16.mxu1 %v12274_v15  ;;  %v3400_v7 = vpop.f32.mrf.mxu0  ;;  %9646 = verf.f32 %v4019_v31  ;;  %v4000_v39 = vmul.f32 0.5, %v12163_v11  ;;  %v9356_v51 = vld [vmem:[%s10620_s11 + $0x874] ss:$24 sps:$4 sm:$0xff]  }
 0x28a   : > { %v3509_v20 = vpop.f32.mrf.mxu1  ;;  %v9637_v56 = vpop.eup %9636  ;;  %v4383_v34 = vmul.f32 %v4287_v9, %v3999_v49  ;;  %v3401_v58 = vadd.f32 %v3400_v7, %v12189_v37  ;;  %6356 = vmatmul.mubr.bf16.gmra.mxu1 %v12250_v38  ;;  %v3994_v31 = vmul.f32 0.5, %v12130_v1  ;;  %v12305_v1 = vadd.f32 %v12008_v0, %v12086_v13 }
 0x28b   : > { %v12289_v57 = vadd.f32 %v3509_v20, %v3397_v30  ;;  %v9639_v54 = vpop.eup %9638  ;;  %v4288_v19 = vadd.f32 1.0, %v9637_v56  ;;  %9648 = verf.f32 %v4020_v16  ;;  %v4025_v14 = vmul.f32 0.70710677, %v12284_v55  ;;  %v3402_v4 = vpop.f32.mrf.mxu0  ;;  %6518 = vmatpush2.bf16.msra.mxu1 %v9348_v35  ;;  %v9354_v16 = vld [vmem:[%s10620_s11 + $0x870] ss:$24 sps:$4 sm:$0xff]  }
 0x28c   : > { %v3513_v24 = vpop.f32.mrf.mxu1  ;;  %v12295_v3 = vpack.c.bf16 %v4383_v34, %v4377_v33  ;;  %v4293_v37 = vadd.f32 1.0, %v9639_v54  ;;  %v3403_v11 = vadd.f32 %v3402_v4, %v12198_v5  ;;  %v4378_v33 = vmul.f32 %v4282_v22, %v3994_v31  ;;  %6519 = vmatprep.subr.bf16.mxu1 %v9356_v51 }
 0x28d   : > { %v4026_v12 = vmul.f32 0.70710677, %v12289_v57  ;;  %v4384_v49 = vmul.f32 %v4288_v19, %v4000_v39  ;;  %9650 = verf.f32 %v4025_v14  ;;  %v12300_v9 = vadd.f32 %v3513_v24, %v3401_v58  ;;  %v3404_v30 = vpop.f32.mrf.mxu0 }
 0x28e   : > { %v3515_v48 = vpop.f32.mrf.mxu1  ;;  %v9641_v7 = vpop.eup %9640  ;;  %v3405_v20 = vadd.f32 %v3404_v30, %v12208_v23  ;;  %v4005_v56 = vmul.f32 0.5, %v12171_v32  ;;  %v4011_v5 = vmul.f32 0.5, %v12211_v47  ;;  %v9362_v23 = vld [vmem:[%s10620_s11 + $0x844] ss:$24 sps:$4 sm:$0xff]   ;;  %v12321_v32 = vadd.f32 %v12019_v62, %v12078_v29 }
 0x28f   : > { %9652 = verf.f32 %v4026_v12  ;;  %v9643_v35 = vpop.eup %9642  ;;  %v4031_v34 = vmul.f32 0.70710677, %v12300_v9  ;;  %v12311_v58 = vadd.f32 %v3515_v48, %v3403_v11  ;;  %v3406_v54 = vpop.f32.mrf.mxu0  ;;  %v12316_v14 = vpack.c.bf16 %v4384_v49, %v4378_v33  ;;  %6520 = vmatpush2.bf16.msra.mxu1 %v9354_v16  ;;  %v9360_v12 = vld [vmem:[%s10620_s11 + $0x840] ss:$24 sps:$4 sm:$0xff]  }
 0x290   : > { %v3517_v39 = vpop.f32.mrf.mxu1  ;;  %v4299_v0 = vadd.f32 1.0, %v9643_v35  ;;  %v3407_v22 = vadd.f32 %v3406_v54, %v12215_v28  ;;  %v4389_v47 = vmul.f32 %v4293_v37, %v4005_v56  ;;  %v4294_v4 = vadd.f32 1.0, %v9641_v7  ;;  %6521 = vmatprep.subr.bf16.mxu1 %v9362_v23 }
 0x291   : > { %v12314_v19 = vadd.f32 %v3517_v39, %v3405_v20  ;;  %9654 = verf.f32 %v4031_v34  ;;  %v3410_v24 = vpop.f32.mrf.mxu0  ;;  %v4032_v28 = vmul.f32 0.70710677, %v12311_v58  ;;  %6365 = vmatprep.mubr.bf16.mxu1 %v12316_v14  ;;  %v4006_v62 = vmul.f32 0.5, %v12201_v59 }
 0x292   : > { %v3519_v31 = vpop.f32.mrf.mxu1  ;;  %v9645_v51 = vpop.eup %9644  ;;  %v4395_v11 = vmul.f32 %v4299_v0, %v4011_v5  ;;  %v3411_v49 = vadd.f32 %v3410_v24, %v12225_v61  ;;  %v4012_v37 = vmul.f32 0.5, %v12235_v41  ;;  %6366 = vmatmul.mubr.bf16.gmra.mxu1 %v12295_v3  ;;  %v9368_v61 = vld [vmem:[%s10620_s11 + $0x814] ss:$24 sps:$4 sm:$0xff]   ;;  %v12341_v59 = vadd.f32 %v12029_v26, %v12086_v13  ;;  %v9366_v0 = vld [vmem:[%s10620_s11 + $0x810] ss:$24 sps:$4 sm:$0xff]  }
 0x293   : > { %v4037_v30 = vmul.f32 0.70710677, %v12314_v19  ;;  %v4300_v48 = vadd.f32 1.0, %v9645_v51  ;;  %v12330_v16 = vadd.f32 %v3519_v31, %v3407_v22  ;;  %v3412_v7 = vpop.f32.mrf.mxu0  ;;  %6522 = vmatpush2.bf16.msra.mxu1 %v9360_v12  ;;  %v4390_v41 = vmul.f32 %v4294_v4, %v4006_v62 }
 0x294   : > { %v3523_v33 = vpop.f32.mrf.mxu1  ;;  %v12333_v20 = vpack.c.bf16 %v4395_v11, %v4389_v47  ;;  %v3413_v35 = vadd.f32 %v3412_v7, %v12232_v21  ;;  %v12347_v22 = vadd.f32 %v12041_v36, %v12078_v29  ;;  %6523 = vmatprep.subr.bf16.mxu1 %v9368_v61  ;;  %v12353_v47 = vadd.f32 %v12053_v8, %v12086_v13  ;;  %v9374_v8 = vld [vmem:[%s10620_s11 + $0x7e4] ss:$24 sps:$4 sm:$0xff]  }
 0x295   : > { %9656 = verf.f32 %v4037_v30  ;;  %v12336_v56 = vadd.f32 %v3523_v33, %v3411_v49  ;;  %v4396_v5 = vmul.f32 %v4300_v48, %v4012_v37  ;;  %v4038_v34 = vmul.f32 0.70710677, %v12330_v16  ;;  %v3414_v54 = vpop.f32.mrf.mxu0  ;;  %v9372_v37 = vld [vmem:[%s10620_s11 + $0x7e0] ss:$24 sps:$4 sm:$0xff]  }
 0x296   : > { %v3525_v39 = vpop.f32.mrf.mxu1  ;;  %9658 = verf.f32 %v4032_v28  ;;  %v3415_v23 = vadd.f32 %v3414_v54, %v12248_v53  ;;  %v9647_v26 = vpop.eup %9646  ;;  %v12361_v51 = vadd.f32 %v12065_v44, %v12078_v29  ;;  %v12369_v28 = vadd.f32 %v12081_v18, %v12086_v13 }
 0x297   : > { %v4043_v21 = vmul.f32 0.70710677, %v12336_v56  ;;  %9660 = verf.f32 %v4038_v34  ;;  %v12355_v4 = vadd.f32 %v3525_v39, %v3413_v35  ;;  %v3416_v24 = vpop.f32.mrf.mxu0  ;;  %v12357_v36 = vpack.c.bf16 %v4396_v5, %v4390_v41  ;;  %6524 = vmatpush2.bf16.msra.mxu1 %v9366_v0  ;;  %v9380_v0 = vld [vmem:[%s10620_s11 + $0x7b4] ss:$24 sps:$4 sm:$0xff]  }
 0x298   : > { %v3527_v31 = vpop.f32.mrf.mxu1  ;;  %v9649_v12 = vpop.eup %9648  ;;  %v3417_v53 = vadd.f32 %v3416_v24, %v12259_v17  ;;  %v12373_v30 = vadd.f32 %v12094_v42, %v12078_v29  ;;  %v3924_v49 = vmul.f32 0.5, %v12272_v45  ;;  %6525 = vmatprep.subr.bf16.mxu1 %v9374_v8  ;;  %v4211_v61 = vadd.f32 1.0, %v9647_v26 }
 0x299   : > { %9662 = verf.f32 %v4043_v21  ;;  %v12364_v11 = vadd.f32 %v3527_v31, %v3415_v23  ;;  %v4044_v44 = vmul.f32 0.70710677, %v12355_v4  ;;  %6375 = vmatprep.mubr.bf16.mxu1 %v12357_v36  ;;  %v3420_v62 = vpop.f32.mrf.mxu0  ;;  %v4212_v7 = vadd.f32 1.0, %v9649_v12  ;;  %v9378_v12 = vld [vmem:[%s10620_s11 + $0x7b0] ss:$24 sps:$4 sm:$0xff]  }
 0x29a   : > { %v3529_v17 = vpop.f32.mrf.mxu1  ;;  %v9651_v48 = vpop.eup %9650  ;;  %v3421_v18 = vadd.f32 %v3420_v62, %v12263_v50  ;;  %v3929_v45 = vmul.f32 0.5, %v12284_v55  ;;  %6376 = vmatmul.mubr.bf16.gmra.mxu1 %v12333_v20  ;;  %v3930_v54 = vmul.f32 0.5, %v12289_v57  ;;  %v3923_v21 = vmul.f32 0.5, %v12253_v10 }
 0x29b   : > { %v4049_v33 = vmul.f32 0.70710677, %v12364_v11  ;;  %v12381_v35 = vadd.f32 %v3529_v17, %v3417_v53  ;;  %v4217_v41 = vadd.f32 1.0, %v9651_v48  ;;  %9664 = verf.f32 %v4044_v44  ;;  %v3422_v5 = vpop.f32.mrf.mxu0  ;;  %6526 = vmatpush2.bf16.msra.mxu1 %v9372_v37 }
 0x29c   : > { %v9653_v42 = vpop.eup %9652  ;;  %v3533_v34 = vpop.f32.mrf.mxu1  ;;  %v3423_v55 = vadd.f32 %v3422_v5, %v12267_v52  ;;  %v4308_v8 = vmul.f32 %v4212_v7, %v3924_v49  ;;  %6527 = vmatprep.subr.bf16.mxu1 %v9380_v0  ;;  %v12396_v10 = vadd.f32 %v12110_v40, %v12086_v13  ;;  %v4307_v62 = vmul.f32 %v4211_v61, %v3923_v21  ;;  %v9386_v40 = vld [vmem:[%s10620_s11 + $0x784] ss:$24 sps:$4 sm:$0xff]  }
 0x29d   : > { %v4218_v39 = vadd.f32 1.0, %v9653_v42  ;;  %9666 = verf.f32 %v4049_v33  ;;  %v4050_v50 = vmul.f32 0.70710677, %v12381_v35  ;;  %v4313_v23 = vmul.f32 %v4217_v41, %v3929_v45  ;;  %v3424_v24 = vpop.f32.mrf.mxu0 }
 0x29e   : > { %v12390_v26 = vadd.f32 %v3533_v34, %v3421_v18  ;;  %v3535_v31 = vpop.f32.mrf.mxu1  ;;  %v9655_v53 = vpop.eup %9654  ;;  %v3425_v44 = vadd.f32 %v3424_v24, %v12278_v60  ;;  %v9246_v18 = vld [vmem:[%s10620_s11 + $0x158] ss:$24 sps:$4 sm:$0xff]   ;;  %v12410_v61 = vadd.f32 %v12123_v25, %v12078_v29  ;;  %v3935_v41 = vmul.f32 0.5, %v12300_v9 }
 0x29f   : > { %v4314_v57 = vmul.f32 %v4218_v39, %v3930_v54  ;;  %9668 = verf.f32 %v4050_v50  ;;  %v4223_v52 = vadd.f32 1.0, %v9655_v53  ;;  %v3426_v37 = vpop.f32.mrf.mxu0  ;;  %v12399_v33 = vadd.f32 %v3535_v31, %v3423_v55  ;;  %6528 = vmatpush2.bf16.msra.mxu1 %v9378_v12  ;;  %v9384_v54 = vld [vmem:[%s10620_s11 + $0x780] ss:$24 sps:$4 sm:$0xff]  }
 0x2a0   : > { %v4055_v17 = vmul.f32 0.70710677, %v12390_v26  ;;  %v3537_v48 = vpop.f32.mrf.mxu1  ;;  %v3427_v49 = vadd.f32 %v3426_v37, %v12305_v1  ;;  %v12412_v45 = vpack.c.bf16 %v4313_v23, %v4307_v62  ;;  %v9251_v1 = vld [vmem:[%s10620_s11 + $0x12c] ss:$24 sps:$4 sm:$0xff]   ;;  %v12418_v39 = vmul.f32 0.5, %v12311_v58  ;;  %6529 = vmatprep.subr.bf16.mxu1 %v9386_v40 }
 0x2a1   : > { %v12402_v7 = vadd.f32 %v3537_v48, %v3425_v44  ;;  %v12404_v60 = vpack.c.bf16 %v4314_v57, %v4308_v8  ;;  %v3430_v5 = vpop.f32.mrf.mxu0  ;;  %v3941_v50 = vmul.f32 0.5, %v12314_v19  ;;  %v4056_v21 = vmul.f32 0.70710677, %v12399_v33  ;;  %v9249_v57 = vld [vmem:[%s10620_s11 + $0x128] ss:$24 sps:$4 sm:$0xff]  }
 0x2a2   : > { %v9657_v42 = vpop.eup %9656  ;;  %14762 = vst [vmem:[#allocation117_spill] sm:$0xff] %v12412_v45  ;;  %9670 = verf.f32 %v4055_v17  ;;  %v3539_v34 = vpop.f32.mrf.mxu1  ;;  %v3942_v9 = vmul.f32 0.5, %v12330_v16  ;;  %v3431_v55 = vadd.f32 %v3430_v5, %v12321_v32  ;;  %v4319_v12 = vmul.f32 %v4223_v52, %v3935_v41  ;;  %v9392_v16 = vld [vmem:[%s10620_s11 + $0x45c] ss:$24 sps:$4 sm:$0xff]  }
 0x2a3   : > { %14761 = vst [vmem:[#allocation112_spill] sm:$0xff] %v12404_v60  ;;  %v4229_v0 = vadd.f32 1.0, %v9657_v42  ;;  %6418 = vmatprep.mubr.bf16.mxu0 %v12404_v60  ;;  %v9659_v25 = vpop.eup %9658  ;;  %v4061_v23 = vmul.f32 0.70710677, %v12402_v7  ;;  %v12426_v24 = vadd.f32 %v3539_v34, %v3427_v49  ;;  %v3432_v58 = vpop.f32.mrf.mxu0  ;;  %9672 = verf.f32 %v4056_v21  ;;  %6530 = vmatpush2.bf16.msra.mxu1 %v9384_v54  ;;  %v9254_v52 = vld [vmem:[%s10620_s11 + $0xfc] ss:$24 sps:$4 sm:$0xff]  }
 0x2a4   : > { %v3543_v31 = vpop.f32.mrf.mxu1  ;;  %6419 = vmatmul.mubr.bf16.vlgmr.msra.gmra.mxu0 %v12412_v45  ;;  %v9661_v19 = vpop.eup %9660  ;;  %v3433_v8 = vadd.f32 %v3432_v58, %v12341_v59  ;;  %v3947_v32 = vmul.f32 0.5, %v12336_v56  ;;  %v3948_v40 = vmul.f32 0.5, %v12355_v4  ;;  %6725 = vmatprep.subr.bf16.mxu1 %v9392_v16  ;;  %v4224_v42 = vadd.f32 1.0, %v9659_v25 }
 0x2a5   : > { %v4325_v53 = vmul.f32 %v4229_v0, %v3941_v50  ;;  %6613 = vmatpush1.bf16.msra.mxu0 %v9246_v18  ;;  %v4230_v62 = vadd.f32 1.0, %v9661_v19  ;;  %9674 = verf.f32 %v4061_v23  ;;  %v4062_v17 = vmul.f32 0.70710677, %v12426_v24  ;;  %v3434_v37 = vpop.f32.mrf.mxu0 }
 0x2a6   : > { %v9663_v44 = vpop.eup %9662  ;;  %v3545_v48 = vpop.f32.mrf.mxu1  ;;  %6614 = vmatprep.subr.bf16.mxu0 %v9251_v1  ;;  %v12438_v59 = vadd.f32 %v3543_v31, %v3431_v55  ;;  %v3435_v18 = vadd.f32 %v3434_v37, %v12347_v22  ;;  %v3953_v54 = vmul.f32 0.5, %v12364_v11  ;;  %v3954_v50 = vmul.f32 0.5, %v12381_v35  ;;  %v9252_v22 = vld [vmem:[%s10620_s11 + $0xf8] ss:$24 sps:$4 sm:$0xff]  }
 0x2a7   : > { %v12435_v49 = vpack.c.bf16 %v4325_v53, %v4319_v12  ;;  %v4235_v41 = vadd.f32 1.0, %v9663_v44  ;;  %9676 = verf.f32 %v4062_v17  ;;  %v12441_v56 = vadd.f32 %v3545_v48, %v3433_v8  ;;  %v3436_v5 = vpop.f32.mrf.mxu0  ;;  %v9257_v12 = vld [vmem:[%s10620_s11 + $0xcc] ss:$24 sps:$4 sm:$0xff]  }
 0x2a8   : > { %v3547_v34 = vpop.f32.mrf.mxu1  ;;  %v9665_v1 = vpop.eup %9664  ;;  %v4067_v4 = vmul.f32 0.70710677, %v12438_v59  ;;  %v3437_v0 = vadd.f32 %v3436_v5, %v12353_v47  ;;  %v4326_v25 = vmul.f32 %v4230_v62, %v3942_v9  ;;  %v4320_v8 = vmul.f32 %v4224_v42, %v12418_v39  ;;  %v9255_v42 = vld [vmem:[%s10620_s11 + $0xc8] ss:$24 sps:$4 sm:$0xff]  }
 0x2a9   : > { %14763 = vst [vmem:[#allocation119_spill] sm:$0xff] %v12435_v49  ;;  %6615 = vmatpush1.bf16.msra.mxu0 %v9249_v57  ;;  %v4236_v23 = vadd.f32 1.0, %v9665_v1  ;;  %v4068_v55 = vmul.f32 0.70710677, %v12441_v56  ;;  %v12449_v58 = vadd.f32 %v3547_v34, %v3435_v18  ;;  %v3440_v31 = vpop.f32.mrf.mxu0  ;;  %v4331_v57 = vmul.f32 %v4235_v41, %v3947_v32  ;;  %v9260_v1 = vld [vmem:[%s10620_s11 + $0x9c] ss:$24 sps:$4 sm:$0xff]  }
 0x2aa   : > { %v9667_v21 = vpop.eup %9666  ;;  %v3549_v19 = vpop.f32.mrf.mxu1  ;;  %6616 = vmatprep.subr.bf16.mxu0 %v9254_v52  ;;  %9678 = verf.f32 %v4067_v4  ;;  %v3441_v35 = vadd.f32 %v3440_v31, %v12361_v51  ;;  %v12458_v51 = vpack.c.bf16 %v4326_v25, %v4320_v8 }
 0x2ab   : > { %v4241_v11 = vadd.f32 1.0, %v9667_v21  ;;  %v12453_v53 = vadd.f32 %v3549_v19, %v3437_v0  ;;  %9680 = verf.f32 %v4068_v55  ;;  %v4073_v9 = vmul.f32 0.70710677, %v12449_v58  ;;  %v3442_v16 = vpop.f32.mrf.mxu0 }
 0x2ac   : > { %v9669_v47 = vpop.eup %9668  ;;  %v3553_v44 = vpop.f32.mrf.mxu1  ;;  %v4332_v62 = vmul.f32 %v4236_v23, %v3948_v40  ;;  %14764 = vst [vmem:[#allocation118_spill] sm:$0xff] %v12458_v51  ;;  %v3443_v52 = vadd.f32 %v3442_v16, %v12369_v28  ;;  %v3342_v28 = vadd.f32 %v12150_v2, %v12078_v29  ;;  %6428 = vmatprep.mubr.bf16.mxu0 %v12458_v51  ;;  %v3959_v23 = vmul.f32 0.5, %v12390_v26  ;;  %v9263_v26 = vld [vmem:[%s10620_s11 + $0x6c] ss:$24 sps:$4 sm:$0xff]   ;;  %v9335_v51 = vld [vmem:[%s10620_s11 + $0x63c] ss:$24 sps:$4 sm:$0xff]  }
 0x2ad   : > { %v4337_v17 = vmul.f32 %v4241_v11, %v3953_v54  ;;  %v4242_v37 = vadd.f32 1.0, %v9669_v47  ;;  %v4074_v48 = vmul.f32 0.70710677, %v12453_v53  ;;  %6617 = vmatpush1.bf16.msra.mxu0 %v9252_v22  ;;  %9682 = verf.f32 %v4073_v9  ;;  %v3444_v32 = vpop.f32.mrf.mxu0 }
 0x2ae   : > { %v12461_v39 = vadd.f32 %v3553_v44, %v3441_v35  ;;  %v3555_v18 = vpop.f32.mrf.mxu1  ;;  %6618 = vmatprep.subr.bf16.mxu0 %v9257_v12  ;;  %v3445_v34 = vadd.f32 %v3444_v32, %v12373_v30  ;;  %v3340_v54 = vadd.f32 %v12134_v27, %v12086_v13  ;;  %6429 = vmatmul.mubr.bf16.gmra.mxu0 %v12435_v49  ;;  %v3960_v35 = vmul.f32 0.5, %v12399_v33 }
 0x2af   : > { %v9671_v41 = vpop.eup %9670  ;;  %v12464_v5 = vpack.c.bf16 %v4337_v17, %v4331_v57  ;;  %v4338_v40 = vmul.f32 %v4242_v37, %v3954_v50  ;;  %9684 = verf.f32 %v4074_v48  ;;  %v12474_v0 = vadd.f32 %v3555_v18, %v3443_v52  ;;  %v3446_v22 = vpop.f32.mrf.mxu0 }
 0x2b0   : > { %v4079_v4 = vmul.f32 0.70710677, %v12461_v39  ;;  %v3557_v21 = vpop.f32.mrf.mxu1  ;;  %v3344_v50 = vadd.f32 %v12166_v6, %v12086_v13  ;;  %v3447_v30 = vadd.f32 %v3446_v22, %v12396_v10  ;;  %v9673_v2 = vpop.eup %9672  ;;  %v4247_v55 = vadd.f32 1.0, %v9671_v41  ;;  %v9258_v6 = vld [vmem:[%s10620_s11 + $0x98] ss:$24 sps:$4 sm:$0xff]  }
 0x2b1   : > { %14765 = vst [vmem:[#allocation120_spill] sm:$0xff] %v12464_v5  ;;  %v12480_v27 = vadd.f32 %v3557_v21, %v3445_v34  ;;  %v12482_v25 = vpack.c.bf16 %v4338_v40, %v4332_v62  ;;  %v4080_v31 = vmul.f32 0.70710677, %v12474_v0  ;;  %6619 = vmatpush1.bf16.msra.mxu0 %v9255_v42  ;;  %v3450_v19 = vpop.f32.mrf.mxu0  ;;  %v3965_v10 = vmul.f32 0.5, %v12402_v7  ;;  %v9261_v41 = vld [vmem:[%s10620_s11 + $0x68] ss:$24 sps:$4 sm:$0xff]  }
 0x2b2   : > { %9686 = verf.f32 %v4079_v4  ;;  %v3559_v12 = vpop.f32.mrf.mxu1  ;;  %v9675_v11 = vpop.eup %9674  ;;  %v3451_v8 = vadd.f32 %v3450_v19, %v12410_v61  ;;  %6620 = vmatprep.subr.bf16.mxu0 %v9260_v1  ;;  %v4248_v57 = vadd.f32 1.0, %v9673_v2  ;;  %v3966_v33 = vmul.f32 0.5, %v12426_v24 }
 0x2b3   : > { %14766 = vst [vmem:[#allocation121_spill] sm:$0xff] %v12482_v25  ;;  %v4085_v47 = vmul.f32 0.70710677, %v12480_v27  ;;  %6438 = vmatprep.mubr.bf16.mxu0 %v12482_v25  ;;  %v4253_v9 = vadd.f32 1.0, %v9675_v11  ;;  %9688 = verf.f32 %v4080_v31  ;;  %v12493_v16 = vadd.f32 %v3559_v12, %v3447_v30  ;;  %v3452_v44 = vpop.f32.mrf.mxu0  ;;  %v9327_v25 = vld [vmem:[%s10620_s11 + $0x668] ss:$24 sps:$4 sm:$0xff]  }
 0x2b4   : > { %v3563_v62 = vpop.f32.mrf.mxu1  ;;  %v9677_v17 = vpop.eup %9676  ;;  %v3453_v7 = vadd.f32 %v3452_v44, %v3340_v54  ;;  %v4343_v61 = vmul.f32 %v4247_v55, %v3959_v23  ;;  %v3348_v40 = vadd.f32 %v12184_v63, %v12078_v29  ;;  %v9266_v54 = vld [vmem:[%s10620_s11 + $0x3c] ss:$24 sps:$4 sm:$0xff]   ;;  %v4344_v22 = vmul.f32 %v4248_v57, %v3960_v35 }
 0x2b5   : > { %9690 = verf.f32 %v4085_v47  ;;  %v12496_v37 = vadd.f32 %v3563_v62, %v3451_v8  ;;  %v4349_v48 = vmul.f32 %v4253_v9, %v3965_v10  ;;  %v4254_v52 = vadd.f32 1.0, %v9677_v17  ;;  %6621 = vmatpush1.bf16.msra.mxu0 %v9258_v6  ;;  %v3454_v18 = vpop.f32.mrf.mxu0  ;;  %v9264_v47 = vld [vmem:[%s10620_s11 + $0x38] ss:$24 sps:$4 sm:$0xff]   ;;  %v9269_v9 = vld [vmem:[%s10620_s11 + $0xc] ss:$24 sps:$4 sm:$0xff]  }
 0x2b6   : > { %v4086_v32 = vmul.f32 0.70710677, %v12493_v16  ;;  %v3565_v42 = vpop.f32.mrf.mxu1  ;;  %v3455_v24 = vadd.f32 %v3454_v18, %v3342_v28  ;;  %6622 = vmatprep.subr.bf16.mxu0 %v9263_v26  ;;  %v3350_v63 = vadd.f32 %v12203_v43, %v12086_v13  ;;  %v3971_v31 = vmul.f32 0.5, %v12438_v59  ;;  %6439 = vmatmul.mubr.bf16.gmra.mxu0 %v12464_v5  ;;  %v14785_v5 = vld [vmem:[#allocation102_spill] sm:$0xff] }
 0x2b7   : > { %v4091_v34 = vmul.f32 0.70710677, %v12496_v37  ;;  %v12503_v1 = vadd.f32 %v3565_v42, %v3453_v7  ;;  %v9679_v4 = vpop.eup %9678  ;;  %v12506_v21 = vpack.c.bf16 %v4349_v48, %v4343_v61  ;;  %v4350_v30 = vmul.f32 %v4254_v52, %v3966_v33  ;;  %v3456_v2 = vpop.f32.mrf.mxu0 }
 0x2b8   : > { %9692 = verf.f32 %v4086_v32  ;;  %v3567_v23 = vpop.f32.mrf.mxu1  ;;  %v9681_v55 = vpop.eup %9680  ;;  %v4259_v28 = vadd.f32 1.0, %v9679_v4  ;;  %v3457_v12 = vadd.f32 %v3456_v2, %v3344_v50  ;;  %v3972_v43 = vmul.f32 0.5, %v12441_v56 }
 0x2b9   : > { %14767 = vst [vmem:[#allocation122_spill] sm:$0xff] %v12506_v21  ;;  %v4092_v19 = vmul.f32 0.70710677, %v12503_v1  ;;  %9694 = verf.f32 %v4091_v34  ;;  %v12513_v6 = vadd.f32 %v3567_v23, %v3455_v24  ;;  %6623 = vmatpush1.bf16.msra.mxu0 %v9261_v41  ;;  %v3460_v11 = vpop.f32.mrf.mxu0  ;;  %v12515_v10 = vpack.c.bf16 %v4350_v30, %v4344_v22  ;;  %v9267_v41 = vld [vmem:[%s10620_s11 + $0x8] ss:$24 sps:$4 sm:$0xff]  }
 0x2ba   : > { %v3569_v35 = vpop.f32.mrf.mxu1  ;;  %v9683_v8 = vpop.eup %9682  ;;  %v4260_v59 = vadd.f32 1.0, %v9681_v55  ;;  %v3977_v26 = vmul.f32 0.5, %v12449_v58  ;;  %v3461_v57 = vadd.f32 %v3460_v11, %v3348_v40  ;;  %6624 = vmatprep.subr.bf16.mxu0 %v9266_v54  ;;  %v3978_v50 = vmul.f32 0.5, %v12453_v53  ;;  %v14769_v34 = vld [vmem:[#allocation109_spill] sm:$0xff]  ;;  %v9272_v30 = vld [vmem:[%s10620_s11 + $0x2dc] ss:$24 sps:$4 sm:$0xff]  }
 0x2bb   : > { %14768 = vst [vmem:[#allocation123_spill] sm:$0xff] %v12515_v10  ;;  %v4265_v62 = vadd.f32 1.0, %v9683_v8  ;;  %9696 = verf.f32 %v4092_v19  ;;  %v4097_v17 = vmul.f32 0.70710677, %v12513_v6  ;;  %6448 = vmatprep.mubr.bf16.mxu0 %v12515_v10  ;;  %v3462_v33 = vpop.f32.mrf.mxu0  ;;  %v12524_v56 = vadd.f32 %v3569_v35, %v3457_v12 }
 0x2bc   : > { %v9685_v44 = vpop.eup %9684  ;;  %v3573_v7 = vpop.f32.mrf.mxu1  ;;  %v3463_v48 = vadd.f32 %v3462_v33, %v3350_v63  ;;  %v3352_v52 = vadd.f32 %v12219_v46, %v12078_v29  ;;  %v4355_v32 = vmul.f32 %v4259_v28, %v3971_v31  ;;  %v3354_v24 = vadd.f32 %v14769_v34, %v12086_v13  ;;  %v9278_v34 = vld [vmem:[%s10620_s11 + $0x27c] ss:$24 sps:$4 sm:$0xff]  }
 0x2bd   : > { %v4266_v61 = vadd.f32 1.0, %v9685_v44  ;;  %v12526_v58 = vadd.f32 %v3573_v7, %v3461_v57  ;;  %v4361_v53 = vmul.f32 %v4265_v62, %v3977_v26  ;;  %9698 = verf.f32 %v4097_v17  ;;  %6625 = vmatpush1.bf16.msra.mxu0 %v9264_v47  ;;  %v3464_v18 = vpop.f32.mrf.mxu0  ;;  %v9275_v44 = vld [vmem:[%s10620_s11 + $0x2ac] ss:$24 sps:$4 sm:$0xff]  }
 0x2be   : > { %v3575_v42 = vpop.f32.mrf.mxu1  ;;  %v4356_v54 = vmul.f32 %v4260_v59, %v3972_v43  ;;  %v4098_v22 = vmul.f32 0.70710677, %v12524_v56  ;;  %6626 = vmatprep.subr.bf16.mxu0 %v9269_v9  ;;  %v3465_v23 = vadd.f32 %v3464_v18, %v3352_v52  ;;  %6449 = vmatmul.mubr.bf16.gmra.mxu0 %v12506_v21  ;;  %v3983_v11 = vmul.f32 0.5, %v12461_v39  ;;  %v9270_v43 = vld [vmem:[%s10620_s11 + $0x2d8] ss:$24 sps:$4 sm:$0xff]  }
 0x2bf   : > { %v9687_v40 = vpop.eup %9686  ;;  %v4362_v4 = vmul.f32 %v4266_v61, %v3978_v50  ;;  %v12535_v2 = vpack.c.bf16 %v4361_v53, %v4355_v32  ;;  %v4103_v46 = vmul.f32 0.70710677, %v12526_v58  ;;  %v3466_v55 = vpop.f32.mrf.mxu0  ;;  %v12539_v13 = vadd.f32 %v3575_v42, %v3463_v48  ;;  %v9273_v42 = vld [vmem:[%s10620_s11 + $0x2a8] ss:$24 sps:$4 sm:$0xff]  }
 0x2c0   : > { %v4271_v29 = vadd.f32 1.0, %v9687_v40  ;;  %v3577_v63 = vpop.f32.mrf.mxu1  ;;  %v9689_v31 = vpop.eup %9688  ;;  %9700 = verf.f32 %v4098_v22  ;;  %v3467_v28 = vadd.f32 %v3466_v55, %v3354_v24  ;;  %v3989_v59 = vmul.f32 0.5, %v12480_v27  ;;  %v9281_v55 = vld [vmem:[%s10620_s11 + $0x24c] ss:$24 sps:$4 sm:$0xff]  }
 0x2c1   : > { %14770 = vst [vmem:[#allocation109_spill] sm:$0xff] %v12535_v2  ;;  %v12541_v19 = vpack.c.bf16 %v4362_v4, %v4356_v54  ;;  %9702 = verf.f32 %v4103_v46  ;;  %v12544_v35 = vadd.f32 %v3577_v63, %v3465_v23  ;;  %6627 = vmatpush1.bf16.msra.mxu0 %v9267_v41  ;;  %v12546_v8 = vpop.f32.mrf.mxu0  ;;  %v4104_v57 = vmul.f32 0.70710677, %v12539_v13  ;;  %v9276_v46 = vld [vmem:[%s10620_s11 + $0x278] ss:$24 sps:$4 sm:$0xff]  }
 0x2c2   : > { %v9691_v12 = vpop.eup %9690  ;;  %v3579_v47 = vpop.f32.mrf.mxu1  ;;  %6628 = vmatprep.subr.bf16.mxu0 %v9272_v30  ;;  %v4272_v39 = vadd.f32 1.0, %v9689_v31  ;;  %v4367_v7 = vmul.f32 %v4271_v29, %v3983_v11  ;;  %v3984_v48 = vmul.f32 0.5, %v12474_v0  ;;  %v3990_v52 = vmul.f32 0.5, %v12493_v16 }
 0x2c3   : > { %14771 = vst [vmem:[#allocation128_spill] sm:$0xff] %v12541_v19  ;;  %v4277_v26 = vadd.f32 1.0, %v9691_v12  ;;  %v12551_v9 = vadd.f32 %v3579_v47, %v3467_v28  ;;  %6458 = vmatprep.mubr.bf16.mxu0 %v12541_v19  ;;  %v4109_v62 = vmul.f32 0.70710677, %v12544_v35  ;;  %v12556_v50 = vpop.f32.mrf.mxu0  ;;  %9704 = verf.f32 %v4104_v57 }
 0x2c4   : > { %v12558_v17 = vpop.f32.mrf.mxu1  ;;  %v4368_v24 = vmul.f32 %v4272_v39, %v3984_v48  ;;  %v3995_v63 = vmul.f32 0.5, %v12496_v37  ;;  %v4001_v31 = vmul.f32 0.5, %v12513_v6  ;;  %v3996_v37 = vmul.f32 0.5, %v12503_v1 }
 0x2c5   : > { %v9693_v33 = vpop.eup %9692  ;;  %v4373_v27 = vmul.f32 %v4277_v26, %v3989_v59  ;;  %v4110_v61 = vmul.f32 0.70710677, %v12551_v9  ;;  %9706 = verf.f32 %v4109_v62  ;;  %6629 = vmatpush2.bf16.msra.mxu0 %v9270_v43  ;;  %v12563_v53 = vpop.f32.mrf.mxu0  ;;  %v4002_v6 = vmul.f32 0.5, %v12524_v56  ;;  %v9282_v56 = vld [vmem:[%s10620_s11 + $0x218] ss:$24 sps:$4 sm:$0xff]  }
 0x2c6   : > { %v4278_v32 = vadd.f32 1.0, %v9693_v33  ;;  %v12565_v18 = vpop.f32.mrf.mxu1  ;;  %v9695_v41 = vpop.eup %9694  ;;  %6630 = vmatprep.subr.bf16.mxu0 %v9275_v44  ;;  %6459 = vmatmul.mubr.bf16.gmra.mxu0 %v12535_v2  ;;  %v9279_v44 = vld [vmem:[%s10620_s11 + $0x248] ss:$24 sps:$4 sm:$0xff]   ;;  %v9284_v33 = vld [vmem:[%s10620_s11 + $0x21c] ss:$24 sps:$4 sm:$0xff]  }
 0x2c7   : > { %v12568_v40 = vpack.c.bf16 %v4373_v27, %v4367_v7  ;;  %9708 = verf.f32 %v4110_v61  ;;  %v12571_v54 = vpop.f32.mrf.mxu0  ;;  %v4283_v22 = vadd.f32 1.0, %v9695_v41  ;;  %v9321_v2 = vld [vmem:[%s10620_s11 + $0x698] ss:$24 sps:$4 sm:$0xff]  }
 0x2c8   : > { %v4374_v0 = vmul.f32 %v4278_v32, %v3990_v52  ;;  %v9697_v16 = vpop.eup %9696  ;;  %v12574_v4 = vpop.f32.mrf.mxu1 }
 0x2c9   : > { %14772 = vst [vmem:[#allocation129_spill] sm:$0xff] %v12568_v40  ;;  %6631 = vmatpush2.bf16.msra.mxu0 %v9273_v42  ;;  %v12576_v30 = vpop.f32.mrf.mxu0  ;;  %v4284_v11 = vadd.f32 1.0, %v9697_v16  ;;  %v4379_v59 = vmul.f32 %v4283_v22, %v3995_v63  ;;  %v4007_v22 = vmul.f32 0.5, %v12526_v58  ;;  %v4008_v63 = vmul.f32 0.5, %v12539_v13 }
 0x2ca   : > { %v12578_v29 = vpack.c.bf16 %v4374_v0, %v4368_v24  ;;  %v9699_v23 = vpop.eup %9698  ;;  %6632 = vmatprep.subr.bf16.mxu0 %v9278_v34  ;;  %v12587_v47 = vpop.f32.mrf.mxu1  ;;  %v9287_v0 = vld [vmem:[%s10620_s11 + $0x1ec] ss:$24 sps:$4 sm:$0xff]  }
 0x2cb   : > { %v4289_v28 = vadd.f32 1.0, %v9699_v23  ;;  %v12585_v12 = vpop.f32.mrf.mxu0  ;;  %v4380_v61 = vmul.f32 %v4284_v11, %v3996_v37 }
 0x2cc   : > { %14773 = vst [vmem:[#allocation130_spill] sm:$0xff] %v12578_v29  ;;  %6468 = vmatprep.mubr.bf16.mxu0 %v12578_v29  ;;  %v12599_v52 = vpop.f32.mrf.mxu1 }
 0x2cd   : > { %v9701_v43 = vpop.eup %9700  ;;  %v4385_v26 = vmul.f32 %v4289_v28, %v4001_v31  ;;  %6633 = vmatpush2.bf16.msra.mxu0 %v9276_v46  ;;  %v12589_v57 = vpop.f32.mrf.mxu0  ;;  %v4013_v46 = vmul.f32 0.5, %v12544_v35  ;;  %v4014_v31 = vmul.f32 0.5, %v12551_v9  ;;  %v9285_v35 = vld [vmem:[%s10620_s11 + $0x1e8] ss:$24 sps:$4 sm:$0xff]  }
 0x2ce   : > { %v9703_v39 = vpop.eup %9702  ;;  %v4290_v62 = vadd.f32 1.0, %v9701_v43  ;;  %6634 = vmatprep.subr.bf16.mxu0 %v9281_v55  ;;  %6469 = vmatmul.mubr.bf16.gmra.mxu0 %v12568_v40  ;;  %v12614_v11 = vpop.f32.mrf.mxu1 }
 0x2cf   : > { %v12595_v7 = vpack.c.bf16 %v4385_v26, %v4379_v59  ;;  %v12597_v27 = vpop.f32.mrf.mxu0  ;;  %v4295_v42 = vadd.f32 1.0, %v9703_v39  ;;  %v9290_v39 = vld [vmem:[%s10620_s11 + $0x1bc] ss:$24 sps:$4 sm:$0xff]  }
 0x2d0   : > { %v4386_v48 = vmul.f32 %v4290_v62, %v4002_v6  ;;  %v9705_v32 = vpop.eup %9704  ;;  %v12625_v37 = vpop.f32.mrf.mxu1 }
 0x2d1   : > { %14774 = vst [vmem:[#allocation131_spill] sm:$0xff] %v12595_v7  ;;  %6635 = vmatpush2.bf16.msra.mxu0 %v9279_v44  ;;  %v12602_v1 = vpop.f32.mrf.mxu0  ;;  %v4296_v34 = vadd.f32 1.0, %v9705_v32  ;;  %v4391_v43 = vmul.f32 %v4295_v42, %v4007_v22 }
 0x2d2   : > { %v9707_v41 = vpop.eup %9706  ;;  %v12605_v24 = vpack.c.bf16 %v4386_v48, %v4380_v61  ;;  %6636 = vmatprep.subr.bf16.mxu0 %v9284_v33  ;;  %v9288_v33 = vld [vmem:[%s10620_s11 + $0x1b8] ss:$24 sps:$4 sm:$0xff]   ;;  %v9293_v61 = vld [vmem:[%s10620_s11 + $0x18c] ss:$24 sps:$4 sm:$0xff]   ;;  %v12637_v32 = vpop.f32.mrf.mxu1 }
 0x2d3   : > { %v4301_v23 = vadd.f32 1.0, %v9707_v41  ;;  %v12610_v55 = vpop.f32.mrf.mxu0  ;;  %v4392_v26 = vmul.f32 %v4296_v34, %v4008_v63  ;;  %v9299_v41 = vld [vmem:[%s10620_s11 + $0x75c] ss:$24 sps:$4 sm:$0xff]   ;;  %v9297_v63 = vld [vmem:[%s10620_s11 + $0x758] ss:$24 sps:$4 sm:$0xff]  }
 0x2d4   : > { %14775 = vst [vmem:[#allocation132_spill] sm:$0xff] %v12605_v24  ;;  %v9709_v16 = vpop.eup %9708  ;;  %6478 = vmatprep.mubr.bf16.mxu0 %v12605_v24 }
 0x2d5   : > { %v4302_v28 = vadd.f32 1.0, %v9709_v16  ;;  %v4397_v59 = vmul.f32 %v4301_v23, %v4013_v46  ;;  %6637 = vmatpush2.bf16.msra.mxu0 %v9282_v56  ;;  %v12617_v58 = vpop.f32.mrf.mxu0  ;;  %v9291_v56 = vld [vmem:[%s10620_s11 + $0x188] ss:$24 sps:$4 sm:$0xff]  }
 0x2d6   : > { %6638 = vmatprep.subr.bf16.mxu0 %v9287_v0  ;;  %6479 = vmatmul.mubr.bf16.gmra.mxu0 %v12595_v7  ;;  %v12645_v0 = vpop.f32.mrf.mxu1  ;;  %v14778_v16 = vld [vmem:[#allocation125_spill] sm:$0xff] }
 0x2d7   : > { %v4398_v44 = vmul.f32 %v4302_v28, %v4014_v31  ;;  %v12621_v13 = vpack.c.bf16 %v4397_v59, %v4391_v43  ;;  %v12623_v9 = vpop.f32.mrf.mxu0  ;;  %v9305_v28 = vld [vmem:[%s10620_s11 + $0x72c] ss:$24 sps:$4 sm:$0xff]  }
 0x2d8   : > { %v12653_v23 = vpop.f32.mrf.mxu1 }
 0x2d9   : > { %14776 = vst [vmem:[#allocation133_spill] sm:$0xff] %v12621_v13  ;;  %v12628_v6 = vpack.c.bf16 %v4398_v44, %v4392_v26  ;;  %6639 = vmatpush2.bf16.msra.mxu0 %v9285_v35  ;;  %v12630_v62 = vpop.f32.mrf.mxu0  ;;  %v14779_v35 = vld [vmem:[#allocation124_spill] sm:$0xff]  ;;  %v14780_v26 = vld [vmem:[#allocation127_spill] sm:$0xff] }
 0x2da   : > { %6640 = vmatprep.subr.bf16.mxu0 %v9290_v39  ;;  %v12661_v59 = vpop.f32.mrf.mxu1  ;;  %v9303_v44 = vld [vmem:[%s10620_s11 + $0x728] ss:$24 sps:$4 sm:$0xff]  }
 0x2db   : > { %14777 = vst [vmem:[#allocation134_spill] sm:$0xff] %v12628_v6  ;;  %6488 = vmatprep.mubr.bf16.mxu0 %v12628_v6  ;;  %v12635_v48 = vpop.f32.mrf.mxu0  ;;  %v9315_v6 = vld [vmem:[%s10620_s11 + $0x6c8] ss:$24 sps:$4 sm:$0xff]  }
 0x2dd   : > { %6641 = vmatpush2.bf16.msra.mxu0 %v9288_v33  ;;  %v12639_v42 = vpop.f32.mrf.mxu0  ;;  %v9311_v33 = vld [vmem:[%s10620_s11 + $0x6fc] ss:$24 sps:$4 sm:$0xff]  }
 0x2de   : > { %6642 = vmatprep.subr.bf16.mxu0 %v9293_v61  ;;  %6489 = vmatmul.mubr.bf16.gmra.mxu0 %v12621_v13  ;;  %v14781_v13 = vld [vmem:[#allocation126_spill] sm:$0xff] }
 0x2df   : > { %v12643_v34 = vpop.f32.mrf.mxu0  ;;  %6644 = vmatprep.mubr.bf16.mxu0 %v14778_v16 }
 0x2e1   : > { %6643 = vmatpush2.bf16.msra.mxu0 %v9291_v56  ;;  %v12649_v22 = vpop.f32.mrf.mxu0  ;;  %v12671_v56 = vpop.f32.mrf.mxu1 }
 0x2e2   : > { %6838 = vmatprep.subr.bf16.mxu0 %v9299_v41  ;;  %v9309_v41 = vld [vmem:[%s10620_s11 + $0x6f8] ss:$24 sps:$4 sm:$0xff]  }
 0x2e3   : > { %v12651_v46 = vpop.f32.mrf.mxu0 }
 0x2e5   : > { %v12656_v31 = vpop.f32.mrf.mxu0 }
 0x2e6   : > { %6645 = vmatmul.mubr.bf16.vlgmr.msra.gmra.mxu0 %v14779_v35  ;;  %v9317_v35 = vld [vmem:[%s10620_s11 + $0x6cc] ss:$24 sps:$4 sm:$0xff]  }
 0x2e7   : > { %v12659_v43 = vpop.f32.mrf.mxu0  ;;  %6654 = vmatprep.mubr.bf16.mxu0 %v14780_v26  ;;  %6839 = vmatpush1.bf16.msra.mxu0 %v9297_v63  ;;  %v12679_v63 = vpop.f32.mrf.mxu1 }
 0x2e8   : > { %6840 = vmatprep.subr.bf16.mxu0 %v9305_v28  ;;  %v14782_v28 = vld [vmem:[#allocation103_spill] sm:$0xff] }
 0x2e9   : > { %v12666_v39 = vpop.f32.mrf.mxu0  ;;  %v12690_v29 = vpop.f32.mrf.mxu1 }
 0x2eb   : > { %v12669_v61 = vpop.f32.mrf.mxu0  ;;  %6841 = vmatpush1.bf16.msra.mxu0 %v9303_v44  ;;  %v9323_v44 = vld [vmem:[%s10620_s11 + $0x69c] ss:$24 sps:$4 sm:$0xff]   ;;  %v12704_v10 = vpop.f32.mrf.mxu1 }
 0x2ec   : > { %6842 = vmatprep.subr.bf16.mxu0 %v9311_v33  ;;  %v14783_v33 = vld [vmem:[#allocation113_spill] sm:$0xff] }
 0x2ed   : > { %v12674_v16 = vpop.f32.mrf.mxu0  ;;  %v14602_v40 = vsub.s32 4, %v14783_v33 }
 0x2ee   : > { %6655 = vmatmul.mubr.bf16.gmra.mxu0 %v14781_v13 }
 0x2ef   : > { %v12677_v26 = vpop.f32.mrf.mxu0  ;;  %6664 = vmatprep.mubr.bf16.mxu0 %v14782_v28  ;;  %6843 = vmatpush1.bf16.msra.mxu0 %v9309_v41  ;;  %v9329_v41 = vld [vmem:[%s10620_s11 + $0x66c] ss:$24 sps:$4 sm:$0xff]  }
 0x2f0   : > { %6844 = vmatprep.subr.bf16.mxu0 %v9317_v35  ;;  %v9775_v35 = vld [vmem:[%s10615_s10] sm:$0x3f] }
 0x2f1   : > { %v12684_v7 = vpop.f32.mrf.mxu0  ;;  %v12702_v21 = vrot.slane %v9775_v35, %v14602_v40 }
 0x2f3   : > { %v12687_v24 = vpop.f32.mrf.mxu0  ;;  %6845 = vmatpush1.bf16.msra.mxu0 %v9315_v6  ;;  %v14786_v6 = vld [vmem:[#allocation115_spill] sm:$0xff]  ;;  %v3617_v40 = vadd.f32 %v12546_v8, %v12702_v21  ;;  %v3621_v8 = vadd.f32 %v12563_v53, %v12702_v21  ;;  %v3627_v53 = vadd.f32 %v12576_v30, %v12702_v21 }
 0x2f4   : > { %6846 = vmatprep.subr.bf16.mxu0 %v9323_v44  ;;  %v14788_v44 = vsub.s32 5, %v14783_v33  ;;  %v9341_v33 = vld [vmem:[%s10620_s11 + $0x60c] ss:$24 sps:$4 sm:$0xff]  }
 0x2f5   : > { %v12693_v13 = vpop.f32.mrf.mxu0 }
 0x2f6   : > { %6665 = vmatmul.mubr.bf16.gmra.mxu0 %v14785_v5  ;;  %v12713_v49 = vrot.slane %v9775_v35, %v14788_v44  ;;  %v12720_v5 = vpop.f32.mrf.mxu1  ;;  %v3730_v35 = vadd.f32 %v12558_v17, %v3617_v40  ;;  %v9347_v40 = vld [vmem:[%s10620_s11 + $0x8dc] ss:$24 sps:$4 sm:$0xff]  }
 0x2f7   : > { %v12697_v19 = vpop.f32.mrf.mxu0  ;;  %6674 = vmatprep.mubr.bf16.mxu0 %v14786_v6  ;;  %6847 = vmatpush1.bf16.msra.mxu0 %v9321_v2  ;;  %v9333_v6 = vld [vmem:[%s10620_s11 + $0x638] ss:$24 sps:$4 sm:$0xff]  }
 0x2f8   : > { %14784 = vst [vmem:[#allocation135_spill] sm:$0xff] %v12697_v19  ;;  %6848 = vmatprep.subr.bf16.mxu0 %v9329_v41  ;;  %v3619_v60 = vadd.f32 %v12556_v50, %v12713_v49  ;;  %v12733_v44 = vpop.f32.mrf.mxu1 }
 0x2f9   : > { %v12709_v28 = vpop.f32.mrf.mxu0 }
 0x2fa   : > { %14787 = vst [vmem:[#allocation136_spill] sm:$0xff] %v12709_v28  ;;  %v3734_v28 = vadd.f32 %v12574_v4, %v3621_v8  ;;  %v3740_v8 = vadd.f32 %v12599_v52, %v3627_v53  ;;  %v9351_v52 = vld [vmem:[%s10620_s11 + $0x8a8] ss:$24 sps:$4 sm:$0xff]   ;;  %v9359_v53 = vld [vmem:[%s10620_s11 + $0x87c] ss:$24 sps:$4 sm:$0xff]  }
 0x2fb   : > { %v12716_v45 = vpop.f32.mrf.mxu0  ;;  %6849 = vmatpush1.bf16.msra.mxu0 %v9327_v25  ;;  %v3623_v25 = vadd.f32 %v12571_v54, %v12713_v49  ;;  %v12747_v54 = vpop.f32.mrf.mxu1 }
 0x2fc   : > { %14789 = vst [vmem:[#allocation137_spill] sm:$0xff] %v12716_v45  ;;  %6850 = vmatprep.subr.bf16.mxu0 %v9335_v51  ;;  %v14792_v45 = vld [vmem:[#allocation114_spill] sm:$0xff]  ;;  %v9339_v51 = vld [vmem:[%s10620_s11 + $0x608] ss:$24 sps:$4 sm:$0xff]  }
 0x2fd   : > { %v12723_v2 = vpop.f32.mrf.mxu0  ;;  %v3736_v19 = vadd.f32 %v12587_v47, %v3623_v25  ;;  %v3631_v47 = vadd.f32 %v12589_v57, %v12702_v21  ;;  %v14794_v25 = vld [vmem:[#allocation108_spill] sm:$0xff] }
 0x2fe   : > { %14790 = vst [vmem:[#allocation138_spill] sm:$0xff] %v12723_v2  ;;  %6675 = vmatmul.mubr.bf16.gmra.mxu0 %v14792_v45  ;;  %v14793_v2 = vld [vmem:[#allocation116_spill] sm:$0xff] }
 0x2ff   : > { %v12728_v41 = vpop.f32.mrf.mxu0  ;;  %6684 = vmatprep.mubr.bf16.mxu0 %v14793_v2  ;;  %6851 = vmatpush1.bf16.msra.mxu0 %v9333_v6 }
 0x300   : > { %14791 = vst [vmem:[#allocation139_spill] sm:$0xff] %v12728_v41  ;;  %v3732_v41 = vadd.f32 %v12565_v18, %v3619_v60  ;;  %6852 = vmatprep.subr.bf16.mxu0 %v9341_v33  ;;  %v9345_v60 = vld [vmem:[%s10620_s11 + $0x8d8] ss:$24 sps:$4 sm:$0xff]   ;;  %v3629_v33 = vadd.f32 %v12585_v12, %v12713_v49 }
 0x301   : > { %v3842_v50 = vpop.f32.mrf.mxu0 }
 0x302   : > { %v12741_v17 = vadd.f32 %v3842_v50, %v3730_v35  ;;  %v9353_v35 = vld [vmem:[%s10620_s11 + $0x8ac] ss:$24 sps:$4 sm:$0xff]   ;;  %v3742_v57 = vadd.f32 %v12614_v11, %v3629_v33 }
 0x303   : > { %v3844_v45 = vpop.f32.mrf.mxu0  ;;  %6853 = vmatpush1.bf16.msra.mxu0 %v9339_v51 }
 0x304   : > { %v4021_v2 = vmul.f32 0.70710677, %v12741_v17  ;;  %v12750_v6 = vadd.f32 %v3844_v45, %v3732_v41  ;;  %6854 = vmatprep.subr.bf16.mxu0 %v9347_v40  ;;  %v12763_v41 = vpop.f32.mrf.mxu1 }
 0x305   : > { %v3846_v18 = vpop.f32.mrf.mxu0 }
 0x306   : > { %9710 = verf.f32 %v4021_v2  ;;  %v4022_v30 = vmul.f32 0.70710677, %v12750_v6  ;;  %v12757_v4 = vadd.f32 %v3846_v18, %v3734_v28  ;;  %6685 = vmatmul.mubr.bf16.gmra.mxu0 %v14794_v25  ;;  %v3633_v28 = vadd.f32 %v12597_v27, %v12713_v49 }
 0x307   : > { %v3848_v45 = vpop.f32.mrf.mxu0  ;;  %6694 = vmatprep.mubr.bf16.mxu0 %v12274_v15  ;;  %6855 = vmatpush2.bf16.msra.mxu0 %v9345_v60  ;;  %v3744_v18 = vadd.f32 %v12625_v37, %v3631_v47  ;;  %v12781_v60 = vpop.f32.mrf.mxu1  ;;  %v9365_v47 = vld [vmem:[%s10620_s11 + $0x84c] ss:$24 sps:$4 sm:$0xff]  }
 0x308   : > { %9712 = verf.f32 %v4022_v30  ;;  %v4027_v12 = vmul.f32 0.70710677, %v12757_v4  ;;  %v12767_v2 = vadd.f32 %v3848_v45, %v3736_v19  ;;  %6856 = vmatprep.subr.bf16.mxu0 %v9353_v35  ;;  %v3637_v19 = vadd.f32 %v12602_v1, %v12702_v21  ;;  %v9357_v35 = vld [vmem:[%s10620_s11 + $0x878] ss:$24 sps:$4 sm:$0xff]  }
 0x309   : > { %v3852_v51 = vpop.f32.mrf.mxu0  ;;  %v3746_v33 = vadd.f32 %v12637_v32, %v3633_v28  ;;  %v3639_v45 = vadd.f32 %v12610_v55, %v12713_v49  ;;  %v3643_v32 = vadd.f32 %v12623_v9, %v12713_v49  ;;  %v3647_v28 = vadd.f32 %v12630_v62, %v12702_v21  ;;  %v9363_v62 = vld [vmem:[%s10620_s11 + $0x848] ss:$24 sps:$4 sm:$0xff]  }
 0x30a   : > { %9714 = verf.f32 %v4027_v12  ;;  %v4028_v50 = vmul.f32 0.70710677, %v12767_v2  ;;  %v12775_v40 = vadd.f32 %v3852_v51, %v3740_v8  ;;  %v3750_v12 = vadd.f32 %v12645_v0, %v3637_v19 }
 0x30b   : > { %v3854_v27 = vpop.f32.mrf.mxu0  ;;  %6857 = vmatpush2.bf16.msra.mxu0 %v9351_v52  ;;  %v3641_v51 = vadd.f32 %v12617_v58, %v12702_v21  ;;  %v3649_v52 = vadd.f32 %v12635_v48, %v12713_v49  ;;  %v3651_v58 = vadd.f32 %v12639_v42, %v12702_v21  ;;  %v3653_v9 = vadd.f32 %v12643_v34, %v12713_v49 }
 0x30c   : > { %9716 = verf.f32 %v4028_v50  ;;  %v4033_v30 = vmul.f32 0.70710677, %v12775_v40  ;;  %v12784_v11 = vadd.f32 %v3854_v27, %v3742_v57  ;;  %6858 = vmatprep.subr.bf16.mxu0 %v9359_v53  ;;  %v12803_v57 = vpop.f32.mrf.mxu1  ;;  %v3657_v53 = vadd.f32 %v12649_v22, %v12702_v21 }
 0x30d   : > { %v3856_v8 = vpop.f32.mrf.mxu0  ;;  %v3752_v42 = vadd.f32 %v12653_v23, %v3639_v45  ;;  %v3754_v34 = vadd.f32 %v12661_v59, %v3641_v51  ;;  %v3762_v22 = vadd.f32 %v12690_v29, %v3649_v52  ;;  %v12831_v23 = vadd.f32 %v12720_v5, %v3653_v9  ;;  %v9369_v45 = vld [vmem:[%s10620_s11 + $0x818] ss:$24 sps:$4 sm:$0xff]  }
 0x30e   : > { %9718 = verf.f32 %v4033_v30  ;;  %v4034_v1 = vmul.f32 0.70710677, %v12784_v11  ;;  %v12791_v37 = vadd.f32 %v3856_v8, %v3744_v18  ;;  %6695 = vmatmul.mubr.bf16.gmra.mxu0 %v12250_v38  ;;  %v9371_v18 = vld [vmem:[%s10620_s11 + $0x81c] ss:$24 sps:$4 sm:$0xff]   ;;  %v3760_v8 = vadd.f32 %v12679_v63, %v3647_v28 }
 0x30f   : > { %v3858_v55 = vpop.f32.mrf.mxu0  ;;  %6704 = vmatprep.mubr.bf16.mxu0 %v12316_v14  ;;  %6859 = vmatpush2.bf16.msra.mxu0 %v9357_v35  ;;  %v3659_v29 = vadd.f32 %v12651_v46, %v12713_v49  ;;  %v12839_v51 = vadd.f32 %v12733_v44, %v3657_v53  ;;  %v3661_v5 = vadd.f32 %v12656_v31, %v12702_v21  ;;  %v3925_v52 = vmul.f32 0.5, %v12741_v17 }
 0x310   : > { %9720 = verf.f32 %v4034_v1  ;;  %v4039_v0 = vmul.f32 0.70710677, %v12791_v37  ;;  %v12807_v50 = vadd.f32 %v3858_v55, %v3746_v33  ;;  %6860 = vmatprep.subr.bf16.mxu0 %v9365_v47  ;;  %v3756_v33 = vadd.f32 %v12671_v56, %v3643_v32  ;;  %v12826_v1 = vpop.f32.mrf.mxu1 }
 0x311   : > { %v3862_v48 = vpop.f32.mrf.mxu0  ;;  %v3764_v55 = vadd.f32 %v12704_v10, %v3651_v58  ;;  %v9377_v10 = vld [vmem:[%s10620_s11 + $0x7ec] ss:$24 sps:$4 sm:$0xff]   ;;  %v3932_v17 = vmul.f32 0.5, %v12767_v2  ;;  %v3663_v2 = vadd.f32 %v12659_v43, %v12713_v49 }
 0x312   : > { %9722 = verf.f32 %v4039_v0  ;;  %v4040_v19 = vmul.f32 0.70710677, %v12807_v50  ;;  %v12818_v27 = vadd.f32 %v3862_v48, %v3750_v12  ;;  %v3926_v0 = vmul.f32 0.5, %v12750_v6  ;;  %v12849_v9 = vpop.f32.mrf.mxu1 }
 0x313   : > { %v9711_v30 = vpop.eup %9710  ;;  %v3864_v35 = vpop.f32.mrf.mxu0  ;;  %6861 = vmatpush2.bf16.msra.mxu0 %v9363_v62  ;;  %v3931_v62 = vmul.f32 0.5, %v12757_v4 }
 0x314   : > { %9724 = verf.f32 %v4040_v19  ;;  %v4045_v47 = vmul.f32 0.70710677, %v12818_v27  ;;  %v4213_v59 = vadd.f32 1.0, %v9711_v30  ;;  %v12833_v56 = vadd.f32 %v3864_v35, %v3752_v42  ;;  %6862 = vmatprep.subr.bf16.mxu0 %v9371_v18  ;;  %v9375_v18 = vld [vmem:[%s10620_s11 + $0x7e8] ss:$24 sps:$4 sm:$0xff]  }
 0x315   : > { %v9713_v12 = vpop.eup %9712  ;;  %v3866_v63 = vpop.f32.mrf.mxu0  ;;  %v9383_v35 = vld [vmem:[%s10620_s11 + $0x7bc] ss:$24 sps:$4 sm:$0xff]  }
 0x316   : > { %9726 = verf.f32 %v4045_v47  ;;  %v12841_v32 = vadd.f32 %v3866_v63, %v3754_v34  ;;  %v4046_v58 = vmul.f32 0.70710677, %v12833_v56  ;;  %v4214_v44 = vadd.f32 1.0, %v9713_v12  ;;  %6705 = vmatmul.mubr.bf16.gmra.mxu0 %v12295_v3 }
 0x317   : > { %v9715_v28 = vpop.eup %9714  ;;  %v3868_v46 = vpop.f32.mrf.mxu0  ;;  %v4309_v19 = vmul.f32 %v4213_v59, %v3925_v52  ;;  %6714 = vmatprep.mubr.bf16.mxu0 %v12357_v36  ;;  %6863 = vmatpush2.bf16.msra.mxu0 %v9369_v45  ;;  %v12863_v12 = vadd.f32 %v12747_v54, %v3659_v29  ;;  %v3667_v63 = vadd.f32 %v12666_v39, %v12702_v21 }
 0x318   : > { %v4219_v48 = vadd.f32 1.0, %v9715_v28  ;;  %v4051_v53 = vmul.f32 0.70710677, %v12841_v32  ;;  %9728 = verf.f32 %v4046_v58  ;;  %v12856_v6 = vadd.f32 %v3868_v46, %v3756_v33  ;;  %6864 = vmatprep.subr.bf16.mxu0 %v9377_v10 }
 0x319   : > { %v9717_v31 = vpop.eup %9716  ;;  %v3872_v30 = vpop.f32.mrf.mxu0  ;;  %v12868_v33 = vadd.f32 %v12763_v41, %v3661_v5  ;;  %v4310_v10 = vmul.f32 %v4214_v44, %v3926_v0  ;;  %v9381_v5 = vld [vmem:[%s10620_s11 + $0x7b8] ss:$24 sps:$4 sm:$0xff]   ;;  %v3669_v39 = vadd.f32 %v12669_v61, %v12713_v49  ;;  %v3671_v0 = vadd.f32 %v12674_v16, %v12702_v21  ;;  %v9389_v44 = vld [vmem:[%s10620_s11 + $0x78c] ss:$24 sps:$4 sm:$0xff]  }
 0x31a   : > { %v4315_v42 = vmul.f32 %v4219_v48, %v3931_v62  ;;  %v4220_v4 = vadd.f32 1.0, %v9717_v31  ;;  %9730 = verf.f32 %v4051_v53  ;;  %v12859_v34 = vadd.f32 %v3872_v30, %v3760_v8  ;;  %v12873_v8 = vpop.f32.mrf.mxu1  ;;  %v9390_v48 = vld [vmem:[%s10620_s11 + $0x458] ss:$24 sps:$4 sm:$0xff]  }
 0x31b   : > { %v9719_v47 = vpop.eup %9718  ;;  %v4052_v59 = vmul.f32 0.70710677, %v12856_v6  ;;  %v3874_v45 = vpop.f32.mrf.mxu0  ;;  %6865 = vmatpush2.bf16.msra.mxu0 %v9375_v18  ;;  %v3938_v31 = vmul.f32 0.5, %v12784_v11 }
 0x31c   : > { %v12875_v28 = vpack.c.bf16 %v4315_v42, %v4309_v19  ;;  %v4316_v54 = vmul.f32 %v4220_v4, %v3932_v17  ;;  %v4225_v52 = vadd.f32 1.0, %v9719_v47  ;;  %v4057_v43 = vmul.f32 0.70710677, %v12859_v34  ;;  %6866 = vmatprep.subr.bf16.mxu0 %v9383_v35  ;;  %v9398_v17 = vld [vmem:[%s10620_s11 + $0x42c] ss:$24 sps:$4 sm:$0xff]   ;;  %v12895_v18 = vpop.f32.mrf.mxu1 }
 0x31d   : > { %v9721_v29 = vpop.eup %9720  ;;  %9732 = verf.f32 %v4052_v59  ;;  %v12878_v41 = vadd.f32 %v3874_v45, %v3762_v22  ;;  %v3876_v58 = vpop.f32.mrf.mxu0  ;;  %v3937_v22 = vmul.f32 0.5, %v12775_v40  ;;  %v3944_v4 = vmul.f32 0.5, %v12807_v50  ;;  %v9387_v47 = vld [vmem:[%s10620_s11 + $0x788] ss:$24 sps:$4 sm:$0xff]   ;;  %v9395_v50 = vld [vmem:[%s10620_s11 + $0x464] ss:$24 sps:$4 sm:$0xff]  }
 0x31e   : > { %v12885_v46 = vadd.f32 %v3876_v58, %v3764_v55  ;;  %v12888_v62 = vpack.c.bf16 %v4316_v54, %v4310_v10  ;;  %9734 = verf.f32 %v4057_v43  ;;  %v4226_v16 = vadd.f32 1.0, %v9721_v29  ;;  %6715 = vmatmul.mubr.bf16.gmra.mxu0 %v12333_v20  ;;  %v9396_v58 = vld [vmem:[%s10620_s11 + $0x428] ss:$24 sps:$4 sm:$0xff]  }
 0x31f   : > { %v9723_v53 = vpop.eup %9722  ;;  %v4058_v19 = vmul.f32 0.70710677, %v12878_v41  ;;  %v3878_v61 = vpop.f32.mrf.mxu0  ;;  %v3943_v55 = vmul.f32 0.5, %v12791_v37  ;;  %v4321_v11 = vmul.f32 %v4225_v52, %v3937_v22  ;;  %6867 = vmatpush2.bf16.msra.mxu0 %v9381_v5  ;;  %v3776_v29 = vadd.f32 %v12781_v60, %v3663_v2 }
 0x320   : > { %v4231_v30 = vadd.f32 1.0, %v9723_v53  ;;  %v4063_v42 = vmul.f32 0.70710677, %v12885_v46  ;;  %6531 = vmatprep.mubr.bf16.mxu1 %v12888_v62  ;;  %v12903_v35 = vadd.f32 %v3878_v61, %v12831_v23  ;;  %6870 = vmatprep.mubr.bf16.mxu0 %v12888_v62  ;;  %v3780_v23 = vadd.f32 %v12803_v57, %v3667_v63 }
 0x321   : > { %v9725_v40 = vpop.eup %9724  ;;  %9736 = verf.f32 %v4058_v19  ;;  %v3882_v37 = vpop.f32.mrf.mxu0  ;;  %6868 = vmatprep.subr.bf16.mxu0 %v9389_v44  ;;  %6532 = vmatmul.mubr.bf16.vlgmr.msra.gmra.mxu1 %v12875_v28  ;;  %v3673_v52 = vadd.f32 %v12677_v26, %v12713_v49  ;;  %v4322_v53 = vmul.f32 %v4226_v16, %v3938_v31  ;;  %v12926_v57 = vadd.f32 %v12849_v9, %v3671_v0  ;;  %v9401_v9 = vld [vmem:[%s10620_s11 + $0x434] ss:$24 sps:$4 sm:$0xff]  }
 0x322   : > { %v4327_v59 = vmul.f32 %v4231_v30, %v3943_v55  ;;  %v4232_v45 = vadd.f32 1.0, %v9725_v40  ;;  %9738 = verf.f32 %v4063_v42  ;;  %v12908_v10 = vadd.f32 %v3882_v37, %v12839_v51  ;;  %6726 = vmatpush1.bf16.msra.mxu1 %v9390_v48  ;;  %v12921_v44 = vpop.f32.mrf.mxu1  ;;  %v9404_v55 = vld [vmem:[%s10620_s11 + $0x3fc] ss:$24 sps:$4 sm:$0xff]  }
 0x323   : > { %v9727_v54 = vpop.eup %9726  ;;  %v4064_v43 = vmul.f32 0.70710677, %v12903_v35  ;;  %v3884_v5 = vpop.f32.mrf.mxu0  ;;  %v12919_v51 = vadd.f32 %v12826_v1, %v3669_v39  ;;  %6727 = vmatprep.subr.bf16.mxu1 %v9398_v17  ;;  %6869 = vmatpush2.bf16.msra.mxu0 %v9387_v47  ;;  %v9393_v1 = vld [vmem:[%s10620_s11 + $0x460] ss:$24 sps:$4 sm:$0xff]   ;;  %v3677_v48 = vadd.f32 %v12684_v7, %v12702_v21  ;;  %v3949_v17 = vmul.f32 0.5, %v12818_v27 }
 0x324   : > { %v12923_v22 = vpack.c.bf16 %v4327_v59, %v4321_v11  ;;  %v4328_v60 = vmul.f32 %v4232_v45, %v3944_v4  ;;  %v4069_v26 = vmul.f32 0.70710677, %v12908_v10  ;;  %v12930_v2 = vadd.f32 %v3884_v5, %v12863_v12  ;;  %7064 = vmatprep.subr.bf16.mxu0 %v9395_v50  ;;  %v3793_v30 = vpop.f32.mrf.mxu1  ;;  %v9402_v27 = vld [vmem:[%s10620_s11 + $0x3f8] ss:$24 sps:$4 sm:$0xff]   ;;  %v9410_v59 = vld [vmem:[%s10620_s11 + $0x3cc] ss:$24 sps:$4 sm:$0xff]  }
 0x325   : > { %9740 = verf.f32 %v4064_v43  ;;  %v3886_v63 = vpop.f32.mrf.mxu0  ;;  %v9729_v39 = vpop.eup %9728  ;;  %v4237_v31 = vadd.f32 1.0, %v9727_v54  ;;  %v12942_v12 = vadd.f32 %v12873_v8, %v3673_v52  ;;  %v3679_v11 = vadd.f32 %v12687_v24, %v12713_v49  ;;  %v9407_v24 = vld [vmem:[%s10620_s11 + $0x404] ss:$24 sps:$4 sm:$0xff]  }
 0x326   : > { %v12936_v19 = vadd.f32 %v3886_v63, %v12868_v33  ;;  %v12939_v0 = vpack.c.bf16 %v4328_v60, %v4322_v53  ;;  %9742 = verf.f32 %v4069_v26  ;;  %v4070_v16 = vmul.f32 0.70710677, %v12930_v2  ;;  %6728 = vmatpush1.bf16.msra.mxu1 %v9396_v58  ;;  %6871 = vmatmul.mubr.bf16.vlgmr.msra.gmra.mxu0 %v12875_v28  ;;  %v3795_v26 = vpop.f32.mrf.mxu1 }
 0x327   : > { %v9731_v61 = vpop.eup %9730  ;;  %v3888_v7 = vpop.f32.mrf.mxu0  ;;  %v3955_v33 = vmul.f32 0.5, %v12841_v32  ;;  %v3681_v4 = vadd.f32 %v12693_v13, %v12702_v21  ;;  %v4238_v47 = vadd.f32 1.0, %v9729_v39  ;;  %7065 = vmatpush1.bf16.msra.mxu0 %v9393_v1  ;;  %v9399_v32 = vld [vmem:[%s10620_s11 + $0x430] ss:$24 sps:$4 sm:$0xff]   ;;  %v4333_v50 = vmul.f32 %v4237_v31, %v3949_v17  ;;  %6729 = vmatprep.subr.bf16.mxu1 %v9404_v55  ;;  %v9413_v55 = vld [vmem:[%s10620_s11 + $0x3d4] ss:$24 sps:$4 sm:$0xff]  }
 0x328   : > { %v4243_v42 = vadd.f32 1.0, %v9731_v61  ;;  %v4075_v40 = vmul.f32 0.70710677, %v12936_v19  ;;  %v12950_v8 = vadd.f32 %v3888_v7, %v3776_v29  ;;  %6541 = vmatprep.mubr.bf16.mxu1 %v12939_v0  ;;  %9744 = verf.f32 %v4070_v16  ;;  %6880 = vmatprep.mubr.bf16.mxu0 %v12939_v0  ;;  %v9405_v61 = vld [vmem:[%s10620_s11 + $0x400] ss:$24 sps:$4 sm:$0xff]  }
 0x329   : > { %v3892_v37 = vpop.f32.mrf.mxu0  ;;  %7066 = vmatprep.subr.bf16.mxu0 %v9401_v9  ;;  %6542 = vmatmul.mubr.bf16.gmra.mxu1 %v12923_v22  ;;  %v3950_v13 = vmul.f32 0.5, %v12833_v56  ;;  %v3956_v52 = vmul.f32 0.5, %v12856_v6  ;;  %v3790_v60 = vadd.f32 %v12895_v18, %v3677_v48  ;;  %v9408_v56 = vld [vmem:[%s10620_s11 + $0x3c8] ss:$24 sps:$4 sm:$0xff]   ;;  %v14795_v6 = vld [vmem:[#allocation135_spill] sm:$0xff]  ;;  %v3792_v17 = vadd.f32 %v12921_v44, %v3679_v11  ;;  %v3799_v11 = vpop.f32.mrf.mxu1 }
 0x32a   : > { %v9733_v45 = vpop.eup %9732  ;;  %v4339_v54 = vmul.f32 %v4243_v42, %v3955_v33  ;;  %9746 = verf.f32 %v4075_v40  ;;  %v4076_v29 = vmul.f32 0.70710677, %v12950_v8  ;;  %v12966_v5 = vadd.f32 %v3892_v37, %v3780_v23  ;;  %6730 = vmatpush1.bf16.msra.mxu1 %v9402_v27  ;;  %v14796_v40 = vld [vmem:[#allocation136_spill] sm:$0xff]  ;;  %v9414_v37 = vld [vmem:[%s10620_s11 + $0x398] ss:$24 sps:$4 sm:$0xff]  }
 0x32b   : > { %v4244_v43 = vadd.f32 1.0, %v9733_v45  ;;  %v3894_v58 = vpop.f32.mrf.mxu0  ;;  %v9735_v53 = vpop.eup %9734  ;;  %v3683_v23 = vadd.f32 %v14795_v6, %v12713_v49  ;;  %v4334_v39 = vmul.f32 %v4238_v47, %v3950_v13  ;;  %7067 = vmatpush1.bf16.msra.mxu0 %v9399_v32  ;;  %6731 = vmatprep.subr.bf16.mxu1 %v9410_v59  ;;  %v3794_v42 = vadd.f32 %v3793_v30, %v3681_v4  ;;  %v9416_v44 = vld [vmem:[%s10620_s11 + $0x39c] ss:$24 sps:$4 sm:$0xff]  }
 0x32c   : > { %v12969_v1 = vpack.c.bf16 %v4339_v54, %v4333_v50  ;;  %9748 = verf.f32 %v4076_v29  ;;  %v12972_v63 = vadd.f32 %v3894_v58, %v12919_v51  ;;  %v4081_v9 = vmul.f32 0.70710677, %v12966_v5  ;;  %7068 = vmatprep.subr.bf16.mxu0 %v9407_v24  ;;  %v9411_v29 = vld [vmem:[%s10620_s11 + $0x3d0] ss:$24 sps:$4 sm:$0xff]   ;;  %v9419_v58 = vld [vmem:[%s10620_s11 + $0x3a4] ss:$24 sps:$4 sm:$0xff]  }
 0x32d   : > { %v4340_v31 = vmul.f32 %v4244_v43, %v3956_v52  ;;  %v3896_v18 = vpop.f32.mrf.mxu0  ;;  %v4249_v51 = vadd.f32 1.0, %v9735_v53  ;;  %v3687_v27 = vadd.f32 %v14796_v40, %v12702_v21  ;;  %v3961_v59 = vmul.f32 0.5, %v12859_v34 }
 0x32e   : > { %v9737_v48 = vpop.eup %9736  ;;  %v4082_v16 = vmul.f32 0.70710677, %v12972_v63  ;;  %v12982_v7 = vadd.f32 %v3896_v18, %v12926_v57  ;;  %9750 = verf.f32 %v4081_v9  ;;  %v3967_v57 = vmul.f32 0.5, %v12885_v46  ;;  %6881 = vmatmul.mubr.bf16.gmra.mxu0 %v12923_v22  ;;  %6732 = vmatpush1.bf16.msra.mxu1 %v9408_v56  ;;  %v9422_v46 = vld [vmem:[%s10620_s11 + $0x36c] ss:$24 sps:$4 sm:$0xff]  }
 0x32f   : > { %v9739_v33 = vpop.eup %9738  ;;  %v3898_v47 = vpop.f32.mrf.mxu0  ;;  %v12987_v32 = vpack.c.bf16 %v4340_v31, %v4334_v39  ;;  %v12995_v4 = vadd.f32 %v3795_v26, %v3683_v23  ;;  %v4250_v50 = vadd.f32 1.0, %v9737_v48  ;;  %7069 = vmatpush1.bf16.msra.mxu0 %v9405_v61  ;;  %v4345_v13 = vmul.f32 %v4249_v51, %v3961_v59  ;;  %6733 = vmatprep.subr.bf16.mxu1 %v9416_v44  ;;  %v14797_v39 = vld [vmem:[#allocation137_spill] sm:$0xff]  ;;  %v14798_v59 = vld [vmem:[#allocation138_spill] sm:$0xff] }
 0x330   : > { %v4255_v45 = vadd.f32 1.0, %v9739_v33  ;;  %v4087_v30 = vmul.f32 0.70710677, %v12982_v7  ;;  %9752 = verf.f32 %v4082_v16  ;;  %v12998_v54 = vadd.f32 %v3898_v47, %v12942_v12  ;;  %7070 = vmatprep.subr.bf16.mxu0 %v9413_v55  ;;  %v9417_v16 = vld [vmem:[%s10620_s11 + $0x3a0] ss:$24 sps:$4 sm:$0xff]  }
 0x331   : > { %6551 = vmatprep.mubr.bf16.mxu1 %v12987_v32  ;;  %v3902_v34 = vpop.f32.mrf.mxu0  ;;  %6890 = vmatprep.mubr.bf16.mxu0 %v12987_v32  ;;  %v3962_v53 = vmul.f32 0.5, %v12878_v41  ;;  %v3968_v12 = vmul.f32 0.5, %v12903_v35  ;;  %v3689_v31 = vadd.f32 %v14797_v39, %v12713_v49  ;;  %v9420_v35 = vld [vmem:[%s10620_s11 + $0x368] ss:$24 sps:$4 sm:$0xff]   ;;  %v3800_v40 = vadd.f32 %v3799_v11, %v3687_v27  ;;  %v9426_v27 = vld [vmem:[%s10620_s11 + $0x338] ss:$24 sps:$4 sm:$0xff]  }
 0x332   : > { %v9741_v24 = vpop.eup %9740  ;;  %v4351_v52 = vmul.f32 %v4255_v45, %v3967_v57  ;;  %9754 = verf.f32 %v4087_v30  ;;  %v13004_v43 = vadd.f32 %v3902_v34, %v3790_v60  ;;  %v4088_v56 = vmul.f32 0.70710677, %v12998_v54  ;;  %6552 = vmatmul.mubr.bf16.gmra.mxu1 %v12969_v1  ;;  %v3801_v60 = vpop.f32.mrf.mxu1  ;;  %v9428_v11 = vld [vmem:[%s10620_s11 + $0x33c] ss:$24 sps:$4 sm:$0xff]  }
 0x333   : > { %v4256_v26 = vadd.f32 1.0, %v9741_v24  ;;  %v3904_v6 = vpop.f32.mrf.mxu0  ;;  %v9743_v23 = vpop.eup %9742  ;;  %6734 = vmatpush1.bf16.msra.mxu1 %v9414_v37  ;;  %v4346_v18 = vmul.f32 %v4250_v50, %v3962_v53  ;;  %7071 = vmatpush1.bf16.msra.mxu0 %v9411_v29  ;;  %v9425_v37 = vld [vmem:[%s10620_s11 + $0x374] ss:$24 sps:$4 sm:$0xff]   ;;  %v3691_v57 = vadd.f32 %v14798_v59, %v12702_v21  ;;  %v3973_v45 = vmul.f32 0.5, %v12908_v10 }
 0x334   : > { %v13013_v9 = vpack.c.bf16 %v4351_v52, %v4345_v13  ;;  %v4093_v61 = vmul.f32 0.70710677, %v13004_v43  ;;  %v13016_v41 = vadd.f32 %v3904_v6, %v3792_v17  ;;  %v4261_v51 = vadd.f32 1.0, %v9743_v23  ;;  %6735 = vmatprep.subr.bf16.mxu1 %v9422_v46  ;;  %7072 = vmatprep.subr.bf16.mxu0 %v9419_v58  ;;  %v3803_v34 = vpop.f32.mrf.mxu1  ;;  %v9423_v58 = vld [vmem:[%s10620_s11 + $0x370] ss:$24 sps:$4 sm:$0xff]   ;;  %v14799_v23 = vld [vmem:[#allocation139_spill] sm:$0xff] }
 0x335   : > { %v4352_v48 = vmul.f32 %v4256_v26, %v3968_v12  ;;  %9756 = verf.f32 %v4088_v56  ;;  %v3906_v55 = vpop.f32.mrf.mxu0  ;;  %v9745_v33 = vpop.eup %9744  ;;  %v3974_v30 = vmul.f32 0.5, %v12930_v2  ;;  %v3980_v13 = vmul.f32 0.5, %v12950_v8  ;;  %v9434_v53 = vld [vmem:[%s10620_s11 + $0x30c] ss:$24 sps:$4 sm:$0xff]  }
 0x336   : > { %9758 = verf.f32 %v4093_v61  ;;  %v4094_v47 = vmul.f32 0.70710677, %v13016_v41  ;;  %v13021_v17 = vadd.f32 %v3906_v55, %v3794_v42  ;;  %v4262_v46 = vadd.f32 1.0, %v9745_v33  ;;  %6891 = vmatmul.mubr.bf16.gmra.mxu0 %v12969_v1  ;;  %v9431_v8 = vld [vmem:[%s10620_s11 + $0x344] ss:$24 sps:$4 sm:$0xff]  }
 0x337   : > { %v9747_v44 = vpop.eup %9746  ;;  %v3908_v50 = vpop.f32.mrf.mxu0  ;;  %v13028_v29 = vpack.c.bf16 %v4352_v48, %v4346_v18  ;;  %v3979_v42 = vmul.f32 0.5, %v12936_v19  ;;  %6736 = vmatpush1.bf16.msra.mxu1 %v9420_v35  ;;  %v4357_v2 = vmul.f32 %v4261_v51, %v3973_v45  ;;  %7073 = vmatpush1.bf16.msra.mxu0 %v9417_v16  ;;  %v3802_v6 = vadd.f32 %v3801_v60, %v3689_v31  ;;  %v9432_v60 = vld [vmem:[%s10620_s11 + $0x308] ss:$24 sps:$4 sm:$0xff]   ;;  %v9437_v59 = vld [vmem:[%s10620_s11 + $0x314] ss:$24 sps:$4 sm:$0xff]  }
 0x338   : > { %v4267_v24 = vadd.f32 1.0, %v9747_v44  ;;  %v4099_v21 = vmul.f32 0.70710677, %v13021_v17  ;;  %9760 = verf.f32 %v4094_v47  ;;  %v13037_v52 = vadd.f32 %v3908_v50, %v12995_v4  ;;  %7074 = vmatprep.subr.bf16.mxu0 %v9425_v37  ;;  %6737 = vmatprep.subr.bf16.mxu1 %v9428_v11  ;;  %v3805_v48 = vpop.f32.mrf.mxu1  ;;  %v9429_v33 = vld [vmem:[%s10620_s11 + $0x340] ss:$24 sps:$4 sm:$0xff]  }
 0x339   : > { %v9749_v10 = vpop.eup %9748  ;;  %6561 = vmatprep.mubr.bf16.mxu1 %v13028_v29  ;;  %v3912_v19 = vpop.f32.mrf.mxu0  ;;  %6900 = vmatprep.mubr.bf16.mxu0 %v13028_v29  ;;  %v3693_v4 = vadd.f32 %v14799_v23, %v12713_v49  ;;  %v3804_v39 = vadd.f32 %v3803_v34, %v3691_v57  ;;  %v4358_v51 = vmul.f32 %v4262_v46, %v3974_v30  ;;  %v9438_v11 = vld [vmem:[%s10620_s11 + $0x5d8] ss:$24 sps:$4 sm:$0xff]   ;;  %v9440_v34 = vld [vmem:[%s10620_s11 + $0x5dc] ss:$24 sps:$4 sm:$0xff]   ;;  %v3985_v46 = vmul.f32 0.5, %v12966_v5 }
 0x33a   : > { %v4363_v12 = vmul.f32 %v4267_v24, %v3979_v42  ;;  %v4268_v26 = vadd.f32 1.0, %v9749_v10  ;;  %9762 = verf.f32 %v4099_v21  ;;  %v13043_v56 = vadd.f32 %v3912_v19, %v3800_v40  ;;  %6562 = vmatmul.mubr.bf16.gmra.mxu1 %v13013_v9 }
 0x33b   : > { %v4100_v61 = vmul.f32 0.70710677, %v13037_v52  ;;  %v3914_v35 = vpop.f32.mrf.mxu0  ;;  %v9751_v18 = vpop.eup %9750  ;;  %6738 = vmatpush1.bf16.msra.mxu1 %v9426_v27  ;;  %7075 = vmatpush1.bf16.msra.mxu0 %v9423_v58  ;;  %v3806_v30 = vadd.f32 %v3805_v48, %v3693_v4  ;;  %v3991_v42 = vmul.f32 0.5, %v12982_v7  ;;  %v9446_v58 = vld [vmem:[%s10620_s11 + $0x5ac] ss:$24 sps:$4 sm:$0xff]  }
 0x33c   : > { %v13050_v16 = vpack.c.bf16 %v4363_v12, %v4357_v2  ;;  %v4364_v55 = vmul.f32 %v4268_v26, %v3980_v13  ;;  %v4105_v31 = vmul.f32 0.70710677, %v13043_v56  ;;  %v13054_v49 = vadd.f32 %v3914_v35, %v3802_v6  ;;  %6739 = vmatprep.subr.bf16.mxu1 %v9434_v53  ;;  %7076 = vmatprep.subr.bf16.mxu0 %v9431_v8  ;;  %v9435_v13 = vld [vmem:[%s10620_s11 + $0x310] ss:$24 sps:$4 sm:$0xff]   ;;  %v9443_v53 = vld [vmem:[%s10620_s11 + $0x5e4] ss:$24 sps:$4 sm:$0xff]  }
 0x33d   : > { %9764 = verf.f32 %v4100_v61  ;;  %v3916_v40 = vpop.f32.mrf.mxu0  ;;  %v9753_v47 = vpop.eup %9752  ;;  %v4273_v37 = vadd.f32 1.0, %v9751_v18  ;;  %v3986_v26 = vmul.f32 0.5, %v12972_v63  ;;  %v3992_v8 = vmul.f32 0.5, %v12998_v54  ;;  %v9441_v63 = vld [vmem:[%s10620_s11 + $0x5e0] ss:$24 sps:$4 sm:$0xff]  }
 0x33e   : > { %9766 = verf.f32 %v4105_v31  ;;  %v13057_v44 = vadd.f32 %v3916_v40, %v3804_v39  ;;  %v13060_v57 = vpack.c.bf16 %v4364_v55, %v4358_v51  ;;  %v4106_v50 = vmul.f32 0.70710677, %v13054_v49  ;;  %6901 = vmatmul.mubr.bf16.gmra.mxu0 %v13013_v9  ;;  %v9444_v39 = vld [vmem:[%s10620_s11 + $0x5a8] ss:$24 sps:$4 sm:$0xff]   ;;  %v9449_v48 = vld [vmem:[%s10620_s11 + $0x5b4] ss:$24 sps:$4 sm:$0xff]  }
 0x33f   : > { %v9755_v45 = vpop.eup %9754  ;;  %v3918_v27 = vpop.f32.mrf.mxu0  ;;  %6740 = vmatpush1.bf16.msra.mxu1 %v9432_v60  ;;  %v4274_v10 = vadd.f32 1.0, %v9753_v47  ;;  %7077 = vmatpush1.bf16.msra.mxu0 %v9429_v33  ;;  %v4369_v5 = vmul.f32 %v4273_v37, %v3985_v46  ;;  %v9452_v31 = vld [vmem:[%s10620_s11 + $0x57c] ss:$24 sps:$4 sm:$0xff]   ;;  %v3997_v60 = vmul.f32 0.5, %v13004_v43  ;;  %v4003_v33 = vmul.f32 0.5, %v13021_v17 }
 0x340   : > { %v4279_v24 = vadd.f32 1.0, %v9755_v45  ;;  %v4111_v21 = vmul.f32 0.70710677, %v13057_v44  ;;  %9768 = verf.f32 %v4106_v50  ;;  %v13069_v2 = vadd.f32 %v3918_v27, %v3806_v30  ;;  %6571 = vmatprep.mubr.bf16.mxu1 %v13060_v57  ;;  %7078 = vmatprep.subr.bf16.mxu0 %v9437_v59  ;;  %v9450_v47 = vld [vmem:[%s10620_s11 + $0x578] ss:$24 sps:$4 sm:$0xff]  }
 0x341   : > { %6910 = vmatprep.mubr.bf16.mxu0 %v13060_v57  ;;  %6741 = vmatprep.subr.bf16.mxu1 %v9440_v34  ;;  %v4370_v61 = vmul.f32 %v4274_v10, %v3986_v26  ;;  %v9447_v59 = vld [vmem:[%s10620_s11 + $0x5b0] ss:$24 sps:$4 sm:$0xff]   ;;  %v9458_v45 = vld [vmem:[%s10620_s11 + $0x54c] ss:$24 sps:$4 sm:$0xff]   ;;  %v4004_v34 = vmul.f32 0.5, %v13037_v52 }
 0x342   : > { %v9757_v19 = vpop.eup %9756  ;;  %v4375_v7 = vmul.f32 %v4279_v24, %v3991_v42  ;;  %9770 = verf.f32 %v4111_v21  ;;  %v4112_v23 = vmul.f32 0.70710677, %v13069_v2  ;;  %6572 = vmatmul.mubr.bf16.gmra.mxu1 %v13050_v16  ;;  %v9455_v43 = vld [vmem:[%s10620_s11 + $0x584] ss:$24 sps:$4 sm:$0xff]   ;;  %v9456_v24 = vld [vmem:[%s10620_s11 + $0x548] ss:$24 sps:$4 sm:$0xff]  }
 0x343   : > { %v9759_v12 = vpop.eup %9758  ;;  %v4280_v6 = vadd.f32 1.0, %v9757_v19  ;;  %6742 = vmatpush2.bf16.msra.mxu1 %v9438_v11  ;;  %7079 = vmatpush1.bf16.msra.mxu0 %v9435_v13  ;;  %v3998_v11 = vmul.f32 0.5, %v13016_v41  ;;  %v9453_v13 = vld [vmem:[%s10620_s11 + $0x580] ss:$24 sps:$4 sm:$0xff]   ;;  %v9461_v52 = vld [vmem:[%s10620_s11 + $0x554] ss:$24 sps:$4 sm:$0xff]  }
 0x344   : > { %v13080_v4 = vpack.c.bf16 %v4375_v7, %v4369_v5  ;;  %9772 = verf.f32 %v4112_v23  ;;  %6743 = vmatprep.subr.bf16.mxu1 %v9446_v58  ;;  %v4285_v18 = vadd.f32 1.0, %v9759_v12  ;;  %7080 = vmatprep.subr.bf16.mxu0 %v9443_v53  ;;  %v9464_v7 = vld [vmem:[%s10620_s11 + $0x51c] ss:$24 sps:$4 sm:$0xff]   ;;  %v4009_v53 = vmul.f32 0.5, %v13043_v56  ;;  %v9459_v23 = vld [vmem:[%s10620_s11 + $0x550] ss:$24 sps:$4 sm:$0xff]  }
 0x345   : > { %v4376_v35 = vmul.f32 %v4280_v6, %v3992_v8  ;;  %v9761_v54 = vpop.eup %9760  ;;  %v4015_v12 = vmul.f32 0.5, %v13057_v44  ;;  %v9462_v8 = vld [vmem:[%s10620_s11 + $0x518] ss:$24 sps:$4 sm:$0xff]   ;;  %v9467_v56 = vld [vmem:[%s10620_s11 + $0x524] ss:$24 sps:$4 sm:$0xff]   ;;  %v4010_v44 = vmul.f32 0.5, %v13054_v49 }
 0x346   : > { %14800 = vst [vmem:[#allocation108_spill] sm:$0xff] %v13080_v4  ;;  %6911 = vmatmul.mubr.bf16.gmra.mxu0 %v13050_v16  ;;  %v4286_v37 = vadd.f32 1.0, %v9761_v54  ;;  %v4381_v50 = vmul.f32 %v4285_v18, %v3997_v60  ;;  %v4016_v54 = vmul.f32 0.5, %v13069_v2  ;;  %v9473_v49 = vld [vmem:[%s10620_s11 + $0x4f4] ss:$24 sps:$4 sm:$0xff]  }
 0x347   : > { %v9763_v51 = vpop.eup %9762  ;;  %v13085_v55 = vpack.c.bf16 %v4376_v35, %v4370_v61  ;;  %6744 = vmatpush2.bf16.msra.mxu1 %v9444_v39  ;;  %7081 = vmatpush2.bf16.msra.mxu0 %v9441_v63  ;;  %v9470_v39 = vld [vmem:[%s10620_s11 + $0x4ec] ss:$24 sps:$4 sm:$0xff]  }
 0x348   : > { %v4291_v40 = vadd.f32 1.0, %v9763_v51  ;;  %7082 = vmatprep.subr.bf16.mxu0 %v9449_v48  ;;  %6745 = vmatprep.subr.bf16.mxu1 %v9452_v31  ;;  %v4382_v21 = vmul.f32 %v4286_v37, %v3998_v11  ;;  %v9468_v51 = vld [vmem:[%s10620_s11 + $0x4e8] ss:$24 sps:$4 sm:$0xff]  }
 0x349   : > { %14801 = vst [vmem:[#allocation135_spill] sm:$0xff] %v13085_v55  ;;  %6581 = vmatprep.mubr.bf16.mxu1 %v13085_v55  ;;  %6920 = vmatprep.mubr.bf16.mxu0 %v13085_v55  ;;  %v9471_v37 = vld [vmem:[%s10620_s11 + $0x4f0] ss:$24 sps:$4 sm:$0xff]   ;;  %v9486_v11 = vld [vmem:[%s10620_s11 + $0x160] ss:$24 sps:$4 sm:$0xff]  }
 0x34a   : > { %v9765_v30 = vpop.eup %9764  ;;  %v4387_v27 = vmul.f32 %v4291_v40, %v4003_v33  ;;  %6582 = vmatmul.mubr.bf16.gmra.mxu1 %v13080_v4  ;;  %v9465_v33 = vld [vmem:[%s10620_s11 + $0x520] ss:$24 sps:$4 sm:$0xff]   ;;  %v9476_v40 = vld [vmem:[%s10620_s11 + $0x4bc] ss:$24 sps:$4 sm:$0xff]  }
 0x34b   : > { %v9767_v17 = vpop.eup %9766  ;;  %v4292_v46 = vadd.f32 1.0, %v9765_v30  ;;  %6746 = vmatpush2.bf16.msra.mxu1 %v9450_v47  ;;  %7083 = vmatpush2.bf16.msra.mxu0 %v9447_v59  ;;  %v9474_v47 = vld [vmem:[%s10620_s11 + $0x4b8] ss:$24 sps:$4 sm:$0xff]   ;;  %v9482_v59 = vld [vmem:[%s10620_s11 + $0x48c] ss:$24 sps:$4 sm:$0xff]  }
 0x34c   : > { %v13100_v42 = vpack.c.bf16 %v4387_v27, %v4381_v50  ;;  %6747 = vmatprep.subr.bf16.mxu1 %v9458_v45  ;;  %v4297_v58 = vadd.f32 1.0, %v9767_v17  ;;  %7084 = vmatprep.subr.bf16.mxu0 %v9455_v43  ;;  %v9479_v45 = vld [vmem:[%s10620_s11 + $0x4c4] ss:$24 sps:$4 sm:$0xff]   ;;  %v9480_v50 = vld [vmem:[%s10620_s11 + $0x488] ss:$24 sps:$4 sm:$0xff]  }
 0x34d   : > { %v4388_v10 = vmul.f32 %v4292_v46, %v4004_v34  ;;  %v9769_v41 = vpop.eup %9768  ;;  %v14806_v30 = vld [vmem:[#allocation112_spill] sm:$0xff]  ;;  %v9485_v43 = vld [vmem:[%s10620_s11 + $0x494] ss:$24 sps:$4 sm:$0xff]   ;;  %v9483_v34 = vld [vmem:[%s10620_s11 + $0x490] ss:$24 sps:$4 sm:$0xff]  }
 0x34e   : > { %14802 = vst [vmem:[#allocation136_spill] sm:$0xff] %v13100_v42  ;;  %6921 = vmatmul.mubr.bf16.gmra.mxu0 %v13080_v4  ;;  %v4298_v6 = vadd.f32 1.0, %v9769_v41  ;;  %v4393_v35 = vmul.f32 %v4297_v58, %v4009_v53  ;;  %v9477_v27 = vld [vmem:[%s10620_s11 + $0x4c0] ss:$24 sps:$4 sm:$0xff]   ;;  %v9488_v17 = vld [vmem:[%s10620_s11 + $0x164] ss:$24 sps:$4 sm:$0xff]  }
 0x34f   : > { %v9771_v19 = vpop.eup %9770  ;;  %v13105_v5 = vpack.c.bf16 %v4388_v10, %v4382_v21  ;;  %6748 = vmatpush2.bf16.msra.mxu1 %v9456_v24  ;;  %7085 = vmatpush2.bf16.msra.mxu0 %v9453_v13  ;;  %v9491_v46 = vld [vmem:[%s10620_s11 + $0x134] ss:$24 sps:$4 sm:$0xff]   ;;  %v13149_v10 = vpop.f32.mrf.mxu1  ;;  %v9489_v41 = vld [vmem:[%s10620_s11 + $0x130] ss:$24 sps:$4 sm:$0xff]   ;;  %v9492_v53 = vld [vmem:[%s10620_s11 + $0x100] ss:$24 sps:$4 sm:$0xff]  }
 0x350   : > { %v4303_v26 = vadd.f32 1.0, %v9771_v19  ;;  %7086 = vmatprep.subr.bf16.mxu0 %v9461_v52  ;;  %6749 = vmatprep.subr.bf16.mxu1 %v9464_v7  ;;  %v4394_v31 = vmul.f32 %v4298_v6, %v4010_v44  ;;  %v14807_v24 = vld [vmem:[#allocation117_spill] sm:$0xff]  ;;  %v14808_v13 = vld [vmem:[#allocation118_spill] sm:$0xff]  ;;  %v9494_v52 = vld [vmem:[%s10620_s11 + $0x104] ss:$24 sps:$4 sm:$0xff]  }
 0x351   : > { %14803 = vst [vmem:[#allocation137_spill] sm:$0xff] %v13105_v5  ;;  %6591 = vmatprep.mubr.bf16.mxu1 %v13105_v5  ;;  %v9773_v61 = vpop.eup %9772  ;;  %6930 = vmatprep.mubr.bf16.mxu0 %v13105_v5  ;;  %v13156_v19 = vpop.f32.mrf.mxu1  ;;  %v9503_v44 = vld [vmem:[%s10620_s11 + $0x74] ss:$24 sps:$4 sm:$0xff]   ;;  %v14845_v55 = vld [vmem:[#allocation103_spill] sm:$0xff] }
 0x352   : > { %v4399_v63 = vmul.f32 %v4303_v26, %v4015_v12  ;;  %v4304_v18 = vadd.f32 1.0, %v9773_v61  ;;  %6592 = vmatmul.mubr.bf16.gmra.mxu1 %v13100_v42  ;;  %v9497_v12 = vld [vmem:[%s10620_s11 + $0xd4] ss:$24 sps:$4 sm:$0xff]   ;;  %v14809_v26 = vld [vmem:[#allocation119_spill] sm:$0xff] }
 0x353   : > { %6750 = vmatpush2.bf16.msra.mxu1 %v9462_v8  ;;  %7087 = vmatpush2.bf16.msra.mxu0 %v9459_v23  ;;  %v13165_v8 = vpop.f32.mrf.mxu1  ;;  %v14810_v23 = vld [vmem:[#allocation121_spill] sm:$0xff]  ;;  %v9500_v61 = vld [vmem:[%s10620_s11 + $0xa4] ss:$24 sps:$4 sm:$0xff]  }
 0x354   : > { %v13120_v48 = vpack.c.bf16 %v4399_v63, %v4393_v35  ;;  %v4400_v60 = vmul.f32 %v4304_v18, %v4016_v54  ;;  %6751 = vmatprep.subr.bf16.mxu1 %v9470_v39  ;;  %7088 = vmatprep.subr.bf16.mxu0 %v9467_v56  ;;  %v9495_v39 = vld [vmem:[%s10620_s11 + $0xd0] ss:$24 sps:$4 sm:$0xff]   ;;  %v9498_v56 = vld [vmem:[%s10620_s11 + $0xa0] ss:$24 sps:$4 sm:$0xff]  }
 0x355   : > { %v13172_v35 = vpop.f32.mrf.mxu1  ;;  %v14811_v18 = vld [vmem:[#allocation120_spill] sm:$0xff] }
 0x356   : > { %14804 = vst [vmem:[#allocation138_spill] sm:$0xff] %v13120_v48  ;;  %v13125_v2 = vpack.c.bf16 %v4400_v60, %v4394_v31  ;;  %6931 = vmatmul.mubr.bf16.gmra.mxu0 %v13100_v42  ;;  %v14812_v60 = vld [vmem:[#allocation123_spill] sm:$0xff]  ;;  %v14826_v42 = vld [vmem:[#allocation134_spill] sm:$0xff] }
 0x357   : > { %6752 = vmatpush2.bf16.msra.mxu1 %v9468_v51  ;;  %7089 = vmatpush2.bf16.msra.mxu0 %v9465_v33  ;;  %v13183_v51 = vpop.f32.mrf.mxu1  ;;  %v9501_v33 = vld [vmem:[%s10620_s11 + $0x70] ss:$24 sps:$4 sm:$0xff]  }
 0x358   : > { %14805 = vst [vmem:[#allocation139_spill] sm:$0xff] %v13125_v2  ;;  %6601 = vmatprep.mubr.bf16.mxu1 %v13125_v2  ;;  %7090 = vmatprep.subr.bf16.mxu0 %v9473_v49  ;;  %v9506_v49 = vld [vmem:[%s10620_s11 + $0x44] ss:$24 sps:$4 sm:$0xff]  }
 0x359   : > { %6940 = vmatprep.mubr.bf16.mxu0 %v13125_v2  ;;  %6753 = vmatprep.subr.bf16.mxu1 %v9476_v40 }
 0x35a   : > { %6602 = vmatmul.mubr.bf16.gmra.mxu1 %v13120_v48 }
 0x35b   : > { %6754 = vmatpush2.bf16.msra.mxu1 %v9474_v47  ;;  %6757 = vmatprep.mubr.bf16.mxu1 %v14806_v30  ;;  %v13192_v47 = vpop.f32.mrf.mxu1 }
 0x35c   : > { %7091 = vmatpush2.bf16.msra.mxu0 %v9471_v37  ;;  %6755 = vmatprep.subr.bf16.mxu1 %v9482_v59  ;;  %v9504_v59 = vld [vmem:[%s10620_s11 + $0x40] ss:$24 sps:$4 sm:$0xff]  }
 0x35d   : > { %7092 = vmatprep.subr.bf16.mxu0 %v9479_v45  ;;  %v9509_v45 = vld [vmem:[%s10620_s11 + $0x14] ss:$24 sps:$4 sm:$0xff]  }
 0x35e   : > { %6941 = vmatmul.mubr.bf16.gmra.mxu0 %v13120_v48 }
 0x35f   : > { %6756 = vmatpush2.bf16.msra.mxu1 %v9480_v50  ;;  %7096 = vmatprep.mubr.bf16.mxu0 %v14806_v30  ;;  %v14813_v50 = vld [vmem:[#allocation122_spill] sm:$0xff] }
 0x360   : > { %7093 = vmatpush2.bf16.msra.mxu0 %v9477_v27  ;;  %6951 = vmatprep.subr.bf16.mxu1 %v9488_v17  ;;  %v13203_v27 = vpop.f32.mrf.mxu1  ;;  %v14814_v17 = vld [vmem:[#allocation128_spill] sm:$0xff] }
 0x361   : > { %7094 = vmatprep.subr.bf16.mxu0 %v9485_v43 }
 0x362   : > { %6758 = vmatmul.mubr.bf16.vlgmr.msra.gmra.mxu1 %v14807_v24 }
 0x363   : > { %6767 = vmatprep.mubr.bf16.mxu1 %v14808_v13  ;;  %6952 = vmatpush1.bf16.msra.mxu1 %v9486_v11  ;;  %v9507_v11 = vld [vmem:[%s10620_s11 + $0x10] ss:$24 sps:$4 sm:$0xff]  }
 0x364   : > { %v13147_v21 = vpop.f32.mrf.mxu0  ;;  %7095 = vmatpush2.bf16.msra.mxu0 %v9483_v34  ;;  %6953 = vmatprep.subr.bf16.mxu1 %v9491_v46  ;;  %v9512_v34 = vld [vmem:[%s10620_s11 + $0x2e4] ss:$24 sps:$4 sm:$0xff]  }
 0x366   : > { %v13153_v58 = vpop.f32.mrf.mxu0 }
 0x367   : > { %7097 = vmatmul.mubr.bf16.vlgmr.msra.gmra.mxu0 %v14807_v24  ;;  %6954 = vmatpush1.bf16.msra.mxu1 %v9489_v41  ;;  %v13212_v24 = vpop.f32.mrf.mxu1  ;;  %v9510_v41 = vld [vmem:[%s10620_s11 + $0x2e0] ss:$24 sps:$4 sm:$0xff]  }
 0x368   : > { %v13159_v7 = vpop.f32.mrf.mxu0  ;;  %7106 = vmatprep.mubr.bf16.mxu0 %v14808_v13  ;;  %6955 = vmatprep.subr.bf16.mxu1 %v9494_v52  ;;  %v9515_v52 = vld [vmem:[%s10620_s11 + $0x2b4] ss:$24 sps:$4 sm:$0xff]  }
 0x36a   : > { %6768 = vmatmul.mubr.bf16.gmra.mxu1 %v14809_v26  ;;  %v13167_v6 = vpop.f32.mrf.mxu0 }
 0x36b   : > { %6777 = vmatprep.mubr.bf16.mxu1 %v14810_v23  ;;  %6956 = vmatpush1.bf16.msra.mxu1 %v9492_v53 }
 0x36c   : > { %6957 = vmatprep.subr.bf16.mxu1 %v9497_v12  ;;  %v14815_v12 = vld [vmem:[#allocation109_spill] sm:$0xff] }
 0x36e   : > { %v13174_v63 = vpop.f32.mrf.mxu0 }
 0x36f   : > { %7107 = vmatmul.mubr.bf16.gmra.mxu0 %v14809_v26  ;;  %6958 = vmatpush1.bf16.msra.mxu1 %v9495_v39  ;;  %v13223_v26 = vpop.f32.mrf.mxu1  ;;  %v14816_v39 = vld [vmem:[#allocation130_spill] sm:$0xff] }
 0x370   : > { %7116 = vmatprep.mubr.bf16.mxu0 %v14810_v23  ;;  %6959 = vmatprep.subr.bf16.mxu1 %v9500_v61  ;;  %v13180_v54 = vpop.f32.mrf.mxu0  ;;  %v9513_v61 = vld [vmem:[%s10620_s11 + $0x2b0] ss:$24 sps:$4 sm:$0xff]  }
 0x372   : > { %6778 = vmatmul.mubr.bf16.gmra.mxu1 %v14811_v18  ;;  %v13185_v31 = vpop.f32.mrf.mxu0 }
 0x373   : > { %6787 = vmatprep.mubr.bf16.mxu1 %v14812_v60  ;;  %6960 = vmatpush1.bf16.msra.mxu1 %v9498_v56  ;;  %v9518_v56 = vld [vmem:[%s10620_s11 + $0x284] ss:$24 sps:$4 sm:$0xff]  }
 0x374   : > { %6961 = vmatprep.subr.bf16.mxu1 %v9503_v44  ;;  %v13190_v40 = vpop.f32.mrf.mxu0 }
 0x376   : > { %v13194_v37 = vpop.f32.mrf.mxu0 }
 0x377   : > { %7117 = vmatmul.mubr.bf16.gmra.mxu0 %v14811_v18  ;;  %6962 = vmatpush1.bf16.msra.mxu1 %v9501_v33  ;;  %v13232_v18 = vpop.f32.mrf.mxu1  ;;  %v9516_v33 = vld [vmem:[%s10620_s11 + $0x280] ss:$24 sps:$4 sm:$0xff]  }
 0x378   : > { %7126 = vmatprep.mubr.bf16.mxu0 %v14812_v60  ;;  %6963 = vmatprep.subr.bf16.mxu1 %v9506_v49  ;;  %v13200_v30 = vpop.f32.mrf.mxu0  ;;  %v9521_v49 = vld [vmem:[%s10620_s11 + $0x254] ss:$24 sps:$4 sm:$0xff]  }
 0x37a   : > { %6788 = vmatmul.mubr.bf16.gmra.mxu1 %v14813_v50  ;;  %v13205_v43 = vpop.f32.mrf.mxu0 }
 0x37b   : > { %6797 = vmatprep.mubr.bf16.mxu1 %v14814_v17  ;;  %6964 = vmatpush1.bf16.msra.mxu1 %v9504_v59 }
 0x37c   : > { %6965 = vmatprep.subr.bf16.mxu1 %v9509_v45  ;;  %v13210_v46 = vpop.f32.mrf.mxu0  ;;  %v14818_v45 = vld [vmem:[#allocation129_spill] sm:$0xff] }
 0x37e   : > { %v13214_v13 = vpop.f32.mrf.mxu0 }
 0x37f   : > { %7127 = vmatmul.mubr.bf16.gmra.mxu0 %v14813_v50  ;;  %6966 = vmatpush1.bf16.msra.mxu1 %v9507_v11  ;;  %v13243_v50 = vpop.f32.mrf.mxu1  ;;  %v14820_v11 = vld [vmem:[#allocation132_spill] sm:$0xff] }
 0x380   : > { %7136 = vmatprep.mubr.bf16.mxu0 %v14814_v17  ;;  %6967 = vmatprep.subr.bf16.mxu1 %v9512_v34  ;;  %v13220_v53 = vpop.f32.mrf.mxu0  ;;  %v9519_v34 = vld [vmem:[%s10620_s11 + $0x250] ss:$24 sps:$4 sm:$0xff]  }
 0x382   : > { %6798 = vmatmul.mubr.bf16.gmra.mxu1 %v14815_v12  ;;  %v13225_v23 = vpop.f32.mrf.mxu0 }
 0x383   : > { %6807 = vmatprep.mubr.bf16.mxu1 %v14816_v39  ;;  %6968 = vmatpush2.bf16.msra.mxu1 %v9510_v41  ;;  %v9524_v41 = vld [vmem:[%s10620_s11 + $0x224] ss:$24 sps:$4 sm:$0xff]  }
 0x384   : > { %6969 = vmatprep.subr.bf16.mxu1 %v9515_v52  ;;  %v13230_v44 = vpop.f32.mrf.mxu0 }
 0x386   : > { %v13234_v60 = vpop.f32.mrf.mxu0 }
 0x387   : > { %7137 = vmatmul.mubr.bf16.gmra.mxu0 %v14815_v12  ;;  %6970 = vmatpush2.bf16.msra.mxu1 %v9513_v61  ;;  %v13252_v12 = vpop.f32.mrf.mxu1  ;;  %v9522_v61 = vld [vmem:[%s10620_s11 + $0x220] ss:$24 sps:$4 sm:$0xff]  }
 0x388   : > { %7146 = vmatprep.mubr.bf16.mxu0 %v14816_v39  ;;  %6971 = vmatprep.subr.bf16.mxu1 %v9518_v56  ;;  %v13240_v59 = vpop.f32.mrf.mxu0  ;;  %v9527_v56 = vld [vmem:[%s10620_s11 + $0x1f4] ss:$24 sps:$4 sm:$0xff]  }
 0x389   : > { %14817 = vst [vmem:[#allocation112_spill] sm:$0xff] %v13240_v59  ;;  %v13263_v48 = vpop.f32.mrf.mxu1 }
 0x38a   : > { %6808 = vmatmul.mubr.bf16.gmra.mxu1 %v14818_v45  ;;  %v13245_v17 = vpop.f32.mrf.mxu0 }
 0x38b   : > { %14819 = vst [vmem:[#allocation117_spill] sm:$0xff] %v13245_v17  ;;  %6817 = vmatprep.mubr.bf16.mxu1 %v14820_v11  ;;  %6972 = vmatpush2.bf16.msra.mxu1 %v9516_v33 }
 0x38c   : > { %6973 = vmatprep.subr.bf16.mxu1 %v9521_v49  ;;  %v13250_v52 = vpop.f32.mrf.mxu0  ;;  %v14824_v49 = vld [vmem:[#allocation131_spill] sm:$0xff] }
 0x38d   : > { %14821 = vst [vmem:[#allocation118_spill] sm:$0xff] %v13250_v52  ;;  %v14838_v52 = vld [vmem:[#allocation127_spill] sm:$0xff] }
 0x38e   : > { %v13254_v39 = vpop.f32.mrf.mxu0 }
 0x38f   : > { %14822 = vst [vmem:[#allocation119_spill] sm:$0xff] %v13254_v39  ;;  %7147 = vmatmul.mubr.bf16.gmra.mxu0 %v14818_v45  ;;  %6974 = vmatpush2.bf16.msra.mxu1 %v9519_v34  ;;  %v9525_v45 = vld [vmem:[%s10620_s11 + $0x1f0] ss:$24 sps:$4 sm:$0xff]   ;;  %v9530_v34 = vld [vmem:[%s10620_s11 + $0x1c4] ss:$24 sps:$4 sm:$0xff]  }
 0x390   : > { %7156 = vmatprep.mubr.bf16.mxu0 %v14820_v11  ;;  %6975 = vmatprep.subr.bf16.mxu1 %v9524_v41  ;;  %v13260_v33 = vpop.f32.mrf.mxu0  ;;  %v13272_v41 = vpop.f32.mrf.mxu1  ;;  %v9534_v39 = vld [vmem:[%s10620_s11 + $0x760] ss:$24 sps:$4 sm:$0xff]  }
 0x391   : > { %14823 = vst [vmem:[#allocation121_spill] sm:$0xff] %v13260_v33  ;;  %v9528_v33 = vld [vmem:[%s10620_s11 + $0x1c0] ss:$24 sps:$4 sm:$0xff]  }
 0x392   : > { %6818 = vmatmul.mubr.bf16.gmra.mxu1 %v14824_v49  ;;  %v13265_v2 = vpop.f32.mrf.mxu0 }
 0x393   : > { %14825 = vst [vmem:[#allocation120_spill] sm:$0xff] %v13265_v2  ;;  %6827 = vmatprep.mubr.bf16.mxu1 %v14826_v42  ;;  %6976 = vmatpush2.bf16.msra.mxu1 %v9522_v61  ;;  %v9533_v61 = vld [vmem:[%s10620_s11 + $0x194] ss:$24 sps:$4 sm:$0xff]  }
 0x394   : > { %6977 = vmatprep.subr.bf16.mxu1 %v9527_v56  ;;  %v13270_v11 = vpop.f32.mrf.mxu0  ;;  %v14830_v56 = vld [vmem:[#allocation133_spill] sm:$0xff] }
 0x395   : > { %14827 = vst [vmem:[#allocation123_spill] sm:$0xff] %v13270_v11  ;;  %v13283_v11 = vpop.f32.mrf.mxu1 }
 0x396   : > { %v13274_v5 = vpop.f32.mrf.mxu0 }
 0x397   : > { %14828 = vst [vmem:[#allocation122_spill] sm:$0xff] %v13274_v5  ;;  %7157 = vmatmul.mubr.bf16.gmra.mxu0 %v14824_v49  ;;  %6978 = vmatpush2.bf16.msra.mxu1 %v9525_v45  ;;  %v14832_v5 = vld [vmem:[#allocation125_spill] sm:$0xff]  ;;  %v9536_v45 = vld [vmem:[%s10620_s11 + $0x764] ss:$24 sps:$4 sm:$0xff]  }
 0x398   : > { %7166 = vmatprep.mubr.bf16.mxu0 %v14826_v42  ;;  %6979 = vmatprep.subr.bf16.mxu1 %v9530_v34  ;;  %v13280_v2 = vpop.f32.mrf.mxu0  ;;  %v9531_v49 = vld [vmem:[%s10620_s11 + $0x190] ss:$24 sps:$4 sm:$0xff]   ;;  %v13292_v34 = vpop.f32.mrf.mxu1 }
 0x399   : > { %14829 = vst [vmem:[#allocation128_spill] sm:$0xff] %v13280_v2 }
 0x39a   : > { %6828 = vmatmul.mubr.bf16.gmra.mxu1 %v14830_v56  ;;  %v13285_v4 = vpop.f32.mrf.mxu0 }
 0x39b   : > { %14831 = vst [vmem:[#allocation109_spill] sm:$0xff] %v13285_v4  ;;  %6980 = vmatpush2.bf16.msra.mxu1 %v9528_v33  ;;  %6983 = vmatprep.mubr.bf16.mxu1 %v14832_v5  ;;  %v9539_v33 = vld [vmem:[%s10620_s11 + $0x734] ss:$24 sps:$4 sm:$0xff]   ;;  %v13302_v4 = vpop.f32.mrf.mxu1 }
 0x39c   : > { %6981 = vmatprep.subr.bf16.mxu1 %v9533_v61  ;;  %v13290_v42 = vpop.f32.mrf.mxu0  ;;  %v14836_v61 = vld [vmem:[#allocation124_spill] sm:$0xff] }
 0x39d   : > { %14833 = vst [vmem:[#allocation130_spill] sm:$0xff] %v13290_v42 }
 0x39e   : > { %v13294_v2 = vpop.f32.mrf.mxu0 }
 0x39f   : > { %14834 = vst [vmem:[#allocation129_spill] sm:$0xff] %v13294_v2  ;;  %7167 = vmatmul.mubr.bf16.gmra.mxu0 %v14830_v56  ;;  %6982 = vmatpush2.bf16.msra.mxu1 %v9531_v49  ;;  %v9537_v2 = vld [vmem:[%s10620_s11 + $0x730] ss:$24 sps:$4 sm:$0xff]   ;;  %v9542_v56 = vld [vmem:[%s10620_s11 + $0x704] ss:$24 sps:$4 sm:$0xff]  }
 0x3a0   : > { %7177 = vmatprep.subr.bf16.mxu1 %v9536_v45  ;;  %v13299_v5 = vpop.f32.mrf.mxu0  ;;  %v13311_v45 = vpop.f32.mrf.mxu1 }
 0x3a1   : > { %14835 = vst [vmem:[#allocation132_spill] sm:$0xff] %v13299_v5  ;;  %v9545_v5 = vld [vmem:[%s10620_s11 + $0x6d4] ss:$24 sps:$4 sm:$0xff]  }
 0x3a2   : > { %6984 = vmatmul.mubr.bf16.vlgmr.msra.gmra.mxu1 %v14836_v61  ;;  %v13304_v42 = vpop.f32.mrf.mxu0  ;;  %v9540_v61 = vld [vmem:[%s10620_s11 + $0x700] ss:$24 sps:$4 sm:$0xff]  }
 0x3a3   : > { %14837 = vst [vmem:[#allocation131_spill] sm:$0xff] %v13304_v42  ;;  %6993 = vmatprep.mubr.bf16.mxu1 %v14838_v52  ;;  %7178 = vmatpush1.bf16.msra.mxu1 %v9534_v39  ;;  %v14842_v52 = vld [vmem:[#allocation126_spill] sm:$0xff]  ;;  %v13320_v39 = vpop.f32.mrf.mxu1 }
 0x3a4   : > { %7179 = vmatprep.subr.bf16.mxu1 %v9539_v33  ;;  %v13309_v49 = vpop.f32.mrf.mxu0  ;;  %14843 = vst [vmem:[#allocation124_spill] sm:$0xff] %v13320_v39  ;;  %v14853_v39 = vld [vmem:[#allocation115_spill] sm:$0xff] }
 0x3a5   : > { %14839 = vst [vmem:[#allocation134_spill] sm:$0xff] %v13309_v49  ;;  %v9543_v49 = vld [vmem:[%s10620_s11 + $0x6d0] ss:$24 sps:$4 sm:$0xff]  }
 0x3a6   : > { %v13313_v17 = vpop.f32.mrf.mxu0 }
 0x3a7   : > { %14840 = vst [vmem:[#allocation133_spill] sm:$0xff] %v13313_v17  ;;  %7180 = vmatpush1.bf16.msra.mxu1 %v9537_v2  ;;  %v9548_v2 = vld [vmem:[%s10620_s11 + $0x6a4] ss:$24 sps:$4 sm:$0xff]  }
 0x3a8   : > { %7181 = vmatprep.subr.bf16.mxu1 %v9542_v56  ;;  %v13317_v42 = vpop.f32.mrf.mxu0  ;;  %v13329_v56 = vpop.f32.mrf.mxu1 }
 0x3a9   : > { %14841 = vst [vmem:[#allocation125_spill] sm:$0xff] %v13317_v42  ;;  %14847 = vst [vmem:[#allocation103_spill] sm:$0xff] %v13329_v56  ;;  %v9551_v42 = vld [vmem:[%s10620_s11 + $0x674] ss:$24 sps:$4 sm:$0xff]  }
 0x3aa   : > { %6994 = vmatmul.mubr.bf16.gmra.mxu1 %v14842_v52  ;;  %v13322_v33 = vpop.f32.mrf.mxu0  ;;  %v9546_v52 = vld [vmem:[%s10620_s11 + $0x6a0] ss:$24 sps:$4 sm:$0xff]  }
 0x3ab   : > { %14844 = vst [vmem:[#allocation127_spill] sm:$0xff] %v13322_v33  ;;  %7003 = vmatprep.mubr.bf16.mxu1 %v14845_v55  ;;  %7182 = vmatpush1.bf16.msra.mxu1 %v9540_v61  ;;  %v14850_v55 = vld [vmem:[#allocation102_spill] sm:$0xff]  ;;  %v13338_v61 = vpop.f32.mrf.mxu1 }
 0x3ac   : > { %7183 = vmatprep.subr.bf16.mxu1 %v9545_v5  ;;  %v13327_v17 = vpop.f32.mrf.mxu0  ;;  %14851 = vst [vmem:[#allocation102_spill] sm:$0xff] %v13338_v61  ;;  %v14860_v61 = vld [vmem:[#allocation116_spill] sm:$0xff] }
 0x3ad   : > { %14846 = vst [vmem:[#allocation126_spill] sm:$0xff] %v13327_v17  ;;  %v9549_v17 = vld [vmem:[%s10620_s11 + $0x670] ss:$24 sps:$4 sm:$0xff]  }
 0x3ae   : > { %v13331_v59 = vpop.f32.mrf.mxu0 }
 0x3af   : > { %14848 = vst [vmem:[#allocation140_spill] sm:$0xff] %v13331_v59  ;;  %7184 = vmatpush1.bf16.msra.mxu1 %v9543_v49  ;;  %v9554_v49 = vld [vmem:[%s10620_s11 + $0x644] ss:$24 sps:$4 sm:$0xff]  }
 0x3b0   : > { %7185 = vmatprep.subr.bf16.mxu1 %v9548_v2  ;;  %v13335_v33 = vpop.f32.mrf.mxu0  ;;  %v13347_v2 = vpop.f32.mrf.mxu1 }
 0x3b1   : > { %14849 = vst [vmem:[#allocation141_spill] sm:$0xff] %v13335_v33  ;;  %14855 = vst [vmem:[#allocation143_spill] sm:$0xff] %v13347_v2  ;;  %v9557_v33 = vld [vmem:[%s10620_s11 + $0x614] ss:$24 sps:$4 sm:$0xff]  }
 0x3b2   : > { %7004 = vmatmul.mubr.bf16.gmra.mxu1 %v14850_v55  ;;  %v13340_v5 = vpop.f32.mrf.mxu0  ;;  %v9552_v55 = vld [vmem:[%s10620_s11 + $0x640] ss:$24 sps:$4 sm:$0xff]  }
 0x3b3   : > { %14852 = vst [vmem:[#allocation142_spill] sm:$0xff] %v13340_v5  ;;  %7013 = vmatprep.mubr.bf16.mxu1 %v14853_v39  ;;  %7186 = vmatpush1.bf16.msra.mxu1 %v9546_v52  ;;  %v14858_v39 = vld [vmem:[#allocation114_spill] sm:$0xff]  ;;  %v13356_v52 = vpop.f32.mrf.mxu1 }
 0x3b4   : > { %7187 = vmatprep.subr.bf16.mxu1 %v9551_v42  ;;  %v13345_v59 = vpop.f32.mrf.mxu0 }
 0x3b5   : > { %14854 = vst [vmem:[#allocation115_spill] sm:$0xff] %v13345_v59  ;;  %v9555_v59 = vld [vmem:[%s10620_s11 + $0x610] ss:$24 sps:$4 sm:$0xff]  }
 0x3b6   : > { %v13349_v56 = vpop.f32.mrf.mxu0 }
 0x3b7   : > { %14856 = vst [vmem:[#allocation144_spill] sm:$0xff] %v13349_v56  ;;  %7188 = vmatpush1.bf16.msra.mxu1 %v9549_v17  ;;  %v9560_v17 = vld [vmem:[%s10620_s11 + $0x8e4] ss:$24 sps:$4 sm:$0xff]  }
 0x3b8   : > { %7189 = vmatprep.subr.bf16.mxu1 %v9554_v49  ;;  %v13353_v5 = vpop.f32.mrf.mxu0  ;;  %v13365_v49 = vpop.f32.mrf.mxu1 }
 0x3b9   : > { %14857 = vst [vmem:[#allocation145_spill] sm:$0xff] %v13353_v5  ;;  %v9563_v5 = vld [vmem:[%s10620_s11 + $0x8b4] ss:$24 sps:$4 sm:$0xff]  }
 0x3ba   : > { %7014 = vmatmul.mubr.bf16.gmra.mxu1 %v14858_v39  ;;  %v13358_v42 = vpop.f32.mrf.mxu0  ;;  %v9558_v39 = vld [vmem:[%s10620_s11 + $0x8e0] ss:$24 sps:$4 sm:$0xff]  }
 0x3bb   : > { %14859 = vst [vmem:[#allocation114_spill] sm:$0xff] %v13358_v42  ;;  %7023 = vmatprep.mubr.bf16.mxu1 %v14860_v61  ;;  %7190 = vmatpush1.bf16.msra.mxu1 %v9552_v55  ;;  %v13374_v61 = vpop.f32.mrf.mxu1  ;;  %v9561_v55 = vld [vmem:[%s10620_s11 + $0x8b0] ss:$24 sps:$4 sm:$0xff]  }
 0x3bc   : > { %7191 = vmatprep.subr.bf16.mxu1 %v9557_v33  ;;  %v13363_v56 = vpop.f32.mrf.mxu0 }
 0x3bd   : > { %14861 = vst [vmem:[#allocation116_spill] sm:$0xff] %v13363_v56 }
 0x3be   : > { %v13367_v2 = vpop.f32.mrf.mxu0 }
 0x3bf   : > { %14862 = vst [vmem:[#allocation146_spill] sm:$0xff] %v13367_v2  ;;  %7192 = vmatpush1.bf16.msra.mxu1 %v9555_v59  ;;  %v9566_v59 = vld [vmem:[%s10620_s11 + $0x884] ss:$24 sps:$4 sm:$0xff]  }
 0x3c0   : > { %7193 = vmatprep.subr.bf16.mxu1 %v9560_v17  ;;  %v13371_v42 = vpop.f32.mrf.mxu0  ;;  %v13383_v17 = vpop.f32.mrf.mxu1 }
 0x3c1   : > { %14863 = vst [vmem:[#allocation147_spill] sm:$0xff] %v13371_v42  ;;  %v9569_v42 = vld [vmem:[%s10620_s11 + $0x854] ss:$24 sps:$4 sm:$0xff]  }
 0x3c2   : > { %7024 = vmatmul.mubr.bf16.gmra.mxu1 %v14794_v25  ;;  %v13376_v33 = vpop.f32.mrf.mxu0  ;;  %v9564_v25 = vld [vmem:[%s10620_s11 + $0x880] ss:$24 sps:$4 sm:$0xff]  }
 0x3c3   : > { %14864 = vst [vmem:[#allocation148_spill] sm:$0xff] %v13376_v33  ;;  %7033 = vmatprep.mubr.bf16.mxu1 %v12274_v15  ;;  %7194 = vmatpush2.bf16.msra.mxu1 %v9558_v39  ;;  %v13392_v15 = vpop.f32.mrf.mxu1  ;;  %v9567_v39 = vld [vmem:[%s10620_s11 + $0x850] ss:$24 sps:$4 sm:$0xff]  }
 0x3c4   : > { %7195 = vmatprep.subr.bf16.mxu1 %v9563_v5  ;;  %v13381_v2 = vpop.f32.mrf.mxu0 }
 0x3c5   : > { %14865 = vst [vmem:[#allocation149_spill] sm:$0xff] %v13381_v2 }
 0x3c6   : > { %v13385_v56 = vpop.f32.mrf.mxu0 }
 0x3c7   : > { %14866 = vst [vmem:[#allocation150_spill] sm:$0xff] %v13385_v56  ;;  %7196 = vmatpush2.bf16.msra.mxu1 %v9561_v55  ;;  %v9572_v55 = vld [vmem:[%s10620_s11 + $0x824] ss:$24 sps:$4 sm:$0xff]  }
 0x3c8   : > { %7197 = vmatprep.subr.bf16.mxu1 %v9566_v59  ;;  %v13389_v33 = vpop.f32.mrf.mxu0  ;;  %v13401_v59 = vpop.f32.mrf.mxu1 }
 0x3c9   : > { %14867 = vst [vmem:[#allocation151_spill] sm:$0xff] %v13389_v33  ;;  %v9575_v33 = vld [vmem:[%s10620_s11 + $0x7f4] ss:$24 sps:$4 sm:$0xff]  }
 0x3ca   : > { %7034 = vmatmul.mubr.bf16.gmra.mxu1 %v12250_v38  ;;  %v13394_v5 = vpop.f32.mrf.mxu0  ;;  %v9570_v38 = vld [vmem:[%s10620_s11 + $0x820] ss:$24 sps:$4 sm:$0xff]  }
 0x3cb   : > { %14868 = vst [vmem:[#allocation152_spill] sm:$0xff] %v13394_v5  ;;  %7043 = vmatprep.mubr.bf16.mxu1 %v12316_v14  ;;  %7198 = vmatpush2.bf16.msra.mxu1 %v9564_v25  ;;  %v13410_v14 = vpop.f32.mrf.mxu1  ;;  %v9573_v25 = vld [vmem:[%s10620_s11 + $0x7f0] ss:$24 sps:$4 sm:$0xff]  }
 0x3cc   : > { %7199 = vmatprep.subr.bf16.mxu1 %v9569_v42  ;;  %v13399_v56 = vpop.f32.mrf.mxu0  ;;  %14872 = vst [vmem:[#allocation156_spill] sm:$0xff] %v13410_v14 }
 0x3cd   : > { %14869 = vst [vmem:[#allocation153_spill] sm:$0xff] %v13399_v56 }
 0x3ce   : > { %v13403_v2 = vpop.f32.mrf.mxu0 }
 0x3cf   : > { %14870 = vst [vmem:[#allocation154_spill] sm:$0xff] %v13403_v2  ;;  %7200 = vmatpush2.bf16.msra.mxu1 %v9567_v39  ;;  %v9578_v39 = vld [vmem:[%s10620_s11 + $0x7c4] ss:$24 sps:$4 sm:$0xff]  }
 0x3d0   : > { %7201 = vmatprep.subr.bf16.mxu1 %v9572_v55  ;;  %v13407_v5 = vpop.f32.mrf.mxu0  ;;  %v13419_v55 = vpop.f32.mrf.mxu1 }
 0x3d1   : > { %14871 = vst [vmem:[#allocation155_spill] sm:$0xff] %v13407_v5  ;;  %v9576_v5 = vld [vmem:[%s10620_s11 + $0x7c0] ss:$24 sps:$4 sm:$0xff]  }
 0x3d2   : > { %7044 = vmatmul.mubr.bf16.gmra.mxu1 %v12295_v3  ;;  %v13412_v42 = vpop.f32.mrf.mxu0  ;;  %v9581_v3 = vld [vmem:[%s10620_s11 + $0x794] ss:$24 sps:$4 sm:$0xff]  }
 0x3d3   : > { %14873 = vst [vmem:[#allocation157_spill] sm:$0xff] %v13412_v42  ;;  %7053 = vmatprep.mubr.bf16.mxu1 %v12357_v36  ;;  %7202 = vmatpush2.bf16.msra.mxu1 %v9570_v38  ;;  %v13428_v36 = vpop.f32.mrf.mxu1 }
 0x3d4   : > { %7203 = vmatprep.subr.bf16.mxu1 %v9575_v33  ;;  %v13417_v2 = vpop.f32.mrf.mxu0  ;;  %v9579_v33 = vld [vmem:[%s10620_s11 + $0x790] ss:$24 sps:$4 sm:$0xff]  }
 0x3d5   : > { %14874 = vst [vmem:[#allocation158_spill] sm:$0xff] %v13417_v2 }
 0x3d6   : > { %v13421_v56 = vpop.f32.mrf.mxu0 }
 0x3d7   : > { %14875 = vst [vmem:[#allocation159_spill] sm:$0xff] %v13421_v56  ;;  %7204 = vmatpush2.bf16.msra.mxu1 %v9573_v25  ;;  %v13436_v25 = vpop.f32.mrf.mxu1 }
 0x3d8   : > { %7205 = vmatprep.subr.bf16.mxu1 %v9578_v39  ;;  %v13425_v14 = vpop.f32.mrf.mxu0 }
 0x3d9   : > { %14876 = vst [vmem:[#allocation160_spill] sm:$0xff] %v13425_v14 }
 0x3da   : > { %7054 = vmatmul.mubr.bf16.gmra.mxu1 %v12333_v20  ;;  %v13430_v38 = vpop.f32.mrf.mxu0  ;;  %v6421_v20 = vadd.f32 %v13147_v21, %v13149_v10  ;;  %v6425_v21 = vadd.f32 %v13159_v7, %v13165_v8  ;;  %v6431_v7 = vadd.f32 %v13174_v63, %v13183_v51  ;;  %v4414_v51 = vld [vmem:[%s10624_s22 + $0x68] sm:$0xff] }
 0x3db   : > { %14877 = vst [vmem:[#allocation161_spill] sm:$0xff] %v13430_v38  ;;  %7206 = vmatpush2.bf16.msra.mxu1 %v9576_v5  ;;  %7209 = vmatprep.mubr.bf16.mxu1 %v12888_v62  ;;  %v4401_v38 = vld [vmem:[%s10624_s22] sm:$0xff]  ;;  %v6423_v62 = vadd.f32 %v13153_v58, %v13156_v19  ;;  %v4407_v58 = vld [vmem:[%s10624_s22 + $0x30] sm:$0xff] }
 0x3dc   : > { %7207 = vmatprep.subr.bf16.mxu1 %v9581_v3  ;;  %v13434_v56 = vpop.f32.mrf.mxu0 }
 0x3dd   : > { %14878 = vst [vmem:[#allocation162_spill] sm:$0xff] %v13434_v56 }
 0x3de   : > { %v13438_v39 = vpop.f32.mrf.mxu0 }
 0x3df   : > { %14879 = vst [vmem:[#allocation163_spill] sm:$0xff] %v13438_v39  ;;  %7208 = vmatpush2.bf16.msra.mxu1 %v9579_v33  ;;  %v4402_v33 = vld [vmem:[%s10624_s22 + $0x8] sm:$0xff] }
 0x3e0   : > { %v13442_v14 = vpop.f32.mrf.mxu0 }
 0x3e1   : > { %14880 = vst [vmem:[#allocation164_spill] sm:$0xff] %v13442_v14  ;;  %v6533_v5 = vpop.f32.mrf.mxu1 }
 0x3e2   : > { %v6534_v3 = vadd.f32 %v6533_v5, %v6421_v20  ;;  %7210 = vmatmul.mubr.bf16.vlgmr.msra.gmra.mxu1 %v12875_v28  ;;  %v13448_v56 = vpop.f32.mrf.mxu0  ;;  %v6427_v28 = vadd.f32 %v13167_v6, %v13172_v35  ;;  %v6433_v35 = vadd.f32 %v13180_v54, %v13192_v47  ;;  %v4419_v47 = vld [vmem:[%s10624_s22 + $0x90] sm:$0xff] }
 0x3e3   : > { %14881 = vst [vmem:[#allocation165_spill] sm:$0xff] %v13448_v56  ;;  %7219 = vmatprep.mubr.bf16.mxu1 %v12939_v0  ;;  %v6535_v39 = vpop.f32.mrf.mxu1  ;;  %v4408_v56 = vld [vmem:[%s10624_s22 + $0x38] sm:$0xff] }
 0x3e4   : > { %v7290_v10 = vadd.f32 %v6534_v3, %v4401_v38  ;;  %v6536_v14 = vadd.f32 %v6535_v39, %v6423_v62  ;;  %v13454_v2 = vpop.f32.mrf.mxu0  ;;  %v4413_v62 = vld [vmem:[%s10624_s22 + $0x60] sm:$0xff] }
 0x3e5   : > { %v6537_v19 = vpop.f32.mrf.mxu1 }
 0x3e6   : > { %7386 = vst [vmem:[%s10624_s22] sm:$0xff] %v7290_v10  ;;  %v7291_v20 = vadd.f32 %v6536_v14, %v4402_v33  ;;  %v6538_v0 = vadd.f32 %v6537_v19, %v6425_v21  ;;  %v13460_v5 = vpop.f32.mrf.mxu0  ;;  %v6435_v33 = vadd.f32 %v13185_v31, %v13203_v27  ;;  %v4420_v19 = vld [vmem:[%s10624_s22 + $0x98] sm:$0xff] }
 0x3e7   : > { %v6539_v42 = vpop.f32.mrf.mxu1 }
 0x3e8   : > { %7387 = vst [vmem:[%s10624_s22 + $0x8] sm:$0xff] %v7291_v20  ;;  %v7296_v8 = vadd.f32 %v6538_v0, %v4407_v58  ;;  %v6540_v38 = vadd.f32 %v6539_v42, %v6427_v28  ;;  %v13466_v39 = vpop.f32.mrf.mxu0  ;;  %v6441_v20 = vadd.f32 %v13194_v37, %v13223_v26  ;;  %v4426_v37 = vld [vmem:[%s10624_s22 + $0xc8] sm:$0xff] }
 0x3e9   : > { %v6543_v6 = vpop.f32.mrf.mxu1 }
 0x3ea   : > { %7392 = vst [vmem:[%s10624_s22 + $0x30] sm:$0xff] %v7296_v8  ;;  %v7297_v14 = vadd.f32 %v6540_v38, %v4408_v56  ;;  %v6544_v3 = vadd.f32 %v6543_v6, %v6431_v7  ;;  %7220 = vmatmul.mubr.bf16.gmra.mxu1 %v12923_v22  ;;  %v13473_v63 = vpop.f32.mrf.mxu0  ;;  %v6437_v22 = vadd.f32 %v13190_v40, %v13212_v24  ;;  %v4425_v24 = vld [vmem:[%s10624_s22 + $0xc0] sm:$0xff] }
 0x3eb   : > { %7229 = vmatprep.mubr.bf16.mxu1 %v12987_v32  ;;  %v6545_v42 = vpop.f32.mrf.mxu1  ;;  %v6443_v8 = vadd.f32 %v13200_v30, %v13232_v18  ;;  %v6447_v30 = vadd.f32 %v13210_v46, %v13252_v12  ;;  %v6453_v46 = vadd.f32 %v13220_v53, %v13272_v41  ;;  %v6457_v41 = vadd.f32 %v13230_v44, %v13292_v34  ;;  %v14882_v44 = vld [vmem:[#allocation112_spill] sm:$0xff] }
 0x3ec   : > { %7393 = vst [vmem:[%s10624_s22 + $0x38] sm:$0xff] %v7297_v14  ;;  %v7302_v21 = vadd.f32 %v6544_v3, %v4413_v62  ;;  %v6546_v54 = vadd.f32 %v6545_v42, %v6433_v35  ;;  %v13484_v10 = vpop.f32.mrf.mxu0  ;;  %v6445_v62 = vadd.f32 %v13205_v43, %v13243_v50  ;;  %v6451_v43 = vadd.f32 %v13214_v13, %v13263_v48  ;;  %v4438_v48 = vld [vmem:[%s10624_s22 + $0x128] sm:$0xff] }
 0x3ed   : > { %v6547_v56 = vpop.f32.mrf.mxu1  ;;  %v6463_v34 = vadd.f32 %v14882_v44, %v13311_v45 }
 0x3ee   : > { %7398 = vst [vmem:[%s10624_s22 + $0x60] sm:$0xff] %v7302_v21  ;;  %v7303_v32 = vadd.f32 %v6546_v54, %v4414_v51  ;;  %v6548_v58 = vadd.f32 %v6547_v56, %v6435_v33  ;;  %v13490_v0 = vpop.f32.mrf.mxu0  ;;  %v4432_v51 = vld [vmem:[%s10624_s22 + $0xf8] sm:$0xff]  ;;  %v4437_v54 = vld [vmem:[%s10624_s22 + $0x120] sm:$0xff] }
 0x3ef   : > { %v6549_v28 = vpop.f32.mrf.mxu1 }
 0x3f0   : > { %7399 = vst [vmem:[%s10624_s22 + $0x68] sm:$0xff] %v7303_v32  ;;  %v7308_v31 = vadd.f32 %v6548_v58, %v4419_v47  ;;  %v6550_v27 = vadd.f32 %v6549_v28, %v6437_v22  ;;  %v13502_v14 = vpop.f32.mrf.mxu0  ;;  %v6455_v22 = vadd.f32 %v13225_v23, %v13283_v11  ;;  %v6461_v23 = vadd.f32 %v13234_v60, %v13302_v4  ;;  %v14883_v4 = vld [vmem:[#allocation135_spill] sm:$0xff]  ;;  %v4450_v60 = vld [vmem:[%s10624_s22 + $0x188] sm:$0xff] }
 0x3f2   : > { %7404 = vst [vmem:[%s10624_s22 + $0x90] sm:$0xff] %v7308_v31  ;;  %v7309_v40 = vadd.f32 %v6550_v27, %v4420_v19  ;;  %v6553_v7 = vpop.f32.mrf.mxu1  ;;  %7230 = vmatmul.mubr.bf16.gmra.mxu1 %v12969_v1  ;;  %v4431_v1 = vld [vmem:[%s10624_s22 + $0xf0] sm:$0xff]  ;;  %v13512_v21 = vpop.f32.mrf.mxu0  ;;  %v4444_v31 = vld [vmem:[%s10624_s22 + $0x158] sm:$0xff] }
 0x3f3   : > { %v6554_v38 = vadd.f32 %v6553_v7, %v6441_v20  ;;  %7239 = vmatprep.mubr.bf16.mxu1 %v13028_v29  ;;  %v4443_v19 = vld [vmem:[%s10624_s22 + $0x150] sm:$0xff] }
 0x3f4   : > { %7405 = vst [vmem:[%s10624_s22 + $0x98] sm:$0xff] %v7309_v40  ;;  %v6555_v26 = vpop.f32.mrf.mxu1  ;;  %v13524_v58 = vpop.f32.mrf.mxu0 }
 0x3f5   : > { %v7314_v6 = vadd.f32 %v6554_v38, %v4425_v24  ;;  %v6556_v35 = vadd.f32 %v6555_v26, %v6443_v8  ;;  %v4449_v24 = vld [vmem:[%s10624_s22 + $0x180] sm:$0xff] }
 0x3f6   : > { %v6557_v3 = vpop.f32.mrf.mxu1  ;;  %v13534_v40 = vpop.f32.mrf.mxu0  ;;  %v14884_v26 = vld [vmem:[#allocation124_spill] sm:$0xff] }
 0x3f7   : > { %7410 = vst [vmem:[%s10624_s22 + $0xc0] sm:$0xff] %v7314_v6  ;;  %v7315_v29 = vadd.f32 %v6556_v35, %v4426_v37  ;;  %v6558_v18 = vadd.f32 %v6557_v3, %v6445_v62  ;;  %v14885_v62 = vld [vmem:[#allocation117_spill] sm:$0xff]  ;;  %v4455_v3 = vld [vmem:[%s10624_s22 + $0x1b0] sm:$0xff] }
 0x3f8   : > { %v6559_v42 = vpop.f32.mrf.mxu1  ;;  %v6465_v6 = vadd.f32 %v14885_v62, %v14884_v26 }
 0x3f9   : > { %7411 = vst [vmem:[%s10624_s22 + $0xc8] sm:$0xff] %v7315_v29  ;;  %v7320_v50 = vadd.f32 %v6558_v18, %v4431_v1  ;;  %v6560_v33 = vadd.f32 %v6559_v42, %v6447_v30  ;;  %v13546_v1 = vpop.f32.mrf.mxu0  ;;  %v14886_v30 = vld [vmem:[#allocation103_spill] sm:$0xff]  ;;  %v14887_v29 = vld [vmem:[#allocation118_spill] sm:$0xff] }
 0x3fa   : > { %v6563_v47 = vpop.f32.mrf.mxu1  ;;  %7240 = vmatmul.mubr.bf16.gmra.mxu1 %v13013_v9  ;;  %v6467_v18 = vadd.f32 %v14887_v29, %v14886_v30 }
 0x3fb   : > { %7416 = vst [vmem:[%s10624_s22 + $0xf0] sm:$0xff] %v7320_v50  ;;  %v7321_v12 = vadd.f32 %v6560_v33, %v4432_v51  ;;  %v6564_v56 = vadd.f32 %v6563_v47, %v6451_v43  ;;  %7249 = vmatprep.mubr.bf16.mxu1 %v13060_v57  ;;  %v4456_v43 = vld [vmem:[%s10624_s22 + $0x1b8] sm:$0xff]  ;;  %v14888_v33 = vld [vmem:[#allocation102_spill] sm:$0xff] }
 0x3fc   : > { %v6565_v13 = vpop.f32.mrf.mxu1 }
 0x3fd   : > { %7417 = vst [vmem:[%s10624_s22 + $0xf8] sm:$0xff] %v7321_v12  ;;  %v7326_v32 = vadd.f32 %v6564_v56, %v4437_v54  ;;  %v6566_v9 = vadd.f32 %v6565_v13, %v6453_v46  ;;  %v14889_v54 = vld [vmem:[#allocation119_spill] sm:$0xff]  ;;  %v13556_v56 = vpop.f32.mrf.mxu0 }
 0x3fe   : > { %v6567_v53 = vpop.f32.mrf.mxu1  ;;  %v6471_v47 = vadd.f32 %v14889_v54, %v14888_v33 }
 0x3ff   : > { %7422 = vst [vmem:[%s10624_s22 + $0x120] sm:$0xff] %v7326_v32  ;;  %v7327_v57 = vadd.f32 %v6566_v9, %v4438_v48  ;;  %v6568_v28 = vadd.f32 %v6567_v53, %v6455_v22  ;;  %v4461_v48 = vld [vmem:[%s10624_s22 + $0x1e0] sm:$0xff]  ;;  %v14891_v32 = vld [vmem:[#allocation143_spill] sm:$0xff]  ;;  %v14892_v9 = vld [vmem:[#allocation121_spill] sm:$0xff] }
 0x400   : > { %v6569_v27 = vpop.f32.mrf.mxu1  ;;  %v14890_v22 = vld [vmem:[#allocation108_spill] sm:$0xff] }
 0x401   : > { %7423 = vst [vmem:[%s10624_s22 + $0x128] sm:$0xff] %v7327_v57  ;;  %v7332_v11 = vadd.f32 %v6568_v28, %v4443_v19  ;;  %v6570_v20 = vadd.f32 %v6569_v27, %v6457_v41  ;;  %v6473_v19 = vadd.f32 %v14892_v9, %v14891_v32  ;;  %v14893_v57 = vld [vmem:[#allocation137_spill] sm:$0xff]  ;;  %v14894_v27 = vld [vmem:[#allocation120_spill] sm:$0xff]  ;;  %v4480_v32 = vld [vmem:[%s10624_s22 + $0x278] sm:$0xff] }
 0x402   : > { %v6573_v7 = vpop.f32.mrf.mxu1  ;;  %7250 = vmatmul.mubr.bf16.gmra.mxu1 %v13050_v16  ;;  %v4462_v28 = vld [vmem:[%s10624_s22 + $0x1e8] sm:$0xff] }
 0x403   : > { %7428 = vst [vmem:[%s10624_s22 + $0x150] sm:$0xff] %v7332_v11  ;;  %v7333_v8 = vadd.f32 %v6570_v20, %v4444_v31  ;;  %v6574_v38 = vadd.f32 %v6573_v7, %v6461_v23  ;;  %7259 = vmatprep.mubr.bf16.mxu1 %v14883_v4  ;;  %v6475_v23 = vadd.f32 %v14894_v27, %v13356_v52  ;;  %v4467_v7 = vld [vmem:[%s10624_s22 + $0x210] sm:$0xff] }
 0x404   : > { %v6575_v37 = vpop.f32.mrf.mxu1  ;;  %v14896_v52 = vld [vmem:[#allocation122_spill] sm:$0xff] }
 0x405   : > { %7429 = vst [vmem:[%s10624_s22 + $0x158] sm:$0xff] %v7333_v8  ;;  %v7338_v35 = vadd.f32 %v6574_v38, %v4449_v24  ;;  %v6576_v16 = vadd.f32 %v6575_v37, %v6463_v34  ;;  %v13568_v24 = vpop.f32.mrf.mxu0  ;;  %v14895_v34 = vld [vmem:[#allocation123_spill] sm:$0xff]  ;;  %v6481_v26 = vadd.f32 %v14896_v52, %v13374_v61  ;;  %v4491_v52 = vld [vmem:[%s10624_s22 + $0x2d0] sm:$0xff] }
 0x406   : > { %v6577_v45 = vpop.f32.mrf.mxu1  ;;  %v6477_v8 = vadd.f32 %v14895_v34, %v13365_v49  ;;  %v14898_v49 = vld [vmem:[#allocation128_spill] sm:$0xff]  ;;  %v14899_v61 = vld [vmem:[#allocation139_spill] sm:$0xff] }
 0x407   : > { %7434 = vst [vmem:[%s10624_s22 + $0x180] sm:$0xff] %v7338_v35  ;;  %v7339_v51 = vadd.f32 %v6576_v16, %v4450_v60  ;;  %v6578_v42 = vadd.f32 %v6577_v45, %v6465_v6  ;;  %v4468_v60 = vld [vmem:[%s10624_s22 + $0x218] sm:$0xff]  ;;  %v13578_v35 = vpop.f32.mrf.mxu0  ;;  %v4473_v16 = vld [vmem:[%s10624_s22 + $0x240] sm:$0xff]  ;;  %v6483_v30 = vadd.f32 %v14898_v49, %v13383_v17 }
 0x408   : > { %v6579_v50 = vpop.f32.mrf.mxu1  ;;  %v14897_v45 = vld [vmem:[#allocation136_spill] sm:$0xff] }
 0x409   : > { %7435 = vst [vmem:[%s10624_s22 + $0x188] sm:$0xff] %v7339_v51  ;;  %v7344_v46 = vadd.f32 %v6578_v42, %v4455_v3  ;;  %v6580_v12 = vadd.f32 %v6579_v50, %v6467_v18  ;;  %v4474_v51 = vld [vmem:[%s10624_s22 + $0x248] sm:$0xff] }
 0x40a   : > { %v6583_v13 = vpop.f32.mrf.mxu1  ;;  %7260 = vmatmul.mubr.bf16.gmra.mxu1 %v14890_v22 }
 0x40b   : > { %7440 = vst [vmem:[%s10624_s22 + $0x1b0] sm:$0xff] %v7344_v46  ;;  %v7345_v53 = vadd.f32 %v6580_v12, %v4456_v43  ;;  %v6584_v41 = vadd.f32 %v6583_v13, %v6471_v47  ;;  %7269 = vmatprep.mubr.bf16.mxu1 %v14893_v57  ;;  %v14900_v43 = vld [vmem:[#allocation109_spill] sm:$0xff]  ;;  %v13590_v47 = vpop.f32.mrf.mxu0  ;;  %v4479_v46 = vld [vmem:[%s10624_s22 + $0x270] sm:$0xff] }
 0x40c   : > { %v6585_v31 = vpop.f32.mrf.mxu1  ;;  %v6485_v50 = vadd.f32 %v14900_v43, %v13392_v15  ;;  %v14901_v12 = vld [vmem:[#allocation130_spill] sm:$0xff]  ;;  %v14903_v15 = vld [vmem:[#allocation129_spill] sm:$0xff] }
 0x40d   : > { %7441 = vst [vmem:[%s10624_s22 + $0x1b8] sm:$0xff] %v7345_v53  ;;  %v7350_v11 = vadd.f32 %v6584_v41, %v4461_v48  ;;  %v6586_v20 = vadd.f32 %v6585_v31, %v6473_v19  ;;  %v6487_v48 = vadd.f32 %v14901_v12, %v13401_v59  ;;  %v14902_v19 = vld [vmem:[#allocation156_spill] sm:$0xff] }
 0x40e   : > { %v6587_v44 = vpop.f32.mrf.mxu1  ;;  %v6491_v53 = vadd.f32 %v14903_v15, %v14902_v19  ;;  %v4485_v31 = vld [vmem:[%s10624_s22 + $0x2a0] sm:$0xff]  ;;  %v14911_v15 = vld [vmem:[#allocation126_spill] sm:$0xff] }
 0x40f   : > { %7446 = vst [vmem:[%s10624_s22 + $0x1e0] sm:$0xff] %v7350_v11  ;;  %v7351_v38 = vadd.f32 %v6586_v20, %v4462_v28  ;;  %v6588_v4 = vadd.f32 %v6587_v44, %v6475_v23  ;;  %v13600_v28 = vpop.f32.mrf.mxu0  ;;  %v14904_v23 = vld [vmem:[#allocation138_spill] sm:$0xff]  ;;  %v14905_v59 = vld [vmem:[#allocation132_spill] sm:$0xff]  ;;  %v4486_v44 = vld [vmem:[%s10624_s22 + $0x2a8] sm:$0xff] }
 0x410   : > { %v6589_v37 = vpop.f32.mrf.mxu1  ;;  %v6493_v11 = vadd.f32 %v14905_v59, %v13419_v55  ;;  %v14907_v55 = vld [vmem:[#allocation134_spill] sm:$0xff] }
 0x411   : > { %7447 = vst [vmem:[%s10624_s22 + $0x1e8] sm:$0xff] %v7351_v38  ;;  %v7356_v62 = vadd.f32 %v6588_v4, %v4467_v7  ;;  %v6590_v6 = vadd.f32 %v6589_v37, %v6477_v8  ;;  %v14906_v8 = vld [vmem:[#allocation131_spill] sm:$0xff]  ;;  %v13611_v37 = vpop.f32.mrf.mxu0 }
 0x412   : > { %v6593_v3 = vpop.f32.mrf.mxu1  ;;  %7270 = vmatmul.mubr.bf16.gmra.mxu1 %v14897_v45  ;;  %v6495_v38 = vadd.f32 %v14906_v8, %v13428_v36 }
 0x413   : > { %7452 = vst [vmem:[%s10624_s22 + $0x210] sm:$0xff] %v7356_v62  ;;  %v7357_v29 = vadd.f32 %v6590_v6, %v4468_v60  ;;  %v6594_v18 = vadd.f32 %v6593_v3, %v6481_v26  ;;  %7279 = vmatprep.mubr.bf16.mxu1 %v14899_v61  ;;  %v6497_v62 = vadd.f32 %v14907_v55, %v13436_v25  ;;  %v4492_v3 = vld [vmem:[%s10624_s22 + $0x2d8] sm:$0xff]  ;;  %v14908_v61 = vld [vmem:[#allocation133_spill] sm:$0xff]  ;;  %v4403_v25 = vld [vmem:[%s10624_s22 + $0x10] sm:$0xff] }
 0x414   : > { %v6595_v42 = vpop.f32.mrf.mxu1  ;;  %v4421_v55 = vld [vmem:[%s10624_s22 + $0xa0] sm:$0xff] }
 0x415   : > { %7453 = vst [vmem:[%s10624_s22 + $0x218] sm:$0xff] %v7357_v29  ;;  %v7362_v33 = vadd.f32 %v6594_v18, %v4473_v16  ;;  %v6596_v54 = vadd.f32 %v6595_v42, %v6483_v30  ;;  %v13619_v30 = vpop.f32.mrf.mxu0 }
 0x416   : > { %v6597_v17 = vpop.f32.mrf.mxu1 }
 0x417   : > { %7458 = vst [vmem:[%s10624_s22 + $0x240] sm:$0xff] %v7362_v33  ;;  %v7363_v13 = vadd.f32 %v6596_v54, %v4474_v51  ;;  %v6598_v22 = vadd.f32 %v6597_v17, %v6485_v50  ;;  %v14909_v50 = vld [vmem:[#allocation125_spill] sm:$0xff]  ;;  %v13627_v54 = vpop.f32.mrf.mxu0 }
 0x418   : > { %v6599_v9 = vpop.f32.mrf.mxu1 }
 0x419   : > { %7459 = vst [vmem:[%s10624_s22 + $0x248] sm:$0xff] %v7363_v13  ;;  %v7368_v41 = vadd.f32 %v6598_v22, %v4479_v46  ;;  %v6600_v57 = vadd.f32 %v6599_v9, %v6487_v48  ;;  %v4404_v46 = vld [vmem:[%s10624_s22 + $0x18] sm:$0xff] }
 0x41a   : > { %v6603_v27 = vpop.f32.mrf.mxu1  ;;  %7280 = vmatmul.mubr.bf16.gmra.mxu1 %v14904_v23  ;;  %v14910_v13 = vld [vmem:[#allocation127_spill] sm:$0xff]  ;;  %v14912_v23 = vld [vmem:[#allocation140_spill] sm:$0xff] }
 0x41b   : > { %7464 = vst [vmem:[%s10624_s22 + $0x270] sm:$0xff] %v7368_v41  ;;  %v7369_v20 = vadd.f32 %v6600_v57, %v4480_v32  ;;  %v6604_v7 = vadd.f32 %v6603_v27, %v6491_v53  ;;  %v4409_v32 = vld [vmem:[%s10624_s22 + $0x40] sm:$0xff]  ;;  %v13636_v41 = vpop.f32.mrf.mxu0  ;;  %v4410_v57 = vld [vmem:[%s10624_s22 + $0x48] sm:$0xff] }
 0x41c   : > { %v6605_v34 = vpop.f32.mrf.mxu1 }
 0x41d   : > { %7465 = vst [vmem:[%s10624_s22 + $0x278] sm:$0xff] %v7369_v20  ;;  %v7374_v4 = vadd.f32 %v6604_v7, %v4485_v31  ;;  %v6606_v60 = vadd.f32 %v6605_v34, %v6493_v11  ;;  %v4415_v11 = vld [vmem:[%s10624_s22 + $0x70] sm:$0xff]  ;;  %v13646_v8 = vpop.f32.mrf.mxu0 }
 0x41e   : > { %v6607_v26 = vpop.f32.mrf.mxu1 }
 0x41f   : > { %7470 = vst [vmem:[%s10624_s22 + $0x2a0] sm:$0xff] %v7374_v4  ;;  %v7375_v6 = vadd.f32 %v6606_v60, %v4486_v44  ;;  %v6608_v16 = vadd.f32 %v6607_v26, %v6495_v38  ;;  %v14913_v44 = vld [vmem:[#allocation141_spill] sm:$0xff]  ;;  %v4416_v38 = vld [vmem:[%s10624_s22 + $0x78] sm:$0xff] }
 0x420   : > { %v6609_v45 = vpop.f32.mrf.mxu1 }
 0x421   : > { %7471 = vst [vmem:[%s10624_s22 + $0x2a8] sm:$0xff] %v7375_v6  ;;  %v7380_v36 = vadd.f32 %v6608_v16, %v4491_v52  ;;  %v6610_v49 = vadd.f32 %v6609_v45, %v6497_v62  ;;  %v14914_v52 = vld [vmem:[#allocation142_spill] sm:$0xff]  ;;  %v14915_v16 = vld [vmem:[#allocation115_spill] sm:$0xff]  ;;  %v13656_v45 = vpop.f32.mrf.mxu0 }
 0x422   : > { %v6759_v29 = vpop.f32.mrf.mxu1 }
 0x423   : > { %7476 = vst [vmem:[%s10624_s22 + $0x2d0] sm:$0xff] %v7380_v36  ;;  %v7381_v18 = vadd.f32 %v6610_v49, %v4492_v3  ;;  %v6760_v51 = vadd.f32 %v6759_v29, %v14908_v61  ;;  %v4422_v36 = vld [vmem:[%s10624_s22 + $0xa8] sm:$0xff] }
 0x424   : > { %v6761_v42 = vpop.f32.mrf.mxu1 }
 0x425   : > { %7477 = vst [vmem:[%s10624_s22 + $0x2d8] sm:$0xff] %v7381_v18  ;;  %v6873_v43 = vadd.f32 %v13460_v5, %v6760_v51  ;;  %v6762_v33 = vadd.f32 %v6761_v42, %v14909_v50  ;;  %v14916_v18 = vld [vmem:[#allocation144_spill] sm:$0xff]  ;;  %v4427_v51 = vld [vmem:[%s10624_s22 + $0xd0] sm:$0xff] }
 0x426   : > { %v6763_v17 = vpop.f32.mrf.mxu1 }
 0x427   : > { %v7292_v12 = vadd.f32 %v6873_v43, %v4403_v25  ;;  %v6875_v48 = vadd.f32 %v13466_v39, %v6762_v33  ;;  %v6764_v22 = vadd.f32 %v6763_v17, %v14910_v13  ;;  %v14917_v43 = vld [vmem:[#allocation145_spill] sm:$0xff]  ;;  %v13666_v33 = vpop.f32.mrf.mxu0 }
 0x428   : > { %v6765_v9 = vpop.f32.mrf.mxu1 }
 0x429   : > { %7388 = vst [vmem:[%s10624_s22 + $0x10] sm:$0xff] %v7292_v12  ;;  %v7293_v19 = vadd.f32 %v6875_v48, %v4404_v46  ;;  %v6877_v5 = vadd.f32 %v13473_v63, %v6764_v22  ;;  %v6766_v53 = vadd.f32 %v6765_v9, %v14911_v15  ;;  %v4428_v46 = vld [vmem:[%s10624_s22 + $0xd8] sm:$0xff]  ;;  %v14918_v48 = vld [vmem:[#allocation114_spill] sm:$0xff]  ;;  %v4433_v22 = vld [vmem:[%s10624_s22 + $0x100] sm:$0xff]  ;;  %v13676_v15 = vpop.f32.mrf.mxu0 }
 0x42a   : > { %v6769_v31 = vpop.f32.mrf.mxu1 }
 0x42b   : > { %7389 = vst [vmem:[%s10624_s22 + $0x18] sm:$0xff] %v7293_v19  ;;  %v7298_v27 = vadd.f32 %v6877_v5, %v4409_v32  ;;  %v6879_v39 = vadd.f32 %v13484_v10, %v6766_v53  ;;  %v6770_v59 = vadd.f32 %v6769_v31, %v14912_v23  ;;  %v14919_v19 = vld [vmem:[#allocation116_spill] sm:$0xff]  ;;  %v4434_v53 = vld [vmem:[%s10624_s22 + $0x108] sm:$0xff]  ;;  %v4439_v23 = vld [vmem:[%s10624_s22 + $0x130] sm:$0xff] }
 0x42c   : > { %v6771_v20 = vpop.f32.mrf.mxu1 }
 0x42d   : > { %7394 = vst [vmem:[%s10624_s22 + $0x40] sm:$0xff] %v7298_v27  ;;  %v7299_v63 = vadd.f32 %v6879_v39, %v4410_v57  ;;  %v6883_v7 = vadd.f32 %v13490_v0, %v6770_v59  ;;  %v6772_v34 = vadd.f32 %v6771_v20, %v14913_v44  ;;  %v14920_v27 = vld [vmem:[#allocation146_spill] sm:$0xff]  ;;  %v14921_v20 = vld [vmem:[#allocation147_spill] sm:$0xff] }
 0x42e   : > { %v6773_v4 = vpop.f32.mrf.mxu1  ;;  %v4440_v44 = vld [vmem:[%s10624_s22 + $0x138] sm:$0xff] }
 0x42f   : > { %7395 = vst [vmem:[%s10624_s22 + $0x48] sm:$0xff] %v7299_v63  ;;  %v7304_v60 = vadd.f32 %v6883_v7, %v4415_v11  ;;  %v6885_v10 = vadd.f32 %v13502_v14, %v6772_v34  ;;  %v6774_v26 = vadd.f32 %v6773_v4, %v14914_v52  ;;  %v13686_v7 = vpop.f32.mrf.mxu0  ;;  %v14922_v4 = vld [vmem:[#allocation148_spill] sm:$0xff] }
 0x430   : > { %v6775_v62 = vpop.f32.mrf.mxu1 }
 0x431   : > { %7400 = vst [vmem:[%s10624_s22 + $0x70] sm:$0xff] %v7304_v60  ;;  %v7305_v0 = vadd.f32 %v6885_v10, %v4416_v38  ;;  %v6887_v6 = vadd.f32 %v13512_v21, %v6774_v26  ;;  %v6776_v3 = vadd.f32 %v6775_v62, %v14915_v16  ;;  %v4445_v10 = vld [vmem:[%s10624_s22 + $0x160] sm:$0xff] }
 0x432   : > { %v6779_v49 = vpop.f32.mrf.mxu1 }
 0x433   : > { %7401 = vst [vmem:[%s10624_s22 + $0x78] sm:$0xff] %v7305_v0  ;;  %v7310_v29 = vadd.f32 %v6887_v6, %v4421_v55  ;;  %v6889_v14 = vadd.f32 %v13524_v58, %v6776_v3  ;;  %v6780_v61 = vadd.f32 %v6779_v49, %v14916_v18  ;;  %v14923_v55 = vld [vmem:[#allocation149_spill] sm:$0xff]  ;;  %v13696_v0 = vpop.f32.mrf.mxu0 }
 0x434   : > { %v6781_v25 = vpop.f32.mrf.mxu1  ;;  %v4446_v6 = vld [vmem:[%s10624_s22 + $0x168] sm:$0xff] }
 0x435   : > { %7406 = vst [vmem:[%s10624_s22 + $0xa0] sm:$0xff] %v7310_v29  ;;  %v7311_v21 = vadd.f32 %v6889_v14, %v4422_v36  ;;  %v6893_v42 = vadd.f32 %v13534_v40, %v6780_v61  ;;  %v6782_v50 = vadd.f32 %v6781_v25, %v14917_v43  ;;  %v14924_v36 = vld [vmem:[#allocation150_spill] sm:$0xff]  ;;  %v14925_v61 = vld [vmem:[#allocation151_spill] sm:$0xff]  ;;  %v6934_v25 = vpop.f32.mrf.mxu0 }
 0x436   : > { %v6783_v17 = vpop.f32.mrf.mxu1  ;;  %v4451_v29 = vld [vmem:[%s10624_s22 + $0x190] sm:$0xff] }
 0x437   : > { %7407 = vst [vmem:[%s10624_s22 + $0xa8] sm:$0xff] %v7311_v21  ;;  %v7316_v12 = vadd.f32 %v6893_v42, %v4427_v51  ;;  %v6895_v58 = vadd.f32 %v13546_v1, %v6782_v50  ;;  %v6784_v13 = vadd.f32 %v6783_v17, %v14918_v48  ;;  %v4452_v21 = vld [vmem:[%s10624_s22 + $0x198] sm:$0xff]  ;;  %v14926_v50 = vld [vmem:[#allocation152_spill] sm:$0xff]  ;;  %v14927_v48 = vld [vmem:[#allocation153_spill] sm:$0xff] }
 0x438   : > { %v6785_v32 = vpop.f32.mrf.mxu1  ;;  %v4457_v17 = vld [vmem:[%s10624_s22 + $0x1c0] sm:$0xff] }
 0x439   : > { %7412 = vst [vmem:[%s10624_s22 + $0xd0] sm:$0xff] %v7316_v12  ;;  %v7317_v40 = vadd.f32 %v6895_v58, %v4428_v46  ;;  %v6897_v9 = vadd.f32 %v13556_v56, %v6784_v13  ;;  %v6786_v5 = vadd.f32 %v6785_v32, %v14919_v19  ;;  %v4458_v32 = vld [vmem:[%s10624_s22 + $0x1c8] sm:$0xff]  ;;  %v14928_v19 = vld [vmem:[#allocation154_spill] sm:$0xff] }
 0x43a   : > { %v6789_v57 = vpop.f32.mrf.mxu1 }
 0x43b   : > { %7413 = vst [vmem:[%s10624_s22 + $0xd8] sm:$0xff] %v7317_v40  ;;  %v7322_v31 = vadd.f32 %v6897_v9, %v4433_v22  ;;  %v6899_v1 = vadd.f32 %v13568_v24, %v6786_v5  ;;  %v6790_v39 = vadd.f32 %v6789_v57, %v14920_v27  ;;  %v6936_v22 = vpop.f32.mrf.mxu0 }
 0x43c   : > { %v6791_v59 = vpop.f32.mrf.mxu1 }
 0x43d   : > { %7418 = vst [vmem:[%s10624_s22 + $0x100] sm:$0xff] %v7322_v31  ;;  %v7323_v56 = vadd.f32 %v6899_v1, %v4434_v53  ;;  %v6903_v11 = vadd.f32 %v13578_v35, %v6790_v39  ;;  %v6792_v63 = vadd.f32 %v6791_v59, %v14921_v20  ;;  %v4463_v53 = vld [vmem:[%s10624_s22 + $0x1f0] sm:$0xff]  ;;  %v14929_v1 = vld [vmem:[#allocation155_spill] sm:$0xff]  ;;  %v6938_v39 = vpop.f32.mrf.mxu0 }
 0x43e   : > { %v6793_v34 = vpop.f32.mrf.mxu1 }
 0x43f   : > { %7419 = vst [vmem:[%s10624_s22 + $0x108] sm:$0xff] %v7323_v56  ;;  %v7328_v38 = vadd.f32 %v6903_v11, %v4439_v23  ;;  %v6905_v24 = vadd.f32 %v13590_v47, %v6792_v63  ;;  %v6794_v60 = vadd.f32 %v6793_v34, %v14922_v4  ;;  %v4464_v23 = vld [vmem:[%s10624_s22 + $0x1f8] sm:$0xff]  ;;  %v14930_v11 = vld [vmem:[#allocation157_spill] sm:$0xff]  ;;  %v4469_v63 = vld [vmem:[%s10624_s22 + $0x220] sm:$0xff]  ;;  %v6942_v4 = vpop.f32.mrf.mxu0 }
 0x440   : > { %v6795_v52 = vpop.f32.mrf.mxu1 }
 0x441   : > { %7424 = vst [vmem:[%s10624_s22 + $0x130] sm:$0xff] %v7328_v38  ;;  %v7329_v35 = vadd.f32 %v6905_v24, %v4440_v44  ;;  %v6907_v26 = vadd.f32 %v13600_v28, %v6794_v60  ;;  %v6796_v62 = vadd.f32 %v6795_v52, %v14923_v55  ;;  %v14931_v38 = vld [vmem:[#allocation158_spill] sm:$0xff]  ;;  %v4470_v60 = vld [vmem:[%s10624_s22 + $0x228] sm:$0xff] }
 0x442   : > { %v6799_v16 = vpop.f32.mrf.mxu1  ;;  %v4475_v55 = vld [vmem:[%s10624_s22 + $0x250] sm:$0xff] }
 0x443   : > { %7425 = vst [vmem:[%s10624_s22 + $0x138] sm:$0xff] %v7329_v35  ;;  %v7334_v3 = vadd.f32 %v6907_v26, %v4445_v10  ;;  %v6909_v47 = vadd.f32 %v13611_v37, %v6796_v62  ;;  %v6800_v49 = vadd.f32 %v6799_v16, %v14924_v36  ;;  %v14932_v35 = vld [vmem:[#allocation159_spill] sm:$0xff]  ;;  %v14933_v16 = vld [vmem:[#allocation160_spill] sm:$0xff] }
 0x444   : > { %v6801_v14 = vpop.f32.mrf.mxu1  ;;  %v4476_v36 = vld [vmem:[%s10624_s22 + $0x258] sm:$0xff] }
 0x445   : > { %7430 = vst [vmem:[%s10624_s22 + $0x160] sm:$0xff] %v7334_v3  ;;  %v7335_v28 = vadd.f32 %v6909_v47, %v4446_v6  ;;  %v6913_v18 = vadd.f32 %v13619_v30, %v6800_v49  ;;  %v6802_v51 = vadd.f32 %v6801_v14, %v14925_v61  ;;  %v6944_v47 = vpop.f32.mrf.mxu0  ;;  %v14934_v14 = vld [vmem:[#allocation161_spill] sm:$0xff] }
 0x446   : > { %v6803_v42 = vpop.f32.mrf.mxu1 }
 0x447   : > { %7431 = vst [vmem:[%s10624_s22 + $0x168] sm:$0xff] %v7335_v28  ;;  %v7340_v43 = vadd.f32 %v6913_v18, %v4451_v29  ;;  %v6915_v37 = vadd.f32 %v13627_v54, %v6802_v51  ;;  %v6804_v46 = vadd.f32 %v6803_v42, %v14926_v50  ;;  %v4481_v18 = vld [vmem:[%s10624_s22 + $0x280] sm:$0xff] }
 0x448   : > { %v6805_v12 = vpop.f32.mrf.mxu1 }
 0x449   : > { %7436 = vst [vmem:[%s10624_s22 + $0x190] sm:$0xff] %v7340_v43  ;;  %v7341_v58 = vadd.f32 %v6915_v37, %v4452_v21  ;;  %v6917_v30 = vadd.f32 %v13636_v41, %v6804_v46  ;;  %v6806_v13 = vadd.f32 %v6805_v12, %v14927_v48  ;;  %v6946_v43 = vpop.f32.mrf.mxu0  ;;  %v4482_v37 = vld [vmem:[%s10624_s22 + $0x288] sm:$0xff] }
 0x44a   : > { %v6809_v40 = vpop.f32.mrf.mxu1 }
 0x44b   : > { %7437 = vst [vmem:[%s10624_s22 + $0x198] sm:$0xff] %v7341_v58  ;;  %v7346_v9 = vadd.f32 %v6917_v30, %v4457_v17  ;;  %v6919_v54 = vadd.f32 %v13646_v8, %v6806_v13  ;;  %v6810_v5 = vadd.f32 %v6809_v40, %v14928_v19  ;;  %v4487_v58 = vld [vmem:[%s10624_s22 + $0x2b0] sm:$0xff]  ;;  %v6948_v40 = vpop.f32.mrf.mxu0 }
 0x44c   : > { %v6811_v57 = vpop.f32.mrf.mxu1 }
 0x44d   : > { %7442 = vst [vmem:[%s10624_s22 + $0x1c0] sm:$0xff] %v7346_v9  ;;  %v7347_v31 = vadd.f32 %v6919_v54, %v4458_v32  ;;  %v6923_v41 = vadd.f32 %v13656_v45, %v6810_v5  ;;  %v6812_v27 = vadd.f32 %v6811_v57, %v14929_v1  ;;  %v4488_v9 = vld [vmem:[%s10624_s22 + $0x2b8] sm:$0xff] }
 0x44e   : > { %v6813_v59 = vpop.f32.mrf.mxu1 }
 0x44f   : > { %7443 = vst [vmem:[%s10624_s22 + $0x1c8] sm:$0xff] %v7347_v31  ;;  %v7352_v56 = vadd.f32 %v6923_v41, %v4463_v53  ;;  %v6925_v8 = vadd.f32 %v13666_v33, %v6812_v27  ;;  %v6814_v20 = vadd.f32 %v6813_v59, %v14930_v11  ;;  %v14938_v53 = vld [vmem:[#allocation165_spill] sm:$0xff]  ;;  %v4493_v31 = vld [vmem:[%s10624_s22 + $0x2e0] sm:$0xff] }
 0x450   : > { %v6815_v44 = vpop.f32.mrf.mxu1  ;;  %v4494_v59 = vld [vmem:[%s10624_s22 + $0x2e8] sm:$0xff] }
 0x451   : > { %7448 = vst [vmem:[%s10624_s22 + $0x1f0] sm:$0xff] %v7352_v56  ;;  %v7353_v34 = vadd.f32 %v6925_v8, %v4464_v23  ;;  %v6927_v45 = vadd.f32 %v13676_v15, %v6814_v20  ;;  %v6816_v24 = vadd.f32 %v6815_v44, %v14931_v38  ;;  %v7098_v23 = vpop.f32.mrf.mxu0 }
 0x452   : > { %v6819_v10 = vpop.f32.mrf.mxu1 }
 0x453   : > { %7449 = vst [vmem:[%s10624_s22 + $0x1f8] sm:$0xff] %v7353_v34  ;;  %v7358_v52 = vadd.f32 %v6927_v45, %v4469_v63  ;;  %v6929_v33 = vadd.f32 %v13686_v7, %v6816_v24  ;;  %v6820_v26 = vadd.f32 %v6819_v10, %v14932_v35  ;;  %v7100_v44 = vpop.f32.mrf.mxu0 }
 0x454   : > { %v6821_v62 = vpop.f32.mrf.mxu1 }
 0x455   : > { %7454 = vst [vmem:[%s10624_s22 + $0x220] sm:$0xff] %v7358_v52  ;;  %v7359_v6 = vadd.f32 %v6929_v33, %v4470_v60  ;;  %v6933_v15 = vadd.f32 %v13696_v0, %v6820_v26  ;;  %v6822_v3 = vadd.f32 %v6821_v62, %v14933_v16  ;;  %v14935_v0 = vld [vmem:[#allocation162_spill] sm:$0xff]  ;;  %v7102_v38 = vpop.f32.mrf.mxu0 }
 0x456   : > { %v6823_v49 = vpop.f32.mrf.mxu1 }
 0x457   : > { %7455 = vst [vmem:[%s10624_s22 + $0x228] sm:$0xff] %v7359_v6  ;;  %v7364_v29 = vadd.f32 %v6933_v15, %v4475_v55  ;;  %v6935_v7 = vadd.f32 %v6934_v25, %v6822_v3  ;;  %v6824_v28 = vadd.f32 %v6823_v49, %v14934_v14  ;;  %v14936_v25 = vld [vmem:[#allocation163_spill] sm:$0xff]  ;;  %v7104_v60 = vpop.f32.mrf.mxu0 }
 0x458   : > { %v6825_v61 = vpop.f32.mrf.mxu1 }
 0x459   : > { %7460 = vst [vmem:[%s10624_s22 + $0x250] sm:$0xff] %v7364_v29  ;;  %v7365_v51 = vadd.f32 %v6935_v7, %v4476_v36  ;;  %v6937_v21 = vadd.f32 %v6936_v22, %v6824_v28  ;;  %v6826_v42 = vadd.f32 %v6825_v61, %v14935_v0  ;;  %v14937_v22 = vld [vmem:[#allocation164_spill] sm:$0xff]  ;;  %v7108_v52 = vpop.f32.mrf.mxu0 }
 0x45a   : > { %v6829_v50 = vpop.f32.mrf.mxu1 }
 0x45b   : > { %7461 = vst [vmem:[%s10624_s22 + $0x258] sm:$0xff] %v7365_v51  ;;  %v7370_v46 = vadd.f32 %v6937_v21, %v4481_v18  ;;  %v6939_v17 = vadd.f32 %v6938_v39, %v6826_v42  ;;  %v6830_v12 = vadd.f32 %v6829_v50, %v14936_v25  ;;  %v7110_v26 = vpop.f32.mrf.mxu0 }
 0x45c   : > { %v6831_v30 = vpop.f32.mrf.mxu1 }
 0x45d   : > { %7466 = vst [vmem:[%s10624_s22 + $0x280] sm:$0xff] %v7370_v46  ;;  %v7371_v48 = vadd.f32 %v6939_v17, %v4482_v37  ;;  %v6943_v13 = vadd.f32 %v6942_v4, %v6830_v12  ;;  %v6832_v32 = vadd.f32 %v6831_v30, %v14937_v22  ;;  %v13774_v6 = vpop.f32.mrf.mxu0 }
 0x45e   : > { %v6833_v54 = vpop.f32.mrf.mxu1 }
 0x45f   : > { %7467 = vst [vmem:[%s10624_s22 + $0x288] sm:$0xff] %v7371_v48  ;;  %v7376_v19 = vadd.f32 %v6943_v13, %v4487_v58  ;;  %v6945_v5 = vadd.f32 %v6944_v47, %v6832_v32  ;;  %v6834_v57 = vadd.f32 %v6833_v54, %v14938_v53  ;;  %v13780_v3 = vpop.f32.mrf.mxu0  ;;  %v4405_v54 = vld [vmem:[%s10624_s22 + $0x20] sm:$0xff] }
 0x460   : > { %v6835_v41 = vpop.f32.mrf.mxu1 }
 0x461   : > { %7472 = vst [vmem:[%s10624_s22 + $0x2b0] sm:$0xff] %v7376_v19  ;;  %v7377_v1 = vadd.f32 %v6945_v5, %v4488_v9  ;;  %v6947_v27 = vadd.f32 %v6946_v43, %v6834_v57  ;;  %v6836_v39 = vadd.f32 %v6835_v41, %v13454_v2  ;;  %v13786_v49 = vpop.f32.mrf.mxu0  ;;  %v4406_v57 = vld [vmem:[%s10624_s22 + $0x28] sm:$0xff] }
 0x462   : > { %v6985_v56 = vpop.f32.mrf.mxu1 }
 0x463   : > { %7473 = vst [vmem:[%s10624_s22 + $0x2b8] sm:$0xff] %v7377_v1  ;;  %v7382_v8 = vadd.f32 %v6947_v27, %v4493_v31  ;;  %v6949_v11 = vadd.f32 %v6948_v40, %v6836_v39  ;;  %v13792_v14 = vpop.f32.mrf.mxu0  ;;  %v7099_v40 = vadd.f32 %v7098_v23, %v6985_v56 }
 0x464   : > { %v6987_v20 = vpop.f32.mrf.mxu1 }
 0x465   : > { %7478 = vst [vmem:[%s10624_s22 + $0x2e0] sm:$0xff] %v7382_v8  ;;  %v7383_v63 = vadd.f32 %v6949_v11, %v4494_v59  ;;  %v13798_v61 = vpop.f32.mrf.mxu0  ;;  %v7101_v5 = vadd.f32 %v7100_v44, %v6987_v20  ;;  %v4411_v59 = vld [vmem:[%s10624_s22 + $0x50] sm:$0xff] }
 0x466   : > { %v6989_v34 = vpop.f32.mrf.mxu1 }
 0x467   : > { %7479 = vst [vmem:[%s10624_s22 + $0x2e8] sm:$0xff] %v7383_v63  ;;  %v13804_v0 = vpop.f32.mrf.mxu0  ;;  %v7103_v41 = vadd.f32 %v7102_v38, %v6989_v34  ;;  %v4412_v63 = vld [vmem:[%s10624_s22 + $0x58] sm:$0xff] }
 0x468   : > { %v6991_v45 = vpop.f32.mrf.mxu1 }
 0x469   : > { %v13810_v37 = vpop.f32.mrf.mxu0  ;;  %v7105_v23 = vadd.f32 %v7104_v60, %v6991_v45 }
 0x46a   : > { %v6995_v24 = vpop.f32.mrf.mxu1 }
 0x46b   : > { %v13816_v17 = vpop.f32.mrf.mxu0  ;;  %v7109_v44 = vadd.f32 %v7108_v52, %v6995_v24 }
 0x46c   : > { %v13760_v4 = vpop.f32.mrf.mxu1 }
 0x46d   : > { %v13822_v58 = vpop.f32.mrf.mxu0 }
 0x46e   : > { %v13762_v10 = vpop.f32.mrf.mxu1 }
 0x46f   : > { %v13828_v13 = vpop.f32.mrf.mxu0  ;;  %v7113_v24 = vadd.f32 %v13774_v6, %v13762_v10 }
 0x470   : > { %v13764_v2 = vpop.f32.mrf.mxu1 }
 0x471   : > { %v13834_v9 = vpop.f32.mrf.mxu0 }
 0x472   : > { %v13766_v33 = vpop.f32.mrf.mxu1 }
 0x473   : > { %v13838_v39 = vpop.f32.mrf.mxu0  ;;  %v7119_v10 = vadd.f32 %v13786_v49, %v13766_v33 }
 0x474   : > { %v13768_v35 = vpop.f32.mrf.mxu1 }
 0x475   : > { %v13844_v38 = vpop.f32.mrf.mxu0 }
 0x476   : > { %v13770_v55 = vpop.f32.mrf.mxu1 }
 0x477   : > { %v7123_v33 = vadd.f32 %v13798_v61, %v13770_v55 }
 0x478   : > { %v13772_v62 = vpop.f32.mrf.mxu1 }
 0x47a   : > { %v13776_v15 = vpop.f32.mrf.mxu1 }
 0x47b   : > { %v7129_v55 = vadd.f32 %v13810_v37, %v13776_v15 }
 0x47c   : > { %v13778_v16 = vpop.f32.mrf.mxu1 }
 0x47e   : > { %v13782_v47 = vpop.f32.mrf.mxu1 }
 0x47f   : > { %v7133_v15 = vadd.f32 %v13822_v58, %v13782_v47 }
 0x480   : > { %v13784_v36 = vpop.f32.mrf.mxu1 }
 0x482   : > { %v13788_v29 = vpop.f32.mrf.mxu1 }
 0x483   : > { %v7139_v47 = vadd.f32 %v13834_v9, %v13788_v29 }
 0x484   : > { %v13790_v7 = vpop.f32.mrf.mxu1 }
 0x486   : > { %v13794_v28 = vpop.f32.mrf.mxu1 }
 0x487   : > { %v7143_v29 = vadd.f32 %v13844_v38, %v13794_v28 }
 0x488   : > { %v13796_v18 = vpop.f32.mrf.mxu1 }
 0x48a   : > { %v13800_v51 = vpop.f32.mrf.mxu1 }
 0x48c   : > { %v13802_v21 = vpop.f32.mrf.mxu1 }
 0x48e   : > { %v13806_v42 = vpop.f32.mrf.mxu1 }
 0x490   : > { %v13808_v43 = vpop.f32.mrf.mxu1 }
 0x492   : > { %v13812_v50 = vpop.f32.mrf.mxu1 }
 0x494   : > { %v13814_v46 = vpop.f32.mrf.mxu1 }
 0x496   : > { %v13818_v25 = vpop.f32.mrf.mxu1 }
 0x498   : > { %v13820_v12 = vpop.f32.mrf.mxu1 }
 0x49a   : > { %v13824_v30 = vpop.f32.mrf.mxu1 }
 0x49c   : > { %v13826_v48 = vpop.f32.mrf.mxu1 }
 0x49e   : > { %v13830_v22 = vpop.f32.mrf.mxu1 }
 0x4a0   : > { %v13832_v32 = vpop.f32.mrf.mxu1 }
 0x4a2   : > { %v7211_v19 = vpop.f32.mrf.mxu1 }
 0x4a3   : > { %v7212_v53 = vadd.f32 %v7211_v19, %v7099_v40 }
 0x4a4   : > { %v7213_v31 = vpop.f32.mrf.mxu1 }
 0x4a5   : > { %v7294_v1 = vadd.f32 %v7212_v53, %v4405_v54  ;;  %v7214_v27 = vadd.f32 %v7213_v31, %v7101_v5  ;;  %v4417_v54 = vld [vmem:[%s10624_s22 + $0x80] sm:$0xff]  ;;  %v7111_v5 = vadd.f32 %v7110_v26, %v13760_v4  ;;  %v4418_v53 = vld [vmem:[%s10624_s22 + $0x88] sm:$0xff]  ;;  %v7115_v4 = vadd.f32 %v13780_v3, %v13764_v2 }
 0x4a6   : > { %v7215_v8 = vpop.f32.mrf.mxu1  ;;  %v7121_v2 = vadd.f32 %v13792_v14, %v13768_v35  ;;  %v7125_v35 = vadd.f32 %v13804_v0, %v13772_v62  ;;  %v7131_v62 = vadd.f32 %v13816_v17, %v13778_v16  ;;  %v7135_v16 = vadd.f32 %v13828_v13, %v13784_v36 }
 0x4a7   : > { %7390 = vst [vmem:[%s10624_s22 + $0x20] sm:$0xff] %v7294_v1  ;;  %v7295_v56 = vadd.f32 %v7214_v27, %v4406_v57  ;;  %v7216_v11 = vadd.f32 %v7215_v8, %v7103_v41  ;;  %v13853_v41 = vpop.f32.mrf.mxu0  ;;  %v4423_v1 = vld [vmem:[%s10624_s22 + $0xb0] sm:$0xff]  ;;  %v4424_v8 = vld [vmem:[%s10624_s22 + $0xb8] sm:$0xff]  ;;  %v7141_v36 = vadd.f32 %v13838_v39, %v13790_v7 }
 0x4a8   : > { %v7217_v20 = vpop.f32.mrf.mxu1  ;;  %v7145_v7 = vadd.f32 %v13853_v41, %v13796_v18 }
 0x4a9   : > { %7391 = vst [vmem:[%s10624_s22 + $0x28] sm:$0xff] %v7295_v56  ;;  %v7300_v40 = vadd.f32 %v7216_v11, %v4411_v59  ;;  %v7218_v34 = vadd.f32 %v7217_v20, %v7105_v23  ;;  %v13863_v11 = vpop.f32.mrf.mxu0 }
 0x4aa   : > { %v7221_v19 = vpop.f32.mrf.mxu1  ;;  %v7149_v28 = vadd.f32 %v13863_v11, %v13800_v51 }
 0x4ab   : > { %7396 = vst [vmem:[%s10624_s22 + $0x50] sm:$0xff] %v7300_v40  ;;  %v7301_v45 = vadd.f32 %v7218_v34, %v4412_v63  ;;  %v7222_v60 = vadd.f32 %v7221_v19, %v7109_v44  ;;  %v4429_v63 = vld [vmem:[%s10624_s22 + $0xe0] sm:$0xff]  ;;  %v4430_v40 = vld [vmem:[%s10624_s22 + $0xe8] sm:$0xff]  ;;  %v13873_v19 = vpop.f32.mrf.mxu0 }
 0x4ac   : > { %v7223_v57 = vpop.f32.mrf.mxu1  ;;  %v7151_v18 = vadd.f32 %v13873_v19, %v13802_v21 }
 0x4ad   : > { %7397 = vst [vmem:[%s10624_s22 + $0x58] sm:$0xff] %v7301_v45  ;;  %v7306_v52 = vadd.f32 %v7222_v60, %v4417_v54  ;;  %v7224_v31 = vadd.f32 %v7223_v57, %v7111_v5  ;;  %v4435_v5 = vld [vmem:[%s10624_s22 + $0x110] sm:$0xff] }
 0x4ae   : > { %v7225_v27 = vpop.f32.mrf.mxu1 }
 0x4af   : > { %7402 = vst [vmem:[%s10624_s22 + $0x80] sm:$0xff] %v7306_v52  ;;  %v7307_v26 = vadd.f32 %v7224_v31, %v4418_v53  ;;  %v7226_v59 = vadd.f32 %v7225_v27, %v7113_v24  ;;  %v4436_v53 = vld [vmem:[%s10624_s22 + $0x118] sm:$0xff]  ;;  %v7152_v52 = vpop.f32.mrf.mxu0  ;;  %v4441_v31 = vld [vmem:[%s10624_s22 + $0x140] sm:$0xff] }
 0x4b0   : > { %v7227_v23 = vpop.f32.mrf.mxu1  ;;  %v7153_v51 = vadd.f32 %v7152_v52, %v13806_v42 }
 0x4b1   : > { %7403 = vst [vmem:[%s10624_s22 + $0x88] sm:$0xff] %v7307_v26  ;;  %v7312_v6 = vadd.f32 %v7226_v59, %v4423_v1  ;;  %v7228_v56 = vadd.f32 %v7227_v23, %v7115_v4  ;;  %v4442_v4 = vld [vmem:[%s10624_s22 + $0x148] sm:$0xff]  ;;  %v4447_v23 = vld [vmem:[%s10624_s22 + $0x170] sm:$0xff] }
 0x4b2   : > { %v7231_v20 = vpop.f32.mrf.mxu1 }
 0x4b3   : > { %7408 = vst [vmem:[%s10624_s22 + $0xb0] sm:$0xff] %v7312_v6  ;;  %v7313_v3 = vadd.f32 %v7228_v56, %v4424_v8  ;;  %v7232_v44 = vadd.f32 %v7231_v20, %v7119_v10  ;;  %v7154_v8 = vpop.f32.mrf.mxu0  ;;  %v4448_v56 = vld [vmem:[%s10624_s22 + $0x178] sm:$0xff] }
 0x4b4   : > { %v7233_v34 = vpop.f32.mrf.mxu1 }
 0x4b5   : > { %7409 = vst [vmem:[%s10624_s22 + $0xb8] sm:$0xff] %v7313_v3  ;;  %v7318_v49 = vadd.f32 %v7232_v44, %v4429_v63  ;;  %v7234_v54 = vadd.f32 %v7233_v34, %v7121_v2  ;;  %v7158_v2 = vpop.f32.mrf.mxu0  ;;  %v4453_v3 = vld [vmem:[%s10624_s22 + $0x1a0] sm:$0xff]  ;;  %v4454_v34 = vld [vmem:[%s10624_s22 + $0x1a8] sm:$0xff] }
 0x4b6   : > { %v7235_v45 = vpop.f32.mrf.mxu1 }
 0x4b7   : > { %7414 = vst [vmem:[%s10624_s22 + $0xe0] sm:$0xff] %v7318_v49  ;;  %v7319_v14 = vadd.f32 %v7234_v54, %v4430_v40  ;;  %v7236_v60 = vadd.f32 %v7235_v45, %v7123_v33  ;;  %v7160_v54 = vpop.f32.mrf.mxu0 }
 0x4b8   : > { %v7237_v57 = vpop.f32.mrf.mxu1 }
 0x4b9   : > { %7415 = vst [vmem:[%s10624_s22 + $0xe8] sm:$0xff] %v7319_v14  ;;  %v7324_v61 = vadd.f32 %v7236_v60, %v4435_v5  ;;  %v7238_v24 = vadd.f32 %v7237_v57, %v7125_v35  ;;  %v4459_v5 = vld [vmem:[%s10624_s22 + $0x1d0] sm:$0xff]  ;;  %v4460_v14 = vld [vmem:[%s10624_s22 + $0x1d8] sm:$0xff]  ;;  %v7162_v57 = vpop.f32.mrf.mxu0 }
 0x4ba   : > { %v7241_v1 = vpop.f32.mrf.mxu1 }
 0x4bb   : > { %7420 = vst [vmem:[%s10624_s22 + $0x110] sm:$0xff] %v7324_v61  ;;  %v7325_v0 = vadd.f32 %v7238_v24, %v4436_v53  ;;  %v7242_v27 = vadd.f32 %v7241_v1, %v7129_v55  ;;  %v4465_v55 = vld [vmem:[%s10624_s22 + $0x200] sm:$0xff] }
 0x4bc   : > { %v7243_v26 = vpop.f32.mrf.mxu1 }
 0x4bd   : > { %7421 = vst [vmem:[%s10624_s22 + $0x118] sm:$0xff] %v7325_v0  ;;  %v7330_v37 = vadd.f32 %v7242_v27, %v4441_v31  ;;  %v7244_v59 = vadd.f32 %v7243_v26, %v7131_v62  ;;  %v4466_v31 = vld [vmem:[%s10624_s22 + $0x208] sm:$0xff]  ;;  %v7164_v0 = vpop.f32.mrf.mxu0  ;;  %v4471_v27 = vld [vmem:[%s10624_s22 + $0x230] sm:$0xff]  ;;  %v7155_v26 = vadd.f32 %v7154_v8, %v13808_v43 }
 0x4be   : > { %v7245_v10 = vpop.f32.mrf.mxu1 }
 0x4bf   : > { %7426 = vst [vmem:[%s10624_s22 + $0x140] sm:$0xff] %v7330_v37  ;;  %v7331_v17 = vadd.f32 %v7244_v59, %v4442_v4  ;;  %v7246_v6 = vadd.f32 %v7245_v10, %v7133_v15  ;;  %v4472_v15 = vld [vmem:[%s10624_s22 + $0x238] sm:$0xff]  ;;  %v7159_v59 = vadd.f32 %v7158_v2, %v13812_v50  ;;  %v4477_v10 = vld [vmem:[%s10624_s22 + $0x260] sm:$0xff] }
 0x4c0   : > { %v7247_v63 = vpop.f32.mrf.mxu1 }
 0x4c1   : > { %7427 = vst [vmem:[%s10624_s22 + $0x148] sm:$0xff] %v7331_v17  ;;  %v7336_v58 = vadd.f32 %v7246_v6, %v4447_v23  ;;  %v7248_v20 = vadd.f32 %v7247_v63, %v7135_v16  ;;  %v7168_v23 = vpop.f32.mrf.mxu0  ;;  %v7161_v17 = vadd.f32 %v7160_v54, %v13814_v46  ;;  %v4478_v6 = vld [vmem:[%s10624_s22 + $0x268] sm:$0xff]  ;;  %v7163_v63 = vadd.f32 %v7162_v57, %v13818_v25 }
 0x4c2   : > { %v7251_v44 = vpop.f32.mrf.mxu1 }
 0x4c3   : > { %7432 = vst [vmem:[%s10624_s22 + $0x170] sm:$0xff] %v7336_v58  ;;  %v7337_v13 = vadd.f32 %v7248_v20, %v4448_v56  ;;  %v7252_v40 = vadd.f32 %v7251_v44, %v7139_v47  ;;  %v7170_v58 = vpop.f32.mrf.mxu0  ;;  %v4483_v20 = vld [vmem:[%s10624_s22 + $0x290] sm:$0xff] }
 0x4c4   : > { %v7253_v33 = vpop.f32.mrf.mxu1 }
 0x4c5   : > { %7433 = vst [vmem:[%s10624_s22 + $0x178] sm:$0xff] %v7337_v13  ;;  %v7342_v9 = vadd.f32 %v7252_v40, %v4453_v3  ;;  %v7254_v49 = vadd.f32 %v7253_v33, %v7141_v36  ;;  %v7165_v3 = vadd.f32 %v7164_v0, %v13820_v12  ;;  %v4484_v36 = vld [vmem:[%s10624_s22 + $0x298] sm:$0xff]  ;;  %v7169_v40 = vadd.f32 %v7168_v23, %v13824_v30  ;;  %v7172_v33 = vpop.f32.mrf.mxu0 }
 0x4c6   : > { %v7255_v45 = vpop.f32.mrf.mxu1 }
 0x4c7   : > { %7438 = vst [vmem:[%s10624_s22 + $0x1a0] sm:$0xff] %v7342_v9  ;;  %v7343_v39 = vadd.f32 %v7254_v49, %v4454_v34  ;;  %v7256_v35 = vadd.f32 %v7255_v45, %v7143_v29  ;;  %v4489_v29 = vld [vmem:[%s10624_s22 + $0x2c0] sm:$0xff]  ;;  %v7171_v49 = vadd.f32 %v7170_v58, %v13826_v48 }
 0x4c8   : > { %v7257_v60 = vpop.f32.mrf.mxu1 }
 0x4c9   : > { %7439 = vst [vmem:[%s10624_s22 + $0x1a8] sm:$0xff] %v7343_v39  ;;  %v7348_v38 = vadd.f32 %v7256_v35, %v4459_v5  ;;  %v7258_v53 = vadd.f32 %v7257_v60, %v7145_v7  ;;  %v4490_v5 = vld [vmem:[%s10624_s22 + $0x2c8] sm:$0xff]  ;;  %v7173_v7 = vadd.f32 %v7172_v33, %v13830_v22  ;;  %v7174_v35 = vpop.f32.mrf.mxu0 }
 0x4ca   : > { %v7261_v61 = vpop.f32.mrf.mxu1 }
 0x4cb   : > { %7444 = vst [vmem:[%s10624_s22 + $0x1d0] sm:$0xff] %v7348_v38  ;;  %v7349_v41 = vadd.f32 %v7258_v53, %v4460_v14  ;;  %v7262_v24 = vadd.f32 %v7261_v61, %v7149_v28  ;;  %v4495_v14 = vld [vmem:[%s10624_s22 + $0x2f0] sm:$0xff]  ;;  %v7175_v28 = vadd.f32 %v7174_v35, %v13832_v32  ;;  %v4496_v53 = vld [vmem:[%s10624_s22 + $0x2f8] sm:$0xff] }
 0x4cc   : > { %v7263_v1 = vpop.f32.mrf.mxu1 }
 0x4cd   : > { %7445 = vst [vmem:[%s10624_s22 + $0x1d8] sm:$0xff] %v7349_v41  ;;  %v7354_v11 = vadd.f32 %v7262_v24, %v4465_v55  ;;  %v7264_v62 = vadd.f32 %v7263_v1, %v7151_v18 }
 0x4ce   : > { %v7265_v4 = vpop.f32.mrf.mxu1 }
 0x4cf   : > { %7450 = vst [vmem:[%s10624_s22 + $0x200] sm:$0xff] %v7354_v11  ;;  %v7355_v21 = vadd.f32 %v7264_v62, %v4466_v31  ;;  %v7266_v19 = vadd.f32 %v7265_v4, %v7153_v51 }
 0x4d0   : > { %v7267_v37 = vpop.f32.mrf.mxu1 }
 0x4d1   : > { %7451 = vst [vmem:[%s10624_s22 + $0x208] sm:$0xff] %v7355_v21  ;;  %v7360_v42 = vadd.f32 %v7266_v19, %v4471_v27  ;;  %v7268_v52 = vadd.f32 %v7267_v37, %v7155_v26 }
 0x4d2   : > { %v7271_v16 = vpop.f32.mrf.mxu1 }
 0x4d3   : > { %7456 = vst [vmem:[%s10624_s22 + $0x230] sm:$0xff] %v7360_v42  ;;  %v7361_v43 = vadd.f32 %v7268_v52, %v4472_v15  ;;  %v7272_v8 = vadd.f32 %v7271_v16, %v7159_v59 }
 0x4d4   : > { %v7273_v56 = vpop.f32.mrf.mxu1 }
 0x4d5   : > { %7457 = vst [vmem:[%s10624_s22 + $0x238] sm:$0xff] %v7361_v43  ;;  %v7366_v50 = vadd.f32 %v7272_v8, %v4477_v10  ;;  %v7274_v47 = vadd.f32 %v7273_v56, %v7161_v17 }
 0x4d6   : > { %v7275_v2 = vpop.f32.mrf.mxu1 }
 0x4d7   : > { %7462 = vst [vmem:[%s10624_s22 + $0x260] sm:$0xff] %v7366_v50  ;;  %v7367_v46 = vadd.f32 %v7274_v47, %v4478_v6  ;;  %v7276_v44 = vadd.f32 %v7275_v2, %v7163_v63 }
 0x4d8   : > { %v7277_v13 = vpop.f32.mrf.mxu1 }
 0x4d9   : > { %7463 = vst [vmem:[%s10624_s22 + $0x268] sm:$0xff] %v7367_v46  ;;  %v7372_v25 = vadd.f32 %v7276_v44, %v4483_v20  ;;  %v7278_v34 = vadd.f32 %v7277_v13, %v7165_v3 }
 0x4da   : > { %v7281_v9 = vpop.f32.mrf.mxu1 }
 0x4db   : > { %7468 = vst [vmem:[%s10624_s22 + $0x290] sm:$0xff] %v7372_v25  ;;  %v7373_v12 = vadd.f32 %v7278_v34, %v4484_v36  ;;  %v7282_v54 = vadd.f32 %v7281_v9, %v7169_v40 }
 0x4dc   : > { %v7283_v45 = vpop.f32.mrf.mxu1 }
 0x4dd   : > { %7469 = vst [vmem:[%s10624_s22 + $0x298] sm:$0xff] %v7373_v12  ;;  %v7378_v30 = vadd.f32 %v7282_v54, %v4489_v29  ;;  %v7284_v39 = vadd.f32 %v7283_v45, %v7171_v49 }
 0x4de   : > { %v7285_v60 = vpop.f32.mrf.mxu1 }
 0x4df   : > { %7474 = vst [vmem:[%s10624_s22 + $0x2c0] sm:$0xff] %v7378_v30  ;;  %v7379_v48 = vadd.f32 %v7284_v39, %v4490_v5  ;;  %v7286_v38 = vadd.f32 %v7285_v60, %v7173_v7 }
 0x4e0   : > { %v7287_v57 = vpop.f32.mrf.mxu1 }
 0x4e1   : > { %7475 = vst [vmem:[%s10624_s22 + $0x2c8] sm:$0xff] %v7379_v48  ;;  %v7384_v55 = vadd.f32 %v7286_v38, %v4495_v14  ;;  %v7288_v61 = vadd.f32 %v7287_v57, %v7175_v28  ;;  %7485 = sbr.rel (%p8615_p7) target bundleno = 1335 (0x537), region = 71 }
 0x4e3   : > { %7480 = vst [vmem:[%s10624_s22 + $0x2f0] sm:$0xff] %v7384_v55  ;;  %v7385_v22 = vadd.f32 %v7288_v61, %v4496_v53 }
 0x4e5   : > { %7481 = vst [vmem:[%s10624_s22 + $0x2f8] sm:$0xff] %v7385_v22 }
 0x4e6   : > { %v7582_v32 = vld [vmem:[%s14437_s4] sm:$0x3f]  ;;  %v14939_v41 = vld [vmem:[#allocation113_spill] sm:$0xff]  ;;  %v7488_v26 = vld [vmem:[%s10624_s22 + $0x10] sm:$0xff] }
 0x4e7   : > { %v7486_v18 = vld [vmem:[%s10624_s22] sm:$0xff]  ;;  %v14940_v24 = vsub.s32 0, %v14939_v41  ;;  %v7487_v1 = vld [vmem:[%s10624_s22 + $0x8] sm:$0xff]  ;;  %v14941_v51 = vsub.s32 1, %v14939_v41  ;;  %v14942_v62 = vsub.s32 2, %v14939_v41  ;;  %v14943_v27 = vsub.s32 3, %v14939_v41 }
 0x4e8   : > { %v7489_v21 = vld [vmem:[%s10624_s22 + $0x18] sm:$0xff]  ;;  %v7490_v19 = vld [vmem:[%s10624_s22 + $0x20] sm:$0xff]  ;;  %v14944_v15 = vsub.s32 4, %v14939_v41  ;;  %v14945_v59 = vsub.s32 5, %v14939_v41  ;;  %v14949_v8 = vld [vmem:[#allocation14_spill] sm:$0xff] }
 0x4e9   : > { %v13960_v31 = vrot.slane %v7582_v32, %v14940_v24  ;;  %v13965_v11 = vrot.slane %v7582_v32, %v14941_v51  ;;  %v13969_v0 = vrot.slane %v7582_v32, %v14942_v62  ;;  %v13973_v4 = vrot.slane %v7582_v32, %v14943_v27  ;;  %v14946_v52 = vld [vmem:[#allocation16_spill] sm:$0xff]  ;;  %v7491_v56 = vld [vmem:[%s10624_s22 + $0x28] sm:$0xff]  ;;  %v7492_v63 = vld [vmem:[%s10624_s22 + $0x30] sm:$0xff] }
 0x4ea   : > { %v13980_v37 = vrot.slane %v7582_v32, %v14944_v15  ;;  %v13984_v42 = vrot.slane %v7582_v32, %v14945_v59  ;;  %v14947_v10 = vld [vmem:[#allocation12_spill] sm:$0xff]  ;;  %v7493_v50 = vld [vmem:[%s10624_s22 + $0x38] sm:$0xff]  ;;  %v14950_v47 = vld [vmem:[#allocation78_spill] sm:$0xff] }
 0x4eb   : > { %v7614_v23 = vadd.f32 %v13960_v31, %v14946_v52  ;;  %v7615_v16 = vadd.f32 %v13965_v11, %v14947_v10  ;;  %v14948_v17 = vld [vmem:[#allocation20_spill] sm:$0xff]  ;;  %v7617_v6 = vadd.f32 %v13973_v4, %v14949_v8  ;;  %v14951_v20 = vld [vmem:[#allocation75_spill] sm:$0xff]  ;;  %v14952_v3 = vld [vmem:[#allocation17_spill] sm:$0xff] }
 0x4ec   : > { %v7616_v43 = vadd.f32 %v13969_v0, %v14948_v17  ;;  %v7618_v58 = vadd.f32 %v13980_v37, %v14950_v47  ;;  %v7619_v2 = vadd.f32 %v13984_v42, %v14951_v20  ;;  %v7620_v46 = vadd.f32 %v13960_v31, %v14952_v3  ;;  %v14953_v44 = vld [vmem:[#allocation13_spill] sm:$0xff]  ;;  %v7494_v33 = vld [vmem:[%s10624_s22 + $0x40] sm:$0xff]  ;;  %v7496_v5 = vld [vmem:[%s10624_s22 + $0x50] sm:$0xff] }
 0x4ed   : > { %v7621_v36 = vadd.f32 %v13965_v11, %v14953_v44  ;;  %v7710_v13 = vadd.f32 %v7614_v23, %v7486_v18  ;;  %v7711_v40 = vadd.f32 %v7615_v16, %v7487_v1  ;;  %v7713_v34 = vadd.f32 %v7617_v6, %v7489_v21  ;;  %v7495_v29 = vld [vmem:[%s10624_s22 + $0x48] sm:$0xff]  ;;  %v7497_v45 = vld [vmem:[%s10624_s22 + $0x58] sm:$0xff]  ;;  %v7498_v7 = vld [vmem:[%s10624_s22 + $0x60] sm:$0xff] }
 0x4ee   : > { %v7712_v25 = vadd.f32 %v7616_v43, %v7488_v26  ;;  %v7714_v9 = vadd.f32 %v7618_v58, %v7490_v19  ;;  %v7715_v49 = vadd.f32 %v7619_v2, %v7491_v56  ;;  %v7716_v12 = vadd.f32 %v7620_v46, %v7492_v63  ;;  %v14954_v30 = vld [vmem:[#allocation21_spill] sm:$0xff]  ;;  %v14955_v35 = vld [vmem:[#allocation15_spill] sm:$0xff]  ;;  %v14957_v48 = vld [vmem:[#allocation76_spill] sm:$0xff] }
 0x4ef   : > { %v7717_v54 = vadd.f32 %v7621_v36, %v7493_v50  ;;  %7806 = vst [vmem:[%s10624_s22] sm:$0xff] %v7710_v13  ;;  %7807 = vst [vmem:[%s10624_s22 + $0x8] sm:$0xff] %v7711_v40  ;;  %v7622_v39 = vadd.f32 %v13969_v0, %v14954_v30  ;;  %v7623_v14 = vadd.f32 %v13973_v4, %v14955_v35  ;;  %v14956_v60 = vld [vmem:[#allocation79_spill] sm:$0xff]  ;;  %v7499_v53 = vld [vmem:[%s10624_s22 + $0x68] sm:$0xff] }
 0x4f0   : > { %7808 = vst [vmem:[%s10624_s22 + $0x10] sm:$0xff] %v7712_v25  ;;  %7809 = vst [vmem:[%s10624_s22 + $0x18] sm:$0xff] %v7713_v34  ;;  %v7624_v28 = vadd.f32 %v13980_v37, %v14956_v60  ;;  %v7625_v38 = vadd.f32 %v13984_v42, %v14957_v48  ;;  %v7500_v57 = vld [vmem:[%s10624_s22 + $0x70] sm:$0xff]  ;;  %v7501_v55 = vld [vmem:[%s10624_s22 + $0x78] sm:$0xff] }
 0x4f1   : > { %7810 = vst [vmem:[%s10624_s22 + $0x20] sm:$0xff] %v7714_v9  ;;  %7811 = vst [vmem:[%s10624_s22 + $0x28] sm:$0xff] %v7715_v49  ;;  %v14958_v61 = vld [vmem:[#allocation24_spill] sm:$0xff]  ;;  %v14959_v32 = vld [vmem:[#allocation18_spill] sm:$0xff]  ;;  %v7718_v62 = vadd.f32 %v7622_v39, %v7494_v33  ;;  %v7719_v27 = vadd.f32 %v7623_v14, %v7495_v29 }
 0x4f2   : > { %7812 = vst [vmem:[%s10624_s22 + $0x30] sm:$0xff] %v7716_v12  ;;  %7813 = vst [vmem:[%s10624_s22 + $0x38] sm:$0xff] %v7717_v54  ;;  %v7626_v22 = vadd.f32 %v13960_v31, %v14958_v61  ;;  %v7627_v18 = vadd.f32 %v13965_v11, %v14959_v32  ;;  %v14960_v41 = vld [vmem:[#allocation28_spill] sm:$0xff]  ;;  %v14961_v1 = vld [vmem:[#allocation22_spill] sm:$0xff]  ;;  %v7720_v26 = vadd.f32 %v7624_v28, %v7496_v5 }
 0x4f3   : > { %v7628_v24 = vadd.f32 %v13969_v0, %v14960_v41  ;;  %v7629_v51 = vadd.f32 %v13973_v4, %v14961_v1  ;;  %v7721_v21 = vadd.f32 %v7625_v38, %v7497_v45  ;;  %v7502_v19 = vld [vmem:[%s10624_s22 + $0x80] sm:$0xff]  ;;  %v7503_v15 = vld [vmem:[%s10624_s22 + $0x88] sm:$0xff]  ;;  %v7504_v16 = vld [vmem:[%s10624_s22 + $0x90] sm:$0xff]  ;;  %7814 = vst [vmem:[%s10624_s22 + $0x40] sm:$0xff] %v7718_v62 }
 0x4f4   : > { %v7722_v59 = vadd.f32 %v7626_v22, %v7498_v7  ;;  %v7723_v52 = vadd.f32 %v7627_v18, %v7499_v53  ;;  %v7505_v17 = vld [vmem:[%s10624_s22 + $0x98] sm:$0xff]  ;;  %v7506_v43 = vld [vmem:[%s10624_s22 + $0xa0] sm:$0xff]  ;;  %7815 = vst [vmem:[%s10624_s22 + $0x48] sm:$0xff] %v7719_v27  ;;  %7816 = vst [vmem:[%s10624_s22 + $0x50] sm:$0xff] %v7720_v26 }
 0x4f5   : > { %v7724_v23 = vadd.f32 %v7628_v24, %v7500_v57  ;;  %v7725_v10 = vadd.f32 %v7629_v51, %v7501_v55  ;;  %7817 = vst [vmem:[%s10624_s22 + $0x58] sm:$0xff] %v7721_v21  ;;  %v14962_v8 = vld [vmem:[#allocation82_spill] sm:$0xff]  ;;  %v14963_v56 = vld [vmem:[#allocation80_spill] sm:$0xff]  ;;  %v14964_v50 = vld [vmem:[#allocation25_spill] sm:$0xff] }
 0x4f6   : > { %v7630_v6 = vadd.f32 %v13980_v37, %v14962_v8  ;;  %v7631_v63 = vadd.f32 %v13984_v42, %v14963_v56  ;;  %v7632_v47 = vadd.f32 %v13960_v31, %v14964_v50  ;;  %v14965_v58 = vld [vmem:[#allocation19_spill] sm:$0xff]  ;;  %v7507_v2 = vld [vmem:[%s10624_s22 + $0xa8] sm:$0xff]  ;;  %v7508_v3 = vld [vmem:[%s10624_s22 + $0xb0] sm:$0xff]  ;;  %7818 = vst [vmem:[%s10624_s22 + $0x60] sm:$0xff] %v7722_v59 }
 0x4f7   : > { %v7633_v20 = vadd.f32 %v13965_v11, %v14965_v58  ;;  %v7509_v46 = vld [vmem:[%s10624_s22 + $0xb8] sm:$0xff]  ;;  %7819 = vst [vmem:[%s10624_s22 + $0x68] sm:$0xff] %v7723_v52  ;;  %7820 = vst [vmem:[%s10624_s22 + $0x70] sm:$0xff] %v7724_v23  ;;  %v14966_v44 = vld [vmem:[#allocation29_spill] sm:$0xff] }
 0x4f8   : > { %7821 = vst [vmem:[%s10624_s22 + $0x78] sm:$0xff] %v7725_v10  ;;  %v7634_v36 = vadd.f32 %v13969_v0, %v14966_v44  ;;  %v14967_v13 = vld [vmem:[#allocation23_spill] sm:$0xff]  ;;  %v14969_v33 = vld [vmem:[#allocation81_spill] sm:$0xff]  ;;  %v7726_v9 = vadd.f32 %v7630_v6, %v7502_v19  ;;  %v7727_v49 = vadd.f32 %v7631_v63, %v7503_v15  ;;  %v7728_v12 = vadd.f32 %v7632_v47, %v7504_v16  ;;  %v7510_v5 = vld [vmem:[%s10624_s22 + $0xc0] sm:$0xff] }
 0x4f9   : > { %v7635_v40 = vadd.f32 %v13973_v4, %v14967_v13  ;;  %v14968_v25 = vld [vmem:[#allocation83_spill] sm:$0xff]  ;;  %v7637_v29 = vadd.f32 %v13984_v42, %v14969_v33  ;;  %v7729_v54 = vadd.f32 %v7633_v20, %v7505_v17  ;;  %v7511_v45 = vld [vmem:[%s10624_s22 + $0xc8] sm:$0xff]  ;;  %v7512_v14 = vld [vmem:[%s10624_s22 + $0xd0] sm:$0xff] }
 0x4fa   : > { %v7636_v34 = vadd.f32 %v13980_v37, %v14968_v25  ;;  %v7730_v7 = vadd.f32 %v7634_v36, %v7506_v43  ;;  %v7513_v60 = vld [vmem:[%s10624_s22 + $0xd8] sm:$0xff]  ;;  %v7514_v28 = vld [vmem:[%s10624_s22 + $0xe0] sm:$0xff]  ;;  %7822 = vst [vmem:[%s10624_s22 + $0x80] sm:$0xff] %v7726_v9  ;;  %7823 = vst [vmem:[%s10624_s22 + $0x88] sm:$0xff] %v7727_v49 }
 0x4fb   : > { %v7731_v30 = vadd.f32 %v7635_v40, %v7507_v2  ;;  %v7733_v35 = vadd.f32 %v7637_v29, %v7509_v46  ;;  %7824 = vst [vmem:[%s10624_s22 + $0x90] sm:$0xff] %v7728_v12  ;;  %7825 = vst [vmem:[%s10624_s22 + $0x98] sm:$0xff] %v7729_v54  ;;  %v14970_v48 = vld [vmem:[#allocation32_spill] sm:$0xff]  ;;  %v14971_v53 = vld [vmem:[#allocation26_spill] sm:$0xff] }
 0x4fc   : > { %v7732_v39 = vadd.f32 %v7636_v34, %v7508_v3  ;;  %v7638_v38 = vadd.f32 %v13960_v31, %v14970_v48  ;;  %v7639_v57 = vadd.f32 %v13965_v11, %v14971_v53  ;;  %v14972_v55 = vld [vmem:[#allocation36_spill] sm:$0xff]  ;;  %v14973_v22 = vld [vmem:[#allocation30_spill] sm:$0xff]  ;;  %v7515_v18 = vld [vmem:[%s10624_s22 + $0xe8] sm:$0xff]  ;;  %7826 = vst [vmem:[%s10624_s22 + $0xa0] sm:$0xff] %v7730_v7 }
 0x4fd   : > { %v7640_v61 = vadd.f32 %v13969_v0, %v14972_v55  ;;  %v7641_v32 = vadd.f32 %v13973_v4, %v14973_v22  ;;  %v7516_v41 = vld [vmem:[%s10624_s22 + $0xf0] sm:$0xff]  ;;  %v7517_v24 = vld [vmem:[%s10624_s22 + $0xf8] sm:$0xff]  ;;  %7827 = vst [vmem:[%s10624_s22 + $0xa8] sm:$0xff] %v7731_v30  ;;  %7829 = vst [vmem:[%s10624_s22 + $0xb8] sm:$0xff] %v7733_v35 }
 0x4fe   : > { %7828 = vst [vmem:[%s10624_s22 + $0xb0] sm:$0xff] %v7732_v39  ;;  %v14974_v1 = vld [vmem:[#allocation86_spill] sm:$0xff]  ;;  %v14975_v62 = vld [vmem:[#allocation84_spill] sm:$0xff]  ;;  %v14976_v26 = vld [vmem:[#allocation33_spill] sm:$0xff]  ;;  %v7734_v59 = vadd.f32 %v7638_v38, %v7510_v5  ;;  %v7735_v52 = vadd.f32 %v7639_v57, %v7511_v45 }
 0x4ff   : > { %v7642_v51 = vadd.f32 %v13980_v37, %v14974_v1  ;;  %v7643_v27 = vadd.f32 %v13984_v42, %v14975_v62  ;;  %v7644_v21 = vadd.f32 %v13960_v31, %v14976_v26  ;;  %v14977_v19 = vld [vmem:[#allocation27_spill] sm:$0xff]  ;;  %v7736_v23 = vadd.f32 %v7640_v61, %v7512_v14  ;;  %v7518_v16 = vld [vmem:[%s10624_s22 + $0x100] sm:$0xff]  ;;  %v7519_v17 = vld [vmem:[%s10624_s22 + $0x108] sm:$0xff] }
 0x500   : > { %v7645_v15 = vadd.f32 %v13965_v11, %v14977_v19  ;;  %v7737_v10 = vadd.f32 %v7641_v32, %v7513_v60  ;;  %v7520_v63 = vld [vmem:[%s10624_s22 + $0x110] sm:$0xff]  ;;  %v7521_v50 = vld [vmem:[%s10624_s22 + $0x118] sm:$0xff]  ;;  %v7522_v47 = vld [vmem:[%s10624_s22 + $0x120] sm:$0xff]  ;;  %7830 = vst [vmem:[%s10624_s22 + $0xc0] sm:$0xff] %v7734_v59 }
 0x501   : > { %v7738_v43 = vadd.f32 %v7642_v51, %v7514_v28  ;;  %v7739_v8 = vadd.f32 %v7643_v27, %v7515_v18  ;;  %v7740_v6 = vadd.f32 %v7644_v21, %v7516_v41  ;;  %7831 = vst [vmem:[%s10624_s22 + $0xc8] sm:$0xff] %v7735_v52  ;;  %7832 = vst [vmem:[%s10624_s22 + $0xd0] sm:$0xff] %v7736_v23  ;;  %v14978_v58 = vld [vmem:[#allocation37_spill] sm:$0xff]  ;;  %v14979_v2 = vld [vmem:[#allocation31_spill] sm:$0xff] }
 0x502   : > { %v7741_v56 = vadd.f32 %v7645_v15, %v7517_v24  ;;  %7833 = vst [vmem:[%s10624_s22 + $0xd8] sm:$0xff] %v7737_v10  ;;  %v7646_v20 = vadd.f32 %v13969_v0, %v14978_v58  ;;  %v7647_v3 = vadd.f32 %v13973_v4, %v14979_v2  ;;  %v14980_v46 = vld [vmem:[#allocation87_spill] sm:$0xff]  ;;  %v14981_v36 = vld [vmem:[#allocation85_spill] sm:$0xff]  ;;  %v7524_v25 = vld [vmem:[%s10624_s22 + $0x130] sm:$0xff] }
 0x503   : > { %v7648_v44 = vadd.f32 %v13980_v37, %v14980_v46  ;;  %v7649_v13 = vadd.f32 %v13984_v42, %v14981_v36  ;;  %v7523_v40 = vld [vmem:[%s10624_s22 + $0x128] sm:$0xff]  ;;  %v7525_v34 = vld [vmem:[%s10624_s22 + $0x138] sm:$0xff]  ;;  %7834 = vst [vmem:[%s10624_s22 + $0xe0] sm:$0xff] %v7738_v43  ;;  %7835 = vst [vmem:[%s10624_s22 + $0xe8] sm:$0xff] %v7739_v8 }
 0x504   : > { %7836 = vst [vmem:[%s10624_s22 + $0xf0] sm:$0xff] %v7740_v6  ;;  %7837 = vst [vmem:[%s10624_s22 + $0xf8] sm:$0xff] %v7741_v56  ;;  %v14982_v33 = vld [vmem:[#allocation40_spill] sm:$0xff]  ;;  %v14983_v9 = vld [vmem:[#allocation34_spill] sm:$0xff]  ;;  %v7742_v7 = vadd.f32 %v7646_v20, %v7518_v16  ;;  %v7743_v30 = vadd.f32 %v7647_v3, %v7519_v17 }
 0x505   : > { %v7650_v29 = vadd.f32 %v13960_v31, %v14982_v33  ;;  %v7651_v49 = vadd.f32 %v13965_v11, %v14983_v9  ;;  %v14984_v12 = vld [vmem:[#allocation44_spill] sm:$0xff]  ;;  %v14985_v5 = vld [vmem:[#allocation38_spill] sm:$0xff]  ;;  %v7744_v39 = vadd.f32 %v7648_v44, %v7520_v63  ;;  %v7745_v35 = vadd.f32 %v7649_v13, %v7521_v50  ;;  %v7527_v60 = vld [vmem:[%s10624_s22 + $0x148] sm:$0xff] }
 0x506   : > { %v7652_v54 = vadd.f32 %v13969_v0, %v14984_v12  ;;  %v7653_v45 = vadd.f32 %v13973_v4, %v14985_v5  ;;  %v7526_v14 = vld [vmem:[%s10624_s22 + $0x140] sm:$0xff]  ;;  %v7528_v57 = vld [vmem:[%s10624_s22 + $0x150] sm:$0xff]  ;;  %v7529_v55 = vld [vmem:[%s10624_s22 + $0x158] sm:$0xff]  ;;  %7838 = vst [vmem:[%s10624_s22 + $0x100] sm:$0xff] %v7742_v7 }
 0x507   : > { %v7746_v28 = vadd.f32 %v7650_v29, %v7522_v47  ;;  %v7747_v48 = vadd.f32 %v7651_v49, %v7523_v40  ;;  %v7530_v61 = vld [vmem:[%s10624_s22 + $0x160] sm:$0xff]  ;;  %7839 = vst [vmem:[%s10624_s22 + $0x108] sm:$0xff] %v7743_v30  ;;  %7840 = vst [vmem:[%s10624_s22 + $0x110] sm:$0xff] %v7744_v39  ;;  %v14986_v22 = vld [vmem:[#allocation90_spill] sm:$0xff] }
 0x508   : > { %v7748_v38 = vadd.f32 %v7652_v54, %v7524_v25  ;;  %v7749_v53 = vadd.f32 %v7653_v45, %v7525_v34  ;;  %7841 = vst [vmem:[%s10624_s22 + $0x118] sm:$0xff] %v7745_v35  ;;  %v7654_v32 = vadd.f32 %v13980_v37, %v14986_v22  ;;  %v14987_v18 = vld [vmem:[#allocation88_spill] sm:$0xff]  ;;  %v14988_v24 = vld [vmem:[#allocation41_spill] sm:$0xff]  ;;  %v14989_v51 = vld [vmem:[#allocation35_spill] sm:$0xff] }
 0x509   : > { %v7655_v41 = vadd.f32 %v13984_v42, %v14987_v18  ;;  %v7656_v1 = vadd.f32 %v13960_v31, %v14988_v24  ;;  %v7657_v62 = vadd.f32 %v13965_v11, %v14989_v51  ;;  %v7531_v27 = vld [vmem:[%s10624_s22 + $0x168] sm:$0xff]  ;;  %v7532_v26 = vld [vmem:[%s10624_s22 + $0x170] sm:$0xff]  ;;  %v7533_v21 = vld [vmem:[%s10624_s22 + $0x178] sm:$0xff]  ;;  %7842 = vst [vmem:[%s10624_s22 + $0x120] sm:$0xff] %v7746_v28 }
 0x50a   : > { %7843 = vst [vmem:[%s10624_s22 + $0x128] sm:$0xff] %v7747_v48  ;;  %7844 = vst [vmem:[%s10624_s22 + $0x130] sm:$0xff] %v7748_v38  ;;  %v14990_v19 = vld [vmem:[#allocation45_spill] sm:$0xff]  ;;  %v14991_v59 = vld [vmem:[#allocation39_spill] sm:$0xff]  ;;  %v7750_v43 = vadd.f32 %v7654_v32, %v7526_v14 }
 0x50b   : > { %7845 = vst [vmem:[%s10624_s22 + $0x138] sm:$0xff] %v7749_v53  ;;  %v7658_v15 = vadd.f32 %v13969_v0, %v14990_v19  ;;  %v7659_v52 = vadd.f32 %v13973_v4, %v14991_v59  ;;  %v14992_v23 = vld [vmem:[#allocation91_spill] sm:$0xff]  ;;  %v14993_v16 = vld [vmem:[#allocation89_spill] sm:$0xff]  ;;  %v7751_v8 = vadd.f32 %v7655_v41, %v7527_v60  ;;  %v7752_v6 = vadd.f32 %v7656_v1, %v7528_v57  ;;  %v7534_v63 = vld [vmem:[%s10624_s22 + $0x180] sm:$0xff] }
 0x50c   : > { %v7660_v10 = vadd.f32 %v13980_v37, %v14992_v23  ;;  %v7661_v17 = vadd.f32 %v13984_v42, %v14993_v16  ;;  %v7753_v56 = vadd.f32 %v7657_v62, %v7529_v55  ;;  %v7535_v50 = vld [vmem:[%s10624_s22 + $0x188] sm:$0xff]  ;;  %v7536_v3 = vld [vmem:[%s10624_s22 + $0x190] sm:$0xff]  ;;  %v7537_v46 = vld [vmem:[%s10624_s22 + $0x198] sm:$0xff]  ;;  %7846 = vst [vmem:[%s10624_s22 + $0x140] sm:$0xff] %v7750_v43 }
 0x50d   : > { %v7754_v47 = vadd.f32 %v7658_v15, %v7530_v61  ;;  %v7755_v58 = vadd.f32 %v7659_v52, %v7531_v27  ;;  %v7538_v44 = vld [vmem:[%s10624_s22 + $0x1a0] sm:$0xff]  ;;  %7847 = vst [vmem:[%s10624_s22 + $0x148] sm:$0xff] %v7751_v8  ;;  %7848 = vst [vmem:[%s10624_s22 + $0x150] sm:$0xff] %v7752_v6  ;;  %v14995_v40 = vld [vmem:[#allocation42_spill] sm:$0xff] }
 0x50e   : > { %v7756_v20 = vadd.f32 %v7660_v10, %v7532_v26  ;;  %v7757_v2 = vadd.f32 %v7661_v17, %v7533_v21  ;;  %7849 = vst [vmem:[%s10624_s22 + $0x158] sm:$0xff] %v7753_v56  ;;  %v14994_v36 = vld [vmem:[#allocation48_spill] sm:$0xff]  ;;  %v7663_v25 = vadd.f32 %v13965_v11, %v14995_v40  ;;  %v14997_v29 = vld [vmem:[#allocation46_spill] sm:$0xff]  ;;  %v7539_v49 = vld [vmem:[%s10624_s22 + $0x1a8] sm:$0xff] }
 0x50f   : > { %v7662_v13 = vadd.f32 %v13960_v31, %v14994_v36  ;;  %v14996_v34 = vld [vmem:[#allocation52_spill] sm:$0xff]  ;;  %v7665_v9 = vadd.f32 %v13973_v4, %v14997_v29  ;;  %v7540_v12 = vld [vmem:[%s10624_s22 + $0x1b0] sm:$0xff]  ;;  %v7541_v54 = vld [vmem:[%s10624_s22 + $0x1b8] sm:$0xff]  ;;  %7850 = vst [vmem:[%s10624_s22 + $0x160] sm:$0xff] %v7754_v47 }
 0x510   : > { %v7664_v33 = vadd.f32 %v13969_v0, %v14996_v34  ;;  %7851 = vst [vmem:[%s10624_s22 + $0x168] sm:$0xff] %v7755_v58  ;;  %7852 = vst [vmem:[%s10624_s22 + $0x170] sm:$0xff] %v7756_v20  ;;  %v14998_v5 = vld [vmem:[#allocation94_spill] sm:$0xff]  ;;  %v14999_v7 = vld [vmem:[#allocation92_spill] sm:$0xff]  ;;  %v7759_v48 = vadd.f32 %v7663_v25, %v7535_v50 }
 0x511   : > { %7853 = vst [vmem:[%s10624_s22 + $0x178] sm:$0xff] %v7757_v2  ;;  %v7666_v45 = vadd.f32 %v13980_v37, %v14998_v5  ;;  %v7667_v30 = vadd.f32 %v13984_v42, %v14999_v7  ;;  %v15000_v39 = vld [vmem:[#allocation49_spill] sm:$0xff]  ;;  %v15001_v14 = vld [vmem:[#allocation43_spill] sm:$0xff]  ;;  %v7758_v28 = vadd.f32 %v7662_v13, %v7534_v63  ;;  %v7761_v53 = vadd.f32 %v7665_v9, %v7537_v46  ;;  %v7542_v57 = vld [vmem:[%s10624_s22 + $0x1c0] sm:$0xff] }
 0x512   : > { %v7668_v35 = vadd.f32 %v13960_v31, %v15000_v39  ;;  %v7669_v60 = vadd.f32 %v13965_v11, %v15001_v14  ;;  %v7760_v38 = vadd.f32 %v7664_v33, %v7536_v3  ;;  %v7543_v55 = vld [vmem:[%s10624_s22 + $0x1c8] sm:$0xff]  ;;  %v7544_v41 = vld [vmem:[%s10624_s22 + $0x1d0] sm:$0xff]  ;;  %v7545_v24 = vld [vmem:[%s10624_s22 + $0x1d8] sm:$0xff]  ;;  %7855 = vst [vmem:[%s10624_s22 + $0x188] sm:$0xff] %v7759_v48 }
 0x513   : > { %v7762_v61 = vadd.f32 %v7666_v45, %v7538_v44  ;;  %v7763_v22 = vadd.f32 %v7667_v30, %v7539_v49  ;;  %v7546_v1 = vld [vmem:[%s10624_s22 + $0x1e0] sm:$0xff]  ;;  %7854 = vst [vmem:[%s10624_s22 + $0x180] sm:$0xff] %v7758_v28  ;;  %7857 = vst [vmem:[%s10624_s22 + $0x198] sm:$0xff] %v7761_v53  ;;  %v15002_v51 = vld [vmem:[#allocation53_spill] sm:$0xff] }
 0x514   : > { %v7764_v32 = vadd.f32 %v7668_v35, %v7540_v12  ;;  %v7765_v18 = vadd.f32 %v7669_v60, %v7541_v54  ;;  %7856 = vst [vmem:[%s10624_s22 + $0x190] sm:$0xff] %v7760_v38  ;;  %v7670_v62 = vadd.f32 %v13969_v0, %v15002_v51  ;;  %v15003_v27 = vld [vmem:[#allocation47_spill] sm:$0xff]  ;;  %v15005_v15 = vld [vmem:[#allocation93_spill] sm:$0xff]  ;;  %v7548_v23 = vld [vmem:[%s10624_s22 + $0x1f0] sm:$0xff] }
 0x515   : > { %v7671_v26 = vadd.f32 %v13973_v4, %v15003_v27  ;;  %v15004_v21 = vld [vmem:[#allocation95_spill] sm:$0xff]  ;;  %v7673_v59 = vadd.f32 %v13984_v42, %v15005_v15  ;;  %v7547_v52 = vld [vmem:[%s10624_s22 + $0x1e8] sm:$0xff]  ;;  %7858 = vst [vmem:[%s10624_s22 + $0x1a0] sm:$0xff] %v7762_v61  ;;  %7859 = vst [vmem:[%s10624_s22 + $0x1a8] sm:$0xff] %v7763_v22 }
 0x516   : > { %v7672_v19 = vadd.f32 %v13980_v37, %v15004_v21  ;;  %v7549_v10 = vld [vmem:[%s10624_s22 + $0x1f8] sm:$0xff]  ;;  %7860 = vst [vmem:[%s10624_s22 + $0x1b0] sm:$0xff] %v7764_v32  ;;  %7861 = vst [vmem:[%s10624_s22 + $0x1b8] sm:$0xff] %v7765_v18  ;;  %v15006_v16 = vld [vmem:[#allocation56_spill] sm:$0xff]  ;;  %v7766_v47 = vadd.f32 %v7670_v62, %v7542_v57 }
 0x517   : > { %v7674_v17 = vadd.f32 %v13960_v31, %v15006_v16  ;;  %v15007_v43 = vld [vmem:[#allocation50_spill] sm:$0xff]  ;;  %v15008_v6 = vld [vmem:[#allocation60_spill] sm:$0xff]  ;;  %v7767_v58 = vadd.f32 %v7671_v26, %v7543_v55  ;;  %v7769_v2 = vadd.f32 %v7673_v59, %v7545_v24  ;;  %v7551_v46 = vld [vmem:[%s10624_s22 + $0x208] sm:$0xff] }
 0x518   : > { %v7675_v8 = vadd.f32 %v13965_v11, %v15007_v43  ;;  %v7676_v56 = vadd.f32 %v13969_v0, %v15008_v6  ;;  %v15009_v63 = vld [vmem:[#allocation54_spill] sm:$0xff]  ;;  %v7768_v20 = vadd.f32 %v7672_v19, %v7544_v41  ;;  %v7550_v3 = vld [vmem:[%s10624_s22 + $0x200] sm:$0xff]  ;;  %v7553_v34 = vld [vmem:[%s10624_s22 + $0x218] sm:$0xff]  ;;  %7862 = vst [vmem:[%s10624_s22 + $0x1c0] sm:$0xff] %v7766_v47 }
 0x519   : > { %v7677_v50 = vadd.f32 %v13973_v4, %v15009_v63  ;;  %v7770_v44 = vadd.f32 %v7674_v17, %v7546_v1  ;;  %v7552_v25 = vld [vmem:[%s10624_s22 + $0x210] sm:$0xff]  ;;  %v7554_v33 = vld [vmem:[%s10624_s22 + $0x220] sm:$0xff]  ;;  %7863 = vst [vmem:[%s10624_s22 + $0x1c8] sm:$0xff] %v7767_v58  ;;  %7865 = vst [vmem:[%s10624_s22 + $0x1d8] sm:$0xff] %v7769_v2 }
 0x51a   : > { %v7771_v36 = vadd.f32 %v7675_v8, %v7547_v52  ;;  %v7772_v13 = vadd.f32 %v7676_v56, %v7548_v23  ;;  %7864 = vst [vmem:[%s10624_s22 + $0x1d0] sm:$0xff] %v7768_v20  ;;  %v15010_v29 = vld [vmem:[#allocation98_spill] sm:$0xff]  ;;  %v15011_v49 = vld [vmem:[#allocation96_spill] sm:$0xff]  ;;  %v15012_v54 = vld [vmem:[#allocation57_spill] sm:$0xff] }
 0x51b   : > { %v7773_v40 = vadd.f32 %v7677_v50, %v7549_v10  ;;  %v7678_v9 = vadd.f32 %v13980_v37, %v15010_v29  ;;  %v7679_v12 = vadd.f32 %v13984_v42, %v15011_v49  ;;  %v7680_v5 = vadd.f32 %v13960_v31, %v15012_v54  ;;  %v15013_v45 = vld [vmem:[#allocation51_spill] sm:$0xff]  ;;  %v7555_v30 = vld [vmem:[%s10624_s22 + $0x228] sm:$0xff]  ;;  %v7556_v39 = vld [vmem:[%s10624_s22 + $0x230] sm:$0xff]  ;;  %7866 = vst [vmem:[%s10624_s22 + $0x1e0] sm:$0xff] %v7770_v44 }
 0x51c   : > { %v7681_v7 = vadd.f32 %v13965_v11, %v15013_v45  ;;  %v7557_v35 = vld [vmem:[%s10624_s22 + $0x238] sm:$0xff]  ;;  %7867 = vst [vmem:[%s10624_s22 + $0x1e8] sm:$0xff] %v7771_v36  ;;  %7868 = vst [vmem:[%s10624_s22 + $0x1f0] sm:$0xff] %v7772_v13  ;;  %v15014_v14 = vld [vmem:[#allocation61_spill] sm:$0xff] }
 0x51d   : > { %7869 = vst [vmem:[%s10624_s22 + $0x1f8] sm:$0xff] %v7773_v40  ;;  %v7682_v60 = vadd.f32 %v13969_v0, %v15014_v14  ;;  %v15015_v28 = vld [vmem:[#allocation55_spill] sm:$0xff]  ;;  %v15017_v57 = vld [vmem:[#allocation97_spill] sm:$0xff]  ;;  %v7774_v61 = vadd.f32 %v7678_v9, %v7550_v3  ;;  %v7775_v22 = vadd.f32 %v7679_v12, %v7551_v46  ;;  %v7776_v32 = vadd.f32 %v7680_v5, %v7552_v25  ;;  %v7558_v41 = vld [vmem:[%s10624_s22 + $0x240] sm:$0xff] }
 0x51e   : > { %v7683_v48 = vadd.f32 %v13973_v4, %v15015_v28  ;;  %v15016_v38 = vld [vmem:[#allocation99_spill] sm:$0xff]  ;;  %v7685_v55 = vadd.f32 %v13984_v42, %v15017_v57  ;;  %v7777_v18 = vadd.f32 %v7681_v7, %v7553_v34  ;;  %v7559_v24 = vld [vmem:[%s10624_s22 + $0x248] sm:$0xff]  ;;  %v7560_v26 = vld [vmem:[%s10624_s22 + $0x250] sm:$0xff] }
 0x51f   : > { %v7684_v53 = vadd.f32 %v13980_v37, %v15016_v38  ;;  %v7778_v1 = vadd.f32 %v7682_v60, %v7554_v33  ;;  %v7561_v21 = vld [vmem:[%s10624_s22 + $0x258] sm:$0xff]  ;;  %v7562_v19 = vld [vmem:[%s10624_s22 + $0x260] sm:$0xff]  ;;  %7870 = vst [vmem:[%s10624_s22 + $0x200] sm:$0xff] %v7774_v61  ;;  %7871 = vst [vmem:[%s10624_s22 + $0x208] sm:$0xff] %v7775_v22 }
 0x520   : > { %v7779_v51 = vadd.f32 %v7683_v48, %v7555_v30  ;;  %v7781_v27 = vadd.f32 %v7685_v55, %v7557_v35  ;;  %7872 = vst [vmem:[%s10624_s22 + $0x210] sm:$0xff] %v7776_v32  ;;  %7873 = vst [vmem:[%s10624_s22 + $0x218] sm:$0xff] %v7777_v18  ;;  %v15018_v15 = vld [vmem:[#allocation64_spill] sm:$0xff]  ;;  %v15019_v52 = vld [vmem:[#allocation58_spill] sm:$0xff] }
 0x521   : > { %v7780_v62 = vadd.f32 %v7684_v53, %v7556_v39  ;;  %v7686_v59 = vadd.f32 %v13960_v31, %v15018_v15  ;;  %v7687_v23 = vadd.f32 %v13965_v11, %v15019_v52  ;;  %v15020_v10 = vld [vmem:[#allocation66_spill] sm:$0xff]  ;;  %v7563_v8 = vld [vmem:[%s10624_s22 + $0x268] sm:$0xff]  ;;  %v7565_v56 = vld [vmem:[%s10624_s22 + $0x278] sm:$0xff]  ;;  %7874 = vst [vmem:[%s10624_s22 + $0x220] sm:$0xff] %v7778_v1 }
 0x522   : > { %v7688_v16 = vadd.f32 %v13969_v0, %v15020_v10  ;;  %v15021_v17 = vld [vmem:[#allocation62_spill] sm:$0xff]  ;;  %7875 = vst [vmem:[%s10624_s22 + $0x228] sm:$0xff] %v7779_v51  ;;  %7877 = vst [vmem:[%s10624_s22 + $0x238] sm:$0xff] %v7781_v27  ;;  %v15022_v63 = vld [vmem:[#allocation104_spill] sm:$0xff] }
 0x523   : > { %v7689_v43 = vadd.f32 %v13973_v4, %v15021_v17  ;;  %v7564_v6 = vld [vmem:[%s10624_s22 + $0x270] sm:$0xff]  ;;  %7876 = vst [vmem:[%s10624_s22 + $0x230] sm:$0xff] %v7780_v62  ;;  %v7690_v50 = vadd.f32 %v13980_v37, %v15022_v63  ;;  %v15023_v47 = vld [vmem:[#allocation100_spill] sm:$0xff]  ;;  %v15024_v20 = vld [vmem:[#allocation65_spill] sm:$0xff]  ;;  %v7782_v44 = vadd.f32 %v7686_v59, %v7558_v41  ;;  %v7783_v36 = vadd.f32 %v7687_v23, %v7559_v24 }
 0x524   : > { %v7691_v58 = vadd.f32 %v13984_v42, %v15023_v47  ;;  %v7692_v2 = vadd.f32 %v13960_v31, %v15024_v20  ;;  %v15025_v3 = vld [vmem:[#allocation59_spill] sm:$0xff]  ;;  %v7784_v13 = vadd.f32 %v7688_v16, %v7560_v26  ;;  %v7566_v25 = vld [vmem:[%s10624_s22 + $0x280] sm:$0xff]  ;;  %v7567_v34 = vld [vmem:[%s10624_s22 + $0x288] sm:$0xff] }
 0x525   : > { %v7693_v46 = vadd.f32 %v13965_v11, %v15025_v3  ;;  %v7785_v40 = vadd.f32 %v7689_v43, %v7561_v21  ;;  %v7786_v33 = vadd.f32 %v7690_v50, %v7562_v19  ;;  %v7568_v12 = vld [vmem:[%s10624_s22 + $0x290] sm:$0xff]  ;;  %v7569_v54 = vld [vmem:[%s10624_s22 + $0x298] sm:$0xff]  ;;  %v7570_v5 = vld [vmem:[%s10624_s22 + $0x2a0] sm:$0xff]  ;;  %7878 = vst [vmem:[%s10624_s22 + $0x240] sm:$0xff] %v7782_v44 }
 0x526   : > { %v7787_v29 = vadd.f32 %v7691_v58, %v7563_v8  ;;  %v7788_v9 = vadd.f32 %v7692_v2, %v7564_v6  ;;  %7879 = vst [vmem:[%s10624_s22 + $0x248] sm:$0xff] %v7783_v36  ;;  %7880 = vst [vmem:[%s10624_s22 + $0x250] sm:$0xff] %v7784_v13  ;;  %v15026_v45 = vld [vmem:[#allocation67_spill] sm:$0xff]  ;;  %v15028_v35 = vld [vmem:[#allocation105_spill] sm:$0xff] }
 0x527   : > { %v7789_v49 = vadd.f32 %v7693_v46, %v7565_v56  ;;  %7881 = vst [vmem:[%s10624_s22 + $0x258] sm:$0xff] %v7785_v40  ;;  %v7694_v7 = vadd.f32 %v13969_v0, %v15026_v45  ;;  %v15027_v30 = vld [vmem:[#allocation63_spill] sm:$0xff]  ;;  %v7696_v14 = vadd.f32 %v13980_v37, %v15028_v35  ;;  %v15029_v60 = vld [vmem:[#allocation101_spill] sm:$0xff]  ;;  %v7572_v38 = vld [vmem:[%s10624_s22 + $0x2b0] sm:$0xff] }
 0x528   : > { %v7695_v39 = vadd.f32 %v13973_v4, %v15027_v30  ;;  %v7697_v28 = vadd.f32 %v13984_v42, %v15029_v60  ;;  %v7571_v48 = vld [vmem:[%s10624_s22 + $0x2a8] sm:$0xff]  ;;  %v7573_v53 = vld [vmem:[%s10624_s22 + $0x2b8] sm:$0xff]  ;;  %7882 = vst [vmem:[%s10624_s22 + $0x260] sm:$0xff] %v7786_v33  ;;  %7883 = vst [vmem:[%s10624_s22 + $0x268] sm:$0xff] %v7787_v29 }
 0x529   : > { %7884 = vst [vmem:[%s10624_s22 + $0x270] sm:$0xff] %v7788_v9  ;;  %7885 = vst [vmem:[%s10624_s22 + $0x278] sm:$0xff] %v7789_v49  ;;  %v15030_v57 = vld [vmem:[#allocation72_spill] sm:$0xff]  ;;  %v15032_v32 = vld [vmem:[#allocation74_spill] sm:$0xff]  ;;  %v7790_v1 = vadd.f32 %v7694_v7, %v7566_v25  ;;  %v7792_v62 = vadd.f32 %v7696_v14, %v7568_v12 }
 0x52a   : > { %v7698_v55 = vadd.f32 %v13960_v31, %v15030_v57  ;;  %v15031_v61 = vld [vmem:[#allocation68_spill] sm:$0xff]  ;;  %v7700_v18 = vadd.f32 %v13969_v0, %v15032_v32  ;;  %v15033_v41 = vld [vmem:[#allocation70_spill] sm:$0xff]  ;;  %v7791_v51 = vadd.f32 %v7695_v39, %v7567_v34  ;;  %v7793_v27 = vadd.f32 %v7697_v28, %v7569_v54  ;;  %v7575_v21 = vld [vmem:[%s10624_s22 + $0x2c8] sm:$0xff] }
 0x52b   : > { %v7699_v22 = vadd.f32 %v13965_v11, %v15031_v61  ;;  %v7701_v24 = vadd.f32 %v13973_v4, %v15033_v41  ;;  %v7574_v26 = vld [vmem:[%s10624_s22 + $0x2c0] sm:$0xff]  ;;  %v7576_v23 = vld [vmem:[%s10624_s22 + $0x2d0] sm:$0xff]  ;;  %v7577_v10 = vld [vmem:[%s10624_s22 + $0x2d8] sm:$0xff]  ;;  %7886 = vst [vmem:[%s10624_s22 + $0x280] sm:$0xff] %v7790_v1 }
 0x52c   : > { %v7794_v19 = vadd.f32 %v7698_v55, %v7570_v5  ;;  %v7796_v59 = vadd.f32 %v7700_v18, %v7572_v38  ;;  %v7578_v16 = vld [vmem:[%s10624_s22 + $0x2e0] sm:$0xff]  ;;  %7887 = vst [vmem:[%s10624_s22 + $0x288] sm:$0xff] %v7791_v51  ;;  %7888 = vst [vmem:[%s10624_s22 + $0x290] sm:$0xff] %v7792_v62  ;;  %v15034_v17 = vld [vmem:[#allocation110_spill] sm:$0xff] }
 0x52d   : > { %v7795_v15 = vadd.f32 %v7699_v22, %v7571_v48  ;;  %v7797_v52 = vadd.f32 %v7701_v24, %v7573_v53  ;;  %7889 = vst [vmem:[%s10624_s22 + $0x298] sm:$0xff] %v7793_v27  ;;  %v7702_v43 = vadd.f32 %v13980_v37, %v15034_v17  ;;  %v15035_v8 = vld [vmem:[#allocation106_spill] sm:$0xff]  ;;  %v15036_v56 = vld [vmem:[#allocation73_spill] sm:$0xff]  ;;  %v7581_v2 = vld [vmem:[%s10624_s22 + $0x2f8] sm:$0xff] }
 0x52e   : > { %v7703_v6 = vadd.f32 %v13984_v42, %v15035_v8  ;;  %v7704_v63 = vadd.f32 %v13960_v31, %v15036_v56  ;;  %v15037_v50 = vld [vmem:[#allocation69_spill] sm:$0xff]  ;;  %v7580_v20 = vld [vmem:[%s10624_s22 + $0x2f0] sm:$0xff]  ;;  %7890 = vst [vmem:[%s10624_s22 + $0x2a0] sm:$0xff] %v7794_v19  ;;  %7892 = vst [vmem:[%s10624_s22 + $0x2b0] sm:$0xff] %v7796_v59 }
 0x52f   : > { %v7705_v47 = vadd.f32 %v13965_v11, %v15037_v50  ;;  %v7579_v58 = vld [vmem:[%s10624_s22 + $0x2e8] sm:$0xff]  ;;  %7891 = vst [vmem:[%s10624_s22 + $0x2a8] sm:$0xff] %v7795_v15  ;;  %7893 = vst [vmem:[%s10624_s22 + $0x2b8] sm:$0xff] %v7797_v52  ;;  %v15039_v44 = vld [vmem:[#allocation71_spill] sm:$0xff]  ;;  %v7798_v25 = vadd.f32 %v7702_v43, %v7574_v26 }
 0x530   : > { %v15038_v3 = vld [vmem:[#allocation77_spill] sm:$0xff]  ;;  %v7707_v31 = vadd.f32 %v13973_v4, %v15039_v44  ;;  %v15040_v36 = vld [vmem:[#allocation111_spill] sm:$0xff]  ;;  %v7799_v34 = vadd.f32 %v7703_v6, %v7575_v21  ;;  %v7800_v33 = vadd.f32 %v7704_v63, %v7576_v23 }
 0x531   : > { %v7706_v46 = vadd.f32 %v13969_v0, %v15038_v3  ;;  %v7708_v11 = vadd.f32 %v13980_v37, %v15040_v36  ;;  %v15041_v13 = vld [vmem:[#allocation107_spill] sm:$0xff]  ;;  %v7801_v29 = vadd.f32 %v7705_v47, %v7577_v10  ;;  %7894 = vst [vmem:[%s10624_s22 + $0x2c0] sm:$0xff] %v7798_v25 }
 0x532   : > { %v7709_v40 = vadd.f32 %v13984_v42, %v15041_v13  ;;  %v7803_v49 = vadd.f32 %v7707_v31, %v7579_v58  ;;  %7895 = vst [vmem:[%s10624_s22 + $0x2c8] sm:$0xff] %v7799_v34  ;;  %7896 = vst [vmem:[%s10624_s22 + $0x2d0] sm:$0xff] %v7800_v33 }
 0x533   : > { %v7802_v9 = vadd.f32 %v7706_v46, %v7578_v16  ;;  %v7804_v0 = vadd.f32 %v7708_v11, %v7580_v20  ;;  %7897 = vst [vmem:[%s10624_s22 + $0x2d8] sm:$0xff] %v7801_v29 }
 0x534   : > { %v7805_v12 = vadd.f32 %v7709_v40, %v7581_v2  ;;  %7899 = vst [vmem:[%s10624_s22 + $0x2e8] sm:$0xff] %v7803_v49 }
 0x535   : > { %7898 = vst [vmem:[%s10624_s22 + $0x2e0] sm:$0xff] %v7802_v9  ;;  %7900 = vst [vmem:[%s10624_s22 + $0x2f0] sm:$0xff] %v7804_v0 }
 0x536   : > { %7901 = vst [vmem:[%s10624_s22 + $0x2f8] sm:$0xff] %v7805_v12 }
 0x537 PF: > { %s8627_s23 = smul.u32 12288, %s9872_s24  ;;  %s7917_s26 = sshll.u32 %s10624_s22, 4  ;;  %s14372_s26 = int_to_ptr.vmem [resolvable:$true] %s7917_s26 }
 0x538   : > { %s15042_s12 = sand.u32 1, %s9852_s19   ;;  %s9776_s28 = scalar_lea.vmem %s14372_s26, 12288 }
 0x539   : > { %s14370_s11 = scalar_lea.hbm %s14438_s5, %s8627_s23  ;;  %s14376_s16 = scalar_lea.sflag [#allocation4], %s15042_s12 }
 0x53a   : > { %p9777_p8 = scmp.ne.s32.totalorder %s14372_s26, %s9776_s28  ;;  %s9887_s24 = smov [#allocation3]  }
 0x53b   : > { %s9780_s22 = sshll.u32 %s9887_s24, 4  ;;  %s9781_s22 = int_to_ptr.vmem [resolvable:$false] %s9780_s22 }
 0x53c   : > { %p9778_p9 = pnand %p9777_p8, %p9999_p10  ;;  %s9782_s7 = scalar_lea.vmem %s9781_s22, 24576 }
 0x53d   : > { %p9783_p13 = scmp.lt.s32.totalorder %s14372_s26, %s9781_s22  ;;  %p9784_p0 = scmp.lt.s32.totalorder %s9782_s7, %s9776_s28 }
 0x53e   : > { %p9779_p11 = pneg %p9778_p9 }
 0x53f   : > { %p9785_p1 = por %p9784_p0, %p9783_p13 }
 0x541   : > { %p9786_p2 = pnand %p9785_p1, %p9779_p11 }
 0x543   : > { %9789 = shalt.err (!%p9786_p2)
}
 0x544   : > { %s9790_s8 = scalar_lea.hbm %s14370_s11, 12288  ;;  %s9794_s21 = scalar_lea.hbm %s14438_s5, 36864 }
 0x545   : > { %p9791_p3 = scmp.ne.s32.totalorder %s14370_s11, %s9790_s8  ;;  %p9795_p6 = scmp.lt.s32.totalorder %s14370_s11, %s14438_s5 }
 0x546   : > { %p9796_p7 = scmp.lt.s32.totalorder %s9794_s21, %s9790_s8 }
 0x547   : > { %p9792_p4 = pnand %p9791_p3, %p9999_p10 }
 0x548   : > { %p9797_p8 = por %p9796_p7, %p9795_p6 }
 0x549   : > { %p9793_p5 = pneg %p9792_p4 }
 0x54b   : > { %p9798_p9 = pnand %p9797_p8, %p9793_p5 }
 0x54d   : > { %9801 = shalt.err (!%p9798_p9)
}
 0x54e   : > { %s9888_s1 = smov 768   ;;  %s9889_s25 = smov 48  }
 0x54f   : > { %8628 = dma.vmem_to_hbm [thread:$0]  (%p9999_p10), %s14372_s26, 12288, %s14370_s11, %s14376_s16, %s9888_s1, %s9888_s1, %s9889_s25  }
 0x550 PF: > { %p8634_p11 = scmp.ge.s32.totalorder %s9884_s27, 2  ;;  %s7932_s23 = sand.u32 1, %s9848_s18  }
 0x551   : > { %s7933_s30 = scalar_lea.sflag [#allocation4], %s7932_s23 }
 0x552   : > { %p8631_p13 = pnand %p8634_p11, %p10006_p12 }
 0x554   : > { %p8632_p0 = pneg %p8631_p13 }
 0x556   : > { %9843 = dma.done.wait (%p8632_p0), %s7933_s30, 12288  }
 0x557   : > { %9845 = vsyncadd (%p8632_p0), %s7933_s30, 4294955008  ;;  %s18_s27 = sadd.s32 1, %s9884_s27   ;;  %s15043_s21 = sld [smem:[#allocation6_spill]] }
 0x558   : > { %p15_p1 = scmp.ge.s32.totalorder %s18_s27, 14   ;;  %s15044_s22 = sld [smem:[#allocation11_spill]] }
 0x559   : > { %s15045_s23 = sld [smem:[#allocation7_spill]]  ;;  %s15049_s18 = smov %s9852_s19 }
 0x55a   : > { %s15046_s24 = sld [smem:[#allocation8_spill]]  ;;  %s15050_s19 = smov %s9856_s20 }
 0x55b   : > { %s15047_s25 = sld [smem:[#allocation9_spill]]  ;;  %s15051_s20 = smov %s10004_s14 }
 0x55c   : > { %s15048_s26 = sld [smem:[#allocation10_spill]]  ;;  %17 = sbr.rel (!%p15_p1) target bundleno = 8 (0x8), region = 120 }
 0x561   :  { %7938 = vsyncpa [#allocation4], 1 }
 0x562   :  { %7940 = vsyncpa [#allocation4 + $0x1], 1 }

</bundles_post_ra>
